<compile_context>
chip_gen: v7x
topology: tpu7x:2x2x1
jax: 0.10.0
libtpu: 0.0.40
codegen_flags: <defaults>
</compile_context>

<pallas_src>
import functools
import math

import jax
import jax.numpy as jnp
from jax.experimental import pallas as pl
from jax.experimental.pallas import tpu as pltpu


_VMEM_LIMIT = 48 * 1024 * 1024  # > v5e 16 MiB scoped default, < v7x 64 MiB physical


# --------------------------------------------------------------------------- #
# Kernel 1: flash attention over a (batch, head-group, q-tile, kv-tile) grid
# --------------------------------------------------------------------------- #
def _flash_attn_kernel(q_ref, k_ref, v_ref, o_ref, m_sc, l_sc, acc_sc, *,
                       heads_per_block, head_dim):
    # q_ref: (1, tq, hg*Dh) bf16 (already scaled)   k/v_ref: (1, tk, hg*Dh) bf16
    # o_ref: (1, tq, hg*Dh) bf16
    # m_sc / l_sc: (hg, tq, 1) f32   acc_sc: (hg, tq, Dh) f32
    ki = pl.program_id(3)

    @pl.when(ki == 0)
    def _init():
        m_sc[...] = jnp.full_like(m_sc, -jnp.inf)
        l_sc[...] = jnp.zeros_like(l_sc)
        acc_sc[...] = jnp.zeros_like(acc_sc)

    q_blk = q_ref[0]            # (tq, hg*Dh) bf16, resident across the ki axis
    k_blk = k_ref[0]            # (tk, hg*Dh) bf16
    v_blk = v_ref[0]            # (tk, hg*Dh) bf16

    for h in range(heads_per_block):                 # static unroll, hg is small
        c0, c1 = h * head_dim, (h + 1) * head_dim
        qh = q_blk[:, c0:c1]                         # (tq, Dh)
        kh = k_blk[:, c0:c1]                         # (tk, Dh)
        vh = v_blk[:, c0:c1]                         # (tk, Dh)
        # s = q @ k^T on the MXU with f32 accumulation.
        s = jax.lax.dot_general(qh, kh, (((1,), (1,)), ((), ())),
                                preferred_element_type=jnp.float32)   # (tq, tk)
        m_prev = m_sc[h]                                               # (tq, 1)
        m_new = jnp.maximum(m_prev, jnp.max(s, axis=-1, keepdims=True))
        alpha = jnp.exp(m_prev - m_new)                                # (tq, 1)
        p = jnp.exp(s - m_new)                                         # (tq, tk) f32
        l_sc[h] = alpha * l_sc[h] + jnp.sum(p, axis=-1, keepdims=True)
        acc_sc[h] = alpha * acc_sc[h] + jnp.dot(
            p.astype(vh.dtype), vh, preferred_element_type=jnp.float32)
        m_sc[h] = m_new

    @pl.when(ki == pl.num_programs(3) - 1)
    def _finalize():
        for h in range(heads_per_block):
            c0, c1 = h * head_dim, (h + 1) * head_dim
            inv_l = pl.reciprocal(l_sc[h], approx=True)
            o_ref[0, :, c0:c1] = (acc_sc[h] * inv_l).astype(o_ref.dtype)


def flash_mha_attention(q, k, v, *, scale, tq=256, tk=512):
    """q, k, v: [B, S, H, Dh] (any float dtype). Returns context [B, S, H*Dh] bf16."""
    B, S, H, Dh = q.shape
    D = H * Dh

    # Lane-dense head grouping: pack hg heads side by side so each block is
    # (tile, hg*Dh) with hg*Dh a multiple of 128 whenever possible.
    hg = max(1, min(H, 128 // Dh))
    while H % hg:
        hg -= 1
    if (hg * Dh) % 128 != 0:
        hg = H                 # full feature width is always a legal block shape
    G = H // hg
    bw = hg * Dh

    # bf16 cast with the softmax scale folded in (torch: cast-to-bf16 then scale),
    # followed by a *free* [B,S,H,Dh] -> [B,S,H*Dh] reshape (no transpose copies).
    scale_b = jnp.asarray(scale, dtype=jnp.bfloat16)
    qf = (q.astype(jnp.bfloat16) * scale_b).reshape(B, S, D)
    kf = k.astype(jnp.bfloat16).reshape(B, S, D)
    vf = v.astype(jnp.bfloat16).reshape(B, S, D)

    tq = min(tq, S)
    tk = min(tk, S)
    assert S % tq == 0 and S % tk == 0, "seq length must be divisible by the tiles"
    grid = (B, G, S // tq, S // tk)

    kernel = functools.partial(_flash_attn_kernel, heads_per_block=hg, head_dim=Dh)

    flops = 4 * B * S * S * D                      # QK^T + PV
    transcendentals = B * H * S * S                # exp
    bytes_accessed = 2 * B * S * D * (2 + 2 * (S // tq))   # q+out once, k+v per q tile

    return pl.pallas_call(
        kernel,
        out_shape=jax.ShapeDtypeStruct((B, S, D), jnp.bfloat16),
        grid_spec=pltpu.PrefetchScalarGridSpec(
            num_scalar_prefetch=0,
            grid=grid,
            in_specs=[
                pl.BlockSpec((1, tq, bw), lambda b, g, qi, ki: (b, qi, g)),
                pl.BlockSpec((1, tk, bw), lambda b, g, qi, ki: (b, ki, g)),
                pl.BlockSpec((1, tk, bw), lambda b, g, qi, ki: (b, ki, g)),
            ],
            out_specs=pl.BlockSpec((1, tq, bw), lambda b, g, qi, ki: (b, qi, g)),
            scratch_shapes=[
                pltpu.VMEM((hg, tq, 1), jnp.float32),    # running max (per head)
                pltpu.VMEM((hg, tq, 1), jnp.float32),    # running denom (per head)
                pltpu.VMEM((hg, tq, Dh), jnp.float32),   # output accumulator
            ],
        ),
        compiler_params=pltpu.CompilerParams(
            dimension_semantics=("parallel", "parallel", "parallel", "arbitrary"),
            vmem_limit_bytes=_VMEM_LIMIT,
        ),
        cost_estimate=pl.CostEstimate(
            flops=flops,
            transcendentals=transcendentals,
            bytes_accessed=bytes_accessed,
        ),
    )(qf, kf, vf)


# --------------------------------------------------------------------------- #
# Kernel 2: out_proj (Linear with bias; bf16 operands, f32 accumulation/output)
# --------------------------------------------------------------------------- #
def _linear_bias_kernel(x_ref, w_ref, b_ref, o_ref):
    # x_ref: (tm, D) bf16   w_ref: (D, tn) bf16   b_ref: (1, tn) f32   o_ref: (tm, tn) f32
    o_ref[...] = (
        jnp.dot(x_ref[...], w_ref[...], preferred_element_type=jnp.float32)
        + b_ref[...]
    ).astype(o_ref.dtype)


def linear_out_proj(x2d, w_t, b, *, tm=256, tn=256,
                    resident_w_bytes=8 * 1024 * 1024):
    """x2d: [M, D] bf16, w_t: [D, N] bf16 (W^T), b: [N] f32. Returns f32 [M, N]."""
    M, D = x2d.shape
    D2, N = w_t.shape
    assert D == D2
    tm = min(tm, M)
    assert M % tm == 0
    b2d = b.reshape(1, N).astype(jnp.float32)
    cost = pl.CostEstimate(flops=2 * M * D * N, transcendentals=0,
                           bytes_accessed=2 * (M * D + D * N) + 4 * (M * N + N))

    if D * N * w_t.dtype.itemsize <= resident_w_bytes:
        # Whole bf16 W^T stays resident in VMEM; grid only over rows -> the
        # context is streamed exactly once and per-step overhead is minimal.
        return pl.pallas_call(
            _linear_bias_kernel,
            out_shape=jax.ShapeDtypeStruct((M, N), jnp.float32),
            grid_spec=pltpu.PrefetchScalarGridSpec(
                num_scalar_prefetch=0,
                grid=(M // tm,),
                in_specs=[
                    pl.BlockSpec((tm, D), lambda i: (i, 0)),
                    pl.BlockSpec((D, N), lambda i: (0, 0)),
                    pl.BlockSpec((1, N), lambda i: (0, 0)),
                ],
                out_specs=pl.BlockSpec((tm, N), lambda i: (i, 0)),
            ),
            compiler_params=pltpu.CompilerParams(
                dimension_semantics=("parallel",),
                vmem_limit_bytes=_VMEM_LIMIT),
            cost_estimate=cost,
        )(x2d, w_t, b2d)

    # Fallback for very wide layers: tile N too; row axis innermost so the
    # weight block is not re-fetched per row tile.
    tn = min(tn, N)
    assert N % tn == 0
    return pl.pallas_call(
        _linear_bias_kernel,
        out_shape=jax.ShapeDtypeStruct((M, N), jnp.float32),
        grid_spec=pltpu.PrefetchScalarGridSpec(
            num_scalar_prefetch=0,
            grid=(N // tn, M // tm),
            in_specs=[
                pl.BlockSpec((tm, D), lambda j, i: (i, 0)),
                pl.BlockSpec((D, tn), lambda j, i: (0, j)),
                pl.BlockSpec((1, tn), lambda j, i: (0, j)),
            ],
            out_specs=pl.BlockSpec((tm, tn), lambda j, i: (i, j)),
        ),
        compiler_params=pltpu.CompilerParams(
            dimension_semantics=("parallel", "parallel"),
            vmem_limit_bytes=_VMEM_LIMIT),
        cost_estimate=cost,
    )(x2d, w_t, b2d)


# --------------------------------------------------------------------------- #
# Module wrapper
# --------------------------------------------------------------------------- #
class FlashMHASelfMaskKVPallas:
    """JAX/Pallas equivalent of FlashMHASelfMaskKV (self mode, no padding mask,
    no diffusion / rotary / fine-tuning branches)."""

    def __init__(self, d_model, num_heads, batch_first=True, attention_dropout=0.0,
                 mode="self", bias=True, causal=False, key=None):
        assert batch_first
        assert d_model % num_heads == 0
        self.d_model = d_model
        self.num_heads = num_heads
        self.head_dim = d_model // num_heads
        assert (self.head_dim % 8 == 0) and (self.head_dim <= 128)
        self.scaling = self.head_dim ** (-0.5)
        self.mode = mode
        self.causal = causal
        # TODO(synk): attention dropout is not applied (inference path only).
        self.dropout_p = attention_dropout

        if key is None:
            key = jax.random.PRNGKey(0)
        kw, kb = jax.random.split(key)
        # nn.Linear default init (kaiming_uniform a=sqrt(5); bias U(+-1/sqrt(fan_in))).
        bound_w = math.sqrt(6.0 / ((1.0 + 5.0) * d_model))
        w = jax.random.uniform(kw, (d_model, d_model), minval=-bound_w,
                               maxval=bound_w, dtype=jnp.float32)
        if bias:
            bound_b = 1.0 / math.sqrt(d_model)
            b = jax.random.uniform(kb, (d_model,), minval=-bound_b,
                                   maxval=bound_b, dtype=jnp.float32)
        else:
            b = jnp.zeros((d_model,), jnp.float32)
        self.out_w = w                                             # [out, in], f32
        self.out_b = b                                             # f32
        self.out_w_t_bf16 = jnp.asarray(w.T, dtype=jnp.bfloat16)   # [in, out] bf16

    def __call__(self, q, k, v, key_padding_mask=None):
        # TODO(synk): key_padding_mask / varlen unpad path not implemented.
        assert key_padding_mask is None
        B, S, H, Dh = q.shape
        assert H == self.num_heads and H * Dh == self.d_model
        ctx = flash_mha_attention(q, k, v, scale=self.scaling)     # [B, S, D] bf16
        out2d = linear_out_proj(ctx.reshape(B * S, self.d_model),
                                self.out_w_t_bf16, self.out_b)     # [B*S, D] f32
        return out2d.reshape(B, S, self.d_model)


# --------------------------------------------------------------------------- #
if __name__ == "__main__":
    d_model, num_heads = 128, 2
    B, S = 2, 1024          # exercises multiple q-tiles and kv-steps
    Dh = d_model // num_heads

    key = jax.random.PRNGKey(0)
    kq, kk, kv_, kw = jax.random.split(key, 4)
    q = jax.random.normal(kq, (B, S, num_heads, Dh), dtype=jnp.float32)
    k = jax.random.normal(kk, (B, S, num_heads, Dh), dtype=jnp.float32)
    v = jax.random.normal(kv_, (B, S, num_heads, Dh), dtype=jnp.float32)

    mha = FlashMHASelfMaskKVPallas(d_model, num_heads, batch_first=True,
                                   attention_dropout=0.0, key=kw)
    out = mha(q, k, v)
    out = jax.block_until_ready(out)
    assert out.shape == (B, S, d_model)

    # Plain-JAX reference with matching bf16-operand / f32-accumulation semantics.
    qb = q.astype(jnp.bfloat16) * jnp.asarray(mha.scaling, jnp.bfloat16)
    kb = k.astype(jnp.bfloat16)
    vb = v.astype(jnp.bfloat16)
    s = jnp.einsum("bqhd,bkhd->bhqk", qb, kb, preferred_element_type=jnp.float32)
    p = jax.nn.softmax(s, axis=-1)
    ctx_ref = jnp.einsum("bhqk,bkhd->bqhd", p.astype(jnp.bfloat16), vb,
                         preferred_element_type=jnp.float32)
    ctx_ref = ctx_ref.reshape(B, S, d_model)
    out_ref = ctx_ref @ mha.out_w.T + mha.out_b

    err = float(jnp.max(jnp.abs(out - out_ref)))
    assert jnp.allclose(out, out_ref, atol=3e-2, rtol=3e-2), err

    print("KERNEL_OK")
</pallas_src>

<mosaic_0001>
module attributes {stable_mosaic.version = 11 : i64} {
  func.func @_flash_attn_kernel(%arg0: i32, %arg1: i32, %arg2: i32, %arg3: i32, %arg4: memref<1x256x128xbf16, #tpu.memory_space<vmem>>, %arg5: memref<1x512x128xbf16, #tpu.memory_space<vmem>>, %arg6: memref<1x512x128xbf16, #tpu.memory_space<vmem>>, %arg7: memref<1x256x128xbf16, #tpu.memory_space<vmem>>, %arg8: memref<2x256x1xf32, #tpu.memory_space<vmem>>, %arg9: memref<2x256x1xf32, #tpu.memory_space<vmem>>, %arg10: memref<2x256x64xf32, #tpu.memory_space<vmem>>) attributes {dimension_semantics = [#tpu.dimension_semantics<parallel>, #tpu.dimension_semantics<parallel>, #tpu.dimension_semantics<parallel>, #tpu.dimension_semantics<arbitrary>], iteration_bounds = array<i64: 2, 1, 4, 2>, scalar_prefetch = 0 : i64, scratch_operands = 3 : i64, tpu.core_type = #tpu.core_type<tc>, window_params = [{transform_indices = @transform_0, window_bounds = array<i64: 1, 256, 128>}, {transform_indices = @transform_1, window_bounds = array<i64: 1, 512, 128>}, {transform_indices = @transform_2, window_bounds = array<i64: 1, 512, 128>}, {transform_indices = @transform_3, window_bounds = array<i64: 1, 256, 128>}]} {
    %c0_i32 = arith.constant 0 : i32
    %0 = arith.cmpi eq, %arg3, %c0_i32 : i32
    %1 = arith.extui %0 : i1 to i32
    %c0_i32_0 = arith.constant 0 : i32
    %2 = arith.cmpi ne, %1, %c0_i32_0 : i32
    scf.if %2 {
      %cst_52 = arith.constant 0xFF800000 : f32
      %84 = vector.broadcast %cst_52 : f32 to vector<2x256x1xf32>
      %c0_53 = arith.constant 0 : index
      %c0_54 = arith.constant 0 : index
      %c0_55 = arith.constant 0 : index
      %85 = vector.load %arg8[%c0_53, %c0_54, %c0_55] : memref<2x256x1xf32, #tpu.memory_space<vmem>>, vector<2x256x1xf32>
      tpu.vector_store %arg8[%c0_53, %c0_54, %c0_55], %84 {strides = array<i32>} : memref<2x256x1xf32, #tpu.memory_space<vmem>>, vector<2x256x1xf32>,
      %cst_56 = arith.constant 0.000000e+00 : f32
      %86 = vector.broadcast %cst_56 : f32 to vector<2x256x1xf32>
      %c0_57 = arith.constant 0 : index
      %c0_58 = arith.constant 0 : index
      %c0_59 = arith.constant 0 : index
      %87 = vector.load %arg9[%c0_57, %c0_58, %c0_59] : memref<2x256x1xf32, #tpu.memory_space<vmem>>, vector<2x256x1xf32>
      tpu.vector_store %arg9[%c0_57, %c0_58, %c0_59], %86 {strides = array<i32>} : memref<2x256x1xf32, #tpu.memory_space<vmem>>, vector<2x256x1xf32>,
      %cst_60 = arith.constant 0.000000e+00 : f32
      %88 = vector.broadcast %cst_60 : f32 to vector<2x256x64xf32>
      %c0_61 = arith.constant 0 : index
      %c0_62 = arith.constant 0 : index
      %c0_63 = arith.constant 0 : index
      %89 = vector.load %arg10[%c0_61, %c0_62, %c0_63] : memref<2x256x64xf32, #tpu.memory_space<vmem>>, vector<2x256x64xf32>
      tpu.vector_store %arg10[%c0_61, %c0_62, %c0_63], %88 {strides = array<i32>} : memref<2x256x64xf32, #tpu.memory_space<vmem>>, vector<2x256x64xf32>,
    } else {
    }
    %c0 = arith.constant 0 : index
    %c0_1 = arith.constant 0 : index
    %c0_2 = arith.constant 0 : index
    %3 = vector.load %arg4[%c0, %c0_1, %c0_2] : memref<1x256x128xbf16, #tpu.memory_space<vmem>>, vector<1x256x128xbf16>
    %4 = vector.shape_cast %3 : vector<1x256x128xbf16> to vector<256x128xbf16>
    %c0_3 = arith.constant 0 : index
    %c0_4 = arith.constant 0 : index
    %c0_5 = arith.constant 0 : index
    %5 = vector.load %arg5[%c0_3, %c0_4, %c0_5] : memref<1x512x128xbf16, #tpu.memory_space<vmem>>, vector<1x512x128xbf16>
    %6 = vector.shape_cast %5 : vector<1x512x128xbf16> to vector<512x128xbf16>
    %c0_6 = arith.constant 0 : index
    %c0_7 = arith.constant 0 : index
    %c0_8 = arith.constant 0 : index
    %7 = vector.load %arg6[%c0_6, %c0_7, %c0_8] : memref<1x512x128xbf16, #tpu.memory_space<vmem>>, vector<1x512x128xbf16>
    %8 = vector.shape_cast %7 : vector<1x512x128xbf16> to vector<512x128xbf16>
    %9 = vector.extract_strided_slice %4 {offsets = [0, 0], sizes = [256, 64], strides = [1, 1]} : vector<256x128xbf16> to vector<256x64xbf16>
    %10 = vector.extract_strided_slice %6 {offsets = [0, 0], sizes = [512, 64], strides = [1, 1]} : vector<512x128xbf16> to vector<512x64xbf16>
    %11 = vector.extract_strided_slice %8 {offsets = [0, 0], sizes = [512, 64], strides = [1, 1]} : vector<512x128xbf16> to vector<512x64xbf16>
    %cst = arith.constant dense<0.000000e+00> : vector<256x512xf32>
    %12 = tpu.matmul %9, %10, %cst {dimension_numbers = #tpu.dot_dimension_numbers<[1], [1], [0], [0], [0, 0, 1, 0], [], []>} : vector<256x64xbf16>, vector<512x64xbf16>, vector<256x512xf32> -> vector<256x512xf32>
    %c0_9 = arith.constant 0 : index
    %c0_10 = arith.constant 0 : index
    %c0_11 = arith.constant 0 : index
    %13 = vector.load %arg8[%c0_9, %c0_10, %c0_11] : memref<2x256x1xf32, #tpu.memory_space<vmem>>, vector<1x256x1xf32>
    %14 = vector.shape_cast %13 : vector<1x256x1xf32> to vector<256x1xf32>
    %cst_12 = arith.constant dense<0xFF800000> : vector<256xf32>
    %15 = vector.multi_reduction <maximumf>, %12, %cst_12 [1] : vector<256x512xf32> to vector<256xf32>
    %16 = vector.shape_cast %15 : vector<256xf32> to vector<256x1xf32>
    %17 = arith.maximumf %14, %16 : vector<256x1xf32>
    %18 = arith.subf %14, %17 : vector<256x1xf32>
    %19 = math.exp %18 : vector<256x1xf32>
    %20 = vector.broadcast %17 : vector<256x1xf32> to vector<256x512xf32>
    %21 = arith.subf %12, %20 : vector<256x512xf32>
    %22 = math.exp %21 : vector<256x512xf32>
    %c0_13 = arith.constant 0 : index
    %c0_14 = arith.constant 0 : index
    %c0_15 = arith.constant 0 : index
    %23 = vector.load %arg9[%c0_13, %c0_14, %c0_15] : memref<2x256x1xf32, #tpu.memory_space<vmem>>, vector<1x256x1xf32>
    %24 = vector.shape_cast %23 : vector<1x256x1xf32> to vector<256x1xf32>
    %25 = arith.mulf %19, %24 : vector<256x1xf32>
    %cst_16 = arith.constant dense<0.000000e+00> : vector<256xf32>
    %26 = vector.multi_reduction <add>, %22, %cst_16 [1] : vector<256x512xf32> to vector<256xf32>
    %27 = vector.shape_cast %26 : vector<256xf32> to vector<256x1xf32>
    %28 = arith.addf %25, %27 : vector<256x1xf32>
    %c0_17 = arith.constant 0 : index
    %c0_18 = arith.constant 0 : index
    %c0_19 = arith.constant 0 : index
    %29 = vector.load %arg9[%c0_17, %c0_18, %c0_19] : memref<2x256x1xf32, #tpu.memory_space<vmem>>, vector<1x256x1xf32>
    %30 = vector.shape_cast %29 : vector<1x256x1xf32> to vector<256x1xf32>
    %31 = vector.shape_cast %28 : vector<256x1xf32> to vector<1x256x1xf32>
    tpu.vector_store %arg9[%c0_17, %c0_18, %c0_19], %31 {strides = array<i32>} : memref<2x256x1xf32, #tpu.memory_space<vmem>>, vector<1x256x1xf32>,
    %c0_20 = arith.constant 0 : index
    %c0_21 = arith.constant 0 : index
    %c0_22 = arith.constant 0 : index
    %32 = vector.load %arg10[%c0_20, %c0_21, %c0_22] : memref<2x256x64xf32, #tpu.memory_space<vmem>>, vector<1x256x64xf32>
    %33 = vector.shape_cast %32 : vector<1x256x64xf32> to vector<256x64xf32>
    %34 = vector.broadcast %19 : vector<256x1xf32> to vector<256x64xf32>
    %35 = arith.mulf %34, %33 : vector<256x64xf32>
    %36 = arith.truncf %22 : vector<256x512xf32> to vector<256x512xbf16>
    %cst_23 = arith.constant dense<0.000000e+00> : vector<256x64xf32>
    %37 = tpu.matmul %36, %11, %cst_23 {dimension_numbers = #tpu.dot_dimension_numbers<[1], [0], [0], [1], [0, 0, 1, 1], [], []>} : vector<256x512xbf16>, vector<512x64xbf16>, vector<256x64xf32> -> vector<256x64xf32>
    %38 = arith.addf %35, %37 : vector<256x64xf32>
    %c0_24 = arith.constant 0 : index
    %c0_25 = arith.constant 0 : index
    %c0_26 = arith.constant 0 : index
    %39 = vector.load %arg10[%c0_24, %c0_25, %c0_26] : memref<2x256x64xf32, #tpu.memory_space<vmem>>, vector<1x256x64xf32>
    %40 = vector.shape_cast %39 : vector<1x256x64xf32> to vector<256x64xf32>
    %41 = vector.shape_cast %38 : vector<256x64xf32> to vector<1x256x64xf32>
    tpu.vector_store %arg10[%c0_24, %c0_25, %c0_26], %41 {strides = array<i32>} : memref<2x256x64xf32, #tpu.memory_space<vmem>>, vector<1x256x64xf32>,
    %c0_27 = arith.constant 0 : index
    %c0_28 = arith.constant 0 : index
    %c0_29 = arith.constant 0 : index
    %42 = vector.load %arg8[%c0_27, %c0_28, %c0_29] : memref<2x256x1xf32, #tpu.memory_space<vmem>>, vector<1x256x1xf32>
    %43 = vector.shape_cast %42 : vector<1x256x1xf32> to vector<256x1xf32>
    %44 = vector.shape_cast %17 : vector<256x1xf32> to vector<1x256x1xf32>
    tpu.vector_store %arg8[%c0_27, %c0_28, %c0_29], %44 {strides = array<i32>} : memref<2x256x1xf32, #tpu.memory_space<vmem>>, vector<1x256x1xf32>,
    %45 = vector.extract_strided_slice %4 {offsets = [0, 64], sizes = [256, 64], strides = [1, 1]} : vector<256x128xbf16> to vector<256x64xbf16>
    %46 = vector.extract_strided_slice %6 {offsets = [0, 64], sizes = [512, 64], strides = [1, 1]} : vector<512x128xbf16> to vector<512x64xbf16>
    %47 = vector.extract_strided_slice %8 {offsets = [0, 64], sizes = [512, 64], strides = [1, 1]} : vector<512x128xbf16> to vector<512x64xbf16>
    %cst_30 = arith.constant dense<0.000000e+00> : vector<256x512xf32>
    %48 = tpu.matmul %45, %46, %cst_30 {dimension_numbers = #tpu.dot_dimension_numbers<[1], [1], [0], [0], [0, 0, 1, 0], [], []>} : vector<256x64xbf16>, vector<512x64xbf16>, vector<256x512xf32> -> vector<256x512xf32>
    %c1 = arith.constant 1 : index
    %c0_31 = arith.constant 0 : index
    %c0_32 = arith.constant 0 : index
    %49 = vector.load %arg8[%c1, %c0_31, %c0_32] : memref<2x256x1xf32, #tpu.memory_space<vmem>>, vector<1x256x1xf32>
    %50 = vector.shape_cast %49 : vector<1x256x1xf32> to vector<256x1xf32>
    %cst_33 = arith.constant dense<0xFF800000> : vector<256xf32>
    %51 = vector.multi_reduction <maximumf>, %48, %cst_33 [1] : vector<256x512xf32> to vector<256xf32>
    %52 = vector.shape_cast %51 : vector<256xf32> to vector<256x1xf32>
    %53 = arith.maximumf %50, %52 : vector<256x1xf32>
    %54 = arith.subf %50, %53 : vector<256x1xf32>
    %55 = math.exp %54 : vector<256x1xf32>
    %56 = vector.broadcast %53 : vector<256x1xf32> to vector<256x512xf32>
    %57 = arith.subf %48, %56 : vector<256x512xf32>
    %58 = math.exp %57 : vector<256x512xf32>
    %c1_34 = arith.constant 1 : index
    %c0_35 = arith.constant 0 : index
    %c0_36 = arith.constant 0 : index
    %59 = vector.load %arg9[%c1_34, %c0_35, %c0_36] : memref<2x256x1xf32, #tpu.memory_space<vmem>>, vector<1x256x1xf32>
    %60 = vector.shape_cast %59 : vector<1x256x1xf32> to vector<256x1xf32>
    %61 = arith.mulf %55, %60 : vector<256x1xf32>
    %cst_37 = arith.constant dense<0.000000e+00> : vector<256xf32>
    %62 = vector.multi_reduction <add>, %58, %cst_37 [1] : vector<256x512xf32> to vector<256xf32>
    %63 = vector.shape_cast %62 : vector<256xf32> to vector<256x1xf32>
    %64 = arith.addf %61, %63 : vector<256x1xf32>
    %c1_38 = arith.constant 1 : index
    %c0_39 = arith.constant 0 : index
    %c0_40 = arith.constant 0 : index
    %65 = vector.load %arg9[%c1_38, %c0_39, %c0_40] : memref<2x256x1xf32, #tpu.memory_space<vmem>>, vector<1x256x1xf32>
    %66 = vector.shape_cast %65 : vector<1x256x1xf32> to vector<256x1xf32>
    %67 = vector.shape_cast %64 : vector<256x1xf32> to vector<1x256x1xf32>
    tpu.vector_store %arg9[%c1_38, %c0_39, %c0_40], %67 {strides = array<i32>} : memref<2x256x1xf32, #tpu.memory_space<vmem>>, vector<1x256x1xf32>,
    %c1_41 = arith.constant 1 : index
    %c0_42 = arith.constant 0 : index
    %c0_43 = arith.constant 0 : index
    %68 = vector.load %arg10[%c1_41, %c0_42, %c0_43] : memref<2x256x64xf32, #tpu.memory_space<vmem>>, vector<1x256x64xf32>
    %69 = vector.shape_cast %68 : vector<1x256x64xf32> to vector<256x64xf32>
    %70 = vector.broadcast %55 : vector<256x1xf32> to vector<256x64xf32>
    %71 = arith.mulf %70, %69 : vector<256x64xf32>
    %72 = arith.truncf %58 : vector<256x512xf32> to vector<256x512xbf16>
    %cst_44 = arith.constant dense<0.000000e+00> : vector<256x64xf32>
    %73 = tpu.matmul %72, %47, %cst_44 {dimension_numbers = #tpu.dot_dimension_numbers<[1], [0], [0], [1], [0, 0, 1, 1], [], []>} : vector<256x512xbf16>, vector<512x64xbf16>, vector<256x64xf32> -> vector<256x64xf32>
    %74 = arith.addf %71, %73 : vector<256x64xf32>
    %c1_45 = arith.constant 1 : index
    %c0_46 = arith.constant 0 : index
    %c0_47 = arith.constant 0 : index
    %75 = vector.load %arg10[%c1_45, %c0_46, %c0_47] : memref<2x256x64xf32, #tpu.memory_space<vmem>>, vector<1x256x64xf32>
    %76 = vector.shape_cast %75 : vector<1x256x64xf32> to vector<256x64xf32>
    %77 = vector.shape_cast %74 : vector<256x64xf32> to vector<1x256x64xf32>
    tpu.vector_store %arg10[%c1_45, %c0_46, %c0_47], %77 {strides = array<i32>} : memref<2x256x64xf32, #tpu.memory_space<vmem>>, vector<1x256x64xf32>,
    %c1_48 = arith.constant 1 : index
    %c0_49 = arith.constant 0 : index
    %c0_50 = arith.constant 0 : index
    %78 = vector.load %arg8[%c1_48, %c0_49, %c0_50] : memref<2x256x1xf32, #tpu.memory_space<vmem>>, vector<1x256x1xf32>
    %79 = vector.shape_cast %78 : vector<1x256x1xf32> to vector<256x1xf32>
    %80 = vector.shape_cast %53 : vector<256x1xf32> to vector<1x256x1xf32>
    tpu.vector_store %arg8[%c1_48, %c0_49, %c0_50], %80 {strides = array<i32>} : memref<2x256x1xf32, #tpu.memory_space<vmem>>, vector<1x256x1xf32>,
    %c1_i32 = arith.constant 1 : i32
    %81 = arith.cmpi eq, %arg3, %c1_i32 : i32
    %82 = arith.extui %81 : i1 to i32
    %c0_i32_51 = arith.constant 0 : i32
    %83 = arith.cmpi ne, %82, %c0_i32_51 : i32
    scf.if %83 {
      %c0_52 = arith.constant 0 : index
      %c0_53 = arith.constant 0 : index
      %c0_54 = arith.constant 0 : index
      %84 = vector.load %arg9[%c0_52, %c0_53, %c0_54] : memref<2x256x1xf32, #tpu.memory_space<vmem>>, vector<1x256x1xf32>
      %85 = vector.shape_cast %84 : vector<1x256x1xf32> to vector<256x1xf32>
      %86 = tpu.reciprocal %85 {approx = true} : vector<256x1xf32> -> vector<256x1xf32>
      %c0_55 = arith.constant 0 : index
      %c0_56 = arith.constant 0 : index
      %c0_57 = arith.constant 0 : index
      %87 = vector.load %arg10[%c0_55, %c0_56, %c0_57] : memref<2x256x64xf32, #tpu.memory_space<vmem>>, vector<1x256x64xf32>
      %88 = vector.shape_cast %87 : vector<1x256x64xf32> to vector<256x64xf32>
      %89 = vector.broadcast %86 : vector<256x1xf32> to vector<256x64xf32>
      %90 = arith.mulf %88, %89 : vector<256x64xf32>
      %91 = arith.truncf %90 : vector<256x64xf32> to vector<256x64xbf16>
      %c0_58 = arith.constant 0 : index
      %c0_59 = arith.constant 0 : index
      %c0_60 = arith.constant 0 : index
      %92 = vector.load %arg7[%c0_58, %c0_59, %c0_60] : memref<1x256x128xbf16, #tpu.memory_space<vmem>>, vector<1x256x64xbf16>
      %93 = vector.shape_cast %92 : vector<1x256x64xbf16> to vector<256x64xbf16>
      %94 = vector.shape_cast %91 : vector<256x64xbf16> to vector<1x256x64xbf16>
      tpu.vector_store %arg7[%c0_58, %c0_59, %c0_60], %94 {strides = array<i32>} : memref<1x256x128xbf16, #tpu.memory_space<vmem>>, vector<1x256x64xbf16>,
      %c1_61 = arith.constant 1 : index
      %c0_62 = arith.constant 0 : index
      %c0_63 = arith.constant 0 : index
      %95 = vector.load %arg9[%c1_61, %c0_62, %c0_63] : memref<2x256x1xf32, #tpu.memory_space<vmem>>, vector<1x256x1xf32>
      %96 = vector.shape_cast %95 : vector<1x256x1xf32> to vector<256x1xf32>
      %97 = tpu.reciprocal %96 {approx = true} : vector<256x1xf32> -> vector<256x1xf32>
      %c1_64 = arith.constant 1 : index
      %c0_65 = arith.constant 0 : index
      %c0_66 = arith.constant 0 : index
      %98 = vector.load %arg10[%c1_64, %c0_65, %c0_66] : memref<2x256x64xf32, #tpu.memory_space<vmem>>, vector<1x256x64xf32>
      %99 = vector.shape_cast %98 : vector<1x256x64xf32> to vector<256x64xf32>
      %100 = vector.broadcast %97 : vector<256x1xf32> to vector<256x64xf32>
      %101 = arith.mulf %99, %100 : vector<256x64xf32>
      %102 = arith.truncf %101 : vector<256x64xf32> to vector<256x64xbf16>
      %c0_67 = arith.constant 0 : index
      %c0_68 = arith.constant 0 : index
      %c64 = arith.constant 64 : index
      %103 = vector.load %arg7[%c0_67, %c0_68, %c64] : memref<1x256x128xbf16, #tpu.memory_space<vmem>>, vector<1x256x64xbf16>
      %104 = vector.shape_cast %103 : vector<1x256x64xbf16> to vector<256x64xbf16>
      %105 = vector.shape_cast %102 : vector<256x64xbf16> to vector<1x256x64xbf16>
      tpu.vector_store %arg7[%c0_67, %c0_68, %c64], %105 {strides = array<i32>} : memref<1x256x128xbf16, #tpu.memory_space<vmem>>, vector<1x256x64xbf16>,
    } else {
    }
    return
  }
  func.func @transform_0(%arg0: i32, %arg1: i32, %arg2: i32, %arg3: i32) -> (i32, i32, i32) {
    %c0_i32 = arith.constant 0 : i32
    return %arg0, %arg2, %arg1 : i32, i32, i32
  }
  func.func @transform_1(%arg0: i32, %arg1: i32, %arg2: i32, %arg3: i32) -> (i32, i32, i32) {
    %c0_i32 = arith.constant 0 : i32
    return %arg0, %arg3, %arg1 : i32, i32, i32
  }
  func.func @transform_2(%arg0: i32, %arg1: i32, %arg2: i32, %arg3: i32) -> (i32, i32, i32) {
    %c0_i32 = arith.constant 0 : i32
    return %arg0, %arg3, %arg1 : i32, i32, i32
  }
  func.func @transform_3(%arg0: i32, %arg1: i32, %arg2: i32, %arg3: i32) -> (i32, i32, i32) {
    %c0_i32 = arith.constant 0 : i32
    return %arg0, %arg2, %arg1 : i32, i32, i32
  }
}

</mosaic_0001>

<bundles_post_ra>
// kernel: tpu_custom_call.1
= control target key start
LH: loop header
LB: loop body
LE: loop exit
PB: predicated region body
PF: predicated region fallthrough
CT: control target
= control target key end

     0   :  { %s14437_s0 = inlined_call_operand.hbm [shape: bf16[2,1024,128], index: 0, kind: input, shape index: {}]   ;;  %s14438_s1 = inlined_call_operand.hbm [shape: bf16[2,1024,128], index: 1, kind: input, shape index: {}]   ;;  %s14439_s2 = inlined_call_operand.hbm [shape: bf16[2,1024,128], index: 2, kind: input, shape index: {}]   ;;  %s14440_s3 = inlined_call_operand.hbm [shape: bf16[2,1024,128], index: 3, kind: output, shape index: {}]  }
   0x1   :  { %14826 = sst [smem:[#allocation211_spill]] %s14438_s1 }
   0x2   :  { %14827 = sst [smem:[#allocation212_spill]] %s14440_s3 }
   0x3   :  { %8 = vsyncpa [#allocation6], 0 }
   0x4   :  { %10 = vsyncpa [#allocation6 + $0x1], 0 }
   0x5   :  { %11 = vsyncpa [#allocation9], 0 }
   0x6   :  { %13 = vsyncpa [#allocation9 + $0x1], 0 }
   0x7   :  { %14 = vsyncpa [#allocation7], 0 }
   0x8   :  { %16 = vsyncpa [#allocation7 + $0x1], 0  ;;  %s9529_s12 = smov 0   ;;  %s9531_s13 = smov 0  }
   0x9   :  { %s9533_s14 = smov 0   ;;  %s9535_s15 = smov 0  }
   0xa   :  { %s9537_s16 = smov 0   ;;  %s9539_s17 = smov 0  }
   0xb   :  { %s9541_s18 = smov 0   ;;  %s9543_s19 = smov 0  }
   0xc   :  { %s9545_s20 = smov 0   ;;  %s9547_s21 = smov 0  }
   0xd   :  { %s9549_s22 = smov 0   ;;  %s9551_s23 = smov 0  }
   0xe   :  { %s9553_s24 = smov 0  }
   0xf LB: > { %14828 = sst [smem:[#allocation15_spill]] %s9450_s13  ;;  %s9593_s25 = sadd.s32 4294967295, %s9494_s24   ;;  %s9494_s24 = sphi %s9553_s24, %s22_s24   ;;  %s9490_s23 = sphi %s9551_s23, %s15771_s23   ;;  %s9486_s22 = sphi %s9549_s22, %s15762_s22   ;;  %s9482_s21 = sphi %s9547_s21, %s15770_s21   ;;  %s9478_s20 = sphi %s9545_s20, %s15769_s20   ;;  %s9474_s19 = sphi %s9543_s19, %s15761_s19   ;;  %s9470_s18 = sphi %s9541_s18, %s15768_s18   ;;  %s9466_s17 = sphi %s9539_s17, %s15767_s17   ;;  %s9462_s16 = sphi %s9537_s16, %s15766_s16   ;;  %s9458_s15 = sphi %s9535_s15, %s15760_s15   ;;  %s9454_s14 = sphi %s9533_s14, %s15765_s14   ;;  %s9450_s13 = sphi %s9531_s13, %s15764_s13   ;;  %s9446_s12 = sphi %s9529_s12, %s15759_s12  }
  0x10   : > { %14829 = sst [smem:[#allocation16_spill]] %s9458_s15  ;;  %s37_s26 = sadd.s32 1, %s9482_s21 }
  0x11   : > { %14830 = sst [smem:[#allocation17_spill]] %s9462_s16  ;;  %p9596_p0 = scmp.ge.s32.totalorder %s37_s26, 2 }
  0x12   : > { %14831 = sst [smem:[#allocation18_spill]] %s9470_s18  ;;  %p14446_p1 = scmp.eq.s32.totalorder %s9494_s24, 0 }
  0x13   : > { %14832 = sst [smem:[#allocation19_spill]] %s9474_s19  ;;  %p14447_p2 = scmp.eq.s32.totalorder %s9593_s25, 0 }
  0x14   : > { %14833 = sst [smem:[#allocation20_spill]] %s9478_s20  ;;  %s15773_s26 = smov (%p9596_p0, %s37_s26), 0 }
  0x15   : > { %14834 = sst [smem:[#allocation21_spill]] %s9486_s22  ;;  %p96_p3 = scmp.ne.s32.totalorder %s9454_s14, %s9450_s13 }
  0x16   : > { %14835 = sst [smem:[#allocation22_spill]] %s9593_s25  ;;  %p102_p4 = scmp.ne.s32.totalorder %s9450_s13, %s9446_s12 }
  0x17   : > { %p9613_p5 = por %p96_p3, %p14446_p1  ;;  %p14445_p7 = scmp.lt.s32.totalorder %s9494_s24, 16 }
  0x18   : > { %p9619_p6 = por %p102_p4, %p14447_p2  ;;  %s14442_s5 = sshll.u32 %s9490_s23, 7 }
  0x19   : > { %s210_s6 = sand.u32 1, %s9494_s24   ;;  %s212_s7 = sand.u32 1, %s9454_s14  }
  0x1a   : > { %s14838_s4 = scalar_select %p9619_p6, 1, 0 }
  0x1b   : > { %s7228_s8 = sshll.u32 %s212_s7, 8  ;;  %s7229_s9 = sshll.u32 %s9482_s21, 6 }
  0x1c   : > { %14839 = sst [smem:[#allocation23_spill]] %s14838_s4  ;;  %s221_s10 = sadd.s32 %s7229_s9, %s14442_s5 }
  0x1d   : > { %s7231_s11 = sshll.u32 %s221_s10, 6  ;;  %s214_s12 = scalar_lea.vmem [#allocation8], %s7228_s8 }
  0x1e   : > { %s224_s29 = sshll.u32 %s214_s12, 4  ;;  %s14840_s1 = sld [smem:[#allocation211_spill]]  ;;  %s9635_s29 = int_to_ptr.vmem [resolvable:$true] %s224_s29 }
  0x1f   : > { %p9641_p8 = pnand %p14445_p7, %p9613_p5  ;;  %s9650_s3 = scalar_lea.hbm %s14439_s2, %s7231_s11 }
  0x20   : > { %s238_s28 = scalar_lea.vmem [#allocation10], %s7228_s8  ;;  %s9654_s19 = scalar_lea.sflag [#allocation9], %s210_s6 }
  0x21   : > { %s9652_s5 = sshll.u32 %s238_s28, 4  ;;  %p9264_p10 = pneg %p9641_p8  ;;  %s9692_s5 = int_to_ptr.vmem [resolvable:$true] %s9652_s5 }
  0x24   : > { %s9633_s20 = scalar_lea.hbm %s14840_s1, %s7231_s11  ;;  %s9267_s4 = scalar_lea.hbm %s14840_s1, 16384 }
  0x25   : > { %s9262_s30 = scalar_lea.hbm %s9633_s20, 4096  ;;  %p9268_p13 = scmp.lt.u32.totalorder %s9633_s20, %s14840_s1 }
  0x26   : > { %p9263_p9 = scmp.ne.s32.totalorder %s9633_s20, %s9262_s30  ;;  %p9269_p3 = scmp.lt.u32.totalorder %s9267_s4, %s9262_s30 }
  0x27   : > { %p9271_p5 = scmp.lt.u32.totalorder %s9262_s30, %s9633_s20 }
  0x28   : > { %p9265_p11 = pnand %p9264_p10, %p9263_p9  ;;  %p9270_p4 = por %p9269_p3, %p9268_p13 }
  0x2a   : > { %p9266_p12 = pneg %p9265_p11  ;;  %p9272_p7 = por %p9271_p5, %p9270_p4 }
  0x2c   : > { %p9273_p1 = pnand %p9272_p7, %p9266_p12 }
  0x2e   : > { %9276 = shalt.err (!%p9273_p1)
}
  0x2f   : > { %s9277_s6 = scalar_lea.vmem %s9635_s29, 4096  ;;  %s9496_s18 = smov [#allocation8]  }
  0x30   : > { %p9278_p9 = scmp.ne.s32.totalorder %s9635_s29, %s9277_s6  ;;  %s9282_s8 = sshll.u32 %s9496_s18, 4  ;;  %s9283_s8 = int_to_ptr.vmem [resolvable:$false] %s9282_s8 }
  0x31   : > { %s9284_s9 = scalar_lea.vmem %s9283_s8, 8192  ;;  %p9285_p6 = scmp.lt.s32.totalorder %s9635_s29, %s9283_s8 }
  0x32   : > { %p9280_p11 = pnand %p9278_p9, %p9264_p10  ;;  %p9286_p13 = scmp.lt.s32.totalorder %s9284_s9, %s9277_s6 }
  0x34   : > { %p9281_p2 = pneg %p9280_p11  ;;  %p9287_p3 = por %p9286_p13, %p9285_p6 }
  0x36   : > { %p9288_p4 = pnand %p9287_p3, %p9281_p2 }
  0x38   : > { %9291 = shalt.err (!%p9288_p4)
}
  0x39   : > { %s14449_s4 = smov 64   ;;  %s14451_s12 = smov 4  }
  0x3a   : > { %8207 = dma.hbm_to_vmem [thread:$0]  (!%p9641_p8), %s9633_s20, 4096, %s9635_s29, %s9654_s19, %s14449_s4, %s14449_s4, %s14451_s12  }
  0x3b   : > { %p7236_p1 = scmp.ge.s32.totalorder %s9494_s24, 1  ;;  %p256_p2 = scmp.lt.s32.totalorder %s9494_s24, 17 }
  0x3c   : > { %s7221_s30 = sadd.s32 4294967294, %s9494_s24   ;;  %s40_s10 = sadd.s32 1, %s9486_s22 }
  0x3d   : > { %p9687_p6 = pnand %p7236_p1, %p256_p2  ;;  %s15775_s10 = smov (!%p9596_p0, %s40_s10), %s9486_s22 }
  0x3e   : > { %p66_p7 = scmp.ne.s32.totalorder %s9466_s17, %s9462_s16  ;;  %p72_p12 = scmp.ne.s32.totalorder %s9462_s16, %s9458_s15 }
  0x3f   : > { %s14842_s28 = scalar_select %p9687_p6, 1, 0 }
  0x40   : > { %p42_p5 = scmp.ge.s32.totalorder %s15775_s10, 4  ;;  %p160_p9 = scmp.eq.s32.totalorder %s9593_s25, 15 }
  0x41   : > { %14843 = sst [smem:[#allocation24_spill]] %s14842_s28  ;;  %s59_s20 = sadd.s32 1, %s9466_s17 }
  0x42   : > { %p14844_p11 = scmp.eq.s32.totalorder %s9593_s25, 0  ;;  %s15777_s10 = smov (%p42_p5, %s15775_s10), 0 }
  0x43   : > { %14847 = sst [smem:[#allocation26_spill]] %s15777_s10  ;;  %s14848_s27 = sadd.s32 1, %s9490_s23 }
  0x44   : > { %p9710_p13 = por %p14844_p11, %p72_p12  ;;  %s15779_s27 = smov (!%p42_p5, %s14848_s27), %s9490_s23 }
  0x45   : > { %p14849_p0 = scmp.eq.s32.totalorder %s9494_s24, 0  ;;  %p9725_p4 = por %p160_p9, %p66_p7 }
  0x46   : > { %s14845_s29 = scalar_select %p9710_p13, 1, 0 }
  0x47   : > { %p9721_p3 = por %p14849_p0, %p66_p7  ;;  %p50_p1 = scmp.ge.s32.totalorder %s15779_s27, 2 }
  0x48   : > { %14846 = sst [smem:[#allocation25_spill]] %s14845_s29  ;;  %p166_p2 = scmp.eq.s32.totalorder %s7221_s30, 15 }
  0x49   : > { %s14851_s6 = scalar_select %p9725_p4, 1, 0 }
  0x4a   : > { %s53_s18 = ssub.s32 %s9486_s22, %s15777_s10  ;;  %s14466_s8 = sand.u32 1, %s9466_s17  }
  0x4b   : > { %14852 = sst [smem:[#allocation27_spill]] %s14851_s6  ;;  %s15781_s27 = smov (%p50_p1, %s15779_s27), 0 }
  0x4c   : > { %14853 = sst [smem:[#allocation28_spill]] %s15781_s27  ;;  %p9737_p5 = por %p166_p2, %p72_p12 }
  0x4d   : > { %s7225_s4 = sshll.u32 %s9486_s22, 5  ;;  %s52_s12 = ssub.s32 %s9490_s23, %s15781_s27 }
  0x4e   : > { %s14854_s9 = scalar_select %p9737_p5, 1, 0 }
  0x4f   : > { %s7224_s1 = sshll.u32 %s14466_s8, 7  ;;  %s54_s30 = sor.u32 %s53_s18, %s52_s12 }
  0x50   : > { %14855 = sst [smem:[#allocation29_spill]] %s14854_s9  ;;  %s14856_s10 = ssub.s32 %s9482_s21, %s15773_s26 }
  0x51   : > { %s84_s6 = sor.u32 %s14856_s10, %s52_s12  ;;  %p57_p7 = scmp.eq.s32.totalorder %s54_s30, 0 }
  0x52   : > { %p87_p9 = scmp.eq.s32.totalorder %s84_s6, 0  ;;  %s14857_s15 = sshll.u32 %s9490_s23, 7 }
  0x53   : > { %s197_s13 = sadd.s32 %s14857_s15, %s7225_s4  ;;  %s14858_s9 = sadd.s32 1, %s9454_s14 }
  0x54   : > { %s9752_s25 = scalar_select %p57_p7, %s9466_s17, %s59_s20  }
  0x55   : > { %s9757_s29 = scalar_select %p87_p9, %s9454_s14, %s14858_s9  }
  0x56   : > { %s7227_s22 = sshll.u32 %s197_s13, 6  ;;  %s190_s27 = scalar_lea.vmem [#allocation5], %s7224_s1 }
  0x57   : > { %s200_s16 = sshll.u32 %s190_s27, 4  ;;  %s9762_s18 = scalar_lea.hbm %s14437_s0, %s7227_s22  ;;  %s9764_s16 = int_to_ptr.vmem [resolvable:$true] %s200_s16 }
  0x58   : > { %p14859_p12 = scmp.lt.s32.totalorder %s9494_s24, 16  ;;  %s9292_s4 = scalar_lea.hbm %s9650_s3, 4096 }
  0x59   : > { %p9293_p0 = scmp.ne.s32.totalorder %s9650_s3, %s9292_s4  ;;  %s9297_s12 = scalar_lea.hbm %s14439_s2, 16384 }
  0x5a   : > { %p9770_p11 = pnand %p14859_p12, %p9721_p3  ;;  %p9298_p7 = scmp.lt.u32.totalorder %s9650_s3, %s14439_s2 }
  0x5b   : > { %p9295_p1 = pnand %p9293_p0, %p9264_p10  ;;  %p9299_p9 = scmp.lt.u32.totalorder %s9297_s12, %s9292_s4 }
  0x5c   : > { %p9301_p3 = scmp.lt.u32.totalorder %s9292_s4, %s9650_s3 }
  0x5d   : > { %p9296_p2 = pneg %p9295_p1  ;;  %p9300_p5 = por %p9299_p9, %p9298_p7 }
  0x5f   : > { %p9302_p12 = por %p9301_p3, %p9300_p5 }
  0x61   : > { %p9303_p4 = pnand %p9302_p12, %p9296_p2 }
  0x63   : > { %9306 = shalt.err (!%p9303_p4)
}
  0x64   : > { %s9307_s10 = scalar_lea.vmem %s9692_s5, 4096  ;;  %s9499_s20 = smov [#allocation10]  }
  0x65   : > { %p9308_p0 = scmp.ne.s32.totalorder %s9692_s5, %s9307_s10  ;;  %s9312_s27 = sshll.u32 %s9499_s20, 4  ;;  %s9313_s27 = int_to_ptr.vmem [resolvable:$false] %s9312_s27 }
  0x66   : > { %s9314_s11 = scalar_lea.vmem %s9313_s27, 8192  ;;  %p9315_p6 = scmp.lt.s32.totalorder %s9692_s5, %s9313_s27 }
  0x67   : > { %p9310_p1 = pnand %p9308_p0, %p9264_p10  ;;  %p9316_p7 = scmp.lt.s32.totalorder %s9314_s11, %s9307_s10 }
  0x69   : > { %p9311_p13 = pneg %p9310_p1  ;;  %p9317_p9 = por %p9316_p7, %p9315_p6 }
  0x6b   : > { %p9318_p5 = pnand %p9317_p9, %p9311_p13 }
  0x6d   : > { %9321 = shalt.err (!%p9318_p5)
}
  0x6e   : > { %s14861_s6 = smov 4   ;;  %s14862_s8 = smov 64  }
  0x6f   : > { %8210 = dma.hbm_to_vmem [thread:$0]  (!%p9641_p8), %s9650_s3, 4096, %s9692_s5, %s9654_s19, %s14862_s8, %s14862_s8, %s14861_s6  }
  0x70   : > { %s14863_s9 = sand.u32 1, %s9466_s17   ;;  %s9322_s4 = scalar_lea.hbm %s9762_s18, 2048 }
  0x71   : > { %s9803_s30 = scalar_lea.sflag [#allocation6], %s14863_s9  ;;  %p9323_p10 = scmp.ne.s32.totalorder %s9762_s18, %s9322_s4 }
  0x72   : > { %p9324_p6 = pneg %p9770_p11  ;;  %s9327_s13 = scalar_lea.hbm %s14437_s0, 16384 }
  0x73   : > { %p9328_p2 = scmp.lt.u32.totalorder %s9762_s18, %s14437_s0  ;;  %p9329_p8 = scmp.lt.u32.totalorder %s9327_s13, %s9322_s4 }
  0x74   : > { %p9325_p13 = pnand %p9324_p6, %p9323_p10  ;;  %p9331_p12 = scmp.lt.u32.totalorder %s9322_s4, %s9762_s18 }
  0x75   : > { %p9330_p3 = por %p9329_p8, %p9328_p2 }
  0x76   : > { %p9326_p4 = pneg %p9325_p13 }
  0x77   : > { %p9332_p0 = por %p9331_p12, %p9330_p3 }
  0x79   : > { %p9333_p1 = pnand %p9332_p0, %p9326_p4 }
  0x7b   : > { %9336 = shalt.err (!%p9333_p1)
}
  0x7c   : > { %s9337_s19 = scalar_lea.vmem %s9764_s16, 2048  ;;  %s9500_s5 = smov [#allocation5]  }
  0x7d   : > { %p9338_p7 = scmp.ne.s32.totalorder %s9764_s16, %s9337_s19  ;;  %s9342_s3 = sshll.u32 %s9500_s5, 4  ;;  %s9343_s3 = int_to_ptr.vmem [resolvable:$false] %s9342_s3 }
  0x7e   : > { %s9344_s28 = scalar_lea.vmem %s9343_s3, 4096  ;;  %p9345_p10 = scmp.lt.s32.totalorder %s9764_s16, %s9343_s3 }
  0x7f   : > { %p9340_p9 = pnand %p9338_p7, %p9324_p6  ;;  %p9346_p13 = scmp.lt.s32.totalorder %s9344_s28, %s9337_s19 }
  0x81   : > { %p9341_p5 = pneg %p9340_p9  ;;  %p9347_p2 = por %p9346_p13, %p9345_p10 }
  0x83   : > { %p9348_p8 = pnand %p9347_p2, %p9341_p5 }
  0x85   : > { %9351 = shalt.err (!%p9348_p8)
}
  0x86   : > { %8204 = dma.hbm_to_vmem [thread:$0]  (!%p9770_p11), %s9762_s18, 2048, %s9764_s16, %s9803_s30, %s14862_s8, %s14862_s8, %s14861_s6  }
  0x87   : > { %s14864_s10 = sld [smem:[#allocation24_spill]] }
  0x8d   : > { %p14865_p6 = scmp.ne.s32.totalorder %s14864_s10, 0 }
  0x8f   : > { %260 = sbr.rel (%p14865_p6) target bundleno = 2308 (0x904), region = 32 }
  0x96   : > { %s14866_s20 = sld [smem:[#allocation17_spill]]  ;;  %s14867_s27 = sld [smem:[#allocation25_spill]] }
  0x9c   : > { %s9837_s11 = sand.u32 1, %s14866_s20   ;;  %p14868_p4 = scmp.ne.s32.totalorder %s14867_s27, 0 }
  0x9d   : > { %s7237_s9 = sshll.u32 %s9837_s11, 7  ;;  %s263_s4 = scalar_lea.sflag [#allocation6], %s9837_s11 }
  0x9e   : > { %s9841_s7 = scalar_lea.vmem [#allocation5], %s7237_s9 }
  0x9f   : > { %9433 = dma.done.wait (%p14868_p4), %s263_s4, 2048  }
  0xa0   : > { %9435 = vsyncadd (%p14868_p4), %s263_s4, 4294965248  ;;  %s14869_s15 = sld [smem:[#allocation22_spill]]  ;;  %s14870_s16 = sld [smem:[#allocation15_spill]] }
  0xa1   : > { %s14871_s18 = sld [smem:[#allocation23_spill]] }
  0xa6   : > { %s271_s6 = sand.u32 1, %s14869_s15   ;;  %s273_s8 = sand.u32 1, %s14870_s16  }
  0xa7   : > { %s7238_s30 = sshll.u32 %s273_s8, 8  ;;  %s272_s1 = scalar_lea.sflag [#allocation9], %s271_s6 }
  0xa8   : > { %s9849_s13 = scalar_lea.vmem [#allocation8], %s7238_s30  ;;  %p14872_p11 = scmp.ne.s32.totalorder %s14871_s18, 0 }
  0xaa   : > { %9437 = dma.done.wait (%p14872_p11), %s272_s1, 8192  }
  0xab   : > { %9439 = vsyncadd (%p14872_p11), %s272_s1, 4294959104  ;;  %s9855_s12 = scalar_lea.vmem [#allocation10], %s7238_s30  ;;  %s9857_s22 = scalar_lea.vmem [#allocation11], %s7237_s9 }
  0xac   : > { %s14873_s19 = sld [smem:[#allocation18_spill]] }
  0xb2   : > { %p7241_p3 = scmp.ne.s32.totalorder %s14873_s19, 0 }
  0xb3   : > { %vm326_vm0 = vcmask (!%p7241_p3), 7168   ;;  %vm455_vm1 = vcmask (!%p7241_p3), 523264   ;;  %v9501_v0 = vmov (!%p7241_p3), -inf   ;;  %v9502_v1 = vmov (!%p7241_p3), 0.0  }
  0xb4   : > { %325 = sbr.rel (%p7241_p3) target bundleno = 276 (0x114), region = 48  ;;  %327 = vst.msk [vmem:[#allocation2] sm:$0xff] (!%p7241_p3), %vm326_vm0, %v9501_v0  ;;  %328 = vst.msk [vmem:[#allocation2 + $0x8] sm:$0xff] (!%p7241_p3), %vm326_vm0, %v9501_v0 }
  0xb5   : > { %329 = vst.msk [vmem:[#allocation2 + $0x10] sm:$0xff] (!%p7241_p3), %vm326_vm0, %v9501_v0  ;;  %330 = vst.msk [vmem:[#allocation2 + $0x18] sm:$0xff] (!%p7241_p3), %vm326_vm0, %v9501_v0 }
  0xb6   : > { %331 = vst.msk [vmem:[#allocation2 + $0x20] sm:$0xff] (!%p7241_p3), %vm326_vm0, %v9501_v0  ;;  %332 = vst.msk [vmem:[#allocation2 + $0x28] sm:$0xff] (!%p7241_p3), %vm326_vm0, %v9501_v0 }
  0xb7   : > { %333 = vst.msk [vmem:[#allocation2 + $0x30] sm:$0xff] (!%p7241_p3), %vm326_vm0, %v9501_v0  ;;  %334 = vst.msk [vmem:[#allocation2 + $0x38] sm:$0xff] (!%p7241_p3), %vm326_vm0, %v9501_v0 }
  0xb8   : > { %335 = vst.msk [vmem:[#allocation2 + $0x40] sm:$0xff] (!%p7241_p3), %vm326_vm0, %v9501_v0  ;;  %336 = vst.msk [vmem:[#allocation2 + $0x48] sm:$0xff] (!%p7241_p3), %vm326_vm0, %v9501_v0 }
  0xb9   : > { %337 = vst.msk [vmem:[#allocation2 + $0x50] sm:$0xff] (!%p7241_p3), %vm326_vm0, %v9501_v0  ;;  %338 = vst.msk [vmem:[#allocation2 + $0x58] sm:$0xff] (!%p7241_p3), %vm326_vm0, %v9501_v0 }
  0xba   : > { %339 = vst.msk [vmem:[#allocation2 + $0x60] sm:$0xff] (!%p7241_p3), %vm326_vm0, %v9501_v0  ;;  %340 = vst.msk [vmem:[#allocation2 + $0x68] sm:$0xff] (!%p7241_p3), %vm326_vm0, %v9501_v0 }
  0xbb   : > { %341 = vst.msk [vmem:[#allocation2 + $0x70] sm:$0xff] %vm326_vm0, %v9501_v0  ;;  %342 = vst.msk [vmem:[#allocation2 + $0x78] sm:$0xff] %vm326_vm0, %v9501_v0 }
  0xbc   : > { %343 = vst.msk [vmem:[#allocation2 + $0x80] sm:$0xff] %vm326_vm0, %v9501_v0  ;;  %344 = vst.msk [vmem:[#allocation2 + $0x88] sm:$0xff] %vm326_vm0, %v9501_v0 }
  0xbd   : > { %345 = vst.msk [vmem:[#allocation2 + $0x90] sm:$0xff] %vm326_vm0, %v9501_v0  ;;  %346 = vst.msk [vmem:[#allocation2 + $0x98] sm:$0xff] %vm326_vm0, %v9501_v0 }
  0xbe   : > { %347 = vst.msk [vmem:[#allocation2 + $0xa0] sm:$0xff] %vm326_vm0, %v9501_v0  ;;  %348 = vst.msk [vmem:[#allocation2 + $0xa8] sm:$0xff] %vm326_vm0, %v9501_v0 }
  0xbf   : > { %349 = vst.msk [vmem:[#allocation2 + $0xb0] sm:$0xff] %vm326_vm0, %v9501_v0  ;;  %350 = vst.msk [vmem:[#allocation2 + $0xb8] sm:$0xff] %vm326_vm0, %v9501_v0 }
  0xc0   : > { %351 = vst.msk [vmem:[#allocation2 + $0xc0] sm:$0xff] %vm326_vm0, %v9501_v0  ;;  %352 = vst.msk [vmem:[#allocation2 + $0xc8] sm:$0xff] %vm326_vm0, %v9501_v0 }
  0xc1   : > { %353 = vst.msk [vmem:[#allocation2 + $0xd0] sm:$0xff] %vm326_vm0, %v9501_v0  ;;  %354 = vst.msk [vmem:[#allocation2 + $0xd8] sm:$0xff] %vm326_vm0, %v9501_v0 }
  0xc2   : > { %355 = vst.msk [vmem:[#allocation2 + $0xe0] sm:$0xff] %vm326_vm0, %v9501_v0  ;;  %356 = vst.msk [vmem:[#allocation2 + $0xe8] sm:$0xff] %vm326_vm0, %v9501_v0 }
  0xc3   : > { %357 = vst.msk [vmem:[#allocation2 + $0xf0] sm:$0xff] %vm326_vm0, %v9501_v0  ;;  %358 = vst.msk [vmem:[#allocation2 + $0xf8] sm:$0xff] %vm326_vm0, %v9501_v0 }
  0xc4   : > { %359 = vst.msk [vmem:[#allocation2 + $0x100] sm:$0xff] %vm326_vm0, %v9501_v0  ;;  %360 = vst.msk [vmem:[#allocation2 + $0x108] sm:$0xff] %vm326_vm0, %v9501_v0 }
  0xc5   : > { %361 = vst.msk [vmem:[#allocation2 + $0x110] sm:$0xff] %vm326_vm0, %v9501_v0  ;;  %362 = vst.msk [vmem:[#allocation2 + $0x118] sm:$0xff] %vm326_vm0, %v9501_v0 }
  0xc6   : > { %363 = vst.msk [vmem:[#allocation2 + $0x120] sm:$0xff] %vm326_vm0, %v9501_v0  ;;  %364 = vst.msk [vmem:[#allocation2 + $0x128] sm:$0xff] %vm326_vm0, %v9501_v0 }
  0xc7   : > { %365 = vst.msk [vmem:[#allocation2 + $0x130] sm:$0xff] %vm326_vm0, %v9501_v0  ;;  %366 = vst.msk [vmem:[#allocation2 + $0x138] sm:$0xff] %vm326_vm0, %v9501_v0 }
  0xc8   : > { %367 = vst.msk [vmem:[#allocation2 + $0x140] sm:$0xff] %vm326_vm0, %v9501_v0  ;;  %368 = vst.msk [vmem:[#allocation2 + $0x148] sm:$0xff] %vm326_vm0, %v9501_v0 }
  0xc9   : > { %369 = vst.msk [vmem:[#allocation2 + $0x150] sm:$0xff] %vm326_vm0, %v9501_v0  ;;  %370 = vst.msk [vmem:[#allocation2 + $0x158] sm:$0xff] %vm326_vm0, %v9501_v0 }
  0xca   : > { %371 = vst.msk [vmem:[#allocation2 + $0x160] sm:$0xff] %vm326_vm0, %v9501_v0  ;;  %372 = vst.msk [vmem:[#allocation2 + $0x168] sm:$0xff] %vm326_vm0, %v9501_v0 }
  0xcb   : > { %373 = vst.msk [vmem:[#allocation2 + $0x170] sm:$0xff] %vm326_vm0, %v9501_v0  ;;  %374 = vst.msk [vmem:[#allocation2 + $0x178] sm:$0xff] %vm326_vm0, %v9501_v0 }
  0xcc   : > { %375 = vst.msk [vmem:[#allocation2 + $0x180] sm:$0xff] %vm326_vm0, %v9501_v0  ;;  %376 = vst.msk [vmem:[#allocation2 + $0x188] sm:$0xff] %vm326_vm0, %v9501_v0 }
  0xcd   : > { %377 = vst.msk [vmem:[#allocation2 + $0x190] sm:$0xff] %vm326_vm0, %v9501_v0  ;;  %378 = vst.msk [vmem:[#allocation2 + $0x198] sm:$0xff] %vm326_vm0, %v9501_v0 }
  0xce   : > { %379 = vst.msk [vmem:[#allocation2 + $0x1a0] sm:$0xff] %vm326_vm0, %v9501_v0  ;;  %380 = vst.msk [vmem:[#allocation2 + $0x1a8] sm:$0xff] %vm326_vm0, %v9501_v0 }
  0xcf   : > { %381 = vst.msk [vmem:[#allocation2 + $0x1b0] sm:$0xff] %vm326_vm0, %v9501_v0  ;;  %382 = vst.msk [vmem:[#allocation2 + $0x1b8] sm:$0xff] %vm326_vm0, %v9501_v0 }
  0xd0   : > { %383 = vst.msk [vmem:[#allocation2 + $0x1c0] sm:$0xff] %vm326_vm0, %v9501_v0  ;;  %384 = vst.msk [vmem:[#allocation2 + $0x1c8] sm:$0xff] %vm326_vm0, %v9501_v0 }
  0xd1   : > { %385 = vst.msk [vmem:[#allocation2 + $0x1d0] sm:$0xff] %vm326_vm0, %v9501_v0  ;;  %386 = vst.msk [vmem:[#allocation2 + $0x1d8] sm:$0xff] %vm326_vm0, %v9501_v0 }
  0xd2   : > { %387 = vst.msk [vmem:[#allocation2 + $0x1e0] sm:$0xff] %vm326_vm0, %v9501_v0  ;;  %388 = vst.msk [vmem:[#allocation2 + $0x1e8] sm:$0xff] %vm326_vm0, %v9501_v0 }
  0xd3   : > { %389 = vst.msk [vmem:[#allocation2 + $0x1f0] sm:$0xff] %vm326_vm0, %v9501_v0  ;;  %390 = vst.msk [vmem:[#allocation2 + $0x1f8] sm:$0xff] %vm326_vm0, %v9501_v0 }
  0xd4   : > { %391 = vst.msk [vmem:[#allocation3] sm:$0xff] %vm326_vm0, %v9502_v1  ;;  %392 = vst.msk [vmem:[#allocation3 + $0x8] sm:$0xff] %vm326_vm0, %v9502_v1 }
  0xd5   : > { %393 = vst.msk [vmem:[#allocation3 + $0x10] sm:$0xff] %vm326_vm0, %v9502_v1  ;;  %394 = vst.msk [vmem:[#allocation3 + $0x18] sm:$0xff] %vm326_vm0, %v9502_v1 }
  0xd6   : > { %395 = vst.msk [vmem:[#allocation3 + $0x20] sm:$0xff] %vm326_vm0, %v9502_v1  ;;  %396 = vst.msk [vmem:[#allocation3 + $0x28] sm:$0xff] %vm326_vm0, %v9502_v1 }
  0xd7   : > { %397 = vst.msk [vmem:[#allocation3 + $0x30] sm:$0xff] %vm326_vm0, %v9502_v1  ;;  %398 = vst.msk [vmem:[#allocation3 + $0x38] sm:$0xff] %vm326_vm0, %v9502_v1 }
  0xd8   : > { %399 = vst.msk [vmem:[#allocation3 + $0x40] sm:$0xff] %vm326_vm0, %v9502_v1  ;;  %400 = vst.msk [vmem:[#allocation3 + $0x48] sm:$0xff] %vm326_vm0, %v9502_v1 }
  0xd9   : > { %401 = vst.msk [vmem:[#allocation3 + $0x50] sm:$0xff] %vm326_vm0, %v9502_v1  ;;  %402 = vst.msk [vmem:[#allocation3 + $0x58] sm:$0xff] %vm326_vm0, %v9502_v1 }
  0xda   : > { %403 = vst.msk [vmem:[#allocation3 + $0x60] sm:$0xff] %vm326_vm0, %v9502_v1  ;;  %404 = vst.msk [vmem:[#allocation3 + $0x68] sm:$0xff] %vm326_vm0, %v9502_v1 }
  0xdb   : > { %405 = vst.msk [vmem:[#allocation3 + $0x70] sm:$0xff] %vm326_vm0, %v9502_v1  ;;  %406 = vst.msk [vmem:[#allocation3 + $0x78] sm:$0xff] %vm326_vm0, %v9502_v1 }
  0xdc   : > { %407 = vst.msk [vmem:[#allocation3 + $0x80] sm:$0xff] %vm326_vm0, %v9502_v1  ;;  %408 = vst.msk [vmem:[#allocation3 + $0x88] sm:$0xff] %vm326_vm0, %v9502_v1 }
  0xdd   : > { %409 = vst.msk [vmem:[#allocation3 + $0x90] sm:$0xff] %vm326_vm0, %v9502_v1  ;;  %410 = vst.msk [vmem:[#allocation3 + $0x98] sm:$0xff] %vm326_vm0, %v9502_v1 }
  0xde   : > { %411 = vst.msk [vmem:[#allocation3 + $0xa0] sm:$0xff] %vm326_vm0, %v9502_v1  ;;  %412 = vst.msk [vmem:[#allocation3 + $0xa8] sm:$0xff] %vm326_vm0, %v9502_v1 }
  0xdf   : > { %413 = vst.msk [vmem:[#allocation3 + $0xb0] sm:$0xff] %vm326_vm0, %v9502_v1  ;;  %414 = vst.msk [vmem:[#allocation3 + $0xb8] sm:$0xff] %vm326_vm0, %v9502_v1 }
  0xe0   : > { %415 = vst.msk [vmem:[#allocation3 + $0xc0] sm:$0xff] %vm326_vm0, %v9502_v1  ;;  %416 = vst.msk [vmem:[#allocation3 + $0xc8] sm:$0xff] %vm326_vm0, %v9502_v1 }
  0xe1   : > { %417 = vst.msk [vmem:[#allocation3 + $0xd0] sm:$0xff] %vm326_vm0, %v9502_v1  ;;  %418 = vst.msk [vmem:[#allocation3 + $0xd8] sm:$0xff] %vm326_vm0, %v9502_v1 }
  0xe2   : > { %419 = vst.msk [vmem:[#allocation3 + $0xe0] sm:$0xff] %vm326_vm0, %v9502_v1  ;;  %420 = vst.msk [vmem:[#allocation3 + $0xe8] sm:$0xff] %vm326_vm0, %v9502_v1 }
  0xe3   : > { %421 = vst.msk [vmem:[#allocation3 + $0xf0] sm:$0xff] %vm326_vm0, %v9502_v1  ;;  %422 = vst.msk [vmem:[#allocation3 + $0xf8] sm:$0xff] %vm326_vm0, %v9502_v1 }
  0xe4   : > { %423 = vst.msk [vmem:[#allocation3 + $0x100] sm:$0xff] %vm326_vm0, %v9502_v1  ;;  %424 = vst.msk [vmem:[#allocation3 + $0x108] sm:$0xff] %vm326_vm0, %v9502_v1 }
  0xe5   : > { %425 = vst.msk [vmem:[#allocation3 + $0x110] sm:$0xff] %vm326_vm0, %v9502_v1  ;;  %426 = vst.msk [vmem:[#allocation3 + $0x118] sm:$0xff] %vm326_vm0, %v9502_v1 }
  0xe6   : > { %427 = vst.msk [vmem:[#allocation3 + $0x120] sm:$0xff] %vm326_vm0, %v9502_v1  ;;  %428 = vst.msk [vmem:[#allocation3 + $0x128] sm:$0xff] %vm326_vm0, %v9502_v1 }
  0xe7   : > { %429 = vst.msk [vmem:[#allocation3 + $0x130] sm:$0xff] %vm326_vm0, %v9502_v1  ;;  %430 = vst.msk [vmem:[#allocation3 + $0x138] sm:$0xff] %vm326_vm0, %v9502_v1 }
  0xe8   : > { %431 = vst.msk [vmem:[#allocation3 + $0x140] sm:$0xff] %vm326_vm0, %v9502_v1  ;;  %432 = vst.msk [vmem:[#allocation3 + $0x148] sm:$0xff] %vm326_vm0, %v9502_v1 }
  0xe9   : > { %433 = vst.msk [vmem:[#allocation3 + $0x150] sm:$0xff] %vm326_vm0, %v9502_v1  ;;  %434 = vst.msk [vmem:[#allocation3 + $0x158] sm:$0xff] %vm326_vm0, %v9502_v1 }
  0xea   : > { %435 = vst.msk [vmem:[#allocation3 + $0x160] sm:$0xff] %vm326_vm0, %v9502_v1  ;;  %436 = vst.msk [vmem:[#allocation3 + $0x168] sm:$0xff] %vm326_vm0, %v9502_v1 }
  0xeb   : > { %437 = vst.msk [vmem:[#allocation3 + $0x170] sm:$0xff] %vm326_vm0, %v9502_v1  ;;  %438 = vst.msk [vmem:[#allocation3 + $0x178] sm:$0xff] %vm326_vm0, %v9502_v1 }
  0xec   : > { %439 = vst.msk [vmem:[#allocation3 + $0x180] sm:$0xff] %vm326_vm0, %v9502_v1  ;;  %440 = vst.msk [vmem:[#allocation3 + $0x188] sm:$0xff] %vm326_vm0, %v9502_v1 }
  0xed   : > { %441 = vst.msk [vmem:[#allocation3 + $0x190] sm:$0xff] %vm326_vm0, %v9502_v1  ;;  %442 = vst.msk [vmem:[#allocation3 + $0x198] sm:$0xff] %vm326_vm0, %v9502_v1 }
  0xee   : > { %443 = vst.msk [vmem:[#allocation3 + $0x1a0] sm:$0xff] %vm326_vm0, %v9502_v1  ;;  %444 = vst.msk [vmem:[#allocation3 + $0x1a8] sm:$0xff] %vm326_vm0, %v9502_v1 }
  0xef   : > { %445 = vst.msk [vmem:[#allocation3 + $0x1b0] sm:$0xff] %vm326_vm0, %v9502_v1  ;;  %446 = vst.msk [vmem:[#allocation3 + $0x1b8] sm:$0xff] %vm326_vm0, %v9502_v1 }
  0xf0   : > { %447 = vst.msk [vmem:[#allocation3 + $0x1c0] sm:$0xff] %vm326_vm0, %v9502_v1  ;;  %448 = vst.msk [vmem:[#allocation3 + $0x1c8] sm:$0xff] %vm326_vm0, %v9502_v1 }
  0xf1   : > { %449 = vst.msk [vmem:[#allocation3 + $0x1d0] sm:$0xff] %vm326_vm0, %v9502_v1  ;;  %450 = vst.msk [vmem:[#allocation3 + $0x1d8] sm:$0xff] %vm326_vm0, %v9502_v1 }
  0xf2   : > { %451 = vst.msk [vmem:[#allocation3 + $0x1e0] sm:$0xff] %vm326_vm0, %v9502_v1  ;;  %452 = vst.msk [vmem:[#allocation3 + $0x1e8] sm:$0xff] %vm326_vm0, %v9502_v1 }
  0xf3   : > { %453 = vst.msk [vmem:[#allocation3 + $0x1f0] sm:$0xff] %vm326_vm0, %v9502_v1  ;;  %454 = vst.msk [vmem:[#allocation3 + $0x1f8] sm:$0xff] %vm326_vm0, %v9502_v1 }
  0xf4   : > { %456 = vst.msk [vmem:[#allocation4] sm:$0xff] %vm455_vm1, %v9502_v1  ;;  %457 = vst.msk [vmem:[#allocation4 + $0x8] sm:$0xff] %vm455_vm1, %v9502_v1 }
  0xf5   : > { %458 = vst.msk [vmem:[#allocation4 + $0x10] sm:$0xff] %vm455_vm1, %v9502_v1  ;;  %459 = vst.msk [vmem:[#allocation4 + $0x18] sm:$0xff] %vm455_vm1, %v9502_v1 }
  0xf6   : > { %460 = vst.msk [vmem:[#allocation4 + $0x20] sm:$0xff] %vm455_vm1, %v9502_v1  ;;  %461 = vst.msk [vmem:[#allocation4 + $0x28] sm:$0xff] %vm455_vm1, %v9502_v1 }
  0xf7   : > { %462 = vst.msk [vmem:[#allocation4 + $0x30] sm:$0xff] %vm455_vm1, %v9502_v1  ;;  %463 = vst.msk [vmem:[#allocation4 + $0x38] sm:$0xff] %vm455_vm1, %v9502_v1 }
  0xf8   : > { %464 = vst.msk [vmem:[#allocation4 + $0x40] sm:$0xff] %vm455_vm1, %v9502_v1  ;;  %465 = vst.msk [vmem:[#allocation4 + $0x48] sm:$0xff] %vm455_vm1, %v9502_v1 }
  0xf9   : > { %466 = vst.msk [vmem:[#allocation4 + $0x50] sm:$0xff] %vm455_vm1, %v9502_v1  ;;  %467 = vst.msk [vmem:[#allocation4 + $0x58] sm:$0xff] %vm455_vm1, %v9502_v1 }
  0xfa   : > { %468 = vst.msk [vmem:[#allocation4 + $0x60] sm:$0xff] %vm455_vm1, %v9502_v1  ;;  %469 = vst.msk [vmem:[#allocation4 + $0x68] sm:$0xff] %vm455_vm1, %v9502_v1 }
  0xfb   : > { %470 = vst.msk [vmem:[#allocation4 + $0x70] sm:$0xff] %vm455_vm1, %v9502_v1  ;;  %471 = vst.msk [vmem:[#allocation4 + $0x78] sm:$0xff] %vm455_vm1, %v9502_v1 }
  0xfc   : > { %472 = vst.msk [vmem:[#allocation4 + $0x80] sm:$0xff] %vm455_vm1, %v9502_v1  ;;  %473 = vst.msk [vmem:[#allocation4 + $0x88] sm:$0xff] %vm455_vm1, %v9502_v1 }
  0xfd   : > { %474 = vst.msk [vmem:[#allocation4 + $0x90] sm:$0xff] %vm455_vm1, %v9502_v1  ;;  %475 = vst.msk [vmem:[#allocation4 + $0x98] sm:$0xff] %vm455_vm1, %v9502_v1 }
  0xfe   : > { %476 = vst.msk [vmem:[#allocation4 + $0xa0] sm:$0xff] %vm455_vm1, %v9502_v1  ;;  %477 = vst.msk [vmem:[#allocation4 + $0xa8] sm:$0xff] %vm455_vm1, %v9502_v1 }
  0xff   : > { %478 = vst.msk [vmem:[#allocation4 + $0xb0] sm:$0xff] %vm455_vm1, %v9502_v1  ;;  %479 = vst.msk [vmem:[#allocation4 + $0xb8] sm:$0xff] %vm455_vm1, %v9502_v1 }
 0x100   : > { %480 = vst.msk [vmem:[#allocation4 + $0xc0] sm:$0xff] %vm455_vm1, %v9502_v1  ;;  %481 = vst.msk [vmem:[#allocation4 + $0xc8] sm:$0xff] %vm455_vm1, %v9502_v1 }
 0x101   : > { %482 = vst.msk [vmem:[#allocation4 + $0xd0] sm:$0xff] %vm455_vm1, %v9502_v1  ;;  %483 = vst.msk [vmem:[#allocation4 + $0xd8] sm:$0xff] %vm455_vm1, %v9502_v1 }
 0x102   : > { %484 = vst.msk [vmem:[#allocation4 + $0xe0] sm:$0xff] %vm455_vm1, %v9502_v1  ;;  %485 = vst.msk [vmem:[#allocation4 + $0xe8] sm:$0xff] %vm455_vm1, %v9502_v1 }
 0x103   : > { %486 = vst.msk [vmem:[#allocation4 + $0xf0] sm:$0xff] %vm455_vm1, %v9502_v1  ;;  %487 = vst.msk [vmem:[#allocation4 + $0xf8] sm:$0xff] %vm455_vm1, %v9502_v1 }
 0x104   : > { %488 = vst.msk [vmem:[#allocation4 + $0x100] sm:$0xff] %vm455_vm1, %v9502_v1  ;;  %489 = vst.msk [vmem:[#allocation4 + $0x108] sm:$0xff] %vm455_vm1, %v9502_v1 }
 0x105   : > { %490 = vst.msk [vmem:[#allocation4 + $0x110] sm:$0xff] %vm455_vm1, %v9502_v1  ;;  %491 = vst.msk [vmem:[#allocation4 + $0x118] sm:$0xff] %vm455_vm1, %v9502_v1 }
 0x106   : > { %492 = vst.msk [vmem:[#allocation4 + $0x120] sm:$0xff] %vm455_vm1, %v9502_v1  ;;  %493 = vst.msk [vmem:[#allocation4 + $0x128] sm:$0xff] %vm455_vm1, %v9502_v1 }
 0x107   : > { %494 = vst.msk [vmem:[#allocation4 + $0x130] sm:$0xff] %vm455_vm1, %v9502_v1  ;;  %495 = vst.msk [vmem:[#allocation4 + $0x138] sm:$0xff] %vm455_vm1, %v9502_v1 }
 0x108   : > { %496 = vst.msk [vmem:[#allocation4 + $0x140] sm:$0xff] %vm455_vm1, %v9502_v1  ;;  %497 = vst.msk [vmem:[#allocation4 + $0x148] sm:$0xff] %vm455_vm1, %v9502_v1 }
 0x109   : > { %498 = vst.msk [vmem:[#allocation4 + $0x150] sm:$0xff] %vm455_vm1, %v9502_v1  ;;  %499 = vst.msk [vmem:[#allocation4 + $0x158] sm:$0xff] %vm455_vm1, %v9502_v1 }
 0x10a   : > { %500 = vst.msk [vmem:[#allocation4 + $0x160] sm:$0xff] %vm455_vm1, %v9502_v1  ;;  %501 = vst.msk [vmem:[#allocation4 + $0x168] sm:$0xff] %vm455_vm1, %v9502_v1 }
 0x10b   : > { %502 = vst.msk [vmem:[#allocation4 + $0x170] sm:$0xff] %vm455_vm1, %v9502_v1  ;;  %503 = vst.msk [vmem:[#allocation4 + $0x178] sm:$0xff] %vm455_vm1, %v9502_v1 }
 0x10c   : > { %504 = vst.msk [vmem:[#allocation4 + $0x180] sm:$0xff] %vm455_vm1, %v9502_v1  ;;  %505 = vst.msk [vmem:[#allocation4 + $0x188] sm:$0xff] %vm455_vm1, %v9502_v1 }
 0x10d   : > { %506 = vst.msk [vmem:[#allocation4 + $0x190] sm:$0xff] %vm455_vm1, %v9502_v1  ;;  %507 = vst.msk [vmem:[#allocation4 + $0x198] sm:$0xff] %vm455_vm1, %v9502_v1 }
 0x10e   : > { %508 = vst.msk [vmem:[#allocation4 + $0x1a0] sm:$0xff] %vm455_vm1, %v9502_v1  ;;  %509 = vst.msk [vmem:[#allocation4 + $0x1a8] sm:$0xff] %vm455_vm1, %v9502_v1 }
 0x10f   : > { %510 = vst.msk [vmem:[#allocation4 + $0x1b0] sm:$0xff] %vm455_vm1, %v9502_v1  ;;  %511 = vst.msk [vmem:[#allocation4 + $0x1b8] sm:$0xff] %vm455_vm1, %v9502_v1 }
 0x110   : > { %512 = vst.msk [vmem:[#allocation4 + $0x1c0] sm:$0xff] %vm455_vm1, %v9502_v1  ;;  %513 = vst.msk [vmem:[#allocation4 + $0x1c8] sm:$0xff] %vm455_vm1, %v9502_v1 }
 0x111   : > { %514 = vst.msk [vmem:[#allocation4 + $0x1d0] sm:$0xff] %vm455_vm1, %v9502_v1  ;;  %515 = vst.msk [vmem:[#allocation4 + $0x1d8] sm:$0xff] %vm455_vm1, %v9502_v1 }
 0x112   : > { %516 = vst.msk [vmem:[#allocation4 + $0x1e0] sm:$0xff] %vm455_vm1, %v9502_v1  ;;  %517 = vst.msk [vmem:[#allocation4 + $0x1e8] sm:$0xff] %vm455_vm1, %v9502_v1 }
 0x113   : > { %518 = vst.msk [vmem:[#allocation4 + $0x1f0] sm:$0xff] %vm455_vm1, %v9502_v1  ;;  %519 = vst.msk [vmem:[#allocation4 + $0x1f8] sm:$0xff] %vm455_vm1, %v9502_v1 }
 0x114 PF: > { %v8332_v2 = vld [vmem:[%s9849_s13 + $0x40] sm:$0xff]   ;;  %vm920_vm2 = vcmask 523264   ;;  %v8336_v7 = vld [vmem:[%s9849_s13 + $0x48] sm:$0xff]   ;;  %v8340_v13 = vld [vmem:[%s9849_s13 + $0x50] sm:$0xff]   ;;  %vm2571_vm3 = vcmask 7168   ;;  %s9504_s5 = smov 64  }
 0x115   : > { %v8333_v3 = vld [vmem:[%s9849_s13 + $0xc0] sm:$0xff]   ;;  %8161 = vmatprep.subr.msk.bf16.mxu0 %vm920_vm2, %v8332_v2  ;;  %v8337_v9 = vld [vmem:[%s9849_s13 + $0xc8] sm:$0xff]   ;;  %v8341_v15 = vld [vmem:[%s9849_s13 + $0xd0] sm:$0xff]   ;;  %s15749_s3 = sld [smem:[#allocation18_spill]] }
 0x116   : > { %v8334_v4 = vld [vmem:[%s9849_s13] sm:$0xff]   ;;  %8169 = vmatprep.subr.msk.bf16.mxu1 %vm920_vm2, %v8333_v3  ;;  %v8338_v10 = vld [vmem:[%s9849_s13 + $0x8] sm:$0xff]   ;;  %v8342_v16 = vld [vmem:[%s9849_s13 + $0x10] sm:$0xff]  }
 0x117   : > { %v8335_v5 = vld [vmem:[%s9849_s13 + $0x80] sm:$0xff]   ;;  %v970_v6 = vsel %vm920_vm2, %v8334_v4, 0  ;;  %v8339_v11 = vld [vmem:[%s9849_s13 + $0x88] sm:$0xff]   ;;  %v973_v12 = vsel %vm920_vm2, %v8338_v10, 0  ;;  %v8343_v17 = vld [vmem:[%s9849_s13 + $0x90] sm:$0xff]   ;;  %v976_v18 = vsel %vm920_vm2, %v8342_v16, 0 }
 0x118   : > { %7522 = vmatpush3.bf16.xpose.msra.mxu0 %v970_v6  ;;  %v1018_v8 = vsel %vm920_vm2, %v8335_v5, 0  ;;  %v1021_v14 = vsel %vm920_vm2, %v8339_v11, 0  ;;  %v8344_v19 = vld [vmem:[%s9849_s13 + $0x58] sm:$0xff]   ;;  %v1024_v20 = vsel %vm920_vm2, %v8343_v17, 0  ;;  %v8348_v25 = vld [vmem:[%s9849_s13 + $0x60] sm:$0xff]   ;;  %v8352_v32 = vld [vmem:[%s9849_s13 + $0x68] sm:$0xff]  }
 0x119   : > { %7570 = vmatpush3.bf16.xpose.msra.mxu1 %v1018_v8  ;;  %8162 = vmatprep.subr.msk.bf16.mxu0 %vm920_vm2, %v8336_v7  ;;  %v8345_v21 = vld [vmem:[%s9849_s13 + $0xd8] sm:$0xff]   ;;  %v8349_v27 = vld [vmem:[%s9849_s13 + $0xe0] sm:$0xff]   ;;  %v8353_v34 = vld [vmem:[%s9849_s13 + $0xe8] sm:$0xff]  }
 0x11a   : > { %8170 = vmatprep.subr.msk.bf16.mxu1 %vm920_vm2, %v8337_v9  ;;  %v8346_v22 = vld [vmem:[%s9849_s13 + $0x18] sm:$0xff]   ;;  %v8350_v28 = vld [vmem:[%s9849_s13 + $0x20] sm:$0xff]   ;;  %v8354_v35 = vld [vmem:[%s9849_s13 + $0x28] sm:$0xff]  }
 0x11b   : > { %v8347_v23 = vld [vmem:[%s9849_s13 + $0x98] sm:$0xff]   ;;  %v979_v24 = vsel %vm920_vm2, %v8346_v22, 0  ;;  %v8351_v29 = vld [vmem:[%s9849_s13 + $0xa0] sm:$0xff]   ;;  %v982_v31 = vsel %vm920_vm2, %v8350_v28, 0  ;;  %v8355_v36 = vld [vmem:[%s9849_s13 + $0xa8] sm:$0xff]   ;;  %v985_v39 = vsel %vm920_vm2, %v8354_v35, 0 }
 0x11c   : > { %v1027_v26 = vsel %vm920_vm2, %v8347_v23, 0  ;;  %v8364_v30 = vld [vmem:[%s9841_s7] sm:$0xff]   ;;  %v1030_v33 = vsel %vm920_vm2, %v8351_v29, 0  ;;  %v8356_v37 = vld [vmem:[%s9849_s13 + $0x70] sm:$0xff]   ;;  %v1033_v41 = vsel %vm920_vm2, %v8355_v36, 0  ;;  %v8362_v45 = vld [vmem:[%s9849_s13 + $0x38] sm:$0xff]  }
 0x11d   : > { %7537 = vmatprep.mubr.msk.bf16.mxu0 %vm920_vm2, %v8364_v30  ;;  %7585 = vmatprep.mubr.msk.bf16.mxu1 %vm920_vm2, %v8364_v30  ;;  %v8358_v38 = vld [vmem:[%s9849_s13 + $0x30] sm:$0xff]   ;;  %v8363_v46 = vld [vmem:[%s9849_s13 + $0xb8] sm:$0xff]   ;;  %v991_v49 = vsel %vm920_vm2, %v8362_v45, 0  ;;  %v8365_v51 = vld [vmem:[%s9841_s7 + $0x8] sm:$0xff]   ;;  %v9503_v45 = vmov 0   ;;  %p7386_p12 = scmp.ne.s32.totalorder %s15749_s3, 1 }
 0x11e   : > { %v8359_v40 = vld [vmem:[%s9849_s13 + $0xb0] sm:$0xff]   ;;  %v988_v43 = vsel %vm920_vm2, %v8358_v38, 0  ;;  %v8360_v47 = vld [vmem:[%s9849_s13 + $0x78] sm:$0xff]   ;;  %v1039_v50 = vsel %vm920_vm2, %v8363_v46, 0  ;;  %v8368_v54 = vld [vmem:[%s9841_s7 + $0x20] sm:$0xff]   ;;  %8331 = vset.pattern.permute.xlu1 %v9503_v45  ;;  %8330 = vset.pattern.permute.xlu0 %v9503_v45  ;;  %vm6505_vm4 = vcmask (!%p7386_p12), 519168  }
 0x11f   : > { %v8357_v42 = vld [vmem:[%s9849_s13 + $0xf0] sm:$0xff]   ;;  %v1036_v44 = vsel %vm920_vm2, %v8359_v40, 0  ;;  %v8361_v48 = vld [vmem:[%s9849_s13 + $0xf8] sm:$0xff]   ;;  %v8369_v55 = vld [vmem:[%s9841_s7 + $0x28] sm:$0xff]   ;;  %s9506_s28 = smov (!%p7386_p12), 64   ;;  %vm7018_vm5 = vcmask (!%p7386_p12), 1043968  }
 0x120   : > { %7524 = vmatpush3.bf16.xpose.msra.mxu0 %v973_v12  ;;  %v8366_v52 = vld [vmem:[%s9841_s7 + $0x10] sm:$0xff]   ;;  %v8367_v53 = vld [vmem:[%s9841_s7 + $0x18] sm:$0xff]   ;;  %v8372_v58 = vld [vmem:[%s9841_s7 + $0x40] sm:$0xff]  }
 0x121   : > { %7572 = vmatpush3.bf16.xpose.msra.mxu1 %v1021_v14  ;;  %8163 = vmatprep.subr.msk.bf16.mxu0 %vm920_vm2, %v8340_v13  ;;  %v8370_v56 = vld [vmem:[%s9841_s7 + $0x30] sm:$0xff]   ;;  %v8371_v57 = vld [vmem:[%s9841_s7 + $0x38] sm:$0xff]   ;;  %v8373_v59 = vld [vmem:[%s9841_s7 + $0x48] sm:$0xff]  }
 0x122   : > { %8171 = vmatprep.subr.msk.bf16.mxu1 %vm920_vm2, %v8341_v15  ;;  %v8374_v60 = vld [vmem:[%s9841_s7 + $0x50] sm:$0xff]   ;;  %v8375_v61 = vld [vmem:[%s9841_s7 + $0x58] sm:$0xff]   ;;  %v8376_v62 = vld [vmem:[%s9841_s7 + $0x60] sm:$0xff]  }
 0x123   : > { %v8377_v63 = vld [vmem:[%s9841_s7 + $0x68] sm:$0xff]   ;;  %v8378_v0 = vld [vmem:[%s9841_s7 + $0x70] sm:$0xff]   ;;  %v8379_v1 = vld [vmem:[%s9841_s7 + $0x78] sm:$0xff]  }
 0x128   : > { %7526 = vmatpush3.bf16.xpose.msra.mxu0 %v976_v18 }
 0x129   : > { %7574 = vmatpush3.bf16.xpose.msra.mxu1 %v1024_v20  ;;  %8164 = vmatprep.subr.msk.bf16.mxu0 %vm920_vm2, %v8344_v19 }
 0x12a   : > { %8172 = vmatprep.subr.msk.bf16.mxu1 %vm920_vm2, %v8345_v21 }
 0x130   : > { %7528 = vmatpush3.bf16.xpose.msra.mxu0 %v979_v24 }
 0x131   : > { %7576 = vmatpush3.bf16.xpose.msra.mxu1 %v1027_v26  ;;  %8165 = vmatprep.subr.msk.bf16.mxu0 %vm920_vm2, %v8348_v25 }
 0x132   : > { %8173 = vmatprep.subr.msk.bf16.mxu1 %vm920_vm2, %v8349_v27 }
 0x138   : > { %7530 = vmatpush3.bf16.xpose.msra.mxu0 %v982_v31 }
 0x139   : > { %7578 = vmatpush3.bf16.xpose.msra.mxu1 %v1030_v33  ;;  %8166 = vmatprep.subr.msk.bf16.mxu0 %vm920_vm2, %v8352_v32 }
 0x13a   : > { %8174 = vmatprep.subr.msk.bf16.mxu1 %vm920_vm2, %v8353_v34 }
 0x140   : > { %7532 = vmatpush3.bf16.xpose.msra.mxu0 %v985_v39 }
 0x141   : > { %7580 = vmatpush3.bf16.xpose.msra.mxu1 %v1033_v41  ;;  %8167 = vmatprep.subr.msk.bf16.mxu0 %vm920_vm2, %v8356_v37 }
 0x142   : > { %8175 = vmatprep.subr.msk.bf16.mxu1 %vm920_vm2, %v8357_v42 }
 0x148   : > { %7534 = vmatpush3.bf16.xpose.msra.mxu0 %v988_v43 }
 0x149   : > { %7582 = vmatpush3.bf16.xpose.msra.mxu1 %v1036_v44  ;;  %8168 = vmatprep.subr.msk.bf16.mxu0 %vm920_vm2, %v8360_v47 }
 0x14a   : > { %8176 = vmatprep.subr.msk.bf16.mxu1 %vm920_vm2, %v8361_v48 }
 0x150   : > { %7536 = vmatpush3.bf16.xpose.msra.mxu0 %v991_v49 }
 0x151   : > { %7584 = vmatpush3.bf16.xpose.msra.mxu1 %v1039_v50 }
 0x157   : > { %7538 = vmatmul.mubr.msk.bf16.vlgmr.msra.gmra.mrb[0].mxu0 %vm920_vm2, %v8364_v30 }
 0x158   : > { %7586 = vmatmul.mubr.msk.bf16.vlgmr.msra.gmra.mrb[0].mxu1 %vm920_vm2, %v8364_v30  ;;  %7539 = vmatprep.mubr.msk.bf16.mxu0 %vm920_vm2, %v8365_v51 }
 0x159   : > { %7587 = vmatprep.mubr.msk.bf16.mxu1 %vm920_vm2, %v8365_v51 }
 0x15f   : > { %7540 = vmatmul.mubr.msk.bf16.gmra.mrb[4].mxu0 %vm920_vm2, %v8365_v51 }
 0x160   : > { %7588 = vmatmul.mubr.msk.bf16.gmra.mrb[4].mxu1 %vm920_vm2, %v8365_v51  ;;  %7541 = vmatprep.mubr.msk.bf16.mxu0 %vm920_vm2, %v8366_v52 }
 0x161   : > { %7589 = vmatprep.mubr.msk.bf16.mxu1 %vm920_vm2, %v8366_v52 }
 0x167   : > { %7542 = vmatmul.mubr.msk.bf16.gmra.mrb[8].mxu0 %vm920_vm2, %v8366_v52 }
 0x168   : > { %7590 = vmatmul.mubr.msk.bf16.gmra.mrb[8].mxu1 %vm920_vm2, %v8366_v52  ;;  %7543 = vmatprep.mubr.msk.bf16.mxu0 %vm920_vm2, %v8367_v53 }
 0x169   : > { %7591 = vmatprep.mubr.msk.bf16.mxu1 %vm920_vm2, %v8367_v53 }
 0x16f   : > { %7544 = vmatmul.mubr.msk.bf16.gmra.mrb[12].mxu0 %vm920_vm2, %v8367_v53 }
 0x170   : > { %7592 = vmatmul.mubr.msk.bf16.gmra.mrb[12].mxu1 %vm920_vm2, %v8367_v53  ;;  %7545 = vmatprep.mubr.msk.bf16.mxu0 %vm920_vm2, %v8368_v54 }
 0x171   : > { %7593 = vmatprep.mubr.msk.bf16.mxu1 %vm920_vm2, %v8368_v54 }
 0x177   : > { %7546 = vmatmul.mubr.msk.bf16.gmra.mrb[16].mxu0 %vm920_vm2, %v8368_v54 }
 0x178   : > { %7594 = vmatmul.mubr.msk.bf16.gmra.mrb[16].mxu1 %vm920_vm2, %v8368_v54  ;;  %7547 = vmatprep.mubr.msk.bf16.mxu0 %vm920_vm2, %v8369_v55 }
 0x179   : > { %7595 = vmatprep.mubr.msk.bf16.mxu1 %vm920_vm2, %v8369_v55 }
 0x17f   : > { %7548 = vmatmul.mubr.msk.bf16.gmra.mrb[20].mxu0 %vm920_vm2, %v8369_v55 }
 0x180   : > { %7596 = vmatmul.mubr.msk.bf16.gmra.mrb[20].mxu1 %vm920_vm2, %v8369_v55  ;;  %7549 = vmatprep.mubr.msk.bf16.mxu0 %vm920_vm2, %v8370_v56 }
 0x181   : > { %7597 = vmatprep.mubr.msk.bf16.mxu1 %vm920_vm2, %v8370_v56 }
 0x187   : > { %7550 = vmatmul.mubr.msk.bf16.gmra.mrb[24].mxu0 %vm920_vm2, %v8370_v56 }
 0x188   : > { %7598 = vmatmul.mubr.msk.bf16.gmra.mrb[24].mxu1 %vm920_vm2, %v8370_v56  ;;  %7551 = vmatprep.mubr.msk.bf16.mxu0 %vm920_vm2, %v8371_v57 }
 0x189   : > { %7599 = vmatprep.mubr.msk.bf16.mxu1 %vm920_vm2, %v8371_v57 }
 0x18f   : > { %7552 = vmatmul.mubr.msk.bf16.gmra.mrb[28].mxu0 %vm920_vm2, %v8371_v57 }
 0x190   : > { %7600 = vmatmul.mubr.msk.bf16.gmra.mrb[28].mxu1 %vm920_vm2, %v8371_v57  ;;  %7553 = vmatprep.mubr.msk.bf16.mxu0 %vm920_vm2, %v8372_v58 }
 0x191   : > { %7601 = vmatprep.mubr.msk.bf16.mxu1 %vm920_vm2, %v8372_v58 }
 0x197   : > { %7554 = vmatmul.mubr.msk.bf16.gmra.mrb[32].mxu0 %vm920_vm2, %v8372_v58 }
 0x198   : > { %7602 = vmatmul.mubr.msk.bf16.gmra.mrb[32].mxu1 %vm920_vm2, %v8372_v58  ;;  %7555 = vmatprep.mubr.msk.bf16.mxu0 %vm920_vm2, %v8373_v59 }
 0x199   : > { %7603 = vmatprep.mubr.msk.bf16.mxu1 %vm920_vm2, %v8373_v59 }
 0x19f   : > { %7556 = vmatmul.mubr.msk.bf16.gmra.mrb[36].mxu0 %vm920_vm2, %v8373_v59 }
 0x1a0   : > { %7604 = vmatmul.mubr.msk.bf16.gmra.mrb[36].mxu1 %vm920_vm2, %v8373_v59  ;;  %7557 = vmatprep.mubr.msk.bf16.mxu0 %vm920_vm2, %v8374_v60 }
 0x1a1   : > { %7605 = vmatprep.mubr.msk.bf16.mxu1 %vm920_vm2, %v8374_v60 }
 0x1a7   : > { %7558 = vmatmul.mubr.msk.bf16.gmra.mrb[40].mxu0 %vm920_vm2, %v8374_v60 }
 0x1a8   : > { %7606 = vmatmul.mubr.msk.bf16.gmra.mrb[40].mxu1 %vm920_vm2, %v8374_v60  ;;  %7559 = vmatprep.mubr.msk.bf16.mxu0 %vm920_vm2, %v8375_v61 }
 0x1a9   : > { %7607 = vmatprep.mubr.msk.bf16.mxu1 %vm920_vm2, %v8375_v61 }
 0x1af   : > { %7560 = vmatmul.mubr.msk.bf16.gmra.mrb[44].mxu0 %vm920_vm2, %v8375_v61 }
 0x1b0   : > { %7608 = vmatmul.mubr.msk.bf16.gmra.mrb[44].mxu1 %vm920_vm2, %v8375_v61  ;;  %7561 = vmatprep.mubr.msk.bf16.mxu0 %vm920_vm2, %v8376_v62 }
 0x1b1   : > { %7609 = vmatprep.mubr.msk.bf16.mxu1 %vm920_vm2, %v8376_v62 }
 0x1b7   : > { %7562 = vmatmul.mubr.msk.bf16.gmra.mrb[48].mxu0 %vm920_vm2, %v8376_v62 }
 0x1b8   : > { %7610 = vmatmul.mubr.msk.bf16.gmra.mrb[48].mxu1 %vm920_vm2, %v8376_v62  ;;  %7563 = vmatprep.mubr.msk.bf16.mxu0 %vm920_vm2, %v8377_v63 }
 0x1b9   : > { %7611 = vmatprep.mubr.msk.bf16.mxu1 %vm920_vm2, %v8377_v63 }
 0x1bf   : > { %7564 = vmatmul.mubr.msk.bf16.gmra.mrb[52].mxu0 %vm920_vm2, %v8377_v63 }
 0x1c0   : > { %7612 = vmatmul.mubr.msk.bf16.gmra.mrb[52].mxu1 %vm920_vm2, %v8377_v63  ;;  %7565 = vmatprep.mubr.msk.bf16.mxu0 %vm920_vm2, %v8378_v0 }
 0x1c1   : > { %7613 = vmatprep.mubr.msk.bf16.mxu1 %vm920_vm2, %v8378_v0 }
 0x1c7   : > { %7566 = vmatmul.mubr.msk.bf16.gmra.mrb[56].mxu0 %vm920_vm2, %v8378_v0 }
 0x1c8   : > { %7614 = vmatmul.mubr.msk.bf16.gmra.mrb[56].mxu1 %vm920_vm2, %v8378_v0  ;;  %7567 = vmatprep.mubr.msk.bf16.mxu0 %vm920_vm2, %v8379_v1 }
 0x1c9   : > { %7615 = vmatprep.mubr.msk.bf16.mxu1 %vm920_vm2, %v8379_v1 }
 0x1cf   : > { %7568 = vmatmul.mubr.msk.bf16.gmra.mrb[60].mxu0 %vm920_vm2, %v8379_v1 }
 0x1d0   : > { %7616 = vmatmul.mubr.msk.bf16.gmra.mrb[60].mxu1 %vm920_vm2, %v8379_v1 }
 0x22a   : > { %v10388_v2 = vpop.f32.mrb[0].mxu0 }
 0x22b   : > { %v10390_v3 = vpop.f32.mrb[0].mxu1  ;;  %v10392_v4 = vpop.f32.mrb[1].mxu0 }
 0x22c   : > { %v1483_v5 = vmax.f32 %v10388_v2, %v10392_v4  ;;  %v10396_v6 = vpop.f32.mrb[1].mxu1  ;;  %v10398_v7 = vpop.f32.mrb[2].mxu0 }
 0x22d   : > { %v10400_v8 = vpop.f32.mrb[2].mxu1  ;;  %v10402_v9 = vpop.f32.mrb[3].mxu0 }
 0x22e   : > { %v1488_v10 = vmax.f32 %v10398_v7, %v10402_v9  ;;  %v10406_v11 = vpop.f32.mrb[3].mxu1  ;;  %v1484_v12 = vmax.f32 %v1483_v5, %v10390_v3 }
 0x230   : > { %v1485_v13 = vmax.f32 %v1484_v12, %v10396_v6  ;;  %v1489_v14 = vmax.f32 %v1488_v10, %v10400_v8 }
 0x232   : > { %1486 = vmax.xlane.f32.xlu0 %v1485_v13  ;;  %v10411_v15 = vpop.f32.mrb[4].mxu0  ;;  %v1490_v16 = vmax.f32 %v1489_v14, %v10406_v11 }
 0x233   : > { %v10414_v17 = vpop.f32.mrb[4].mxu1  ;;  %v10416_v18 = vpop.f32.mrb[5].mxu0 }
 0x234   : > { %v1493_v19 = vmax.f32 %v10411_v15, %v10416_v18  ;;  %v10420_v20 = vpop.f32.mrb[5].mxu1  ;;  %v10422_v21 = vpop.f32.mrb[6].mxu0 }
 0x235   : > { %v10424_v22 = vpop.f32.mrb[6].mxu1  ;;  %v10426_v23 = vpop.f32.mrb[7].mxu0 }
 0x236   : > { %v1498_v24 = vmax.f32 %v10422_v21, %v10426_v23  ;;  %v10430_v25 = vpop.f32.mrb[7].mxu1  ;;  %1491 = vmax.xlane.f32.xlu0 %v1490_v16  ;;  %v1494_v26 = vmax.f32 %v1493_v19, %v10414_v17 }
 0x238   : > { %v1495_v27 = vmax.f32 %v1494_v26, %v10420_v20  ;;  %v1499_v28 = vmax.f32 %v1498_v24, %v10424_v22 }
 0x23a   : > { %1496 = vmax.xlane.f32.xlu1 %v1495_v27  ;;  %v10435_v29 = vpop.f32.mrb[8].mxu0  ;;  %v1500_v30 = vmax.f32 %v1499_v28, %v10430_v25 }
 0x23b   : > { %v10438_v31 = vpop.f32.mrb[8].mxu1  ;;  %v10440_v32 = vpop.f32.mrb[9].mxu0 }
 0x23c   : > { %v1503_v33 = vmax.f32 %v10435_v29, %v10440_v32  ;;  %v10444_v34 = vpop.f32.mrb[9].mxu1  ;;  %v10446_v35 = vpop.f32.mrb[10].mxu0 }
 0x23d   : > { %v10448_v36 = vpop.f32.mrb[10].mxu1  ;;  %v10450_v37 = vpop.f32.mrb[11].mxu0 }
 0x23e   : > { %v1508_v38 = vmax.f32 %v10446_v35, %v10450_v37  ;;  %v10454_v39 = vpop.f32.mrb[11].mxu1  ;;  %1501 = vmax.xlane.f32.xlu1 %v1500_v30  ;;  %v1504_v40 = vmax.f32 %v1503_v33, %v10438_v31 }
 0x240   : > { %v1505_v41 = vmax.f32 %v1504_v40, %v10444_v34  ;;  %v1509_v42 = vmax.f32 %v1508_v38, %v10448_v36 }
 0x242   : > { %1506 = vmax.xlane.f32.xlu0 %v1505_v41  ;;  %v10459_v43 = vpop.f32.mrb[12].mxu0  ;;  %v1510_v44 = vmax.f32 %v1509_v42, %v10454_v39 }
 0x243   : > { %v10462_v46 = vpop.f32.mrb[12].mxu1  ;;  %v10464_v47 = vpop.f32.mrb[13].mxu0 }
 0x244   : > { %14874 = vst [vmem:[#allocation30_spill] sm:$0xff] %v10462_v46  ;;  %v1513_v48 = vmax.f32 %v10459_v43, %v10464_v47  ;;  %v10468_v49 = vpop.f32.mrb[13].mxu1  ;;  %1511 = vmax.xlane.f32.xlu1 %v1510_v44  ;;  %v10470_v50 = vpop.f32.mrb[14].mxu0 }
 0x245   : > { %14875 = vst [vmem:[#allocation31_spill] sm:$0xff] %v10468_v49  ;;  %14876 = vst [vmem:[#allocation32_spill] sm:$0xff] %v10470_v50  ;;  %v10472_v51 = vpop.f32.mrb[14].mxu1  ;;  %v10474_v52 = vpop.f32.mrb[15].mxu0 }
 0x246   : > { %14877 = vst [vmem:[#allocation33_spill] sm:$0xff] %v10472_v51  ;;  %14878 = vst [vmem:[#allocation34_spill] sm:$0xff] %v10474_v52  ;;  %v1518_v53 = vmax.f32 %v10470_v50, %v10474_v52  ;;  %v10478_v54 = vpop.f32.mrb[15].mxu1  ;;  %v1514_v55 = vmax.f32 %v1513_v48, %v10462_v46  ;;  %v9053_v52 = vld [vmem:[%s9849_s13 + $0x40] sm:$0xff]  }
 0x247   : > { %14879 = vst [vmem:[#allocation35_spill] sm:$0xff] %v10478_v54 }
 0x248   : > { %v1515_v56 = vmax.f32 %v1514_v55, %v10468_v49  ;;  %v1519_v57 = vmax.f32 %v1518_v53, %v10472_v51 }
 0x24a   : > { %1516 = vmax.xlane.f32.xlu0 %v1515_v56  ;;  %v10483_v58 = vpop.f32.mrb[16].mxu0  ;;  %v1520_v59 = vmax.f32 %v1519_v57, %v10478_v54  ;;  %v9052_v54 = vld [vmem:[%s9849_s13] sm:$0xff]  }
 0x24b   : > { %14880 = vst [vmem:[#allocation36_spill] sm:$0xff] %v10483_v58  ;;  %v10486_v60 = vpop.f32.mrb[16].mxu1  ;;  %v10488_v61 = vpop.f32.mrb[17].mxu0 }
 0x24c   : > { %14881 = vst [vmem:[#allocation37_spill] sm:$0xff] %v10486_v60  ;;  %14882 = vst [vmem:[#allocation38_spill] sm:$0xff] %v10488_v61  ;;  %v1523_v62 = vmax.f32 %v10483_v58, %v10488_v61  ;;  %v10492_v63 = vpop.f32.mrb[17].mxu1  ;;  %1521 = vmax.xlane.f32.xlu1 %v1520_v59  ;;  %v10494_v0 = vpop.f32.mrb[18].mxu0 }
 0x24d   : > { %14883 = vst [vmem:[#allocation39_spill] sm:$0xff] %v10492_v63  ;;  %14884 = vst [vmem:[#allocation40_spill] sm:$0xff] %v10494_v0  ;;  %v10496_v1 = vpop.f32.mrb[18].mxu1  ;;  %v10498_v5 = vpop.f32.mrb[19].mxu0 }
 0x24e   : > { %14885 = vst [vmem:[#allocation41_spill] sm:$0xff] %v10496_v1  ;;  %14886 = vst [vmem:[#allocation42_spill] sm:$0xff] %v10498_v5  ;;  %v1528_v10 = vmax.f32 %v10494_v0, %v10498_v5  ;;  %v10502_v12 = vpop.f32.mrb[19].mxu1  ;;  %v1524_v13 = vmax.f32 %v1523_v62, %v10486_v60 }
 0x24f   : > { %14887 = vst [vmem:[#allocation43_spill] sm:$0xff] %v10502_v12 }
 0x250   : > { %v1525_v14 = vmax.f32 %v1524_v13, %v10492_v63  ;;  %v1529_v16 = vmax.f32 %v1528_v10, %v10496_v1  ;;  %v10926_v63 = vld [vmem:[#allocation2 + $0x68] sm:$0xff] }
 0x252   : > { %1526 = vmax.xlane.f32.xlu0 %v1525_v14  ;;  %v10507_v19 = vpop.f32.mrb[20].mxu0  ;;  %v1530_v24 = vmax.f32 %v1529_v16, %v10502_v12 }
 0x253   : > { %14888 = vst [vmem:[#allocation44_spill] sm:$0xff] %v10507_v19  ;;  %v10510_v26 = vpop.f32.mrb[20].mxu1  ;;  %v10512_v27 = vpop.f32.mrb[21].mxu0 }
 0x254   : > { %14889 = vst [vmem:[#allocation45_spill] sm:$0xff] %v10510_v26  ;;  %14890 = vst [vmem:[#allocation46_spill] sm:$0xff] %v10512_v27  ;;  %v1533_v28 = vmax.f32 %v10507_v19, %v10512_v27  ;;  %v10516_v30 = vpop.f32.mrb[21].mxu1  ;;  %1531 = vmax.xlane.f32.xlu1 %v1530_v24  ;;  %v10518_v33 = vpop.f32.mrb[22].mxu0  ;;  %v10866_v19 = vld [vmem:[#allocation2 + $0x38] sm:$0xff] }
 0x255   : > { %14891 = vst [vmem:[#allocation47_spill] sm:$0xff] %v10516_v30  ;;  %14892 = vst [vmem:[#allocation48_spill] sm:$0xff] %v10518_v33  ;;  %v10520_v38 = vpop.f32.mrb[22].mxu1  ;;  %v10522_v40 = vpop.f32.mrb[23].mxu0 }
 0x256   : > { %14893 = vst [vmem:[#allocation49_spill] sm:$0xff] %v10520_v38  ;;  %14894 = vst [vmem:[#allocation50_spill] sm:$0xff] %v10522_v40  ;;  %v1538_v41 = vmax.f32 %v10518_v33, %v10522_v40  ;;  %v10526_v42 = vpop.f32.mrb[23].mxu1  ;;  %v1534_v44 = vmax.f32 %v1533_v28, %v10510_v26  ;;  %v8405_v40 = vld [vmem:[%s9855_s12 + $0xf0] sm:$0xff]   ;;  %v8408_v33 = vld [vmem:[%s9855_s12 + $0x78] sm:$0xff]  }
 0x257   : > { %14895 = vst [vmem:[#allocation51_spill] sm:$0xff] %v10526_v42  ;;  %v8411_v26 = vld [vmem:[%s9855_s12 + $0xb8] sm:$0xff]  }
 0x258   : > { %v1535_v45 = vmax.f32 %v1534_v44, %v10516_v30  ;;  %v1539_v48 = vmax.f32 %v1538_v41, %v10520_v38  ;;  %v8404_v38 = vld [vmem:[%s9855_s12 + $0x70] sm:$0xff]   ;;  %v8409_v30 = vld [vmem:[%s9855_s12 + $0xf8] sm:$0xff]  }
 0x25a   : > { %1536 = vmax.xlane.f32.xlu0 %v1535_v45  ;;  %v10531_v53 = vpop.f32.mrb[24].mxu0  ;;  %v1540_v55 = vmax.f32 %v1539_v48, %v10526_v42 }
 0x25b   : > { %14896 = vst [vmem:[#allocation52_spill] sm:$0xff] %v10531_v53  ;;  %v10534_v56 = vpop.f32.mrb[24].mxu1  ;;  %v10536_v57 = vpop.f32.mrb[25].mxu0 }
 0x25c   : > { %14897 = vst [vmem:[#allocation53_spill] sm:$0xff] %v10534_v56  ;;  %14898 = vst [vmem:[#allocation54_spill] sm:$0xff] %v10536_v57  ;;  %v1543_v59 = vmax.f32 %v10531_v53, %v10536_v57  ;;  %v10540_v62 = vpop.f32.mrb[25].mxu1  ;;  %1541 = vmax.xlane.f32.xlu1 %v1540_v55  ;;  %v10542_v10 = vpop.f32.mrb[26].mxu0 }
 0x25d   : > { %14899 = vst [vmem:[#allocation55_spill] sm:$0xff] %v10540_v62  ;;  %14900 = vst [vmem:[#allocation56_spill] sm:$0xff] %v10542_v10  ;;  %v10544_v13 = vpop.f32.mrb[26].mxu1  ;;  %v10546_v14 = vpop.f32.mrb[27].mxu0 }
 0x25e   : > { %14901 = vst [vmem:[#allocation57_spill] sm:$0xff] %v10544_v13  ;;  %14902 = vst [vmem:[#allocation58_spill] sm:$0xff] %v10546_v14  ;;  %v1548_v16 = vmax.f32 %v10542_v10, %v10546_v14  ;;  %v10550_v24 = vpop.f32.mrb[27].mxu1  ;;  %v1544_v28 = vmax.f32 %v1543_v59, %v10534_v56 }
 0x25f   : > { %14903 = vst [vmem:[#allocation59_spill] sm:$0xff] %v10550_v24 }
 0x260   : > { %v1545_v41 = vmax.f32 %v1544_v28, %v10540_v62  ;;  %v1549_v44 = vmax.f32 %v1548_v16, %v10544_v13 }
 0x262   : > { %1546 = vmax.xlane.f32.xlu0 %v1545_v41  ;;  %v10555_v45 = vpop.f32.mrb[28].mxu0  ;;  %v1550_v48 = vmax.f32 %v1549_v44, %v10550_v24 }
 0x263   : > { %14904 = vst [vmem:[#allocation60_spill] sm:$0xff] %v10555_v45  ;;  %v10558_v55 = vpop.f32.mrb[28].mxu1  ;;  %v10560_v57 = vpop.f32.mrb[29].mxu0 }
 0x264   : > { %14905 = vst [vmem:[#allocation61_spill] sm:$0xff] %v10558_v55  ;;  %14906 = vst [vmem:[#allocation62_spill] sm:$0xff] %v10560_v57  ;;  %v1553_v14 = vmax.f32 %v10555_v45, %v10560_v57  ;;  %v10564_v10 = vpop.f32.mrb[29].mxu1  ;;  %1551 = vmax.xlane.f32.xlu1 %v1550_v48  ;;  %v10566_v59 = vpop.f32.mrb[30].mxu0 }
 0x265   : > { %14907 = vst [vmem:[#allocation63_spill] sm:$0xff] %v10564_v10  ;;  %14908 = vst [vmem:[#allocation64_spill] sm:$0xff] %v10566_v59  ;;  %v10568_v28 = vpop.f32.mrb[30].mxu1  ;;  %v10570_v16 = vpop.f32.mrb[31].mxu0 }
 0x266   : > { %14909 = vst [vmem:[#allocation65_spill] sm:$0xff] %v10568_v28  ;;  %14910 = vst [vmem:[#allocation66_spill] sm:$0xff] %v10570_v16  ;;  %v1558_v41 = vmax.f32 %v10566_v59, %v10570_v16  ;;  %v10574_v44 = vpop.f32.mrb[31].mxu1  ;;  %v1554_v24 = vmax.f32 %v1553_v14, %v10558_v55 }
 0x267   : > { %14911 = vst [vmem:[#allocation67_spill] sm:$0xff] %v10574_v44 }
 0x268   : > { %v1555_v13 = vmax.f32 %v1554_v24, %v10564_v10  ;;  %v1559_v57 = vmax.f32 %v1558_v41, %v10568_v28 }
 0x26a   : > { %1556 = vmax.xlane.f32.xlu0 %v1555_v13  ;;  %v10579_v45 = vpop.f32.mrb[32].mxu0  ;;  %v1560_v48 = vmax.f32 %v1559_v57, %v10574_v44 }
 0x26b   : > { %14912 = vst [vmem:[#allocation68_spill] sm:$0xff] %v10579_v45  ;;  %v10582_v62 = vpop.f32.mrb[32].mxu1  ;;  %v10584_v56 = vpop.f32.mrb[33].mxu0 }
 0x26c   : > { %14913 = vst [vmem:[#allocation69_spill] sm:$0xff] %v10582_v62  ;;  %14914 = vst [vmem:[#allocation70_spill] sm:$0xff] %v10584_v56  ;;  %v1563_v16 = vmax.f32 %v10579_v45, %v10584_v56  ;;  %v10588_v59 = vpop.f32.mrb[33].mxu1  ;;  %1561 = vmax.xlane.f32.xlu1 %v1560_v48  ;;  %v10590_v14 = vpop.f32.mrb[34].mxu0 }
 0x26d   : > { %14915 = vst [vmem:[#allocation71_spill] sm:$0xff] %v10588_v59  ;;  %14916 = vst [vmem:[#allocation72_spill] sm:$0xff] %v10590_v14  ;;  %v10592_v24 = vpop.f32.mrb[34].mxu1  ;;  %v10594_v41 = vpop.f32.mrb[35].mxu0 }
 0x26e   : > { %14917 = vst [vmem:[#allocation73_spill] sm:$0xff] %v10592_v24  ;;  %14918 = vst [vmem:[#allocation74_spill] sm:$0xff] %v10594_v41  ;;  %v1568_v13 = vmax.f32 %v10590_v14, %v10594_v41  ;;  %v10598_v57 = vpop.f32.mrb[35].mxu1  ;;  %v1564_v44 = vmax.f32 %v1563_v16, %v10582_v62 }
 0x26f   : > { %14919 = vst [vmem:[#allocation75_spill] sm:$0xff] %v10598_v57 }
 0x270   : > { %v1565_v28 = vmax.f32 %v1564_v44, %v10588_v59  ;;  %v1569_v56 = vmax.f32 %v1568_v13, %v10592_v24 }
 0x272   : > { %1566 = vmax.xlane.f32.xlu0 %v1565_v28  ;;  %v10603_v45 = vpop.f32.mrb[36].mxu0  ;;  %v1570_v48 = vmax.f32 %v1569_v56, %v10598_v57 }
 0x273   : > { %14920 = vst [vmem:[#allocation76_spill] sm:$0xff] %v10603_v45  ;;  %v10606_v10 = vpop.f32.mrb[36].mxu1  ;;  %v10608_v55 = vpop.f32.mrb[37].mxu0 }
 0x274   : > { %14921 = vst [vmem:[#allocation77_spill] sm:$0xff] %v10606_v10  ;;  %14922 = vst [vmem:[#allocation78_spill] sm:$0xff] %v10608_v55  ;;  %v1573_v41 = vmax.f32 %v10603_v45, %v10608_v55  ;;  %v10612_v14 = vpop.f32.mrb[37].mxu1  ;;  %1571 = vmax.xlane.f32.xlu1 %v1570_v48  ;;  %v10614_v16 = vpop.f32.mrb[38].mxu0 }
 0x275   : > { %14923 = vst [vmem:[#allocation79_spill] sm:$0xff] %v10612_v14  ;;  %14924 = vst [vmem:[#allocation80_spill] sm:$0xff] %v10614_v16  ;;  %v10616_v44 = vpop.f32.mrb[38].mxu1  ;;  %v10618_v13 = vpop.f32.mrb[39].mxu0 }
 0x276   : > { %14925 = vst [vmem:[#allocation81_spill] sm:$0xff] %v10616_v44  ;;  %14926 = vst [vmem:[#allocation82_spill] sm:$0xff] %v10618_v13  ;;  %v1578_v28 = vmax.f32 %v10614_v16, %v10618_v13  ;;  %v10622_v56 = vpop.f32.mrb[39].mxu1  ;;  %v1574_v57 = vmax.f32 %v1573_v41, %v10606_v10 }
 0x277   : > { %14927 = vst [vmem:[#allocation83_spill] sm:$0xff] %v10622_v56 }
 0x278   : > { %v1575_v24 = vmax.f32 %v1574_v57, %v10612_v14  ;;  %v1579_v55 = vmax.f32 %v1578_v28, %v10616_v44  ;;  %v8381_v14 = vld [vmem:[%s9855_s12] sm:$0xff]  }
 0x27a   : > { %1576 = vmax.xlane.f32.xlu0 %v1575_v24  ;;  %v10627_v48 = vpop.f32.mrb[40].mxu0  ;;  %v1580_v45 = vmax.f32 %v1579_v55, %v10622_v56 }
 0x27b   : > { %14928 = vst [vmem:[#allocation84_spill] sm:$0xff] %v10627_v48  ;;  %v10630_v59 = vpop.f32.mrb[40].mxu1  ;;  %v10632_v62 = vpop.f32.mrb[41].mxu0 }
 0x27c   : > { %14929 = vst [vmem:[#allocation85_spill] sm:$0xff] %v10630_v59  ;;  %14930 = vst [vmem:[#allocation86_spill] sm:$0xff] %v10632_v62  ;;  %v1583_v13 = vmax.f32 %v10627_v48, %v10632_v62  ;;  %v10636_v16 = vpop.f32.mrb[41].mxu1  ;;  %1581 = vmax.xlane.f32.xlu1 %v1580_v45  ;;  %v10638_v41 = vpop.f32.mrb[42].mxu0  ;;  %v8380_v48 = vld [vmem:[%s9855_s12 + $0x40] sm:$0xff]  }
 0x27d   : > { %14931 = vst [vmem:[#allocation87_spill] sm:$0xff] %v10636_v16  ;;  %14932 = vst [vmem:[#allocation88_spill] sm:$0xff] %v10638_v41  ;;  %v10640_v57 = vpop.f32.mrb[42].mxu1  ;;  %v10642_v24 = vpop.f32.mrb[43].mxu0  ;;  %7617 = vmatprep.subr.bf16.mxu0 %v8380_v48 }
 0x27e   : > { %14933 = vst [vmem:[#allocation89_spill] sm:$0xff] %v10640_v57  ;;  %14934 = vst [vmem:[#allocation90_spill] sm:$0xff] %v10642_v24  ;;  %v1588_v28 = vmax.f32 %v10638_v41, %v10642_v24  ;;  %v10646_v55 = vpop.f32.mrb[43].mxu1  ;;  %v1584_v56 = vmax.f32 %v1583_v13, %v10630_v59  ;;  %7618 = vmatpush3.bf16.msra.mxu0 %v8381_v14  ;;  %v8382_v14 = vld [vmem:[%s9855_s12 + $0xc0] sm:$0xff]  }
 0x27f   : > { %14935 = vst [vmem:[#allocation91_spill] sm:$0xff] %v10646_v55  ;;  %v8383_v41 = vld [vmem:[%s9855_s12 + $0x80] sm:$0xff]   ;;  %7729 = vmatprep.subr.bf16.mxu1 %v8382_v14 }
 0x280   : > { %v1585_v44 = vmax.f32 %v1584_v56, %v10636_v16  ;;  %v1589_v62 = vmax.f32 %v1588_v28, %v10640_v57  ;;  %7730 = vmatpush3.bf16.msra.mxu1 %v8383_v41 }
 0x282   : > { %1586 = vmax.xlane.f32.xlu0 %v1585_v44  ;;  %v10653_v45 = vpop.f32.mrb[44].mxu0  ;;  %v1590_v10 = vmax.f32 %v1589_v62, %v10646_v55 }
 0x283   : > { %14936 = vst [vmem:[#allocation92_spill] sm:$0xff] %v10653_v45  ;;  %v10656_v53 = vpop.f32.mrb[44].mxu1  ;;  %v10658_v24 = vpop.f32.mrb[45].mxu0 }
 0x284   : > { %14937 = vst [vmem:[#allocation93_spill] sm:$0xff] %v10656_v53  ;;  %14938 = vst [vmem:[#allocation94_spill] sm:$0xff] %v10658_v24  ;;  %v1593_v13 = vmax.f32 %v10653_v45, %v10658_v24  ;;  %v10662_v56 = vpop.f32.mrb[45].mxu1  ;;  %1591 = vmax.xlane.f32.xlu1 %v1590_v10  ;;  %v10664_v28 = vpop.f32.mrb[46].mxu0 }
 0x285   : > { %14939 = vst [vmem:[#allocation95_spill] sm:$0xff] %v10662_v56  ;;  %14940 = vst [vmem:[#allocation96_spill] sm:$0xff] %v10664_v28  ;;  %v10666_v44 = vpop.f32.mrb[46].mxu1  ;;  %v10668_v57 = vpop.f32.mrb[47].mxu0 }
 0x286   : > { %14941 = vst [vmem:[#allocation97_spill] sm:$0xff] %v10666_v44  ;;  %14942 = vst [vmem:[#allocation98_spill] sm:$0xff] %v10668_v57  ;;  %v1598_v62 = vmax.f32 %v10664_v28, %v10668_v57  ;;  %v10672_v48 = vpop.f32.mrb[47].mxu1  ;;  %v1594_v55 = vmax.f32 %v1593_v13, %v10656_v53 }
 0x287   : > { %14943 = vst [vmem:[#allocation99_spill] sm:$0xff] %v10672_v48 }
 0x288   : > { %v1595_v24 = vmax.f32 %v1594_v55, %v10662_v56  ;;  %v1599_v45 = vmax.f32 %v1598_v62, %v10666_v44  ;;  %v8385_v44 = vld [vmem:[%s9855_s12 + $0x8] sm:$0xff]  }
 0x28a   : > { %1596 = vmax.xlane.f32.xlu0 %v1595_v24  ;;  %v10679_v10 = vpop.f32.mrb[48].mxu0  ;;  %v1600_v16 = vmax.f32 %v1599_v45, %v10672_v48 }
 0x28b   : > { %14944 = vst [vmem:[#allocation100_spill] sm:$0xff] %v10679_v10  ;;  %v10682_v57 = vpop.f32.mrb[48].mxu1  ;;  %v10684_v28 = vpop.f32.mrb[49].mxu0 }
 0x28c   : > { %14945 = vst [vmem:[#allocation101_spill] sm:$0xff] %v10682_v57  ;;  %14946 = vst [vmem:[#allocation102_spill] sm:$0xff] %v10684_v28  ;;  %v1603_v13 = vmax.f32 %v10679_v10, %v10684_v28  ;;  %v10688_v53 = vpop.f32.mrb[49].mxu1  ;;  %1601 = vmax.xlane.f32.xlu1 %v1600_v16  ;;  %v10690_v55 = vpop.f32.mrb[50].mxu0  ;;  %v8384_v10 = vld [vmem:[%s9855_s12 + $0x48] sm:$0xff]  }
 0x28d   : > { %14947 = vst [vmem:[#allocation103_spill] sm:$0xff] %v10688_v53  ;;  %14948 = vst [vmem:[#allocation104_spill] sm:$0xff] %v10690_v55  ;;  %v10692_v41 = vpop.f32.mrb[50].mxu1  ;;  %v10694_v24 = vpop.f32.mrb[51].mxu0  ;;  %7619 = vmatprep.subr.bf16.mxu0 %v8384_v10 }
 0x28e   : > { %14949 = vst [vmem:[#allocation105_spill] sm:$0xff] %v10692_v41  ;;  %14950 = vst [vmem:[#allocation106_spill] sm:$0xff] %v10694_v24  ;;  %v1608_v62 = vmax.f32 %v10690_v55, %v10694_v24  ;;  %v10698_v45 = vpop.f32.mrb[51].mxu1  ;;  %v1604_v14 = vmax.f32 %v1603_v13, %v10682_v57  ;;  %7620 = vmatpush3.bf16.msra.mxu0 %v8385_v44  ;;  %v8386_v44 = vld [vmem:[%s9855_s12 + $0xc8] sm:$0xff]  }
 0x28f   : > { %14951 = vst [vmem:[#allocation107_spill] sm:$0xff] %v10698_v45  ;;  %v8387_v55 = vld [vmem:[%s9855_s12 + $0x88] sm:$0xff]   ;;  %7731 = vmatprep.subr.bf16.mxu1 %v8386_v44 }
 0x290   : > { %v1605_v48 = vmax.f32 %v1604_v14, %v10688_v53  ;;  %v1609_v28 = vmax.f32 %v1608_v62, %v10692_v41  ;;  %7732 = vmatpush3.bf16.msra.mxu1 %v8387_v55 }
 0x292   : > { %1606 = vmax.xlane.f32.xlu0 %v1605_v48  ;;  %v10705_v16 = vpop.f32.mrb[52].mxu0  ;;  %v1610_v56 = vmax.f32 %v1609_v28, %v10698_v45 }
 0x293   : > { %14952 = vst [vmem:[#allocation108_spill] sm:$0xff] %v10705_v16  ;;  %v10708_v59 = vpop.f32.mrb[52].mxu1  ;;  %v10710_v24 = vpop.f32.mrb[53].mxu0 }
 0x294   : > { %14953 = vst [vmem:[#allocation109_spill] sm:$0xff] %v10708_v59  ;;  %14954 = vst [vmem:[#allocation110_spill] sm:$0xff] %v10710_v24  ;;  %v1613_v13 = vmax.f32 %v10705_v16, %v10710_v24  ;;  %v10714_v14 = vpop.f32.mrb[53].mxu1  ;;  %1611 = vmax.xlane.f32.xlu1 %v1610_v56  ;;  %v10716_v62 = vpop.f32.mrb[54].mxu0 }
 0x295   : > { %14955 = vst [vmem:[#allocation111_spill] sm:$0xff] %v10714_v14  ;;  %14956 = vst [vmem:[#allocation112_spill] sm:$0xff] %v10716_v62  ;;  %v10718_v48 = vpop.f32.mrb[54].mxu1  ;;  %v10720_v41 = vpop.f32.mrb[55].mxu0 }
 0x296   : > { %14957 = vst [vmem:[#allocation113_spill] sm:$0xff] %v10718_v48  ;;  %14958 = vst [vmem:[#allocation114_spill] sm:$0xff] %v10720_v41  ;;  %v1618_v28 = vmax.f32 %v10716_v62, %v10720_v41  ;;  %v10724_v10 = vpop.f32.mrb[55].mxu1  ;;  %v1614_v45 = vmax.f32 %v1613_v13, %v10708_v59 }
 0x297   : > { %14959 = vst [vmem:[#allocation115_spill] sm:$0xff] %v10724_v10 }
 0x298   : > { %v1615_v24 = vmax.f32 %v1614_v45, %v10714_v14  ;;  %v1619_v16 = vmax.f32 %v1618_v28, %v10718_v48  ;;  %v8389_v48 = vld [vmem:[%s9855_s12 + $0x10] sm:$0xff]  }
 0x29a   : > { %1616 = vmax.xlane.f32.xlu0 %v1615_v24  ;;  %v10731_v56 = vpop.f32.mrb[56].mxu0  ;;  %v1620_v53 = vmax.f32 %v1619_v16, %v10724_v10 }
 0x29b   : > { %14960 = vst [vmem:[#allocation116_spill] sm:$0xff] %v10731_v56  ;;  %v10734_v41 = vpop.f32.mrb[56].mxu1  ;;  %v10736_v62 = vpop.f32.mrb[57].mxu0 }
 0x29c   : > { %14961 = vst [vmem:[#allocation117_spill] sm:$0xff] %v10734_v41  ;;  %14962 = vst [vmem:[#allocation118_spill] sm:$0xff] %v10736_v62  ;;  %v1623_v13 = vmax.f32 %v10731_v56, %v10736_v62  ;;  %v10740_v59 = vpop.f32.mrb[57].mxu1  ;;  %1621 = vmax.xlane.f32.xlu1 %v1620_v53  ;;  %v10742_v45 = vpop.f32.mrb[58].mxu0  ;;  %v8388_v56 = vld [vmem:[%s9855_s12 + $0x50] sm:$0xff]  }
 0x29d   : > { %14963 = vst [vmem:[#allocation119_spill] sm:$0xff] %v10740_v59  ;;  %14964 = vst [vmem:[#allocation120_spill] sm:$0xff] %v10742_v45  ;;  %v10744_v55 = vpop.f32.mrb[58].mxu1  ;;  %v10746_v24 = vpop.f32.mrb[59].mxu0  ;;  %7621 = vmatprep.subr.bf16.mxu0 %v8388_v56 }
 0x29e   : > { %14965 = vst [vmem:[#allocation121_spill] sm:$0xff] %v10744_v55  ;;  %14966 = vst [vmem:[#allocation122_spill] sm:$0xff] %v10746_v24  ;;  %v1628_v28 = vmax.f32 %v10742_v45, %v10746_v24  ;;  %v10750_v16 = vpop.f32.mrb[59].mxu1  ;;  %v1624_v44 = vmax.f32 %v1623_v13, %v10734_v41  ;;  %7622 = vmatpush3.bf16.msra.mxu0 %v8389_v48  ;;  %v10838_v41 = vld [vmem:[#allocation2 + $0x28] sm:$0xff] }
 0x29f   : > { %14967 = vst [vmem:[#allocation123_spill] sm:$0xff] %v10750_v16 }
 0x2a0   : > { %v1625_v10 = vmax.f32 %v1624_v44, %v10740_v59  ;;  %v1629_v62 = vmax.f32 %v1628_v28, %v10744_v55  ;;  %v8403_v59 = vld [vmem:[%s9855_s12 + $0xa8] sm:$0xff]  }
 0x2a2   : > { %1626 = vmax.xlane.f32.xlu0 %v1625_v10  ;;  %v10757_v53 = vpop.f32.mrb[60].mxu0  ;;  %v1630_v14 = vmax.f32 %v1629_v62, %v10750_v16 }
 0x2a3   : > { %14968 = vst [vmem:[#allocation124_spill] sm:$0xff] %v10757_v53  ;;  %v10760_v57 = vpop.f32.mrb[60].mxu1  ;;  %v10762_v24 = vpop.f32.mrb[61].mxu0 }
 0x2a4   : > { %14969 = vst [vmem:[#allocation125_spill] sm:$0xff] %v10760_v57  ;;  %14970 = vst [vmem:[#allocation126_spill] sm:$0xff] %v10762_v24  ;;  %v1633_v13 = vmax.f32 %v10757_v53, %v10762_v24  ;;  %v10766_v44 = vpop.f32.mrb[61].mxu1  ;;  %1631 = vmax.xlane.f32.xlu1 %v1630_v14  ;;  %v10768_v10 = vpop.f32.mrb[62].mxu0  ;;  %v8390_v24 = vld [vmem:[%s9855_s12 + $0xd0] sm:$0xff]  }
 0x2a5   : > { %14971 = vst [vmem:[#allocation127_spill] sm:$0xff] %v10766_v44  ;;  %14972 = vst [vmem:[#allocation128_spill] sm:$0xff] %v10768_v10  ;;  %v10770_v28 = vpop.f32.mrb[62].mxu1  ;;  %v10772_v55 = vpop.f32.mrb[63].mxu0  ;;  %v8391_v53 = vld [vmem:[%s9855_s12 + $0x90] sm:$0xff]   ;;  %7733 = vmatprep.subr.bf16.mxu1 %v8390_v24 }
 0x2a6   : > { %14973 = vst [vmem:[#allocation129_spill] sm:$0xff] %v10770_v28  ;;  %14974 = vst [vmem:[#allocation130_spill] sm:$0xff] %v10772_v55  ;;  %v1638_v62 = vmax.f32 %v10768_v10, %v10772_v55  ;;  %v10776_v56 = vpop.f32.mrb[63].mxu1  ;;  %v1634_v48 = vmax.f32 %v1633_v13, %v10760_v57  ;;  %7734 = vmatpush3.bf16.msra.mxu1 %v8391_v53  ;;  %v8392_v55 = vld [vmem:[%s9855_s12 + $0x58] sm:$0xff]  }
 0x2a7   : > { %14975 = vst [vmem:[#allocation131_spill] sm:$0xff] %v10776_v56  ;;  %v8393_v10 = vld [vmem:[%s9855_s12 + $0x18] sm:$0xff]   ;;  %7623 = vmatprep.subr.bf16.mxu0 %v8392_v55  ;;  %v10827_v55 = vld [vmem:[#allocation2 + $0x20] sm:$0xff] }
 0x2a8   : > { %v1635_v14 = vmax.f32 %v1634_v48, %v10766_v44  ;;  %v1639_v16 = vmax.f32 %v1638_v62, %v10770_v28  ;;  %7624 = vmatpush3.bf16.msra.mxu0 %v8393_v10  ;;  %v8394_v13 = vld [vmem:[%s9855_s12 + $0xd8] sm:$0xff]   ;;  %v10788_v48 = vld [vmem:[#allocation2] sm:$0xff]  ;;  %v8400_v28 = vld [vmem:[%s9855_s12 + $0x68] sm:$0xff]  }
 0x2a9   : > { %v8395_v57 = vld [vmem:[%s9855_s12 + $0x98] sm:$0xff]   ;;  %7735 = vmatprep.subr.bf16.mxu1 %v8394_v13  ;;  %v8396_v62 = vld [vmem:[%s9855_s12 + $0x60] sm:$0xff]   ;;  %v10807_v13 = vld [vmem:[#allocation2 + $0x10] sm:$0xff] }
 0x2aa   : > { %1636 = vmax.xlane.f32.xlu0 %v1635_v14  ;;  %v1640_v45 = vmax.f32 %v1639_v16, %v10776_v56  ;;  %7736 = vmatpush3.bf16.msra.mxu1 %v8395_v57  ;;  %v8397_v16 = vld [vmem:[%s9855_s12 + $0x20] sm:$0xff]  }
 0x2ab   : > { %v8398_v14 = vld [vmem:[%s9855_s12 + $0xe0] sm:$0xff]   ;;  %7625 = vmatprep.subr.bf16.mxu0 %v8396_v62 }
 0x2ac   : > { %1641 = vmax.xlane.f32.xlu1 %v1640_v45  ;;  %v10796_v45 = vld [vmem:[#allocation2 + $0x8] sm:$0xff]  ;;  %v8399_v56 = vld [vmem:[%s9855_s12 + $0xa0] sm:$0xff]   ;;  %7626 = vmatpush3.bf16.msra.mxu0 %v8397_v16 }
 0x2ad   : > { %7737 = vmatprep.subr.bf16.mxu1 %v8398_v14  ;;  %v10817_v14 = vld [vmem:[#allocation2 + $0x18] sm:$0xff]  ;;  %7627 = vmatprep.subr.bf16.mxu0 %v8400_v28 }
 0x2ae   : > { %7738 = vmatpush3.bf16.msra.mxu1 %v8399_v56  ;;  %v8402_v56 = vld [vmem:[%s9855_s12 + $0x28] sm:$0xff]  }
 0x2b0   : > { %7628 = vmatpush3.bf16.msra.mxu0 %v8402_v56  ;;  %v8406_v56 = vld [vmem:[%s9855_s12 + $0x30] sm:$0xff]  }
 0x2b1   : > { %7629 = vmatprep.subr.bf16.mxu0 %v8404_v38 }
 0x2b4   : > { %7630 = vmatpush3.bf16.msra.mxu0 %v8406_v56  ;;  %v10906_v56 = vld [vmem:[#allocation2 + $0x58] sm:$0xff] }
 0x2b5   : > { %7631 = vmatprep.subr.bf16.mxu0 %v8408_v33  ;;  %v10886_v33 = vld [vmem:[#allocation2 + $0x48] sm:$0xff] }
 0x2bf   : > { %v1487_v24 = vpop.xlane.xlu0 %1486 }
 0x2c0   : > { %v10791_v53 = vmax.f32 %v10788_v48, %v1487_v24 }
 0x2c2   : > { %3470 = vst.msk [vmem:[#allocation2] sm:$0xff] %vm2571_vm3, %v10791_v53  ;;  %1773 = vperm.xlu0 %8330, %v10791_v53  }
 0x2c3   : > { %v1492_v57 = vpop.xlane.xlu0 %1491 }
 0x2c4   : > { %v10805_v10 = vmax.f32 %v10796_v45, %v1492_v57 }
 0x2c6   : > { %3471 = vst.msk [vmem:[#allocation2 + $0x8] sm:$0xff] %vm2571_vm3, %v10805_v10  ;;  %1778 = vperm.xlu1 %8331, %v10805_v10   ;;  %v15009_v46 = vsub.f32 %v10796_v45, %v10805_v10 }
 0x2c7   : > { %v1497_v62 = vpop.xlane.xlu1 %1496 }
 0x2c8   : > { %v10815_v16 = vmax.f32 %v10807_v13, %v1497_v62  ;;  %v8401_v62 = vld [vmem:[%s9855_s12 + $0xe8] sm:$0xff]  }
 0x2c9   : > { %7739 = vmatprep.subr.bf16.mxu1 %v8401_v62 }
 0x2ca   : > { %3472 = vst.msk [vmem:[#allocation2 + $0x10] sm:$0xff] %vm2571_vm3, %v10815_v16  ;;  %1783 = vperm.xlu1 %8331, %v10815_v16   ;;  %7740 = vmatpush3.bf16.msra.mxu1 %v8403_v59  ;;  %v8407_v59 = vld [vmem:[%s9855_s12 + $0xb0] sm:$0xff]  }
 0x2cb   : > { %v1502_v57 = vpop.xlane.xlu1 %1501  ;;  %7741 = vmatprep.subr.bf16.mxu1 %v8405_v40 }
 0x2cc   : > { %v10825_v24 = vmax.f32 %v10817_v14, %v1502_v57 }
 0x2ce   : > { %3473 = vst.msk [vmem:[#allocation2 + $0x18] sm:$0xff] %vm2571_vm3, %v10825_v24  ;;  %1788 = vperm.xlu1 %8331, %v10825_v24   ;;  %7742 = vmatpush3.bf16.msra.mxu1 %v8407_v59 }
 0x2cf   : > { %v1507_v57 = vpop.xlane.xlu0 %1506  ;;  %7743 = vmatprep.subr.bf16.mxu1 %v8409_v30 }
 0x2d0   : > { %v10841_v42 = vmax.f32 %v10827_v55, %v1507_v57  ;;  %v10859_v57 = vld [vmem:[#allocation2 + $0x30] sm:$0xff] }
 0x2d1   : > { %v1512_v44 = vpop.xlane.xlu1 %1511 }
 0x2d2   : > { %3474 = vst.msk [vmem:[#allocation2 + $0x20] sm:$0xff] %vm2571_vm3, %v10841_v42  ;;  %v10850_v28 = vmax.f32 %v10838_v41, %v1512_v44  ;;  %1793 = vperm.xlu1 %8331, %v10841_v42   ;;  %v8410_v44 = vld [vmem:[%s9855_s12 + $0x38] sm:$0xff]   ;;  %7744 = vmatpush3.bf16.msra.mxu1 %v8411_v26  ;;  %v15013_v45 = vsub.f32 %v10827_v55, %v10841_v42 }
 0x2d3   : > { %7632 = vmatpush3.bf16.msra.mxu0 %v8410_v44 }
 0x2d4   : > { %3475 = vst.msk [vmem:[#allocation2 + $0x28] sm:$0xff] %vm2571_vm3, %v10850_v28  ;;  %v1715_v10 = vmul.f32 1.442695, %v15013_v45  ;;  %v9071_v45 = vld [vmem:[%s9849_s13 + $0xe0] sm:$0xff]  }
 0x2d6   : > { %1798 = vperm.xlu1 %8331, %v10850_v28  }
 0x2d7   : > { %v1517_v27 = vpop.xlane.xlu0 %1516 }
 0x2d8   : > { %v10869_v38 = vmax.f32 %v10859_v57, %v1517_v27  ;;  %v10883_v27 = vld [vmem:[#allocation2 + $0x40] sm:$0xff] }
 0x2d9   : > { %v1522_v40 = vpop.xlane.xlu1 %1521 }
 0x2da   : > { %3476 = vst.msk [vmem:[#allocation2 + $0x30] sm:$0xff] %vm2571_vm3, %v10869_v38  ;;  %v10876_v59 = vmax.f32 %v10866_v19, %v1522_v40  ;;  %1803 = vperm.xlu1 %8331, %v10869_v38  }
 0x2dc   : > { %3477 = vst.msk [vmem:[#allocation2 + $0x38] sm:$0xff] %vm2571_vm3, %v10876_v59 }
 0x2de   : > { %1808 = vperm.xlu1 %8331, %v10876_v59  }
 0x2df   : > { %v1527_v26 = vpop.xlane.xlu0 %1526 }
 0x2e0   : > { %v10889_v44 = vmax.f32 %v10883_v27, %v1527_v26  ;;  %v10904_v26 = vld [vmem:[#allocation2 + $0x50] sm:$0xff] }
 0x2e1   : > { %v1532_v40 = vpop.xlane.xlu1 %1531 }
 0x2e2   : > { %3478 = vst.msk [vmem:[#allocation2 + $0x40] sm:$0xff] %vm2571_vm3, %v10889_v44  ;;  %v10896_v30 = vmax.f32 %v10886_v33, %v1532_v40  ;;  %1813 = vperm.xlu1 %8331, %v10889_v44  }
 0x2e4   : > { %3479 = vst.msk [vmem:[#allocation2 + $0x48] sm:$0xff] %vm2571_vm3, %v10896_v30  ;;  %1818 = vperm.xlu0 %8330, %v10896_v30  }
 0x2e7   : > { %v1537_v12 = vpop.xlane.xlu0 %1536 }
 0x2e8   : > { %v10909_v1 = vmax.f32 %v10904_v26, %v1537_v12  ;;  %v10924_v12 = vld [vmem:[#allocation2 + $0x60] sm:$0xff] }
 0x2e9   : > { %v1542_v40 = vpop.xlane.xlu1 %1541 }
 0x2ea   : > { %3480 = vst.msk [vmem:[#allocation2 + $0x50] sm:$0xff] %vm2571_vm3, %v10909_v1  ;;  %v10916_v62 = vmax.f32 %v10906_v56, %v1542_v40  ;;  %1823 = vperm.xlu1 %8331, %v10909_v1  }
 0x2ec   : > { %3481 = vst.msk [vmem:[#allocation2 + $0x58] sm:$0xff] %vm2571_vm3, %v10916_v62  ;;  %1828 = vperm.xlu0 %8330, %v10916_v62  }
 0x2ef   : > { %v1547_v5 = vpop.xlane.xlu0 %1546 }
 0x2f0   : > { %v10929_v60 = vmax.f32 %v10924_v12, %v1547_v5  ;;  %v10944_v5 = vld [vmem:[#allocation2 + $0x70] sm:$0xff] }
 0x2f1   : > { %v1552_v40 = vpop.xlane.xlu1 %1551  ;;  %14976 = vst [vmem:[#allocation132_spill] sm:$0xff] %v10944_v5 }
 0x2f2   : > { %3482 = vst.msk [vmem:[#allocation2 + $0x60] sm:$0xff] %vm2571_vm3, %v10929_v60  ;;  %v10936_v0 = vmax.f32 %v10926_v63, %v1552_v40  ;;  %1833 = vperm.xlu1 %8331, %v10929_v60   ;;  %v10948_v40 = vld [vmem:[#allocation2 + $0x78] sm:$0xff] }
 0x2f3   : > { %14977 = vst [vmem:[#allocation133_spill] sm:$0xff] %v10948_v40 }
 0x2f4   : > { %3483 = vst.msk [vmem:[#allocation2 + $0x68] sm:$0xff] %vm2571_vm3, %v10936_v0  ;;  %1838 = vperm.xlu0 %8330, %v10936_v0  }
 0x2f6   : > { %3534 = vrot.lane.b32.xlu1 %v9052_v54, %s9504_s5 }
 0x2f7   : > { %v1557_v61 = vpop.xlane.xlu0 %1556 }
 0x2f8   : > { %v10951_v51 = vmax.f32 %v10944_v5, %v1557_v61  ;;  %3550 = vrot.lane.b32.xlu0 %v9053_v52, %s9504_s5  ;;  %v10968_v52 = vld [vmem:[#allocation2 + $0x80] sm:$0xff]  ;;  %v10972_v5 = vld [vmem:[#allocation2 + $0x88] sm:$0xff] }
 0x2f9   : > { %v1562_v58 = vpop.xlane.xlu1 %1561  ;;  %14980 = vst [vmem:[#allocation136_spill] sm:$0xff] %v10968_v52  ;;  %v9054_v61 = vld [vmem:[%s9849_s13 + $0x80] sm:$0xff]   ;;  %14981 = vst [vmem:[#allocation137_spill] sm:$0xff] %v10972_v5 }
 0x2fa   : > { %14978 = vst [vmem:[#allocation134_spill] sm:$0xff] %v10951_v51  ;;  %3484 = vst.msk [vmem:[#allocation2 + $0x70] sm:$0xff] %vm2571_vm3, %v10951_v51  ;;  %v10960_v49 = vmax.f32 %v10948_v40, %v1562_v58  ;;  %1843 = vperm.xlu1 %8331, %v10951_v51   ;;  %v9055_v51 = vld [vmem:[%s9849_s13 + $0xc0] sm:$0xff]  }
 0x2fc   : > { %14979 = vst [vmem:[#allocation135_spill] sm:$0xff] %v10960_v49  ;;  %3485 = vst.msk [vmem:[#allocation2 + $0x78] sm:$0xff] %vm2571_vm3, %v10960_v49  ;;  %1848 = vperm.xlu0 %8330, %v10960_v49  }
 0x2fe   : > { %3566 = vrot.lane.b32.xlu1 %v9054_v61, %s9504_s5  ;;  %v9056_v61 = vld [vmem:[%s9849_s13 + $0x8] sm:$0xff]  }
 0x2ff   : > { %v1567_v50 = vpop.xlane.xlu0 %1566 }
 0x300   : > { %v10975_v58 = vmax.f32 %v10968_v52, %v1567_v50  ;;  %3582 = vrot.lane.b32.xlu0 %v9055_v51, %s9504_s5  ;;  %v10992_v51 = vld [vmem:[#allocation2 + $0x90] sm:$0xff]  ;;  %v10996_v52 = vld [vmem:[#allocation2 + $0x98] sm:$0xff] }
 0x301   : > { %v1572_v54 = vpop.xlane.xlu1 %1571  ;;  %14984 = vst [vmem:[#allocation140_spill] sm:$0xff] %v10992_v51  ;;  %14985 = vst [vmem:[#allocation141_spill] sm:$0xff] %v10996_v52 }
 0x302   : > { %14982 = vst [vmem:[#allocation138_spill] sm:$0xff] %v10975_v58  ;;  %3486 = vst.msk [vmem:[#allocation2 + $0x80] sm:$0xff] %vm2571_vm3, %v10975_v58  ;;  %v10984_v40 = vmax.f32 %v10972_v5, %v1572_v54  ;;  %1853 = vperm.xlu1 %8331, %v10975_v58   ;;  %v9057_v58 = vld [vmem:[%s9849_s13 + $0x48] sm:$0xff]  }
 0x304   : > { %14983 = vst [vmem:[#allocation139_spill] sm:$0xff] %v10984_v40  ;;  %3487 = vst.msk [vmem:[#allocation2 + $0x88] sm:$0xff] %vm2571_vm3, %v10984_v40  ;;  %1858 = vperm.xlu0 %8330, %v10984_v40  }
 0x306   : > { %3536 = vrot.lane.b32.xlu1 %v9056_v61, %s9504_s5  ;;  %v9058_v61 = vld [vmem:[%s9849_s13 + $0x88] sm:$0xff]  }
 0x307   : > { %v1577_v49 = vpop.xlane.xlu0 %1576 }
 0x308   : > { %v10999_v54 = vmax.f32 %v10992_v51, %v1577_v49  ;;  %3552 = vrot.lane.b32.xlu0 %v9057_v58, %s9504_s5  ;;  %v11016_v58 = vld [vmem:[#allocation2 + $0xa0] sm:$0xff]  ;;  %v11020_v51 = vld [vmem:[#allocation2 + $0xa8] sm:$0xff] }
 0x309   : > { %v1582_v50 = vpop.xlane.xlu1 %1581  ;;  %14988 = vst [vmem:[#allocation144_spill] sm:$0xff] %v11016_v58  ;;  %14989 = vst [vmem:[#allocation145_spill] sm:$0xff] %v11020_v51 }
 0x30a   : > { %14986 = vst [vmem:[#allocation142_spill] sm:$0xff] %v10999_v54  ;;  %3488 = vst.msk [vmem:[#allocation2 + $0x90] sm:$0xff] %vm2571_vm3, %v10999_v54  ;;  %v11008_v5 = vmax.f32 %v10996_v52, %v1582_v50  ;;  %1863 = vperm.xlu1 %8331, %v10999_v54   ;;  %v9059_v54 = vld [vmem:[%s9849_s13 + $0xc8] sm:$0xff]  }
 0x30c   : > { %14987 = vst [vmem:[#allocation143_spill] sm:$0xff] %v11008_v5  ;;  %3489 = vst.msk [vmem:[#allocation2 + $0x98] sm:$0xff] %vm2571_vm3, %v11008_v5  ;;  %1868 = vperm.xlu0 %8330, %v11008_v5  }
 0x30e   : > { %3568 = vrot.lane.b32.xlu1 %v9058_v61, %s9504_s5  ;;  %v9060_v61 = vld [vmem:[%s9849_s13 + $0x10] sm:$0xff]  }
 0x30f   : > { %v1587_v40 = vpop.xlane.xlu0 %1586 }
 0x310   : > { %v11023_v50 = vmax.f32 %v11016_v58, %v1587_v40  ;;  %3584 = vrot.lane.b32.xlu0 %v9059_v54, %s9504_s5  ;;  %v11040_v54 = vld [vmem:[#allocation2 + $0xb0] sm:$0xff]  ;;  %v11044_v58 = vld [vmem:[#allocation2 + $0xb8] sm:$0xff] }
 0x311   : > { %v1592_v49 = vpop.xlane.xlu1 %1591  ;;  %14992 = vst [vmem:[#allocation148_spill] sm:$0xff] %v11040_v54  ;;  %14993 = vst [vmem:[#allocation149_spill] sm:$0xff] %v11044_v58 }
 0x312   : > { %14990 = vst [vmem:[#allocation146_spill] sm:$0xff] %v11023_v50  ;;  %3490 = vst.msk [vmem:[#allocation2 + $0xa0] sm:$0xff] %vm2571_vm3, %v11023_v50  ;;  %v11032_v52 = vmax.f32 %v11020_v51, %v1592_v49  ;;  %1873 = vperm.xlu1 %8331, %v11023_v50   ;;  %v9061_v50 = vld [vmem:[%s9849_s13 + $0x50] sm:$0xff]  }
 0x314   : > { %14991 = vst [vmem:[#allocation147_spill] sm:$0xff] %v11032_v52  ;;  %3491 = vst.msk [vmem:[#allocation2 + $0xa8] sm:$0xff] %vm2571_vm3, %v11032_v52  ;;  %1878 = vperm.xlu0 %8330, %v11032_v52  }
 0x316   : > { %3538 = vrot.lane.b32.xlu1 %v9060_v61, %s9504_s5  ;;  %v9062_v61 = vld [vmem:[%s9849_s13 + $0x90] sm:$0xff]  }
 0x317   : > { %v1597_v5 = vpop.xlane.xlu0 %1596 }
 0x318   : > { %v11047_v49 = vmax.f32 %v11040_v54, %v1597_v5  ;;  %3554 = vrot.lane.b32.xlu0 %v9061_v50, %s9504_s5  ;;  %v11064_v50 = vld [vmem:[#allocation2 + $0xc0] sm:$0xff]  ;;  %v11068_v54 = vld [vmem:[#allocation2 + $0xc8] sm:$0xff] }
 0x319   : > { %v1602_v40 = vpop.xlane.xlu1 %1601  ;;  %14996 = vst [vmem:[#allocation152_spill] sm:$0xff] %v11064_v50  ;;  %14997 = vst [vmem:[#allocation153_spill] sm:$0xff] %v11068_v54 }
 0x31a   : > { %14994 = vst [vmem:[#allocation150_spill] sm:$0xff] %v11047_v49  ;;  %3492 = vst.msk [vmem:[#allocation2 + $0xb0] sm:$0xff] %vm2571_vm3, %v11047_v49  ;;  %v11056_v51 = vmax.f32 %v11044_v58, %v1602_v40  ;;  %1883 = vperm.xlu1 %8331, %v11047_v49   ;;  %v9063_v49 = vld [vmem:[%s9849_s13 + $0xd0] sm:$0xff]  }
 0x31c   : > { %14995 = vst [vmem:[#allocation151_spill] sm:$0xff] %v11056_v51  ;;  %3493 = vst.msk [vmem:[#allocation2 + $0xb8] sm:$0xff] %vm2571_vm3, %v11056_v51  ;;  %1888 = vperm.xlu0 %8330, %v11056_v51  }
 0x31e   : > { %3570 = vrot.lane.b32.xlu1 %v9062_v61, %s9504_s5  ;;  %v9064_v61 = vld [vmem:[%s9849_s13 + $0x18] sm:$0xff]  }
 0x31f   : > { %v1607_v52 = vpop.xlane.xlu0 %1606 }
 0x320   : > { %v11071_v40 = vmax.f32 %v11064_v50, %v1607_v52  ;;  %3586 = vrot.lane.b32.xlu0 %v9063_v49, %s9504_s5  ;;  %v11088_v49 = vld [vmem:[#allocation2 + $0xd0] sm:$0xff]  ;;  %v11092_v50 = vld [vmem:[#allocation2 + $0xd8] sm:$0xff] }
 0x321   : > { %v1612_v5 = vpop.xlane.xlu1 %1611  ;;  %15000 = vst [vmem:[#allocation156_spill] sm:$0xff] %v11088_v49  ;;  %15001 = vst [vmem:[#allocation157_spill] sm:$0xff] %v11092_v50 }
 0x322   : > { %14998 = vst [vmem:[#allocation154_spill] sm:$0xff] %v11071_v40  ;;  %3494 = vst.msk [vmem:[#allocation2 + $0xc0] sm:$0xff] %vm2571_vm3, %v11071_v40  ;;  %v11080_v58 = vmax.f32 %v11068_v54, %v1612_v5  ;;  %1893 = vperm.xlu1 %8331, %v11071_v40   ;;  %v9065_v40 = vld [vmem:[%s9849_s13 + $0x58] sm:$0xff]  }
 0x324   : > { %14999 = vst [vmem:[#allocation155_spill] sm:$0xff] %v11080_v58  ;;  %3495 = vst.msk [vmem:[#allocation2 + $0xc8] sm:$0xff] %vm2571_vm3, %v11080_v58  ;;  %1898 = vperm.xlu0 %8330, %v11080_v58  }
 0x326   : > { %3540 = vrot.lane.b32.xlu1 %v9064_v61, %s9504_s5  ;;  %v9066_v61 = vld [vmem:[%s9849_s13 + $0x98] sm:$0xff]  }
 0x327   : > { %v1617_v51 = vpop.xlane.xlu0 %1616 }
 0x328   : > { %v11095_v5 = vmax.f32 %v11088_v49, %v1617_v51  ;;  %3556 = vrot.lane.b32.xlu0 %v9065_v40, %s9504_s5  ;;  %v11112_v40 = vld [vmem:[#allocation2 + $0xe0] sm:$0xff]  ;;  %v11116_v49 = vld [vmem:[#allocation2 + $0xe8] sm:$0xff] }
 0x329   : > { %v1622_v52 = vpop.xlane.xlu1 %1621  ;;  %15004 = vst [vmem:[#allocation160_spill] sm:$0xff] %v11112_v40  ;;  %15005 = vst [vmem:[#allocation161_spill] sm:$0xff] %v11116_v49 }
 0x32a   : > { %15002 = vst [vmem:[#allocation158_spill] sm:$0xff] %v11095_v5  ;;  %3496 = vst.msk [vmem:[#allocation2 + $0xd0] sm:$0xff] %vm2571_vm3, %v11095_v5  ;;  %v11104_v54 = vmax.f32 %v11092_v50, %v1622_v52  ;;  %1903 = vperm.xlu1 %8331, %v11095_v5   ;;  %v9067_v5 = vld [vmem:[%s9849_s13 + $0xd8] sm:$0xff]  }
 0x32b   : > { %v11155_v50 = vld [vmem:[#allocation2 + $0xf8] sm:$0xff] }
 0x32c   : > { %15003 = vst [vmem:[#allocation159_spill] sm:$0xff] %v11104_v54  ;;  %3497 = vst.msk [vmem:[#allocation2 + $0xd8] sm:$0xff] %vm2571_vm3, %v11104_v54  ;;  %1908 = vperm.xlu0 %8330, %v11104_v54  }
 0x32d   : > { %15014 = vst [vmem:[#allocation165_spill] sm:$0xff] %v11155_v50 }
 0x32e   : > { %3572 = vrot.lane.b32.xlu1 %v9066_v61, %s9504_s5 }
 0x32f   : > { %v1627_v58 = vpop.xlane.xlu0 %1626 }
 0x330   : > { %v11119_v52 = vmax.f32 %v11112_v40, %v1627_v58  ;;  %3588 = vrot.lane.b32.xlu0 %v9067_v5, %s9504_s5  ;;  %v15008_v58 = vsub.f32 %v10788_v48, %v10791_v53  ;;  %v1709_v5 = vmul.f32 1.442695, %v15009_v46  ;;  %v11145_v40 = vld [vmem:[#allocation2 + $0xf0] sm:$0xff]  ;;  %v15012_v48 = vsub.f32 %v10817_v14, %v10825_v24  ;;  %v9068_v46 = vld [vmem:[%s9849_s13 + $0x20] sm:$0xff]  }
 0x331   : > { %v1632_v51 = vpop.xlane.xlu1 %1631  ;;  %15011 = vst [vmem:[#allocation164_spill] sm:$0xff] %v11145_v40  ;;  %v9069_v24 = vld [vmem:[%s9849_s13 + $0x60] sm:$0xff]   ;;  %v15017_v14 = vsub.f32 %v10859_v57, %v10869_v38  ;;  %v15020_v57 = vsub.f32 %v10883_v27, %v10889_v44 }
 0x332   : > { %15006 = vst [vmem:[#allocation162_spill] sm:$0xff] %v11119_v52  ;;  %3498 = vst.msk [vmem:[#allocation2 + $0xe0] sm:$0xff] %vm2571_vm3, %v11119_v52  ;;  %v11128_v54 = vmax.f32 %v11116_v49, %v1632_v51  ;;  %1913 = vperm.xlu1 %8331, %v11119_v52   ;;  %v1707_v61 = vmul.f32 1.442695, %v15008_v58  ;;  %v15010_v51 = vsub.f32 %v10807_v13, %v10815_v16  ;;  %v1713_v53 = vmul.f32 1.442695, %v15012_v48 }
 0x333   : > { %v15015_v13 = vsub.f32 %v10838_v41, %v10850_v28  ;;  %v1719_v42 = vmul.f32 1.442695, %v15017_v14  ;;  %v1723_v38 = vmul.f32 1.442695, %v15020_v57  ;;  %v15022_v48 = vsub.f32 %v10904_v26, %v10909_v1  ;;  %v9070_v44 = vld [vmem:[%s9849_s13 + $0xa0] sm:$0xff]   ;;  %v15080_v41 = vld [vmem:[#allocation63_spill] sm:$0xff] }
 0x334   : > { %15007 = vst [vmem:[#allocation163_spill] sm:$0xff] %v11128_v54  ;;  %3499 = vst.msk [vmem:[#allocation2 + $0xe8] sm:$0xff] %vm2571_vm3, %v11128_v54  ;;  %1918 = vperm.xlu0 %8330, %v11128_v54   ;;  %v1711_v52 = vmul.f32 1.442695, %v15010_v51  ;;  %8412 = vpow2.f32 %v1707_v61  ;;  %v15018_v61 = vsub.f32 %v10866_v19, %v10876_v59  ;;  %v15021_v19 = vsub.f32 %v10886_v33, %v10896_v30  ;;  %v9098_v54 = vld [vmem:[%s9841_s7 + $0x68] sm:$0xff]  }
 0x335   : > { %8414 = vpow2.f32 %v1709_v5  ;;  %v1717_v16 = vmul.f32 1.442695, %v15015_v13  ;;  %v1727_v27 = vmul.f32 1.442695, %v15022_v48  ;;  %v15023_v30 = vsub.f32 %v10906_v56, %v10916_v62 }
 0x336   : > { %3542 = vrot.lane.b32.xlu1 %v9068_v46, %s9504_s5  ;;  %8416 = vpow2.f32 %v1711_v52  ;;  %v1721_v5 = vmul.f32 1.442695, %v15018_v61  ;;  %v1725_v59 = vmul.f32 1.442695, %v15021_v19  ;;  %v15026_v26 = vsub.f32 %v10926_v63, %v10936_v0 }
 0x337   : > { %v1637_v58 = vpop.xlane.xlu0 %1636  ;;  %8418 = vpow2.f32 %v1713_v53  ;;  %v1729_v33 = vmul.f32 1.442695, %v15023_v30  ;;  %v15024_v53 = vsub.f32 %v10924_v12, %v10929_v60 }
 0x338   : > { %v11161_v51 = vmax.f32 %v11145_v40, %v1637_v58  ;;  %3558 = vrot.lane.b32.xlu0 %v9069_v24, %s9504_s5  ;;  %8420 = vpow2.f32 %v1715_v10  ;;  %v1733_v10 = vmul.f32 1.442695, %v15026_v26  ;;  %v9076_v26 = vld [vmem:[%s9849_s13 + $0x30] sm:$0xff]  }
 0x339   : > { %v1642_v55 = vpop.xlane.xlu1 %1641  ;;  %8422 = vpow2.f32 %v1717_v16  ;;  %v1731_v46 = vmul.f32 1.442695, %v15024_v53  ;;  %v9072_v16 = vld [vmem:[%s9849_s13 + $0x28] sm:$0xff]  }
 0x33a   : > { %15016 = vst [vmem:[#allocation166_spill] sm:$0xff] %v11161_v51  ;;  %3500 = vst.msk [vmem:[#allocation2 + $0xf0] sm:$0xff] %vm2571_vm3, %v11161_v51  ;;  %v11176_v28 = vmax.f32 %v11155_v50, %v1642_v55  ;;  %1923 = vperm.xlu1 %8331, %v11161_v51   ;;  %8424 = vpow2.f32 %v1719_v42  ;;  %v15092_v51 = vld [vmem:[#allocation71_spill] sm:$0xff] }
 0x33b   : > { %8426 = vpow2.f32 %v1721_v5 }
 0x33c   : > { %15019 = vst [vmem:[#allocation167_spill] sm:$0xff] %v11176_v28  ;;  %3501 = vst.msk [vmem:[#allocation2 + $0xf8] sm:$0xff] %vm2571_vm3, %v11176_v28  ;;  %1928 = vperm.xlu0 %8330, %v11176_v28   ;;  %8428 = vpow2.f32 %v1723_v38  ;;  %v9074_v38 = vld [vmem:[%s9849_s13 + $0xa8] sm:$0xff]   ;;  %v15084_v28 = vld [vmem:[#allocation66_spill] sm:$0xff] }
 0x33d   : > { %8430 = vpow2.f32 %v1725_v59 }
 0x33e   : > { %3574 = vrot.lane.b32.xlu1 %v9070_v44, %s9504_s5  ;;  %v11203_v1 = vpop.eup %8412  ;;  %8432 = vpow2.f32 %v1727_v27 }
 0x33f   : > { %15025 = vst [vmem:[#allocation168_spill] sm:$0xff] %v11203_v1  ;;  %v11208_v13 = vpop.eup %8414  ;;  %8434 = vpow2.f32 %v1729_v33 }
 0x340   : > { %3590 = vrot.lane.b32.xlu0 %v9071_v45, %s9504_s5  ;;  %15027 = vst [vmem:[#allocation169_spill] sm:$0xff] %v11208_v13  ;;  %v11216_v24 = vpop.eup %8416  ;;  %8436 = vpow2.f32 %v1731_v46 }
 0x341   : > { %v1774_v58 = vpop.permute.xlu0 %1773  ;;  %15028 = vst [vmem:[#allocation170_spill] sm:$0xff] %v11216_v24  ;;  %v11218_v63 = vpop.eup %8418  ;;  %8438 = vpow2.f32 %v1733_v10 }
 0x342   : > { %v1931_v62 = vsub.f32 %v10388_v2, %v1774_v58  ;;  %v1932_v56 = vsub.f32 %v10392_v4, %v1774_v58  ;;  %v1933_v60 = vsub.f32 %v10390_v3, %v1774_v58  ;;  %v1934_v12 = vsub.f32 %v10396_v6, %v1774_v58  ;;  %3544 = vrot.lane.b32.xlu1 %v9072_v16, %s9504_s5  ;;  %v9073_v2 = vld [vmem:[%s9849_s13 + $0x68] sm:$0xff]   ;;  %v11222_v4 = vpop.eup %8420 }
 0x343   : > { %15029 = vst [vmem:[#allocation171_spill] sm:$0xff] %v11218_v63  ;;  %15030 = vst [vmem:[#allocation172_spill] sm:$0xff] %v11222_v4  ;;  %v11224_v55 = vpop.eup %8422 }
 0x344   : > { %v2059_v0 = vmul.f32 1.442695, %v1931_v62  ;;  %v2061_v14 = vmul.f32 1.442695, %v1932_v56  ;;  %v2063_v42 = vmul.f32 1.442695, %v1933_v60  ;;  %3560 = vrot.lane.b32.xlu0 %v9073_v2, %s9504_s5  ;;  %v11231_v19 = vpop.eup %8424 }
 0x345   : > { %v2065_v3 = vmul.f32 1.442695, %v1934_v12  ;;  %v1779_v6 = vpop.permute.xlu1 %1778  ;;  %15031 = vst [vmem:[#allocation173_spill] sm:$0xff] %v11224_v55  ;;  %15032 = vst [vmem:[#allocation174_spill] sm:$0xff] %v11231_v19  ;;  %v11234_v48 = vpop.eup %8426  ;;  %v9077_v12 = vld [vmem:[%s9849_s13 + $0x70] sm:$0xff]  }
 0x346   : > { %8440 = vpow2.f32 %v2059_v0  ;;  %v1935_v61 = vsub.f32 %v10398_v7, %v1779_v6  ;;  %v1936_v5 = vsub.f32 %v10402_v9, %v1779_v6  ;;  %v1937_v57 = vsub.f32 %v10400_v8, %v1779_v6  ;;  %3576 = vrot.lane.b32.xlu1 %v9074_v38, %s9504_s5  ;;  %15033 = vst [vmem:[#allocation175_spill] sm:$0xff] %v11234_v48  ;;  %v9075_v7 = vld [vmem:[%s9849_s13 + $0xe8] sm:$0xff]   ;;  %v11238_v9 = vpop.eup %8428 }
 0x347   : > { %8442 = vpow2.f32 %v2061_v14  ;;  %v1938_v59 = vsub.f32 %v10406_v11, %v1779_v6  ;;  %15034 = vst [vmem:[#allocation176_spill] sm:$0xff] %v11238_v9  ;;  %v11240_v53 = vpop.eup %8430 }
 0x348   : > { %8444 = vpow2.f32 %v2063_v42  ;;  %v2067_v27 = vmul.f32 1.442695, %v1935_v61  ;;  %v2069_v44 = vmul.f32 1.442695, %v1936_v5  ;;  %v2071_v30 = vmul.f32 1.442695, %v1937_v57  ;;  %3592 = vrot.lane.b32.xlu0 %v9075_v7, %s9504_s5  ;;  %v11247_v10 = vpop.eup %8432 }
 0x349   : > { %8446 = vpow2.f32 %v2065_v3  ;;  %v2073_v8 = vmul.f32 1.442695, %v1938_v59  ;;  %v1784_v33 = vpop.permute.xlu1 %1783  ;;  %15035 = vst [vmem:[#allocation177_spill] sm:$0xff] %v11240_v53  ;;  %15036 = vst [vmem:[#allocation178_spill] sm:$0xff] %v11247_v10  ;;  %v9078_v42 = vld [vmem:[%s9849_s13 + $0xb0] sm:$0xff]  }
 0x34a   : > { %8448 = vpow2.f32 %v2067_v27  ;;  %v1939_v11 = vsub.f32 %v10411_v15, %v1784_v33  ;;  %v1940_v46 = vsub.f32 %v10416_v18, %v1784_v33  ;;  %v1941_v45 = vsub.f32 %v10414_v17, %v1784_v33  ;;  %3546 = vrot.lane.b32.xlu1 %v9076_v26, %s9504_s5  ;;  %v11252_v15 = vpop.eup %8434 }
 0x34b   : > { %8450 = vpow2.f32 %v2069_v44  ;;  %v1942_v58 = vsub.f32 %v10420_v20, %v1784_v33  ;;  %15037 = vst [vmem:[#allocation179_spill] sm:$0xff] %v11252_v15  ;;  %v11254_v16 = vpop.eup %8436 }
 0x34c   : > { %8452 = vpow2.f32 %v2071_v30  ;;  %v2075_v62 = vmul.f32 1.442695, %v1939_v11  ;;  %v2077_v56 = vmul.f32 1.442695, %v1940_v46  ;;  %v2079_v60 = vmul.f32 1.442695, %v1941_v45  ;;  %3562 = vrot.lane.b32.xlu0 %v9077_v12, %s9504_s5  ;;  %v11261_v2 = vpop.eup %8438 }
 0x34d   : > { %8454 = vpow2.f32 %v2073_v8  ;;  %v2081_v17 = vmul.f32 1.442695, %v1942_v58  ;;  %v1789_v18 = vpop.permute.xlu1 %1788  ;;  %15038 = vst [vmem:[#allocation180_spill] sm:$0xff] %v11254_v16  ;;  %15039 = vst [vmem:[#allocation181_spill] sm:$0xff] %v11261_v2  ;;  %v9080_v30 = vld [vmem:[%s9849_s13 + $0x38] sm:$0xff]  }
 0x34e   : > { %8456 = vpow2.f32 %v2075_v62  ;;  %v1943_v0 = vsub.f32 %v10422_v21, %v1789_v18  ;;  %v1944_v20 = vsub.f32 %v10426_v23, %v1789_v18  ;;  %v1945_v14 = vsub.f32 %v10424_v22, %v1789_v18  ;;  %3578 = vrot.lane.b32.xlu1 %v9078_v42, %s9504_s5  ;;  %v9079_v21 = vld [vmem:[%s9849_s13 + $0xf0] sm:$0xff]  }
 0x34f   : > { %8458 = vpow2.f32 %v2077_v56  ;;  %v1946_v3 = vsub.f32 %v10430_v25, %v1789_v18  ;;  %v9082_v18 = vld [vmem:[%s9849_s13 + $0xb8] sm:$0xff]  }
 0x350   : > { %v11264_v6 = vpop.eup %8440  ;;  %8460 = vpow2.f32 %v2079_v60  ;;  %v2083_v61 = vmul.f32 1.442695, %v1943_v0  ;;  %v2085_v5 = vmul.f32 1.442695, %v1944_v20  ;;  %v2087_v57 = vmul.f32 1.442695, %v1945_v14  ;;  %3594 = vrot.lane.b32.xlu0 %v9079_v21, %s9504_s5 }
 0x351   : > { %v8443_v23 = vpop.eup %8442  ;;  %8462 = vpow2.f32 %v2081_v17  ;;  %v2089_v22 = vmul.f32 1.442695, %v1946_v3  ;;  %v1794_v38 = vpop.permute.xlu1 %1793 }
 0x352   : > { %v11268_v59 = vpop.eup %8444  ;;  %8464 = vpow2.f32 %v2083_v61  ;;  %v1947_v25 = vsub.f32 %v10435_v29, %v1794_v38  ;;  %v1948_v27 = vsub.f32 %v10440_v32, %v1794_v38  ;;  %v1949_v44 = vsub.f32 %v10438_v31, %v1794_v38  ;;  %3548 = vrot.lane.b32.xlu1 %v9080_v30, %s9504_s5  ;;  %v9081_v29 = vld [vmem:[%s9849_s13 + $0x78] sm:$0xff]   ;;  %v15041_v30 = vld [vmem:[#allocation31_spill] sm:$0xff] }
 0x353   : > { %v8447_v7 = vpop.eup %8446  ;;  %8466 = vpow2.f32 %v2085_v5  ;;  %v1950_v8 = vsub.f32 %v10444_v34, %v1794_v38  ;;  %v2379_v33 = vadd.f32 %v8443_v23, %v11264_v6 }
 0x354   : > { %v8449_v11 = vpop.eup %8448  ;;  %8468 = vpow2.f32 %v2087_v57  ;;  %v2091_v46 = vmul.f32 1.442695, %v1947_v25  ;;  %v2093_v45 = vmul.f32 1.442695, %v1948_v27  ;;  %v2095_v26 = vmul.f32 1.442695, %v1949_v44  ;;  %3564 = vrot.lane.b32.xlu0 %v9081_v29, %s9504_s5 }
 0x355   : > { %v8451_v32 = vpop.eup %8450  ;;  %8470 = vpow2.f32 %v2089_v22  ;;  %v2097_v31 = vmul.f32 1.442695, %v1950_v8  ;;  %v1799_v58 = vpop.permute.xlu1 %1798  ;;  %v2828_v62 = vpack.c.bf16 %v8449_v11, %v11264_v6  ;;  %v2380_v56 = vadd.f32 %v11268_v59, %v2379_v33  ;;  %v9084_v27 = vld [vmem:[%s9841_s7] sm:$0xff]  }
 0x356   : > { %v8453_v34 = vpop.eup %8452  ;;  %8472 = vpow2.f32 %v2091_v46  ;;  %v1951_v60 = vsub.f32 %v10446_v35, %v1799_v58  ;;  %v1952_v12 = vsub.f32 %v10450_v37, %v1799_v58  ;;  %v1953_v17 = vsub.f32 %v10448_v36, %v1799_v58  ;;  %3580 = vrot.lane.b32.xlu1 %v9082_v18, %s9504_s5  ;;  %v9083_v37 = vld [vmem:[%s9849_s13 + $0xf8] sm:$0xff]  }
 0x357   : > { %v8455_v0 = vpop.eup %8454  ;;  %8474 = vpow2.f32 %v2093_v45  ;;  %v1954_v20 = vsub.f32 %v10454_v39, %v1799_v58  ;;  %v2829_v14 = vpack.c.bf16 %v8451_v32, %v8443_v23  ;;  %v2830_v42 = vpack.c.bf16 %v8453_v34, %v11268_v59  ;;  %v15040_v59 = vld [vmem:[#allocation30_spill] sm:$0xff] }
 0x358   : > { %v11288_v3 = vpop.eup %8456  ;;  %8476 = vpow2.f32 %v2095_v26  ;;  %v2099_v6 = vmul.f32 1.442695, %v1951_v60  ;;  %v2101_v61 = vmul.f32 1.442695, %v1952_v12  ;;  %v2103_v35 = vmul.f32 1.442695, %v1953_v17  ;;  %3596 = vrot.lane.b32.xlu0 %v9083_v37, %s9504_s5 }
 0x359   : > { %v11292_v36 = vpop.eup %8458  ;;  %8478 = vpow2.f32 %v2097_v31  ;;  %v2105_v5 = vmul.f32 1.442695, %v1954_v20  ;;  %3116 = vmatprep.mubr.bf16.mxu0 %v2829_v14  ;;  %v2831_v57 = vpack.c.bf16 %v8455_v0, %v8447_v7  ;;  %v1804_v39 = vpop.permute.xlu1 %1803  ;;  %v2384_v21 = vadd.f32 %v8451_v32, %v8449_v11  ;;  %v9085_v26 = vld [vmem:[%s9841_s7 + $0x8] sm:$0xff]   ;;  %v15045_v60 = vld [vmem:[#allocation34_spill] sm:$0xff]  ;;  %v15046_v17 = vld [vmem:[#allocation33_spill] sm:$0xff] }
 0x35a   : > { %v11294_v23 = vpop.eup %8460  ;;  %8480 = vpow2.f32 %v2099_v6  ;;  %3117 = vmatmul.mubr.bf16.vlgmr.msra.gmra.mrb[64].mxu0 %v2828_v62  ;;  %v1955_v22 = vsub.f32 %v10459_v43, %v1804_v39  ;;  %v1956_v38 = vsub.f32 %v10464_v47, %v1804_v39  ;;  %v1957_v25 = vsub.f32 %v15040_v59, %v1804_v39  ;;  %3502 = vrot.lane.b32.xlu1 %v9084_v27, %s9504_s5  ;;  %v9086_v20 = vld [vmem:[%s9841_s7 + $0x30] sm:$0xff]  }
 0x35b   : > { %v11301_v44 = vpop.eup %8462  ;;  %8482 = vpow2.f32 %v2101_v61  ;;  %3277 = vmatprep.mubr.bf16.mxu1 %v2831_v57  ;;  %v1958_v8 = vsub.f32 %v15041_v30, %v1804_v39  ;;  %v2385_v33 = vadd.f32 %v8453_v34, %v2384_v21  ;;  %v11304_v11 = vadd.f32 %v8447_v7, %v2380_v56  ;;  %v15044_v56 = vld [vmem:[#allocation32_spill] sm:$0xff] }
 0x35c   : > { %v8465_v46 = vpop.eup %8464  ;;  %8484 = vpow2.f32 %v2103_v35  ;;  %3278 = vmatmul.mubr.bf16.vlgmr.msra.gmra.mrb[64].mxu1 %v2830_v42  ;;  %v2107_v43 = vmul.f32 1.442695, %v1955_v22  ;;  %v2109_v47 = vmul.f32 1.442695, %v1956_v38  ;;  %v2111_v45 = vmul.f32 1.442695, %v1957_v25  ;;  %3504 = vrot.lane.b32.xlu0 %v9085_v26, %s9504_s5 }
 0x35d   : > { %15042 = vst [vmem:[#allocation30_spill] sm:$0xff] %v11304_v11  ;;  %v8467_v29 = vpop.eup %8466  ;;  %8486 = vpow2.f32 %v2105_v5  ;;  %v2113_v32 = vmul.f32 1.442695, %v1958_v8  ;;  %v1809_v31 = vpop.permute.xlu1 %1808  ;;  %v2832_v58 = vpack.c.bf16 %v8465_v46, %v11288_v3  ;;  %v11309_v62 = vadd.f32 %v8455_v0, %v2385_v33  ;;  %v15047_v42 = vld [vmem:[#allocation35_spill] sm:$0xff]  ;;  %v9087_v39 = vld [vmem:[%s9841_s7 + $0x10] sm:$0xff]   ;;  %v15049_v33 = vld [vmem:[#allocation38_spill] sm:$0xff] }
 0x35e   : > { %v8469_v7 = vpop.eup %8468  ;;  %8488 = vpow2.f32 %v2107_v43  ;;  %v1959_v34 = vsub.f32 %v15044_v56, %v1809_v31  ;;  %v1960_v12 = vsub.f32 %v15045_v60, %v1809_v31  ;;  %v1961_v18 = vsub.f32 %v15046_v17, %v1809_v31  ;;  %3514 = vrot.lane.b32.xlu1 %v9086_v20, %s9504_s5  ;;  %v15048_v30 = vld [vmem:[#allocation36_spill] sm:$0xff]  ;;  %v9088_v26 = vld [vmem:[%s9841_s7 + $0x40] sm:$0xff]  }
 0x35f   : > { %15043 = vst [vmem:[#allocation31_spill] sm:$0xff] %v11309_v62  ;;  %v11316_v14 = vpop.eup %8470  ;;  %8490 = vpow2.f32 %v2109_v47  ;;  %v1962_v6 = vsub.f32 %v15047_v42, %v1809_v31  ;;  %v2833_v0 = vpack.c.bf16 %v8467_v29, %v11292_v36  ;;  %v2834_v61 = vpack.c.bf16 %v8469_v7, %v11294_v23  ;;  %v15050_v47 = vld [vmem:[#allocation37_spill] sm:$0xff]  ;;  %v15051_v31 = vld [vmem:[#allocation39_spill] sm:$0xff] }
 0x360   : > { %v11321_v35 = vpop.eup %8472  ;;  %8492 = vpow2.f32 %v2111_v45  ;;  %v2115_v37 = vmul.f32 1.442695, %v1959_v34  ;;  %v2117_v5 = vmul.f32 1.442695, %v1960_v12  ;;  %v2119_v57 = vmul.f32 1.442695, %v1961_v18  ;;  %3506 = vrot.lane.b32.xlu0 %v9087_v39, %s9504_s5 }
 0x361   : > { %v11325_v21 = vpop.eup %8474  ;;  %8494 = vpow2.f32 %v2113_v32  ;;  %v2121_v22 = vmul.f32 1.442695, %v1962_v6  ;;  %3124 = vmatprep.mubr.bf16.mxu0 %v2833_v0  ;;  %v2835_v38 = vpack.c.bf16 %v11316_v14, %v11301_v44  ;;  %v1814_v59 = vpop.permute.xlu1 %1813  ;;  %v2394_v25 = vadd.f32 %v8467_v29, %v8465_v46  ;;  %v9089_v18 = vld [vmem:[%s9841_s7 + $0x18] sm:$0xff]   ;;  %v15052_v6 = vld [vmem:[#allocation40_spill] sm:$0xff]  ;;  %v9090_v39 = vld [vmem:[%s9841_s7 + $0x48] sm:$0xff]  }
 0x362   : > { %v11329_v27 = vpop.eup %8476  ;;  %8496 = vpow2.f32 %v2115_v37  ;;  %3125 = vmatmul.mubr.bf16.gmra.mrb[68].mxu0 %v2832_v58  ;;  %v1963_v8 = vsub.f32 %v15048_v30, %v1814_v59  ;;  %v1964_v43 = vsub.f32 %v15049_v33, %v1814_v59  ;;  %v1965_v45 = vsub.f32 %v15050_v47, %v1814_v59  ;;  %3518 = vrot.lane.b32.xlu1 %v9088_v26, %s9504_s5  ;;  %v15053_v37 = vld [vmem:[#allocation42_spill] sm:$0xff] }
 0x363   : > { %v11336_v32 = vpop.eup %8478  ;;  %8498 = vpow2.f32 %v2117_v5  ;;  %3285 = vmatprep.mubr.bf16.mxu1 %v2835_v38  ;;  %v1966_v46 = vsub.f32 %v15051_v31, %v1814_v59  ;;  %v1819_v29 = vpop.permute.xlu0 %1818  ;;  %v2395_v56 = vadd.f32 %v8469_v7, %v2394_v25  ;;  %v2389_v58 = vadd.f32 %v11292_v36, %v11288_v3  ;;  %v15054_v3 = vld [vmem:[#allocation41_spill] sm:$0xff] }
 0x364   : > { %v8481_v34 = vpop.eup %8480  ;;  %8500 = vpow2.f32 %v2119_v57  ;;  %3286 = vmatmul.mubr.bf16.gmra.mrb[68].mxu1 %v2834_v61  ;;  %v2123_v60 = vmul.f32 1.442695, %v1963_v8  ;;  %v2125_v12 = vmul.f32 1.442695, %v1964_v43  ;;  %v2127_v17 = vmul.f32 1.442695, %v1965_v45  ;;  %3508 = vrot.lane.b32.xlu0 %v9089_v18, %s9504_s5 }
 0x365   : > { %v8483_v20 = vpop.eup %8482  ;;  %8502 = vpow2.f32 %v2121_v22  ;;  %v2129_v42 = vmul.f32 1.442695, %v1966_v46  ;;  %v1967_v0 = vsub.f32 %v15052_v6, %v1819_v29  ;;  %v1968_v7 = vsub.f32 %v15053_v37, %v1819_v29  ;;  %v15055_v57 = vld [vmem:[#allocation43_spill] sm:$0xff]  ;;  %v9091_v45 = vld [vmem:[%s9841_s7 + $0x20] sm:$0xff]   ;;  %v15059_v37 = vld [vmem:[#allocation45_spill] sm:$0xff] }
 0x366   : > { %v11345_v5 = vpop.eup %8484  ;;  %8504 = vpow2.f32 %v2123_v60  ;;  %v1969_v36 = vsub.f32 %v15054_v3, %v1819_v29  ;;  %v1970_v61 = vsub.f32 %v15055_v57, %v1819_v29  ;;  %3520 = vrot.lane.b32.xlu1 %v9090_v39, %s9504_s5  ;;  %v2837_v38 = vpack.c.bf16 %v8483_v20, %v11325_v21  ;;  %v15058_v6 = vld [vmem:[#allocation46_spill] sm:$0xff]  ;;  %v15060_v3 = vld [vmem:[#allocation47_spill] sm:$0xff] }
 0x367   : > { %v11352_v59 = vpop.eup %8486  ;;  %8506 = vpow2.f32 %v2125_v12  ;;  %v2131_v22 = vmul.f32 1.442695, %v1967_v0  ;;  %v2133_v25 = vmul.f32 1.442695, %v1968_v7  ;;  %v2836_v30 = vpack.c.bf16 %v8481_v34, %v11321_v35 }
 0x368   : > { %v11355_v8 = vpop.eup %8488  ;;  %8508 = vpow2.f32 %v2127_v17  ;;  %v2135_v33 = vmul.f32 1.442695, %v1969_v36  ;;  %v2137_v43 = vmul.f32 1.442695, %v1970_v61  ;;  %3132 = vmatprep.mubr.bf16.mxu0 %v2837_v38  ;;  %v2839_v47 = vpack.c.bf16 %v11352_v59, %v11336_v32  ;;  %3510 = vrot.lane.b32.xlu0 %v9091_v45, %s9504_s5  ;;  %v15057_v17 = vld [vmem:[#allocation44_spill] sm:$0xff] }
 0x369   : > { %v11361_v26 = vpop.eup %8490  ;;  %8510 = vpow2.f32 %v2129_v42  ;;  %v2838_v31 = vpack.c.bf16 %v11345_v5, %v11329_v27  ;;  %v1824_v46 = vpop.permute.xlu1 %1823  ;;  %v11366_v29 = vadd.f32 %v11316_v14, %v2395_v56  ;;  %v2390_v60 = vadd.f32 %v11294_v23, %v2389_v58  ;;  %v9092_v56 = vld [vmem:[%s9841_s7 + $0x50] sm:$0xff]  }
 0x36a   : > { %v11369_v12 = vpop.eup %8492  ;;  %8512 = vpow2.f32 %v2131_v22  ;;  %3293 = vmatprep.mubr.bf16.mxu1 %v2839_v47  ;;  %3133 = vmatmul.mubr.bf16.gmra.mrb[72].mxu0 %v2836_v30  ;;  %v1971_v18 = vsub.f32 %v15057_v17, %v1824_v46  ;;  %v1972_v0 = vsub.f32 %v15058_v6, %v1824_v46  ;;  %v1973_v42 = vsub.f32 %v15059_v37, %v1824_v46  ;;  %v9093_v22 = vld [vmem:[%s9841_s7 + $0x28] sm:$0xff]   ;;  %v15062_v47 = vld [vmem:[#allocation48_spill] sm:$0xff] }
 0x36b   : > { %15056 = vst [vmem:[#allocation32_spill] sm:$0xff] %v11366_v29  ;;  %v11374_v7 = vpop.eup %8494  ;;  %8514 = vpow2.f32 %v2133_v25  ;;  %v1974_v14 = vsub.f32 %v15060_v3, %v1824_v46  ;;  %3522 = vrot.lane.b32.xlu1 %v9092_v56, %s9504_s5  ;;  %v1829_v23 = vpop.permute.xlu0 %1828  ;;  %v11380_v58 = vadd.f32 %v11301_v44, %v2390_v60  ;;  %v2404_v36 = vadd.f32 %v8483_v20, %v8481_v34  ;;  %v15063_v44 = vld [vmem:[#allocation50_spill] sm:$0xff]  ;;  %v15064_v20 = vld [vmem:[#allocation49_spill] sm:$0xff] }
 0x36c   : > { %v11382_v57 = vpop.eup %8496  ;;  %8516 = vpow2.f32 %v2135_v33  ;;  %3294 = vmatmul.mubr.bf16.gmra.mrb[72].mxu1 %v2838_v31  ;;  %v2139_v61 = vmul.f32 1.442695, %v1971_v18  ;;  %v2141_v39 = vmul.f32 1.442695, %v1972_v0  ;;  %v2143_v38 = vmul.f32 1.442695, %v1973_v42  ;;  %3512 = vrot.lane.b32.xlu0 %v9093_v22, %s9504_s5 }
 0x36d   : > { %15061 = vst [vmem:[#allocation34_spill] sm:$0xff] %v11380_v58  ;;  %v11386_v25 = vpop.eup %8498  ;;  %8518 = vpow2.f32 %v2137_v43  ;;  %v2145_v30 = vmul.f32 1.442695, %v1974_v14  ;;  %v1975_v45 = vsub.f32 %v15062_v47, %v1829_v23  ;;  %v1976_v46 = vsub.f32 %v15063_v44, %v1829_v23  ;;  %v15065_v31 = vld [vmem:[#allocation51_spill] sm:$0xff]  ;;  %v9094_v0 = vld [vmem:[%s9841_s7 + $0x78] sm:$0xff]   ;;  %v15066_v44 = vld [vmem:[#allocation52_spill] sm:$0xff] }
 0x36e   : > { %v11390_v34 = vpop.eup %8500  ;;  %8520 = vpow2.f32 %v2139_v61  ;;  %v1977_v33 = vsub.f32 %v15064_v20, %v1829_v23  ;;  %v1978_v60 = vsub.f32 %v15065_v31, %v1829_v23  ;;  %v2841_v17 = vpack.c.bf16 %v11386_v25, %v11361_v26  ;;  %v9095_v23 = vld [vmem:[%s9841_s7 + $0x38] sm:$0xff]   ;;  %v15067_v20 = vld [vmem:[#allocation54_spill] sm:$0xff]  ;;  %v15149_v58 = vld [vmem:[#allocation119_spill] sm:$0xff] }
 0x36f   : > { %v11396_v18 = vpop.eup %8502  ;;  %8522 = vpow2.f32 %v2141_v39  ;;  %v2147_v43 = vmul.f32 1.442695, %v1975_v45  ;;  %v2149_v6 = vmul.f32 1.442695, %v1976_v46  ;;  %3532 = vrot.lane.b32.xlu1 %v9094_v0, %s9504_s5  ;;  %v2840_v37 = vpack.c.bf16 %v11382_v57, %v11355_v8  ;;  %v9114_v29 = vld [vmem:[%s9855_s12 + $0x98] sm:$0xff]  }
 0x370   : > { %v11402_v42 = vpop.eup %8504  ;;  %8524 = vpow2.f32 %v2143_v38  ;;  %v2151_v3 = vmul.f32 1.442695, %v1977_v33  ;;  %v2153_v14 = vmul.f32 1.442695, %v1978_v60  ;;  %3140 = vmatprep.mubr.bf16.mxu0 %v2841_v17  ;;  %v2843_v56 = vpack.c.bf16 %v11396_v18, %v11374_v7  ;;  %3516 = vrot.lane.b32.xlu0 %v9095_v23, %s9504_s5  ;;  %v15069_v17 = vld [vmem:[#allocation55_spill] sm:$0xff]  ;;  %v9096_v23 = vld [vmem:[%s9841_s7 + $0x58] sm:$0xff]  }
 0x371   : > { %v11408_v61 = vpop.eup %8506  ;;  %8526 = vpow2.f32 %v2145_v30  ;;  %v2842_v39 = vpack.c.bf16 %v11390_v34, %v11369_v12  ;;  %v1834_v22 = vpop.permute.xlu1 %1833  ;;  %v2405_v47 = vadd.f32 %v11345_v5, %v2404_v36  ;;  %v2399_v38 = vadd.f32 %v11325_v21, %v11321_v35  ;;  %v15068_v30 = vld [vmem:[#allocation53_spill] sm:$0xff] }
 0x372   : > { %v11415_v45 = vpop.eup %8508  ;;  %8528 = vpow2.f32 %v2147_v43  ;;  %3301 = vmatprep.mubr.bf16.mxu1 %v2843_v56  ;;  %3141 = vmatmul.mubr.bf16.gmra.mrb[76].mxu0 %v2840_v37  ;;  %v1979_v46 = vsub.f32 %v15066_v44, %v1834_v22  ;;  %v1980_v33 = vsub.f32 %v15067_v20, %v1834_v22  ;;  %v1981_v31 = vsub.f32 %v15068_v30, %v1834_v22  ;;  %v15071_v44 = vld [vmem:[#allocation56_spill] sm:$0xff] }
 0x373   : > { %v11420_v60 = vpop.eup %8510  ;;  %8530 = vpow2.f32 %v2149_v6  ;;  %v1982_v5 = vsub.f32 %v15069_v17, %v1834_v22  ;;  %2638 = vperm.xlu1 %8331, %v11203_v1   ;;  %v1839_v35 = vpop.permute.xlu0 %1838  ;;  %v11425_v21 = vadd.f32 %v11352_v59, %v2405_v47  ;;  %v2400_v36 = vadd.f32 %v11329_v27, %v2399_v38  ;;  %v15072_v59 = vld [vmem:[#allocation58_spill] sm:$0xff]  ;;  %v15074_v38 = vld [vmem:[#allocation59_spill] sm:$0xff] }
 0x374   : > { %v11428_v43 = vpop.eup %8512  ;;  %8532 = vpow2.f32 %v2151_v3  ;;  %3302 = vmatmul.mubr.bf16.gmra.mrb[76].mxu1 %v2842_v39  ;;  %v2155_v0 = vmul.f32 1.442695, %v1979_v46  ;;  %v2157_v37 = vmul.f32 1.442695, %v1980_v33  ;;  %v2159_v56 = vmul.f32 1.442695, %v1981_v31  ;;  %3524 = vrot.lane.b32.xlu0 %v9096_v23, %s9504_s5 }
 0x375   : > { %15070 = vst [vmem:[#allocation33_spill] sm:$0xff] %v11425_v21  ;;  %v11432_v6 = vpop.eup %8514  ;;  %8534 = vpow2.f32 %v2153_v14  ;;  %v2161_v22 = vmul.f32 1.442695, %v1982_v5  ;;  %v1983_v20 = vsub.f32 %v15071_v44, %v1839_v35  ;;  %v1984_v47 = vsub.f32 %v15072_v59, %v1839_v35  ;;  %v3535_v30 = vpop.permute.xlu1 %3534  ;;  %v15073_v3 = vld [vmem:[#allocation57_spill] sm:$0xff] }
 0x376   : > { %v11436_v27 = vpop.eup %8516  ;;  %8536 = vpow2.f32 %v2155_v0  ;;  %v1985_v39 = vsub.f32 %v15073_v3, %v1839_v35  ;;  %v1986_v46 = vsub.f32 %v15074_v38, %v1839_v35  ;;  %v2845_v33 = vpack.c.bf16 %v11432_v6, %v11408_v61  ;;  %v15076_v38 = vld [vmem:[#allocation60_spill] sm:$0xff] }
 0x377   : > { %v11442_v31 = vpop.eup %8518  ;;  %8538 = vpow2.f32 %v2157_v37  ;;  %v2163_v14 = vmul.f32 1.442695, %v1983_v20  ;;  %v2165_v17 = vmul.f32 1.442695, %v1984_v47  ;;  %v3647_v5 = vsel %vm920_vm2, %v3535_v30, 0  ;;  %2648 = vperm.xlu1 %8331, %v11216_v24   ;;  %v3551_v23 = vpop.permute.xlu0 %3550  ;;  %v9097_v37 = vld [vmem:[%s9841_s7 + $0x60] sm:$0xff]  }
 0x378   : > { %v11446_v44 = vpop.eup %8520  ;;  %8540 = vpow2.f32 %v2159_v56  ;;  %v2167_v0 = vmul.f32 1.442695, %v1985_v39  ;;  %v2169_v59 = vmul.f32 1.442695, %v1986_v46  ;;  %3148 = vmatprep.mubr.bf16.mxu0 %v2845_v33  ;;  %v2847_v35 = vpack.c.bf16 %v11442_v31, %v11420_v60  ;;  %8177 = vmatprep.subr.msk.bf16.mxu0 %vm920_vm2, %v3551_v23  ;;  %v15077_v46 = vld [vmem:[#allocation62_spill] sm:$0xff]  ;;  %v15078_v23 = vld [vmem:[#allocation61_spill] sm:$0xff] }
 0x379   : > { %v11451_v3 = vpop.eup %8522  ;;  %8542 = vpow2.f32 %v2161_v22  ;;  %3526 = vrot.lane.b32.xlu0 %v9097_v37, %s9504_s5  ;;  %v2844_v20 = vpack.c.bf16 %v11428_v43, %v11402_v42  ;;  %v2846_v56 = vpack.c.bf16 %v11436_v27, %v11415_v45  ;;  %7842 = vmatpush3.bf16.xpose.msra.mxu0 %v3647_v5  ;;  %v1844_v47 = vpop.permute.xlu1 %1843  ;;  %v11460_v30 = vadd.f32 %v11336_v32, %v2400_v36 }
 0x37a   : > { %v11462_v39 = vpop.eup %8524  ;;  %8544 = vpow2.f32 %v2163_v14  ;;  %3309 = vmatprep.mubr.bf16.mxu1 %v2847_v35  ;;  %v1987_v22 = vsub.f32 %v15076_v38, %v1844_v47  ;;  %v1988_v33 = vsub.f32 %v15077_v46, %v1844_v47  ;;  %v1989_v37 = vsub.f32 %v15078_v23, %v1844_v47 }
 0x37b   : > { %15075 = vst [vmem:[#allocation35_spill] sm:$0xff] %v11460_v30  ;;  %v11467_v52 = vpop.eup %8526  ;;  %8546 = vpow2.f32 %v2165_v17  ;;  %3149 = vmatmul.mubr.bf16.gmra.mrb[80].mxu0 %v2844_v20  ;;  %v1990_v5 = vsub.f32 %v15080_v41, %v1844_v47  ;;  %2653 = vperm.xlu1 %8331, %v11218_v63   ;;  %v1849_v32 = vpop.permute.xlu0 %1848  ;;  %v2409_v36 = vadd.f32 %v11361_v26, %v11355_v8  ;;  %v15083_v47 = vld [vmem:[#allocation64_spill] sm:$0xff] }
 0x37c   : > { %15079 = vst [vmem:[#allocation36_spill] sm:$0xff] %v11467_v52  ;;  %v2414_v14 = vadd.f32 %v11386_v25, %v11382_v57  ;;  %v11475_v35 = vpop.eup %8528  ;;  %8548 = vpow2.f32 %v2167_v0  ;;  %3310 = vmatmul.mubr.bf16.gmra.mrb[80].mxu1 %v2846_v56  ;;  %v2171_v38 = vmul.f32 1.442695, %v1987_v22  ;;  %v2173_v46 = vmul.f32 1.442695, %v1988_v33  ;;  %v15086_v57 = vld [vmem:[#allocation65_spill] sm:$0xff] }
 0x37d   : > { %15081 = vst [vmem:[#allocation38_spill] sm:$0xff] %v11475_v35  ;;  %v2175_v17 = vmul.f32 1.442695, %v1989_v37  ;;  %v11477_v20 = vpop.eup %8530  ;;  %8550 = vpow2.f32 %v2169_v59  ;;  %v2177_v41 = vmul.f32 1.442695, %v1990_v5  ;;  %v1991_v23 = vsub.f32 %v15083_v47, %v1849_v32  ;;  %3528 = vrot.lane.b32.xlu0 %v9098_v54, %s9504_s5  ;;  %v3567_v8 = vpop.permute.xlu1 %3566  ;;  %v15087_v0 = vld [vmem:[#allocation67_spill] sm:$0xff] }
 0x37e   : > { %15082 = vst [vmem:[#allocation37_spill] sm:$0xff] %v11477_v20  ;;  %v1992_v50 = vsub.f32 %v15084_v28, %v1849_v32  ;;  %v11483_v26 = vpop.eup %8532  ;;  %8552 = vpow2.f32 %v2171_v38  ;;  %v1993_v25 = vsub.f32 %v15086_v57, %v1849_v32  ;;  %v1994_v56 = vsub.f32 %v15087_v0, %v1849_v32  ;;  %v15089_v0 = vld [vmem:[#allocation68_spill] sm:$0xff] }
 0x37f   : > { %15085 = vst [vmem:[#allocation39_spill] sm:$0xff] %v11483_v26  ;;  %v2849_v22 = vpack.c.bf16 %v11477_v20, %v11451_v3  ;;  %v11489_v59 = vpop.eup %8534  ;;  %8554 = vpow2.f32 %v2173_v46  ;;  %v2179_v33 = vmul.f32 1.442695, %v1991_v23  ;;  %v3695_v37 = vsel %vm920_vm2, %v3567_v8, 0  ;;  %2663 = vperm.xlu1 %8331, %v11224_v55   ;;  %v3583_v54 = vpop.permute.xlu0 %3582  ;;  %v15103_v55 = vld [vmem:[#allocation79_spill] sm:$0xff] }
 0x380   : > { %15088 = vst [vmem:[#allocation40_spill] sm:$0xff] %v11489_v59  ;;  %v2181_v28 = vmul.f32 1.442695, %v1992_v50  ;;  %v11493_v5 = vpop.eup %8536  ;;  %8556 = vpow2.f32 %v2175_v17  ;;  %v2183_v38 = vmul.f32 1.442695, %v1993_v25  ;;  %v2851_v32 = vpack.c.bf16 %v11489_v59, %v11467_v52  ;;  %8185 = vmatprep.subr.msk.bf16.mxu1 %vm920_vm2, %v3583_v54  ;;  %v9099_v50 = vld [vmem:[%s9841_s7 + $0x70] sm:$0xff]  }
 0x381   : > { %v2185_v47 = vmul.f32 1.442695, %v1994_v56  ;;  %3156 = vmatprep.mubr.bf16.mxu0 %v2849_v22  ;;  %v11498_v57 = vpop.eup %8538  ;;  %8558 = vpow2.f32 %v2177_v41  ;;  %3530 = vrot.lane.b32.xlu0 %v9099_v50, %s9504_s5  ;;  %v2848_v46 = vpack.c.bf16 %v11475_v35, %v11446_v44  ;;  %v2850_v17 = vpack.c.bf16 %v11483_v26, %v11462_v39  ;;  %v1854_v23 = vpop.permute.xlu1 %1853  ;;  %v15090_v41 = vld [vmem:[#allocation70_spill] sm:$0xff]  ;;  %v15091_v54 = vld [vmem:[#allocation69_spill] sm:$0xff]  ;;  %v15130_v20 = vld [vmem:[#allocation103_spill] sm:$0xff] }
 0x382   : > { %7890 = vmatpush3.bf16.xpose.msra.mxu1 %v3695_v37  ;;  %v2410_v8 = vadd.f32 %v11369_v12, %v2409_v36  ;;  %v11507_v25 = vpop.eup %8540  ;;  %8560 = vpow2.f32 %v2179_v33  ;;  %3317 = vmatprep.mubr.bf16.mxu1 %v2851_v32  ;;  %v1995_v56 = vsub.f32 %v15089_v0, %v1854_v23  ;;  %v1996_v22 = vsub.f32 %v15090_v41, %v1854_v23  ;;  %v9106_v35 = vld [vmem:[%s9855_s12 + $0x8] sm:$0xff]  }
 0x383   : > { %v1997_v50 = vsub.f32 %v15091_v54, %v1854_v23  ;;  %v11512_v49 = vpop.eup %8542  ;;  %8562 = vpow2.f32 %v2181_v28  ;;  %3157 = vmatmul.mubr.bf16.gmra.mrb[84].mxu0 %v2848_v46  ;;  %v1998_v40 = vsub.f32 %v15092_v51, %v1854_v23  ;;  %2673 = vperm.xlu1 %8331, %v11234_v48   ;;  %v1859_v37 = vpop.permute.xlu0 %1858  ;;  %v2415_v36 = vadd.f32 %v11390_v34, %v2414_v14  ;;  %v15094_v51 = vld [vmem:[#allocation72_spill] sm:$0xff]  ;;  %v15095_v23 = vld [vmem:[#allocation74_spill] sm:$0xff]  ;;  %v15096_v34 = vld [vmem:[#allocation73_spill] sm:$0xff] }
 0x384   : > { %v11517_v12 = vadd.f32 %v11374_v7, %v2410_v8  ;;  %v11520_v33 = vpop.eup %8544  ;;  %8564 = vpow2.f32 %v2183_v38  ;;  %3318 = vmatmul.mubr.bf16.gmra.mrb[84].mxu1 %v2850_v17  ;;  %v2187_v32 = vmul.f32 1.442695, %v1995_v56  ;;  %v2189_v0 = vmul.f32 1.442695, %v1996_v22  ;;  %v15097_v38 = vld [vmem:[#allocation75_spill] sm:$0xff] }
 0x385   : > { %v2191_v41 = vmul.f32 1.442695, %v1997_v50  ;;  %v11522_v54 = vpop.eup %8546  ;;  %8566 = vpow2.f32 %v2185_v47  ;;  %v2193_v28 = vmul.f32 1.442695, %v1998_v40  ;;  %v1999_v46 = vsub.f32 %v15094_v51, %v1859_v37  ;;  %2643 = vperm.xlu0 %8330, %v11208_v13   ;;  %v3537_v7 = vpop.permute.xlu1 %3536 }
 0x386   : > { %15093 = vst [vmem:[#allocation42_spill] sm:$0xff] %v11517_v12  ;;  %v2000_v48 = vsub.f32 %v15095_v23, %v1859_v37  ;;  %v11527_v8 = vpop.eup %8548  ;;  %8568 = vpow2.f32 %v2187_v32  ;;  %v2001_v14 = vsub.f32 %v15096_v34, %v1859_v37  ;;  %v2002_v17 = vsub.f32 %v15097_v38, %v1859_v37 }
 0x387   : > { %v2853_v56 = vpack.c.bf16 %v11522_v54, %v11498_v57  ;;  %v11533_v22 = vpop.eup %8550  ;;  %8570 = vpow2.f32 %v2189_v0  ;;  %v2195_v40 = vmul.f32 1.442695, %v1999_v46  ;;  %v3650_v50 = vsel %vm920_vm2, %v3537_v7, 0  ;;  %2683 = vperm.xlu1 %8331, %v11240_v53   ;;  %v3553_v51 = vpop.permute.xlu0 %3552 }
 0x388   : > { %15098 = vst [vmem:[#allocation41_spill] sm:$0xff] %v11533_v22  ;;  %v2197_v47 = vmul.f32 1.442695, %v2000_v48  ;;  %v11537_v23 = vpop.eup %8552  ;;  %8572 = vpow2.f32 %v2191_v41  ;;  %v2199_v32 = vmul.f32 1.442695, %v2001_v14  ;;  %v2855_v37 = vpack.c.bf16 %v11533_v22, %v11512_v49  ;;  %8178 = vmatprep.subr.msk.bf16.mxu0 %vm920_vm2, %v3553_v51  ;;  %v15100_v14 = vld [vmem:[#allocation76_spill] sm:$0xff] }
 0x389   : > { %v2201_v34 = vmul.f32 1.442695, %v2002_v17  ;;  %3164 = vmatprep.mubr.bf16.mxu0 %v2853_v56  ;;  %v8555_v38 = vpop.eup %8554  ;;  %8574 = vpow2.f32 %v2193_v28  ;;  %2658 = vperm.xlu0 %8330, %v11222_v4   ;;  %v2852_v48 = vpack.c.bf16 %v11520_v33, %v11493_v5  ;;  %v2854_v0 = vpack.c.bf16 %v11527_v8, %v11507_v25  ;;  %v1864_v41 = vpop.permute.xlu1 %1863  ;;  %v15101_v28 = vld [vmem:[#allocation78_spill] sm:$0xff]  ;;  %v15102_v51 = vld [vmem:[#allocation77_spill] sm:$0xff] }
 0x38a   : > { %7844 = vmatpush3.bf16.xpose.msra.mxu0 %v3650_v50  ;;  %v11548_v46 = vadd.f32 %v11396_v18, %v2415_v36  ;;  %v11550_v7 = vpop.eup %8556  ;;  %8576 = vpow2.f32 %v2195_v40  ;;  %3325 = vmatprep.mubr.bf16.mxu1 %v2855_v37  ;;  %v2003_v17 = vsub.f32 %v15100_v14, %v1864_v41  ;;  %v2004_v56 = vsub.f32 %v15101_v28, %v1864_v41 }
 0x38b   : > { %v2005_v53 = vsub.f32 %v15102_v51, %v1864_v41  ;;  %v8559_v4 = vpop.eup %8558  ;;  %8578 = vpow2.f32 %v2197_v47  ;;  %3165 = vmatmul.mubr.bf16.gmra.mrb[88].mxu0 %v2852_v48  ;;  %v2006_v24 = vsub.f32 %v15103_v55, %v1864_v41  ;;  %2693 = vperm.xlu1 %8331, %v11252_v15   ;;  %v1869_v50 = vpop.permute.xlu0 %1868  ;;  %v2449_v18 = vadd.f32 %v8555_v38, %v11537_v23  ;;  %v15104_v48 = vld [vmem:[#allocation80_spill] sm:$0xff]  ;;  %v15105_v51 = vld [vmem:[#allocation82_spill] sm:$0xff] }
 0x38c   : > { %15099 = vst [vmem:[#allocation43_spill] sm:$0xff] %v11548_v46  ;;  %v11560_v36 = vadd.f32 %v11408_v61, %v11402_v42  ;;  %v11562_v40 = vpop.eup %8560  ;;  %8580 = vpow2.f32 %v2199_v32  ;;  %3326 = vmatmul.mubr.bf16.gmra.mrb[88].mxu1 %v2854_v0  ;;  %v2203_v37 = vmul.f32 1.442695, %v2003_v17  ;;  %v2205_v14 = vmul.f32 1.442695, %v2004_v56  ;;  %v15106_v32 = vld [vmem:[#allocation81_spill] sm:$0xff] }
 0x38d   : > { %v2207_v28 = vmul.f32 1.442695, %v2005_v53  ;;  %v11564_v47 = vpop.eup %8562  ;;  %8582 = vpow2.f32 %v2201_v34  ;;  %v2209_v55 = vmul.f32 1.442695, %v2006_v24  ;;  %v2007_v41 = vsub.f32 %v15104_v48, %v1869_v50  ;;  %2668 = vperm.xlu0 %8330, %v11231_v19   ;;  %v3569_v42 = vpop.permute.xlu1 %3568  ;;  %v15107_v17 = vld [vmem:[#allocation83_spill] sm:$0xff] }
 0x38e   : > { %v2008_v15 = vsub.f32 %v15105_v51, %v1869_v50  ;;  %v11569_v61 = vpop.eup %8564  ;;  %8584 = vpow2.f32 %v2203_v37  ;;  %v2009_v0 = vsub.f32 %v15106_v32, %v1869_v50  ;;  %v2010_v56 = vsub.f32 %v15107_v17, %v1869_v50  ;;  %v9100_v51 = vld [vmem:[%s9855_s12 + $0x40] sm:$0xff]  }
 0x38f   : > { %v2857_v53 = vpack.c.bf16 %v11564_v47, %v8555_v38  ;;  %v11574_v63 = vpop.eup %8566  ;;  %8586 = vpow2.f32 %v2205_v14  ;;  %v2211_v24 = vmul.f32 1.442695, %v2007_v41  ;;  %v3698_v48 = vsel %vm920_vm2, %v3569_v42, 0  ;;  %5587 = vrot.lane.b32.xlu1 %v9100_v51, %s9504_s5  ;;  %v3585_v19 = vpop.permute.xlu0 %3584 }
 0x390   : > { %v2213_v34 = vmul.f32 1.442695, %v2008_v15  ;;  %v11579_v1 = vpop.eup %8568  ;;  %8588 = vpow2.f32 %v2207_v28  ;;  %v2215_v37 = vmul.f32 1.442695, %v2009_v0  ;;  %v2217_v32 = vmul.f32 1.442695, %v2010_v56  ;;  %8186 = vmatprep.subr.msk.bf16.mxu1 %vm920_vm2, %v3585_v19 }
 0x391   : > { %3172 = vmatprep.mubr.bf16.mxu0 %v2857_v53  ;;  %v2859_v50 = vpack.c.bf16 %v11574_v63, %v8559_v4  ;;  %v8571_v38 = vpop.eup %8570  ;;  %8590 = vpow2.f32 %v2209_v55  ;;  %2678 = vperm.xlu0 %8330, %v11238_v9   ;;  %v2856_v15 = vpack.c.bf16 %v11562_v40, %v11537_v23  ;;  %v2858_v14 = vpack.c.bf16 %v11569_v61, %v11550_v7  ;;  %v1874_v28 = vpop.permute.xlu1 %1873  ;;  %v15108_v19 = vld [vmem:[#allocation84_spill] sm:$0xff]  ;;  %v15109_v55 = vld [vmem:[#allocation86_spill] sm:$0xff]  ;;  %v15110_v56 = vld [vmem:[#allocation85_spill] sm:$0xff] }
 0x392   : > { %7892 = vmatpush3.bf16.xpose.msra.mxu1 %v3698_v48  ;;  %v2450_v41 = vadd.f32 %v11550_v7, %v2449_v18  ;;  %v11589_v42 = vpop.eup %8572  ;;  %8592 = vpow2.f32 %v2211_v24  ;;  %v2011_v0 = vsub.f32 %v15108_v19, %v1874_v28  ;;  %v2012_v17 = vsub.f32 %v15109_v55, %v1874_v28  ;;  %v15111_v23 = vld [vmem:[#allocation87_spill] sm:$0xff]  ;;  %v9101_v48 = vld [vmem:[%s9855_s12 + $0xc0] sm:$0xff]  }
 0x393   : > { %3333 = vmatprep.mubr.bf16.mxu1 %v2859_v50  ;;  %v2013_v53 = vsub.f32 %v15110_v56, %v1874_v28  ;;  %v11594_v51 = vpop.eup %8574  ;;  %8594 = vpow2.f32 %v2213_v34  ;;  %3173 = vmatmul.mubr.bf16.gmra.mrb[92].mxu0 %v2856_v15  ;;  %v2014_v9 = vsub.f32 %v15111_v23, %v1874_v28  ;;  %v1879_v7 = vpop.permute.xlu0 %1878  ;;  %v2459_v24 = vadd.f32 %v8571_v38, %v11579_v1  ;;  %v15113_v15 = vld [vmem:[#allocation88_spill] sm:$0xff]  ;;  %v15114_v23 = vld [vmem:[#allocation90_spill] sm:$0xff] }
 0x394   : > { %5619 = vrot.lane.b32.xlu1 %v9101_v48, %s9504_s5  ;;  %v11599_v18 = vadd.f32 %v8559_v4, %v2450_v41  ;;  %v11602_v50 = vpop.eup %8576  ;;  %8596 = vpow2.f32 %v2215_v37  ;;  %3334 = vmatmul.mubr.bf16.gmra.mrb[92].mxu1 %v2858_v14  ;;  %v2219_v19 = vmul.f32 1.442695, %v2011_v0  ;;  %v2221_v55 = vmul.f32 1.442695, %v2012_v17  ;;  %v15115_v37 = vld [vmem:[#allocation89_spill] sm:$0xff]  ;;  %v15116_v0 = vld [vmem:[#allocation91_spill] sm:$0xff] }
 0x395   : > { %v2223_v56 = vmul.f32 1.442695, %v2013_v53  ;;  %v11604_v13 = vpop.eup %8578  ;;  %8598 = vpow2.f32 %v2217_v32  ;;  %v2225_v34 = vmul.f32 1.442695, %v2014_v9  ;;  %v2015_v28 = vsub.f32 %v15113_v15, %v1879_v7  ;;  %2688 = vperm.xlu0 %8330, %v11247_v10   ;;  %v3539_v4 = vpop.permute.xlu1 %3538 }
 0x396   : > { %15112 = vst [vmem:[#allocation44_spill] sm:$0xff] %v11599_v18  ;;  %v2016_v48 = vsub.f32 %v15114_v23, %v1879_v7  ;;  %v11609_v41 = vpop.eup %8580  ;;  %8600 = vpow2.f32 %v2219_v19  ;;  %v2017_v14 = vsub.f32 %v15115_v37, %v1879_v7  ;;  %v2018_v17 = vsub.f32 %v15116_v0, %v1879_v7  ;;  %v9102_v23 = vld [vmem:[%s9855_s12] sm:$0xff]   ;;  %v15138_v18 = vld [vmem:[#allocation111_spill] sm:$0xff] }
 0x397   : > { %v2861_v53 = vpack.c.bf16 %v11604_v13, %v8571_v38  ;;  %v11614_v22 = vpop.eup %8582  ;;  %8602 = vpow2.f32 %v2221_v55  ;;  %v2227_v9 = vmul.f32 1.442695, %v2015_v28  ;;  %v3653_v15 = vsel %vm920_vm2, %v3539_v4, 0  ;;  %v3555_v10 = vpop.permute.xlu0 %3554 }
 0x398   : > { %v2229_v32 = vmul.f32 1.442695, %v2016_v48  ;;  %5571 = vrot.lane.b32.xlu1 %v9102_v23, %s9504_s5  ;;  %v11619_v59 = vpop.eup %8584  ;;  %8604 = vpow2.f32 %v2223_v56  ;;  %v2231_v19 = vmul.f32 1.442695, %v2017_v14  ;;  %v2233_v37 = vmul.f32 1.442695, %v2018_v17  ;;  %8179 = vmatprep.subr.msk.bf16.mxu0 %vm920_vm2, %v3555_v10 }
 0x399   : > { %3180 = vmatprep.mubr.bf16.mxu0 %v2861_v53  ;;  %v2863_v38 = vpack.c.bf16 %v11614_v22, %v11594_v51  ;;  %v11624_v7 = vpop.eup %8586  ;;  %8606 = vpow2.f32 %v2225_v34  ;;  %2698 = vperm.xlu0 %8330, %v11254_v16   ;;  %v2860_v55 = vpack.c.bf16 %v11602_v50, %v11579_v1  ;;  %v2862_v56 = vpack.c.bf16 %v11609_v41, %v11589_v42  ;;  %v1884_v28 = vpop.permute.xlu1 %1883  ;;  %v15117_v10 = vld [vmem:[#allocation92_spill] sm:$0xff]  ;;  %v15118_v34 = vld [vmem:[#allocation94_spill] sm:$0xff]  ;;  %v15119_v17 = vld [vmem:[#allocation93_spill] sm:$0xff] }
 0x39a   : > { %7846 = vmatpush3.bf16.xpose.msra.mxu0 %v3653_v15  ;;  %v2460_v48 = vadd.f32 %v11589_v42, %v2459_v24  ;;  %v11632_v4 = vpop.eup %8588  ;;  %8608 = vpow2.f32 %v2227_v9  ;;  %v2019_v14 = vsub.f32 %v15117_v10, %v1884_v28  ;;  %v2020_v0 = vsub.f32 %v15118_v34, %v1884_v28  ;;  %v15120_v1 = vld [vmem:[#allocation95_spill] sm:$0xff] }
 0x39b   : > { %3341 = vmatprep.mubr.bf16.mxu1 %v2863_v38  ;;  %v2021_v53 = vsub.f32 %v15119_v17, %v1884_v28  ;;  %v11637_v23 = vpop.eup %8590  ;;  %8610 = vpow2.f32 %v2229_v32  ;;  %3181 = vmatmul.mubr.bf16.gmra.mrb[96].mxu0 %v2860_v55  ;;  %v2022_v16 = vsub.f32 %v15120_v1, %v1884_v28  ;;  %v9103_v15 = vld [vmem:[%s9855_s12 + $0x48] sm:$0xff]   ;;  %v1889_v42 = vpop.permute.xlu0 %1888  ;;  %v2420_v9 = vadd.f32 %v11415_v45, %v11560_v36  ;;  %v15122_v17 = vld [vmem:[#allocation96_spill] sm:$0xff]  ;;  %v15124_v36 = vld [vmem:[#allocation97_spill] sm:$0xff] }
 0x39c   : > { %5589 = vrot.lane.b32.xlu1 %v9103_v15, %s9504_s5  ;;  %v11643_v24 = vadd.f32 %v11594_v51, %v2460_v48  ;;  %v11647_v38 = vpop.eup %8592  ;;  %8612 = vpow2.f32 %v2231_v19  ;;  %3342 = vmatmul.mubr.bf16.gmra.mrb[96].mxu1 %v2862_v56  ;;  %v2235_v10 = vmul.f32 1.442695, %v2019_v14  ;;  %v2237_v34 = vmul.f32 1.442695, %v2020_v0  ;;  %v15123_v15 = vld [vmem:[#allocation98_spill] sm:$0xff]  ;;  %v15125_v56 = vld [vmem:[#allocation99_spill] sm:$0xff] }
 0x39d   : > { %v2239_v32 = vmul.f32 1.442695, %v2021_v53  ;;  %v11649_v55 = vpop.eup %8594  ;;  %8614 = vpow2.f32 %v2233_v37  ;;  %v2241_v28 = vmul.f32 1.442695, %v2022_v16  ;;  %v2023_v1 = vsub.f32 %v15122_v17, %v1889_v42  ;;  %2703 = vperm.xlu0 %8330, %v11261_v2   ;;  %v3571_v48 = vpop.permute.xlu1 %3570 }
 0x39e   : > { %15121 = vst [vmem:[#allocation46_spill] sm:$0xff] %v11643_v24  ;;  %v2024_v51 = vsub.f32 %v15123_v15, %v1889_v42  ;;  %v11654_v45 = vpop.eup %8596  ;;  %8616 = vpow2.f32 %v2235_v10  ;;  %v2025_v19 = vsub.f32 %v15124_v36, %v1889_v42  ;;  %v2026_v14 = vsub.f32 %v15125_v56, %v1889_v42  ;;  %v9104_v15 = vld [vmem:[%s9855_s12 + $0xc8] sm:$0xff]  }
 0x39f   : > { %v2865_v0 = vpack.c.bf16 %v11649_v55, %v11624_v7  ;;  %v11660_v37 = vpop.eup %8598  ;;  %8618 = vpow2.f32 %v2237_v34  ;;  %v2243_v16 = vmul.f32 1.442695, %v2023_v1  ;;  %v3701_v17 = vsel %vm920_vm2, %v3571_v48, 0  ;;  %v3587_v2 = vpop.permute.xlu0 %3586  ;;  %v9105_v1 = vld [vmem:[%s9855_s12 + $0x80] sm:$0xff]  }
 0x3a0   : > { %v2245_v53 = vmul.f32 1.442695, %v2024_v51  ;;  %5621 = vrot.lane.b32.xlu1 %v9104_v15, %s9504_s5  ;;  %v11665_v10 = vpop.eup %8600  ;;  %8620 = vpow2.f32 %v2239_v32  ;;  %v2247_v36 = vmul.f32 1.442695, %v2025_v19  ;;  %v2249_v42 = vmul.f32 1.442695, %v2026_v14  ;;  %8187 = vmatprep.subr.msk.bf16.mxu1 %vm920_vm2, %v3587_v2 }
 0x3a1   : > { %3188 = vmatprep.mubr.bf16.mxu0 %v2865_v0  ;;  %v2867_v56 = vpack.c.bf16 %v11660_v37, %v11637_v23  ;;  %v11670_v34 = vpop.eup %8602  ;;  %8622 = vpow2.f32 %v2241_v28  ;;  %5603 = vrot.lane.b32.xlu0 %v9105_v1, %s9504_s5  ;;  %v2864_v51 = vpack.c.bf16 %v11647_v38, %v11619_v59  ;;  %v2866_v32 = vpack.c.bf16 %v11654_v45, %v11632_v4  ;;  %v1894_v48 = vpop.permute.xlu1 %1893  ;;  %v15127_v2 = vld [vmem:[#allocation100_spill] sm:$0xff]  ;;  %v15128_v0 = vld [vmem:[#allocation102_spill] sm:$0xff]  ;;  %v15129_v1 = vld [vmem:[#allocation101_spill] sm:$0xff] }
 0x3a2   : > { %7894 = vmatpush3.bf16.xpose.msra.mxu1 %v3701_v17  ;;  %v11679_v19 = vadd.f32 %v11420_v60, %v2420_v9  ;;  %v11681_v14 = vpop.eup %8604  ;;  %8624 = vpow2.f32 %v2243_v16  ;;  %v2027_v28 = vsub.f32 %v15127_v2, %v1894_v48  ;;  %v2028_v15 = vsub.f32 %v15128_v0, %v1894_v48 }
 0x3a3   : > { %3349 = vmatprep.mubr.bf16.mxu1 %v2867_v56  ;;  %v2029_v26 = vsub.f32 %v15129_v1, %v1894_v48  ;;  %v11686_v52 = vpop.eup %8606  ;;  %8626 = vpow2.f32 %v2245_v53  ;;  %3189 = vmatmul.mubr.bf16.gmra.mrb[100].mxu0 %v2864_v51  ;;  %v2030_v17 = vsub.f32 %v15130_v20, %v1894_v48  ;;  %v1899_v60 = vpop.permute.xlu0 %1898  ;;  %v2469_v9 = vadd.f32 %v11624_v7, %v11619_v59  ;;  %v15131_v48 = vld [vmem:[#allocation104_spill] sm:$0xff]  ;;  %v15132_v1 = vld [vmem:[#allocation106_spill] sm:$0xff]  ;;  %v9107_v59 = vld [vmem:[%s9855_s12 + $0x88] sm:$0xff]  }
 0x3a4   : > { %15126 = vst [vmem:[#allocation45_spill] sm:$0xff] %v11679_v19  ;;  %5573 = vrot.lane.b32.xlu1 %v9106_v35, %s9504_s5  ;;  %v2424_v16 = vadd.f32 %v11432_v6, %v11428_v43  ;;  %v11695_v56 = vpop.eup %8608  ;;  %8628 = vpow2.f32 %v2247_v36  ;;  %3350 = vmatmul.mubr.bf16.gmra.mrb[100].mxu1 %v2866_v32  ;;  %v2251_v2 = vmul.f32 1.442695, %v2027_v28  ;;  %v2253_v53 = vmul.f32 1.442695, %v2028_v15  ;;  %v15133_v7 = vld [vmem:[#allocation105_spill] sm:$0xff] }
 0x3a5   : > { %v2255_v51 = vmul.f32 1.442695, %v2029_v26  ;;  %v11697_v0 = vpop.eup %8610  ;;  %8630 = vpow2.f32 %v2249_v42  ;;  %v2257_v20 = vmul.f32 1.442695, %v2030_v17  ;;  %v2031_v35 = vsub.f32 %v15131_v48, %v1899_v60  ;;  %5605 = vrot.lane.b32.xlu0 %v9107_v59, %s9504_s5  ;;  %v3541_v43 = vpop.permute.xlu1 %3540  ;;  %v15134_v32 = vld [vmem:[#allocation107_spill] sm:$0xff] }
 0x3a6   : > { %v2032_v19 = vsub.f32 %v15132_v1, %v1899_v60  ;;  %v11703_v6 = vpop.eup %8612  ;;  %8632 = vpow2.f32 %v2251_v2  ;;  %v2033_v36 = vsub.f32 %v15133_v7, %v1899_v60  ;;  %v2034_v26 = vsub.f32 %v15134_v32, %v1899_v60  ;;  %v9108_v1 = vld [vmem:[%s9855_s12 + $0x50] sm:$0xff]  }
 0x3a7   : > { %v2869_v42 = vpack.c.bf16 %v11697_v0, %v11670_v34  ;;  %v11709_v28 = vpop.eup %8614  ;;  %8634 = vpow2.f32 %v2253_v53  ;;  %v2259_v15 = vmul.f32 1.442695, %v2031_v35  ;;  %v3656_v48 = vsel %vm920_vm2, %v3541_v43, 0  ;;  %v3557_v59 = vpop.permute.xlu0 %3556 }
 0x3a8   : > { %v2261_v17 = vmul.f32 1.442695, %v2032_v19  ;;  %5591 = vrot.lane.b32.xlu1 %v9108_v1, %s9504_s5  ;;  %v11714_v2 = vpop.eup %8616  ;;  %8636 = vpow2.f32 %v2255_v51  ;;  %v2263_v7 = vmul.f32 1.442695, %v2033_v36  ;;  %v2265_v60 = vmul.f32 1.442695, %v2034_v26  ;;  %8180 = vmatprep.subr.msk.bf16.mxu0 %vm920_vm2, %v3557_v59 }
 0x3a9   : > { %3196 = vmatprep.mubr.bf16.mxu0 %v2869_v42  ;;  %v2871_v32 = vpack.c.bf16 %v11709_v28, %v11686_v52  ;;  %v11719_v53 = vpop.eup %8618  ;;  %8638 = vpow2.f32 %v2257_v20  ;;  %v9109_v19 = vld [vmem:[%s9855_s12 + $0xd0] sm:$0xff]   ;;  %v2868_v35 = vpack.c.bf16 %v11695_v56, %v11665_v10  ;;  %v2870_v51 = vpack.c.bf16 %v11703_v6, %v11681_v14  ;;  %7848 = vmatpush3.bf16.xpose.msra.mxu0 %v3656_v48  ;;  %v1904_v43 = vpop.permute.xlu1 %1903  ;;  %v15136_v1 = vld [vmem:[#allocation110_spill] sm:$0xff] }
 0x3aa   : > { %5623 = vrot.lane.b32.xlu0 %v9109_v19, %s9504_s5  ;;  %v2470_v36 = vadd.f32 %v11632_v4, %v2469_v9  ;;  %v11728_v26 = vpop.eup %8620  ;;  %8640 = vpow2.f32 %v2259_v15  ;;  %v15135_v42 = vld [vmem:[#allocation108_spill] sm:$0xff]  ;;  %v2036_v59 = vsub.f32 %v15136_v1, %v1904_v43  ;;  %v15137_v19 = vld [vmem:[#allocation109_spill] sm:$0xff]  ;;  %v2038_v12 = vsub.f32 %v15138_v18, %v1904_v43 }
 0x3ab   : > { %3357 = vmatprep.mubr.bf16.mxu1 %v2871_v32  ;;  %v2035_v20 = vsub.f32 %v15135_v42, %v1904_v43  ;;  %v2037_v24 = vsub.f32 %v15137_v19, %v1904_v43  ;;  %v11733_v46 = vpop.eup %8622  ;;  %8642 = vpow2.f32 %v2261_v17  ;;  %3197 = vmatmul.mubr.bf16.gmra.mrb[104].mxu0 %v2868_v35  ;;  %v9110_v48 = vld [vmem:[%s9855_s12 + $0x10] sm:$0xff]   ;;  %v1909_v4 = vpop.permute.xlu0 %1908  ;;  %v2425_v15 = vadd.f32 %v11436_v27, %v2424_v16 }
 0x3ac   : > { %5575 = vrot.lane.b32.xlu1 %v9110_v48, %s9504_s5  ;;  %v11739_v9 = vadd.f32 %v11637_v23, %v2470_v36  ;;  %v11742_v32 = vpop.eup %8624  ;;  %8644 = vpow2.f32 %v2263_v7  ;;  %3358 = vmatmul.mubr.bf16.gmra.mrb[104].mxu1 %v2870_v51  ;;  %v2269_v1 = vmul.f32 1.442695, %v2036_v59  ;;  %v2273_v18 = vmul.f32 1.442695, %v2038_v12  ;;  %v15140_v43 = vld [vmem:[#allocation112_spill] sm:$0xff]  ;;  %v15141_v48 = vld [vmem:[#allocation114_spill] sm:$0xff] }
 0x3ad   : > { %v2267_v42 = vmul.f32 1.442695, %v2035_v20  ;;  %v2271_v17 = vmul.f32 1.442695, %v2037_v24  ;;  %v11744_v35 = vpop.eup %8626  ;;  %8646 = vpow2.f32 %v2265_v60  ;;  %v2039_v19 = vsub.f32 %v15140_v43, %v1909_v4  ;;  %v9111_v23 = vld [vmem:[%s9855_s12 + $0x90] sm:$0xff]   ;;  %v3573_v27 = vpop.permute.xlu1 %3572  ;;  %v15142_v7 = vld [vmem:[#allocation113_spill] sm:$0xff] }
 0x3ae   : > { %15139 = vst [vmem:[#allocation47_spill] sm:$0xff] %v11739_v9  ;;  %v2040_v30 = vsub.f32 %v15141_v48, %v1909_v4  ;;  %5607 = vrot.lane.b32.xlu0 %v9111_v23, %s9504_s5  ;;  %v11750_v16 = vpop.eup %8628  ;;  %v2041_v51 = vsub.f32 %v15142_v7, %v1909_v4  ;;  %v15143_v36 = vld [vmem:[#allocation115_spill] sm:$0xff]  ;;  %v2873_v60 = vpack.c.bf16 %v11744_v35, %v11719_v53  ;;  %v3704_v43 = vsel %vm920_vm2, %v3573_v27, 0  ;;  %v9112_v48 = vld [vmem:[%s9855_s12 + $0x58] sm:$0xff]  }
 0x3af   : > { %8648 = vpow2.f32 %v2267_v42  ;;  %v2042_v24 = vsub.f32 %v15143_v36, %v1909_v4  ;;  %v11756_v12 = vpop.eup %8630  ;;  %v2275_v20 = vmul.f32 1.442695, %v2039_v19  ;;  %v3589_v23 = vpop.permute.xlu0 %3588  ;;  %v2872_v19 = vpack.c.bf16 %v11742_v32, %v11714_v2 }
 0x3b0   : > { %15144 = vst [vmem:[#allocation48_spill] sm:$0xff] %v11756_v12  ;;  %8650 = vpow2.f32 %v2269_v1  ;;  %v2277_v59 = vmul.f32 1.442695, %v2040_v30  ;;  %5593 = vrot.lane.b32.xlu1 %v9112_v48, %s9504_s5  ;;  %v11761_v42 = vpop.eup %8632  ;;  %v2279_v7 = vmul.f32 1.442695, %v2041_v51  ;;  %3204 = vmatprep.mubr.bf16.mxu0 %v2873_v60  ;;  %v2875_v36 = vpack.c.bf16 %v11756_v12, %v11733_v46  ;;  %v9113_v30 = vld [vmem:[%s9855_s12 + $0xd8] sm:$0xff]  }
 0x3b1   : > { %8652 = vpow2.f32 %v2271_v17  ;;  %v2281_v4 = vmul.f32 1.442695, %v2042_v24  ;;  %8188 = vmatprep.subr.msk.bf16.mxu1 %vm920_vm2, %v3589_v23  ;;  %v11766_v1 = vpop.eup %8634  ;;  %v2874_v17 = vpack.c.bf16 %v11750_v16, %v11728_v26  ;;  %v1914_v27 = vpop.permute.xlu1 %1913  ;;  %v11775_v51 = vadd.f32 %v11442_v31, %v2425_v15  ;;  %v15147_v48 = vld [vmem:[#allocation118_spill] sm:$0xff] }
 0x3b2   : > { %8654 = vpow2.f32 %v2273_v18  ;;  %5625 = vrot.lane.b32.xlu0 %v9113_v30, %s9504_s5  ;;  %7896 = vmatpush3.bf16.xpose.msra.mxu1 %v3704_v43  ;;  %v11777_v24 = vpop.eup %8636  ;;  %v15146_v18 = vld [vmem:[#allocation116_spill] sm:$0xff]  ;;  %v2044_v23 = vsub.f32 %v15147_v48, %v1914_v27  ;;  %v15148_v30 = vld [vmem:[#allocation117_spill] sm:$0xff]  ;;  %v2046_v43 = vsub.f32 %v15149_v58, %v1914_v27  ;;  %v2479_v15 = vadd.f32 %v11670_v34, %v11665_v10 }
 0x3b3   : > { %15145 = vst [vmem:[#allocation50_spill] sm:$0xff] %v11775_v51  ;;  %8656 = vpow2.f32 %v2275_v20  ;;  %3365 = vmatprep.mubr.bf16.mxu1 %v2875_v36  ;;  %v2043_v60 = vsub.f32 %v15146_v18, %v1914_v27  ;;  %v2045_v9 = vsub.f32 %v15148_v30, %v1914_v27  ;;  %v11782_v21 = vpop.eup %8638  ;;  %3205 = vmatmul.mubr.bf16.gmra.mrb[108].mxu0 %v2872_v19  ;;  %v1919_v31 = vpop.permute.xlu0 %1918  ;;  %v15150_v27 = vld [vmem:[#allocation120_spill] sm:$0xff]  ;;  %v15151_v30 = vld [vmem:[#allocation122_spill] sm:$0xff]  ;;  %v9115_v10 = vld [vmem:[%s9855_s12 + $0x18] sm:$0xff]  }
 0x3b4   : > { %8658 = vpow2.f32 %v2277_v59  ;;  %5609 = vrot.lane.b32.xlu1 %v9114_v29, %s9504_s5  ;;  %v2429_v20 = vadd.f32 %v11451_v3, %v11446_v44  ;;  %v11791_v36 = vpop.eup %8640  ;;  %3366 = vmatmul.mubr.bf16.gmra.mrb[108].mxu1 %v2874_v17  ;;  %v2285_v59 = vmul.f32 1.442695, %v2044_v23  ;;  %v2289_v58 = vmul.f32 1.442695, %v2046_v43  ;;  %v15152_v34 = vld [vmem:[#allocation121_spill] sm:$0xff]  ;;  %v15153_v17 = vld [vmem:[#allocation123_spill] sm:$0xff] }
 0x3b5   : > { %8660 = vpow2.f32 %v2279_v7  ;;  %v2283_v18 = vmul.f32 1.442695, %v2043_v60  ;;  %v2287_v19 = vmul.f32 1.442695, %v2045_v9  ;;  %v11793_v48 = vpop.eup %8642  ;;  %v2047_v29 = vsub.f32 %v15150_v27, %v1919_v31  ;;  %v3543_v44 = vpop.permute.xlu1 %3542 }
 0x3b6   : > { %8662 = vpow2.f32 %v2281_v4  ;;  %v2048_v51 = vsub.f32 %v15151_v30, %v1919_v31  ;;  %5577 = vrot.lane.b32.xlu0 %v9115_v10, %s9504_s5  ;;  %v11799_v3 = vpop.eup %8644  ;;  %v2049_v7 = vsub.f32 %v15152_v34, %v1919_v31  ;;  %v2050_v9 = vsub.f32 %v15153_v17, %v1919_v31  ;;  %v9116_v30 = vld [vmem:[%s9855_s12 + $0x60] sm:$0xff]  }
 0x3b7   : > { %8664 = vpow2.f32 %v2283_v18  ;;  %v2877_v4 = vpack.c.bf16 %v11793_v48, %v11766_v1  ;;  %v11805_v60 = vpop.eup %8646  ;;  %v2291_v23 = vmul.f32 1.442695, %v2047_v29  ;;  %v3659_v27 = vsel %vm920_vm2, %v3543_v44, 0  ;;  %v3559_v10 = vpop.permute.xlu0 %3558 }
 0x3b8   : > { %15154 = vst [vmem:[#allocation49_spill] sm:$0xff] %v11805_v60  ;;  %8666 = vpow2.f32 %v2285_v59  ;;  %v2293_v43 = vmul.f32 1.442695, %v2048_v51  ;;  %5595 = vrot.lane.b32.xlu1 %v9116_v30, %s9504_s5  ;;  %v2295_v34 = vmul.f32 1.442695, %v2049_v7  ;;  %v2879_v17 = vpack.c.bf16 %v11805_v60, %v11782_v21  ;;  %8181 = vmatprep.subr.msk.bf16.mxu0 %vm920_vm2, %v3559_v10  ;;  %v9117_v51 = vld [vmem:[%s9855_s12 + $0xe0] sm:$0xff]  }
 0x3b9   : > { %v11810_v18 = vpop.eup %8648  ;;  %8668 = vpow2.f32 %v2287_v19  ;;  %v2297_v31 = vmul.f32 1.442695, %v2050_v9  ;;  %3212 = vmatprep.mubr.bf16.mxu0 %v2877_v4  ;;  %v2876_v29 = vpack.c.bf16 %v11791_v36, %v11761_v42  ;;  %v2878_v19 = vpack.c.bf16 %v11799_v3, %v11777_v24  ;;  %7850 = vmatpush3.bf16.xpose.msra.mxu0 %v3659_v27  ;;  %v1924_v44 = vpop.permute.xlu1 %1923  ;;  %v15155_v4 = vld [vmem:[#allocation124_spill] sm:$0xff]  ;;  %v15156_v30 = vld [vmem:[#allocation126_spill] sm:$0xff]  ;;  %v15158_v60 = vld [vmem:[#allocation127_spill] sm:$0xff] }
 0x3ba   : > { %v11815_v59 = vpop.eup %8650  ;;  %8670 = vpow2.f32 %v2289_v58  ;;  %5627 = vrot.lane.b32.xlu0 %v9117_v51, %s9504_s5  ;;  %v2480_v7 = vadd.f32 %v11681_v14, %v2479_v15  ;;  %3373 = vmatprep.mubr.bf16.mxu1 %v2879_v17  ;;  %v2051_v58 = vsub.f32 %v15155_v4, %v1924_v44  ;;  %v2052_v10 = vsub.f32 %v15156_v30, %v1924_v44  ;;  %v15157_v51 = vld [vmem:[#allocation125_spill] sm:$0xff]  ;;  %v9118_v27 = vld [vmem:[%s9855_s12 + $0x20] sm:$0xff]  }
 0x3bb   : > { %v11824_v9 = vpop.eup %8652  ;;  %8672 = vpow2.f32 %v2291_v23  ;;  %v2053_v11 = vsub.f32 %v15157_v51, %v1924_v44  ;;  %3213 = vmatmul.mubr.bf16.gmra.mrb[112].mxu0 %v2876_v29  ;;  %v2054_v12 = vsub.f32 %v15158_v60, %v1924_v44  ;;  %v1929_v14 = vpop.permute.xlu0 %1928  ;;  %v11838_v23 = vadd.f32 %v11462_v39, %v2429_v20  ;;  %v15160_v44 = vld [vmem:[#allocation128_spill] sm:$0xff] }
 0x3bc   : > { %v11829_v62 = vpop.eup %8654  ;;  %8674 = vpow2.f32 %v2293_v43  ;;  %5579 = vrot.lane.b32.xlu1 %v9118_v27, %s9504_s5  ;;  %v11835_v15 = vadd.f32 %v11686_v52, %v2480_v7  ;;  %3374 = vmatmul.mubr.bf16.gmra.mrb[112].mxu1 %v2878_v19  ;;  %v2299_v4 = vmul.f32 1.442695, %v2051_v58  ;;  %v2301_v43 = vmul.f32 1.442695, %v2052_v10  ;;  %v15161_v27 = vld [vmem:[#allocation130_spill] sm:$0xff]  ;;  %v15163_v58 = vld [vmem:[#allocation131_spill] sm:$0xff] }
 0x3bd   : > { %v11840_v17 = vpop.eup %8656  ;;  %8676 = vpow2.f32 %v2295_v34  ;;  %v2303_v29 = vmul.f32 1.442695, %v2053_v11  ;;  %v2305_v60 = vmul.f32 1.442695, %v2054_v12  ;;  %v2055_v51 = vsub.f32 %v15160_v44, %v1929_v14  ;;  %v9119_v7 = vld [vmem:[%s9855_s12 + $0xa0] sm:$0xff]   ;;  %v3575_v39 = vpop.permute.xlu1 %3574  ;;  %v15162_v34 = vld [vmem:[#allocation129_spill] sm:$0xff] }
 0x3be   : > { %15159 = vst [vmem:[#allocation51_spill] sm:$0xff] %v11835_v15  ;;  %v11842_v30 = vpop.eup %8658  ;;  %8678 = vpow2.f32 %v2297_v31  ;;  %v2056_v52 = vsub.f32 %v15161_v27, %v1929_v14  ;;  %5611 = vrot.lane.b32.xlu0 %v9119_v7, %s9504_s5  ;;  %v2057_v19 = vsub.f32 %v15162_v34, %v1929_v14  ;;  %v2058_v11 = vsub.f32 %v15163_v58, %v1929_v14  ;;  %v9120_v7 = vld [vmem:[%s9855_s12 + $0x68] sm:$0xff]  }
 0x3bf   : > { %v11848_v20 = vpop.eup %8660  ;;  %8680 = vpow2.f32 %v2299_v4  ;;  %v2881_v31 = vpack.c.bf16 %v11842_v30, %v11815_v59  ;;  %v2307_v10 = vmul.f32 1.442695, %v2055_v51  ;;  %v3707_v27 = vsel %vm920_vm2, %v3575_v39, 0  ;;  %v3591_v15 = vpop.permute.xlu0 %3590 }
 0x3c0   : > { %v11854_v12 = vpop.eup %8662  ;;  %8682 = vpow2.f32 %v2301_v43  ;;  %v2309_v44 = vmul.f32 1.442695, %v2056_v52  ;;  %5597 = vrot.lane.b32.xlu1 %v9120_v7, %s9504_s5  ;;  %v2311_v34 = vmul.f32 1.442695, %v2057_v19  ;;  %8189 = vmatprep.subr.msk.bf16.mxu1 %vm920_vm2, %v3591_v15  ;;  %v2313_v51 = vmul.f32 1.442695, %v2058_v11 }
 0x3c1   : > { %v11859_v4 = vpop.eup %8664  ;;  %8684 = vpow2.f32 %v2303_v29  ;;  %3220 = vmatprep.mubr.bf16.mxu0 %v2881_v31  ;;  %v2883_v14 = vpack.c.bf16 %v11854_v12, %v11829_v62  ;;  %v9121_v52 = vld [vmem:[%s9855_s12 + $0xe8] sm:$0xff]   ;;  %v2880_v39 = vpack.c.bf16 %v11840_v17, %v11810_v18  ;;  %v2882_v29 = vpack.c.bf16 %v11848_v20, %v11824_v9  ;;  %7898 = vmatpush3.bf16.xpose.msra.mxu1 %v3707_v27  ;;  %v3545_v19 = vpop.permute.xlu1 %3544 }
 0x3c2   : > { %v8667_v43 = vpop.eup %8666  ;;  %8686 = vpow2.f32 %v2305_v60  ;;  %5629 = vrot.lane.b32.xlu0 %v9121_v52, %s9504_s5  ;;  %v3662_v15 = vsel %vm920_vm2, %v3545_v19, 0  ;;  %v2489_v60 = vadd.f32 %v11719_v53, %v11714_v2  ;;  %v9122_v31 = vld [vmem:[%s9855_s12 + $0xa8] sm:$0xff]   ;;  %v2499_v27 = vadd.f32 %v11766_v1, %v11761_v42 }
 0x3c3   : > { %v11870_v58 = vpop.eup %8668  ;;  %8688 = vpow2.f32 %v2307_v10  ;;  %3381 = vmatprep.mubr.bf16.mxu1 %v2883_v14  ;;  %3221 = vmatmul.mubr.bf16.gmra.mrb[116].mxu0 %v2880_v39  ;;  %v3561_v7 = vpop.permute.xlu0 %3560  ;;  %v2439_v10 = vadd.f32 %v11498_v57, %v11493_v5  ;;  %v2509_v14 = vadd.f32 %v11815_v59, %v11810_v18  ;;  %v2444_v53 = vadd.f32 %v11522_v54, %v11520_v33  ;;  %v9123_v42 = vld [vmem:[%s9855_s12 + $0x28] sm:$0xff]  }
 0x3c4   : > { %v11875_v11 = vpop.eup %8670  ;;  %8690 = vpow2.f32 %v2309_v44  ;;  %5613 = vrot.lane.b32.xlu1 %v9122_v31, %s9504_s5  ;;  %3382 = vmatmul.mubr.bf16.gmra.mrb[116].mxu1 %v2882_v29  ;;  %v2490_v2 = vadd.f32 %v11728_v26, %v2489_v60  ;;  %v2500_v1 = vadd.f32 %v11777_v24, %v2499_v27  ;;  %v2519_v31 = vadd.f32 %v8667_v43, %v11859_v4 }
 0x3c5   : > { %v11885_v52 = vpop.eup %8672  ;;  %8692 = vpow2.f32 %v2311_v34  ;;  %8182 = vmatprep.subr.msk.bf16.mxu0 %vm920_vm2, %v3561_v7  ;;  %v3577_v5 = vpop.permute.xlu1 %3576  ;;  %v2440_v18 = vadd.f32 %v11507_v25, %v2439_v10  ;;  %v2510_v19 = vadd.f32 %v11824_v9, %v2509_v14  ;;  %v11925_v60 = vadd.f32 %v11527_v8, %v2444_v53  ;;  %v9125_v7 = vld [vmem:[%s9855_s12 + $0xf0] sm:$0xff]  }
 0x3c6   : > { %v11891_v44 = vpop.eup %8674  ;;  %8694 = vpow2.f32 %v2313_v51  ;;  %5581 = vrot.lane.b32.xlu0 %v9123_v42, %s9504_s5  ;;  %7852 = vmatpush3.bf16.xpose.msra.mxu0 %v3662_v15  ;;  %v2884_v57 = vpack.c.bf16 %v11885_v52, %v11859_v4  ;;  %v3710_v33 = vsel %vm920_vm2, %v3577_v5, 0  ;;  %v11904_v54 = vadd.f32 %v11733_v46, %v2490_v2  ;;  %v9124_v51 = vld [vmem:[%s9855_s12 + $0x70] sm:$0xff]  }
 0x3c7   : > { %v11899_v26 = vpop.eup %8676  ;;  %v2885_v59 = vpack.c.bf16 %v11891_v44, %v8667_v43  ;;  %v3593_v39 = vpop.permute.xlu0 %3592  ;;  %v11913_v25 = vadd.f32 %v11782_v21, %v2500_v1  ;;  %v11916_v29 = vadd.f32 %v11512_v49, %v2440_v18  ;;  %v11931_v9 = vadd.f32 %v11829_v62, %v2510_v19  ;;  %v9126_v62 = vld [vmem:[%s9855_s12 + $0x30] sm:$0xff]  }
 0x3c8   : > { %v11906_v34 = vpop.eup %8678  ;;  %5599 = vrot.lane.b32.xlu1 %v9124_v51, %s9504_s5  ;;  %v2886_v24 = vpack.c.bf16 %v11899_v26, %v11870_v58  ;;  %8190 = vmatprep.subr.msk.bf16.mxu1 %vm920_vm2, %v3593_v39  ;;  %v2454_v27 = vadd.f32 %v11564_v47, %v11562_v40  ;;  %v2464_v10 = vadd.f32 %v11604_v13, %v11602_v50  ;;  %v9128_v51 = vld [vmem:[%s9855_s12 + $0x78] sm:$0xff]  }
 0x3c9   : > { %v11919_v46 = vpop.eup %8680  ;;  %3228 = vmatprep.mubr.bf16.mxu0 %v2885_v59  ;;  %v2887_v15 = vpack.c.bf16 %v11906_v34, %v11875_v11  ;;  %7900 = vmatpush3.bf16.xpose.msra.mxu1 %v3710_v33  ;;  %v3547_v49 = vpop.permute.xlu1 %3546  ;;  %v2520_v43 = vadd.f32 %v11870_v58, %v2519_v31  ;;  %v2474_v47 = vadd.f32 %v11649_v55, %v11647_v38  ;;  %v9129_v31 = vld [vmem:[%s9855_s12 + $0xf8] sm:$0xff]  }
 0x3ca   : > { %v8683_v21 = vpop.eup %8682  ;;  %5631 = vrot.lane.b32.xlu0 %v9125_v7, %s9504_s5  ;;  %v3665_v4 = vsel %vm920_vm2, %v3547_v49, 0  ;;  %v2455_v40 = vadd.f32 %v11569_v61, %v2454_v27  ;;  %v2465_v13 = vadd.f32 %v11609_v41, %v2464_v10  ;;  %v2484_v5 = vadd.f32 %v11697_v0, %v11695_v56  ;;  %v9127_v61 = vld [vmem:[%s9855_s12 + $0xb0] sm:$0xff]   ;;  %v9131_v27 = vld [vmem:[%s9855_s12 + $0x38] sm:$0xff]  }
 0x3cb   : > { %v11937_v8 = vpop.eup %8684  ;;  %3389 = vmatprep.mubr.bf16.mxu1 %v2887_v15  ;;  %v2529_v14 = vadd.f32 %v8683_v21, %v11919_v46  ;;  %3229 = vmatmul.mubr.bf16.gmra.mrb[120].mxu0 %v2884_v57  ;;  %v3563_v53 = vpop.permute.xlu0 %3562  ;;  %v11950_v58 = vadd.f32 %v11875_v11, %v2520_v43  ;;  %v2475_v0 = vadd.f32 %v11654_v45, %v2474_v47  ;;  %v15164_v7 = vld [vmem:[#allocation48_spill] sm:$0xff] }
 0x3cc   : > { %v8687_v2 = vpop.eup %8686  ;;  %5583 = vrot.lane.b32.xlu1 %v9126_v62, %s9504_s5  ;;  %3390 = vmatmul.mubr.bf16.gmra.mrb[120].mxu1 %v2886_v24  ;;  %v11959_v55 = vadd.f32 %v11574_v63, %v2455_v40  ;;  %v11962_v11 = vadd.f32 %v11614_v22, %v2465_v13  ;;  %v2485_v24 = vadd.f32 %v11703_v6, %v2484_v5 }
 0x3cd   : > { %v8689_v50 = vpop.eup %8688  ;;  %8183 = vmatprep.subr.msk.bf16.mxu0 %vm920_vm2, %v3563_v53  ;;  %v2530_v42 = vadd.f32 %v11937_v8, %v2529_v14  ;;  %v3579_v41 = vpop.permute.xlu1 %3578  ;;  %v2494_v22 = vadd.f32 %v11744_v35, %v11742_v32  ;;  %v2504_v19 = vadd.f32 %v11793_v48, %v11791_v36  ;;  %v11978_v45 = vadd.f32 %v11660_v37, %v2475_v0 }
 0x3ce   : > { %v8691_v57 = vpop.eup %8690  ;;  %5615 = vrot.lane.b32.xlu0 %v9127_v61, %s9504_s5  ;;  %7854 = vmatpush3.bf16.xpose.msra.mxu0 %v3665_v4  ;;  %v2888_v38 = vpack.c.bf16 %v8689_v50, %v11919_v46  ;;  %v3713_v59 = vsel %vm920_vm2, %v3579_v41, 0  ;;  %v2514_v15 = vadd.f32 %v11842_v30, %v11840_v17  ;;  %v11985_v32 = vadd.f32 %v11709_v28, %v2485_v24  ;;  %v15166_v41 = vld [vmem:[#allocation31_spill] sm:$0xff] }
 0x3cf   : > { %v8693_v1 = vpop.eup %8692  ;;  %v2889_v18 = vpack.c.bf16 %v8691_v57, %v8683_v21  ;;  %v11965_v56 = vadd.f32 %v8687_v2, %v2530_v42  ;;  %v3595_v39 = vpop.permute.xlu0 %3594  ;;  %v2495_v35 = vadd.f32 %v11750_v16, %v2494_v22  ;;  %v2505_v36 = vadd.f32 %v11799_v3, %v2504_v19  ;;  %v9130_v21 = vld [vmem:[%s9855_s12 + $0xb8] sm:$0xff]   ;;  %v15171_v24 = vld [vmem:[#allocation35_spill] sm:$0xff]  ;;  %v15172_v19 = vld [vmem:[#allocation42_spill] sm:$0xff] }
 0x3d0   : > { %v8695_v33 = vpop.eup %8694  ;;  %5601 = vrot.lane.b32.xlu1 %v9128_v51, %s9504_s5  ;;  %v2890_v63 = vpack.c.bf16 %v8693_v1, %v11937_v8  ;;  %8191 = vmatprep.subr.msk.bf16.mxu1 %vm920_vm2, %v3595_v39  ;;  %v2515_v48 = vadd.f32 %v11848_v20, %v2514_v15  ;;  %v2524_v17 = vadd.f32 %v11891_v44, %v11885_v52  ;;  %v15165_v16 = vld [vmem:[#allocation49_spill] sm:$0xff]  ;;  %v15173_v15 = vld [vmem:[#allocation44_spill] sm:$0xff] }
 0x3d1   : > { %3236 = vmatprep.mubr.bf16.mxu0 %v2889_v18  ;;  %v2891_v46 = vpack.c.bf16 %v8695_v33, %v8687_v2  ;;  %7902 = vmatpush3.bf16.xpose.msra.mxu1 %v3713_v59  ;;  %v3549_v6 = vpop.permute.xlu1 %3548  ;;  %v2534_v30 = vadd.f32 %v8691_v57, %v8689_v50  ;;  %v11996_v49 = vadd.f32 %v15164_v7, %v2495_v35  ;;  %v15168_v59 = vld [vmem:[#allocation32_spill] sm:$0xff]  ;;  %v15170_v39 = vld [vmem:[#allocation33_spill] sm:$0xff]  ;;  %v15179_v7 = vld [vmem:[#allocation47_spill] sm:$0xff] }
 0x3d2   : > { %5633 = vrot.lane.b32.xlu0 %v9129_v31, %s9504_s5  ;;  %v3668_v37 = vsel %vm920_vm2, %v3549_v6, 0  ;;  %v11999_v3 = vadd.f32 %v15165_v16, %v2505_v36  ;;  %v12003_v20 = vadd.f32 %v11854_v12, %v2515_v48  ;;  %v2525_v52 = vadd.f32 %v11899_v26, %v2524_v17  ;;  %v15174_v6 = vld [vmem:[#allocation43_spill] sm:$0xff]  ;;  %v15175_v36 = vld [vmem:[#allocation46_spill] sm:$0xff]  ;;  %v15176_v48 = vld [vmem:[#allocation45_spill] sm:$0xff] }
 0x3d3   : > { %3397 = vmatprep.mubr.bf16.mxu1 %v2891_v46  ;;  %3237 = vmatmul.mubr.bf16.gmra.mrb[124].mxu0 %v2888_v38  ;;  %v3565_v28 = vpop.permute.xlu0 %3564  ;;  %v2535_v44 = vadd.f32 %v8693_v1, %v2534_v30  ;;  %v15167_v1 = vld [vmem:[#allocation30_spill] sm:$0xff] }
 0x3d4   : > { %5617 = vrot.lane.b32.xlu1 %v9130_v21, %s9504_s5  ;;  %3398 = vmatmul.mubr.bf16.gmra.mrb[124].mxu1 %v2890_v63  ;;  %v12010_v4 = vadd.f32 %v11906_v34, %v2525_v52  ;;  %v15177_v30 = vld [vmem:[#allocation38_spill] sm:$0xff]  ;;  %v15178_v21 = vld [vmem:[#allocation37_spill] sm:$0xff] }
 0x3d5   : > { %8184 = vmatprep.subr.msk.bf16.mxu0 %vm920_vm2, %v3565_v28  ;;  %v3581_v10 = vpop.permute.xlu1 %3580  ;;  %v12012_v43 = vadd.f32 %v8695_v33, %v2535_v44  ;;  %v15169_v33 = vld [vmem:[#allocation34_spill] sm:$0xff]  ;;  %v2434_v28 = vadd.f32 %v15178_v21, %v15177_v30  ;;  %v15181_v44 = vld [vmem:[#allocation36_spill] sm:$0xff]  ;;  %v2605_v30 = vld [vmem:[#allocation4 + $0x8] sm:$0xff] }
 0x3d6   : > { %5585 = vrot.lane.b32.xlu0 %v9131_v27, %s9504_s5  ;;  %7856 = vmatpush3.bf16.xpose.msra.mxu0 %v3668_v37  ;;  %v3716_v8 = vsel %vm920_vm2, %v3581_v10, 0  ;;  %v15180_v52 = vld [vmem:[#allocation50_spill] sm:$0xff]  ;;  %v2431_v27 = vadd.f32 %v15181_v44, %v11838_v23  ;;  %v15182_v10 = vld [vmem:[#allocation39_spill] sm:$0xff] }
 0x3d7   : > { %v3597_v14 = vpop.permute.xlu0 %3596 }
 0x3d8   : > { %8192 = vmatprep.subr.msk.bf16.mxu1 %vm920_vm2, %v3597_v14 }
 0x3d9   : > { %7904 = vmatpush3.bf16.xpose.msra.mxu1 %v3716_v8  ;;  %v3503_v12 = vpop.permute.xlu1 %3502  ;;  %v2435_v8 = vadd.f32 %v15182_v10, %v2434_v28 }
 0x3da   : > { %7857 = vmatprep.mubr.msk.bf16.mxu0 %vm920_vm2, %v3503_v12  ;;  %7905 = vmatprep.mubr.msk.bf16.mxu1 %vm920_vm2, %v3503_v12 }
 0x3db   : > { %v3505_v26 = vpop.permute.xlu0 %3504 }
 0x3dd   : > { %7858 = vmatmul.mubr.msk.bf16.vlgmr.msra.gmra.mrb[128].mxu0 %vm920_vm2, %v3503_v12  ;;  %v12018_v2 = vpop.permute.xlu1 %3514 }
 0x3de   : > { %7859 = vmatprep.mubr.msk.bf16.mxu0 %vm920_vm2, %v3505_v26 }
 0x3df   : > { %v3507_v34 = vpop.permute.xlu0 %3506 }
 0x3e0   : > { %7906 = vmatmul.mubr.msk.bf16.vlgmr.msra.gmra.mrb[128].mxu1 %vm920_vm2, %v3503_v12  ;;  %v15183_v12 = vld [vmem:[#allocation51_spill] sm:$0xff] }
 0x3e1   : > { %v12022_v62 = vpop.permute.xlu1 %3518  ;;  %7907 = vmatprep.mubr.msk.bf16.mxu1 %vm920_vm2, %v3505_v26 }
 0x3e3   : > { %v3509_v53 = vpop.permute.xlu0 %3508 }
 0x3e5   : > { %7860 = vmatmul.mubr.msk.bf16.gmra.mrb[132].mxu0 %vm920_vm2, %v3505_v26  ;;  %v12026_v40 = vpop.permute.xlu1 %3520 }
 0x3e6   : > { %7861 = vmatprep.mubr.msk.bf16.mxu0 %vm920_vm2, %v3507_v34 }
 0x3e7   : > { %v3511_v13 = vpop.permute.xlu0 %3510 }
 0x3e8   : > { %7908 = vmatmul.mubr.msk.bf16.gmra.mrb[132].mxu1 %vm920_vm2, %v3505_v26 }
 0x3e9   : > { %v12030_v47 = vpop.permute.xlu1 %3522  ;;  %7909 = vmatprep.mubr.msk.bf16.mxu1 %vm920_vm2, %v3507_v34 }
 0x3eb   : > { %v3513_v50 = vpop.permute.xlu0 %3512 }
 0x3ed   : > { %7862 = vmatmul.mubr.msk.bf16.gmra.mrb[136].mxu0 %vm920_vm2, %v3507_v34  ;;  %v12034_v42 = vpop.permute.xlu1 %3532 }
 0x3ee   : > { %7863 = vmatprep.mubr.msk.bf16.mxu0 %vm920_vm2, %v3509_v53 }
 0x3ef   : > { %v12037_v5 = vpop.permute.xlu0 %3516 }
 0x3f0   : > { %7910 = vmatmul.mubr.msk.bf16.gmra.mrb[136].mxu1 %vm920_vm2, %v3507_v34  ;;  %v15184_v34 = vld [vmem:[#allocation40_spill] sm:$0xff] }
 0x3f1   : > { %7911 = vmatprep.mubr.msk.bf16.mxu1 %vm920_vm2, %v3509_v53 }
 0x3f2   : > { %v12041_v57 = vpop.permute.xlu1 %2638 }
 0x3f3   : > { %v12043_v61 = vpop.permute.xlu0 %3524 }
 0x3f5   : > { %2387 = vadd.xlane.f32.xlu0 %v15166_v41  ;;  %7864 = vmatmul.mubr.msk.bf16.gmra.mrb[140].mxu0 %vm920_vm2, %v3509_v53 }
 0x3f6   : > { %7865 = vmatprep.mubr.msk.bf16.mxu0 %vm920_vm2, %v3511_v13  ;;  %v12048_v38 = vpop.permute.xlu1 %2648 }
 0x3f7   : > { %v12051_v18 = vpop.permute.xlu0 %3526 }
 0x3f8   : > { %2382 = vadd.xlane.f32.xlu1 %v15167_v1  ;;  %7912 = vmatmul.mubr.msk.bf16.gmra.mrb[140].mxu1 %vm920_vm2, %v3509_v53  ;;  %v2436_v53 = vadd.f32 %v15184_v34, %v2435_v8 }
 0x3f9   : > { %2397 = vadd.xlane.f32.xlu0 %v15168_v59  ;;  %7913 = vmatprep.mubr.msk.bf16.mxu1 %vm920_vm2, %v3511_v13 }
 0x3fa   : > { %v12056_v0 = vpop.permute.xlu1 %2653 }
 0x3fb   : > { %v12059_v51 = vpop.permute.xlu0 %3528 }
 0x3fc   : > { %2392 = vadd.xlane.f32.xlu1 %v15169_v33 }
 0x3fd   : > { %2407 = vadd.xlane.f32.xlu0 %v15170_v39  ;;  %7866 = vmatmul.mubr.msk.bf16.gmra.mrb[144].mxu0 %vm920_vm2, %v3511_v13 }
 0x3fe   : > { %7867 = vmatprep.mubr.msk.bf16.mxu0 %vm920_vm2, %v3513_v50  ;;  %v12064_v63 = vpop.permute.xlu1 %2663 }
 0x3ff   : > { %v12067_v22 = vpop.permute.xlu0 %3530 }
 0x400   : > { %2402 = vadd.xlane.f32.xlu1 %v15171_v24  ;;  %7914 = vmatmul.mubr.msk.bf16.gmra.mrb[144].mxu1 %vm920_vm2, %v3511_v13  ;;  %v2604_v24 = vld [vmem:[#allocation4] sm:$0xff] }
 0x401   : > { %2412 = vadd.xlane.f32.xlu0 %v15172_v19  ;;  %7915 = vmatprep.mubr.msk.bf16.mxu1 %vm920_vm2, %v3513_v50 }
 0x402   : > { %v12072_v46 = vpop.permute.xlu1 %2673 }
 0x404   : > { %2452 = vadd.xlane.f32.xlu1 %v15173_v15  ;;  %v12075_v31 = vpop.permute.xlu0 %2643 }
 0x405   : > { %2417 = vadd.xlane.f32.xlu0 %v15174_v6  ;;  %7868 = vmatmul.mubr.msk.bf16.gmra.mrb[148].mxu0 %vm920_vm2, %v3513_v50 }
 0x406   : > { %7869 = vmatprep.mubr.msk.bf16.mxu0 %vm920_vm2, %v12018_v2  ;;  %v12081_v35 = vpop.permute.xlu1 %2683 }
 0x408   : > { %2462 = vadd.xlane.f32.xlu1 %v15175_v36  ;;  %v12084_v37 = vpop.permute.xlu0 %2658  ;;  %7916 = vmatmul.mubr.msk.bf16.gmra.mrb[148].mxu1 %vm920_vm2, %v3513_v50 }
 0x409   : > { %2422 = vadd.xlane.f32.xlu0 %v15176_v48  ;;  %7917 = vmatprep.mubr.msk.bf16.mxu1 %vm920_vm2, %v12018_v2 }
 0x40a   : > { %v12090_v17 = vpop.permute.xlu1 %2693 }
 0x40c   : > { %2472 = vadd.xlane.f32.xlu1 %v15179_v7  ;;  %v12095_v16 = vpop.permute.xlu0 %2668  ;;  %v2796_v7 = vmul.f32 %v12041_v57, %v2604_v24  ;;  %v2608_v24 = vld [vmem:[#allocation4 + $0x20] sm:$0xff] }
 0x40d   : > { %2427 = vadd.xlane.f32.xlu0 %v15180_v52  ;;  %7870 = vmatmul.mubr.msk.bf16.gmra.mrb[152].mxu0 %vm920_vm2, %v12018_v2 }
 0x40e   : > { %7871 = vmatprep.mubr.msk.bf16.mxu0 %vm920_vm2, %v12037_v5  ;;  %v5588_v14 = vpop.permute.xlu1 %5587 }
 0x40f   : > { %7937 = vmatprep.subr.bf16.mxu0 %v5588_v14 }
 0x410   : > { %2482 = vadd.xlane.f32.xlu1 %v15183_v12  ;;  %v12106_v26 = vpop.permute.xlu0 %2678  ;;  %7918 = vmatmul.mubr.msk.bf16.gmra.mrb[152].mxu1 %vm920_vm2, %v12018_v2 }
 0x411   : > { %2432 = vadd.xlane.f32.xlu0 %v2431_v27  ;;  %7919 = vmatprep.mubr.msk.bf16.mxu1 %vm920_vm2, %v12037_v5 }
 0x412   : > { %v5620_v13 = vpop.permute.xlu1 %5619 }
 0x413   : > { %8049 = vmatprep.subr.bf16.mxu1 %v5620_v13  ;;  %v2606_v13 = vld [vmem:[#allocation4 + $0x10] sm:$0xff] }
 0x414   : > { %2492 = vadd.xlane.f32.xlu1 %v11904_v54  ;;  %v12114_v23 = vpop.permute.xlu0 %2688  ;;  %v15185_v54 = vld [vmem:[#allocation41_spill] sm:$0xff] }
 0x415   : > { %2437 = vadd.xlane.f32.xlu0 %v2436_v53  ;;  %7872 = vmatmul.mubr.msk.bf16.gmra.mrb[156].mxu0 %vm920_vm2, %v12037_v5  ;;  %v2446_v41 = vadd.f32 %v15185_v54, %v11925_v60 }
 0x416   : > { %7873 = vmatprep.mubr.msk.bf16.mxu0 %vm920_vm2, %v12022_v62  ;;  %v5572_v50 = vpop.permute.xlu1 %5571 }
 0x417   : > { %7938 = vmatpush3.bf16.msra.mxu0 %v5572_v50 }
 0x418   : > { %2502 = vadd.xlane.f32.xlu1 %v11913_v25  ;;  %v12121_v2 = vpop.permute.xlu0 %2698  ;;  %7920 = vmatmul.mubr.msk.bf16.gmra.mrb[156].mxu1 %vm920_vm2, %v12037_v5 }
 0x419   : > { %2442 = vadd.xlane.f32.xlu0 %v11916_v29  ;;  %7921 = vmatprep.mubr.msk.bf16.mxu1 %vm920_vm2, %v12022_v62 }
 0x41a   : > { %v5590_v1 = vpop.permute.xlu1 %5589 }
 0x41b   : > { %7939 = vmatprep.subr.bf16.mxu0 %v5590_v1 }
 0x41c   : > { %2512 = vadd.xlane.f32.xlu1 %v11931_v9  ;;  %v12131_v59 = vpop.permute.xlu0 %2703 }
 0x41d   : > { %2447 = vadd.xlane.f32.xlu0 %v2446_v41  ;;  %7874 = vmatmul.mubr.msk.bf16.gmra.mrb[160].mxu0 %vm920_vm2, %v12022_v62 }
 0x41e   : > { %7875 = vmatprep.mubr.msk.bf16.mxu0 %vm920_vm2, %v12026_v40  ;;  %v5622_v25 = vpop.permute.xlu1 %5621 }
 0x420   : > { %2522 = vadd.xlane.f32.xlu1 %v11950_v58  ;;  %7922 = vmatmul.mubr.msk.bf16.gmra.mrb[160].mxu1 %vm920_vm2, %v12022_v62  ;;  %v5604_v29 = vpop.permute.xlu0 %5603 }
 0x421   : > { %2457 = vadd.xlane.f32.xlu0 %v11959_v55  ;;  %7923 = vmatprep.mubr.msk.bf16.mxu1 %vm920_vm2, %v12026_v40 }
 0x422   : > { %8050 = vmatpush3.bf16.msra.mxu1 %v5604_v29  ;;  %v5574_v60 = vpop.permute.xlu1 %5573  ;;  %v2607_v29 = vld [vmem:[#allocation4 + $0x18] sm:$0xff] }
 0x423   : > { %8051 = vmatprep.subr.bf16.mxu1 %v5622_v25  ;;  %7940 = vmatpush3.bf16.msra.mxu0 %v5574_v60 }
 0x424   : > { %2532 = vadd.xlane.f32.xlu1 %v11965_v56  ;;  %v5606_v9 = vpop.permute.xlu0 %5605 }
 0x425   : > { %2467 = vadd.xlane.f32.xlu0 %v11962_v11  ;;  %7876 = vmatmul.mubr.msk.bf16.gmra.mrb[164].mxu0 %vm920_vm2, %v12026_v40 }
 0x426   : > { %7877 = vmatprep.mubr.msk.bf16.mxu0 %vm920_vm2, %v12030_v47  ;;  %8052 = vmatpush3.bf16.msra.mxu1 %v5606_v9  ;;  %v5592_v58 = vpop.permute.xlu1 %5591 }
 0x427   : > { %7941 = vmatprep.subr.bf16.mxu0 %v5592_v58  ;;  %v2798_v58 = vmul.f32 %v12048_v38, %v2606_v13 }
 0x428   : > { %7924 = vmatmul.mubr.msk.bf16.gmra.mrb[164].mxu1 %vm920_vm2, %v12026_v40  ;;  %v5624_v55 = vpop.permute.xlu0 %5623 }
 0x429   : > { %2477 = vadd.xlane.f32.xlu0 %v11978_v45  ;;  %7925 = vmatprep.mubr.msk.bf16.mxu1 %vm920_vm2, %v12030_v47 }
 0x42a   : > { %8053 = vmatprep.subr.bf16.mxu1 %v5624_v55  ;;  %v5576_v11 = vpop.permute.xlu1 %5575 }
 0x42b   : > { %7942 = vmatpush3.bf16.msra.mxu0 %v5576_v11 }
 0x42c   : > { %v5608_v56 = vpop.permute.xlu0 %5607 }
 0x42d   : > { %2487 = vadd.xlane.f32.xlu0 %v11985_v32  ;;  %7878 = vmatmul.mubr.msk.bf16.gmra.mrb[168].mxu0 %vm920_vm2, %v12030_v47  ;;  %v7633_v62 = vpop.f32.mrb[64].mxu0 }
 0x42e   : > { %7879 = vmatprep.mubr.msk.bf16.mxu0 %vm920_vm2, %v12043_v61  ;;  %8054 = vmatpush3.bf16.msra.mxu1 %v5608_v56  ;;  %v7634_v45 = vpop.f32.mrb[65].mxu0  ;;  %v5594_v40 = vpop.permute.xlu1 %5593 }
 0x42f   : > { %v7745_v5 = vpop.f32.mrb[64].mxu1  ;;  %v7635_v33 = vadd.f32 %v7634_v45, %v7633_v62  ;;  %v7636_v39 = vpop.f32.mrb[66].mxu0  ;;  %7943 = vmatprep.subr.bf16.mxu0 %v5594_v40 }
 0x430   : > { %v7746_v19 = vpop.f32.mrb[65].mxu1  ;;  %v7637_v15 = vpop.f32.mrb[67].mxu0  ;;  %7926 = vmatmul.mubr.msk.bf16.gmra.mrb[168].mxu1 %vm920_vm2, %v12030_v47 }
 0x431   : > { %2497 = vadd.xlane.f32.xlu0 %v11996_v49  ;;  %v7747_v32 = vadd.f32 %v7746_v19, %v7745_v5  ;;  %v7748_v6 = vpop.f32.mrb[66].mxu1  ;;  %v7638_v36 = vadd.f32 %v7637_v15, %v7636_v39  ;;  %7927 = vmatprep.mubr.msk.bf16.mxu1 %vm920_vm2, %v12043_v61  ;;  %v5626_v48 = vpop.permute.xlu0 %5625  ;;  %v2797_v49 = vmul.f32 %v12075_v31, %v2605_v30 }
 0x432   : > { %v7749_v21 = vpop.f32.mrb[67].mxu1  ;;  %v5610_v28 = vpop.permute.xlu1 %5609  ;;  %8055 = vmatprep.subr.bf16.mxu1 %v5626_v48  ;;  %v2609_v48 = vld [vmem:[#allocation4 + $0x28] sm:$0xff] }
 0x433   : > { %v3280_v52 = vadd.f32 %v7747_v32, %v7635_v33  ;;  %v7750_v44 = vadd.f32 %v7749_v21, %v7748_v6  ;;  %8056 = vmatpush3.bf16.msra.mxu1 %v5610_v28  ;;  %v2800_v28 = vmul.f32 %v12084_v37, %v2608_v24 }
 0x435   : > { %2507 = vadd.xlane.f32.xlu0 %v11999_v3  ;;  %7880 = vmatmul.mubr.msk.bf16.gmra.mrb[172].mxu0 %vm920_vm2, %v12043_v61  ;;  %v3406_v47 = vadd.f32 %v3280_v52, %v2796_v7  ;;  %v3283_v27 = vadd.f32 %v7750_v44, %v7638_v36  ;;  %v7639_v10 = vpop.f32.mrb[68].mxu0  ;;  %v5578_v8 = vpop.permute.xlu0 %5577 }
 0x436   : > { %7881 = vmatprep.mubr.msk.bf16.mxu0 %vm920_vm2, %v12051_v18  ;;  %v7640_v14 = vpop.f32.mrb[69].mxu0  ;;  %v5596_v12 = vpop.permute.xlu1 %5595  ;;  %7944 = vmatpush3.bf16.msra.mxu0 %v5578_v8 }
 0x437   : > { %3438 = vst.msk [vmem:[#allocation4] sm:$0xff] %vm920_vm2, %v3406_v47  ;;  %v3407_v57 = vadd.f32 %v3283_v27, %v2797_v49  ;;  %v7751_v34 = vpop.f32.mrb[68].mxu1  ;;  %v7641_v3 = vadd.f32 %v7640_v14, %v7639_v10  ;;  %v7642_v53 = vpop.f32.mrb[70].mxu0  ;;  %7945 = vmatprep.subr.bf16.mxu0 %v5596_v12 }
 0x438   : > { %v7752_v50 = vpop.f32.mrb[69].mxu1  ;;  %v7643_v31 = vpop.f32.mrb[71].mxu0  ;;  %7928 = vmatmul.mubr.msk.bf16.gmra.mrb[172].mxu1 %vm920_vm2, %v12043_v61  ;;  %v2799_v61 = vmul.f32 %v12056_v0, %v2607_v29 }
 0x439   : > { %2517 = vadd.xlane.f32.xlu0 %v12003_v20  ;;  %3439 = vst.msk [vmem:[#allocation4 + $0x8] sm:$0xff] %vm920_vm2, %v3407_v57  ;;  %v7753_v54 = vadd.f32 %v7752_v50, %v7751_v34  ;;  %v7754_v41 = vpop.f32.mrb[70].mxu1  ;;  %v7644_v1 = vadd.f32 %v7643_v31, %v7642_v53  ;;  %7929 = vmatprep.mubr.msk.bf16.mxu1 %vm920_vm2, %v12051_v18  ;;  %v5628_v25 = vpop.permute.xlu0 %5627  ;;  %v2610_v57 = vld [vmem:[#allocation4 + $0x30] sm:$0xff]  ;;  %v2611_v31 = vld [vmem:[#allocation4 + $0x38] sm:$0xff] }
 0x43a   : > { %v7755_v60 = vpop.f32.mrb[71].mxu1  ;;  %v5580_v9 = vpop.permute.xlu1 %5579  ;;  %8057 = vmatprep.subr.bf16.mxu1 %v5628_v25 }
 0x43b   : > { %v3288_v55 = vadd.f32 %v7753_v54, %v7641_v3  ;;  %v7756_v20 = vadd.f32 %v7755_v60, %v7754_v41  ;;  %7946 = vmatpush3.bf16.msra.mxu0 %v5580_v9 }
 0x43d   : > { %2527 = vadd.xlane.f32.xlu0 %v12010_v4  ;;  %7882 = vmatmul.mubr.msk.bf16.gmra.mrb[176].mxu0 %vm920_vm2, %v12051_v18  ;;  %v3408_v11 = vadd.f32 %v3288_v55, %v2798_v58  ;;  %v3291_v56 = vadd.f32 %v7756_v20, %v7644_v1  ;;  %v7645_v62 = vpop.f32.mrb[72].mxu0  ;;  %v5612_v45 = vpop.permute.xlu0 %5611  ;;  %v2802_v1 = vmul.f32 %v12095_v16, %v2610_v57 }
 0x43e   : > { %7883 = vmatprep.mubr.msk.bf16.mxu0 %vm920_vm2, %v12059_v51  ;;  %v7646_v40 = vpop.f32.mrb[73].mxu0  ;;  %v5598_v5 = vpop.permute.xlu1 %5597  ;;  %8058 = vmatpush3.bf16.msra.mxu1 %v5612_v45 }
 0x43f   : > { %3440 = vst.msk [vmem:[#allocation4 + $0x10] sm:$0xff] %vm920_vm2, %v3408_v11  ;;  %v3409_v38 = vadd.f32 %v3291_v56, %v2799_v61  ;;  %v7757_v33 = vpop.f32.mrb[72].mxu1  ;;  %v7647_v4 = vadd.f32 %v7646_v40, %v7645_v62  ;;  %v7648_v39 = vpop.f32.mrb[74].mxu0  ;;  %7947 = vmatprep.subr.bf16.mxu0 %v5598_v5  ;;  %v2612_v56 = vld [vmem:[#allocation4 + $0x40] sm:$0xff] }
 0x440   : > { %v7758_v19 = vpop.f32.mrb[73].mxu1  ;;  %v7649_v0 = vpop.f32.mrb[75].mxu0  ;;  %7930 = vmatmul.mubr.msk.bf16.gmra.mrb[176].mxu1 %vm920_vm2, %v12051_v18  ;;  %v2801_v18 = vmul.f32 %v12064_v63, %v2609_v48 }
 0x441   : > { %2537 = vadd.xlane.f32.xlu0 %v12012_v43  ;;  %3441 = vst.msk [vmem:[#allocation4 + $0x18] sm:$0xff] %vm920_vm2, %v3409_v38  ;;  %v7759_v15 = vadd.f32 %v7758_v19, %v7757_v33  ;;  %v7760_v32 = vpop.f32.mrb[74].mxu1  ;;  %v7650_v6 = vadd.f32 %v7649_v0, %v7648_v39  ;;  %7931 = vmatprep.mubr.msk.bf16.mxu1 %vm920_vm2, %v12059_v51  ;;  %v5630_v36 = vpop.permute.xlu0 %5629  ;;  %v2613_v33 = vld [vmem:[#allocation4 + $0x48] sm:$0xff] }
 0x442   : > { %v7761_v30 = vpop.f32.mrb[75].mxu1  ;;  %v5614_v21 = vpop.permute.xlu1 %5613  ;;  %8059 = vmatprep.subr.bf16.mxu1 %v5630_v36  ;;  %v2804_v19 = vmul.f32 %v12106_v26, %v2612_v56  ;;  %v2614_v26 = vld [vmem:[#allocation4 + $0x50] sm:$0xff] }
 0x443   : > { %v3296_v7 = vadd.f32 %v7759_v15, %v7647_v4  ;;  %v7762_v43 = vadd.f32 %v7761_v30, %v7760_v32  ;;  %8060 = vmatpush3.bf16.msra.mxu1 %v5614_v21 }
 0x445   : > { %7884 = vmatmul.mubr.msk.bf16.gmra.mrb[180].mxu0 %vm920_vm2, %v12059_v51  ;;  %v3410_v52 = vadd.f32 %v3296_v7, %v2800_v28  ;;  %v3299_v44 = vadd.f32 %v7762_v43, %v7650_v6  ;;  %v7651_v49 = vpop.f32.mrb[76].mxu0  ;;  %v5582_v47 = vpop.permute.xlu0 %5581 }
 0x446   : > { %7885 = vmatprep.mubr.msk.bf16.mxu0 %vm920_vm2, %v12067_v22  ;;  %v7652_v27 = vpop.f32.mrb[77].mxu0  ;;  %v5600_v10 = vpop.permute.xlu1 %5599  ;;  %7948 = vmatpush3.bf16.msra.mxu0 %v5582_v47  ;;  %v2615_v47 = vld [vmem:[#allocation4 + $0x58] sm:$0xff] }
 0x447   : > { %3442 = vst.msk [vmem:[#allocation4 + $0x20] sm:$0xff] %vm920_vm2, %v3410_v52  ;;  %v3411_v37 = vadd.f32 %v3299_v44, %v2801_v18  ;;  %v7763_v8 = vpop.f32.mrb[76].mxu1  ;;  %v7653_v14 = vadd.f32 %v7652_v27, %v7651_v49  ;;  %v7654_v12 = vpop.f32.mrb[78].mxu0  ;;  %7949 = vmatprep.subr.bf16.mxu0 %v5600_v10 }
 0x448   : > { %v7764_v34 = vpop.f32.mrb[77].mxu1  ;;  %v7655_v63 = vpop.f32.mrb[79].mxu0  ;;  %7932 = vmatmul.mubr.msk.bf16.gmra.mrb[180].mxu1 %vm920_vm2, %v12059_v51  ;;  %v2803_v51 = vmul.f32 %v12072_v46, %v2611_v31 }
 0x449   : > { %3443 = vst.msk [vmem:[#allocation4 + $0x28] sm:$0xff] %vm920_vm2, %v3411_v37  ;;  %v7765_v3 = vadd.f32 %v7764_v34, %v7763_v8  ;;  %v7766_v53 = vpop.f32.mrb[78].mxu1  ;;  %v7656_v13 = vadd.f32 %v7655_v63, %v7654_v12  ;;  %7933 = vmatprep.mubr.msk.bf16.mxu1 %vm920_vm2, %v12067_v22  ;;  %v5632_v50 = vpop.permute.xlu0 %5631  ;;  %v2806_v37 = vmul.f32 %v12114_v23, %v2614_v26 }
 0x44a   : > { %v7767_v54 = vpop.f32.mrb[79].mxu1  ;;  %v5584_v41 = vpop.permute.xlu1 %5583  ;;  %8061 = vmatprep.subr.bf16.mxu1 %v5632_v50  ;;  %v2807_v12 = vmul.f32 %v12090_v17, %v2615_v47 }
 0x44b   : > { %v3304_v25 = vadd.f32 %v7765_v3, %v7653_v14  ;;  %v7768_v29 = vadd.f32 %v7767_v54, %v7766_v53  ;;  %7950 = vmatpush3.bf16.msra.mxu0 %v5584_v41 }
 0x44d   : > { %7886 = vmatmul.mubr.msk.bf16.gmra.mrb[184].mxu0 %vm920_vm2, %v12067_v22  ;;  %v3412_v60 = vadd.f32 %v3304_v25, %v2802_v1  ;;  %v3307_v9 = vadd.f32 %v7768_v29, %v7656_v13  ;;  %v5616_v58 = vpop.permute.xlu0 %5615  ;;  %v2616_v13 = vld [vmem:[#allocation4 + $0x60] sm:$0xff]  ;;  %v2617_v25 = vld [vmem:[#allocation4 + $0x68] sm:$0xff] }
 0x44e   : > { %7887 = vmatprep.mubr.msk.bf16.mxu0 %vm920_vm2, %v12034_v42  ;;  %v7657_v55 = vpop.f32.mrb[80].mxu0  ;;  %v5602_v20 = vpop.permute.xlu1 %5601  ;;  %8062 = vmatpush3.bf16.msra.mxu1 %v5616_v58  ;;  %v2809_v58 = vmul.f32 %v12131_v59, %v2617_v25 }
 0x44f   : > { %3444 = vst.msk [vmem:[#allocation4 + $0x30] sm:$0xff] %vm920_vm2, %v3412_v60  ;;  %v3413_v16 = vadd.f32 %v3307_v9, %v2803_v51  ;;  %v7769_v61 = vpop.f32.mrb[80].mxu1  ;;  %v7658_v11 = vpop.f32.mrb[81].mxu0  ;;  %7951 = vmatprep.subr.bf16.mxu0 %v5602_v20  ;;  %v2808_v51 = vmul.f32 %v12121_v2, %v2616_v13 }
 0x450   : > { %v7659_v62 = vadd.f32 %v7658_v11, %v7657_v55  ;;  %v7770_v45 = vpop.f32.mrb[81].mxu1  ;;  %v7660_v40 = vpop.f32.mrb[82].mxu0  ;;  %7934 = vmatmul.mubr.msk.bf16.gmra.mrb[184].mxu1 %vm920_vm2, %v12067_v22  ;;  %v2805_v22 = vmul.f32 %v12081_v35, %v2613_v33 }
 0x451   : > { %3445 = vst.msk [vmem:[#allocation4 + $0x38] sm:$0xff] %vm920_vm2, %v3413_v16  ;;  %v7771_v46 = vadd.f32 %v7770_v45, %v7769_v61  ;;  %v7772_v5 = vpop.f32.mrb[82].mxu1  ;;  %v7661_v38 = vpop.f32.mrb[83].mxu0  ;;  %7935 = vmatprep.mubr.msk.bf16.mxu1 %vm920_vm2, %v12034_v42 }
 0x452   : > { %v7662_v4 = vadd.f32 %v7661_v38, %v7660_v40  ;;  %v7773_v39 = vpop.f32.mrb[83].mxu1  ;;  %v5634_v24 = vpop.permute.xlu0 %5633 }
 0x453   : > { %v3312_v0 = vadd.f32 %v7771_v46, %v7659_v62  ;;  %v7774_v15 = vadd.f32 %v7773_v39, %v7772_v5  ;;  %v5618_v32 = vpop.permute.xlu1 %5617  ;;  %8063 = vmatprep.subr.bf16.mxu1 %v5634_v24 }
 0x454   : > { %8064 = vmatpush3.bf16.msra.mxu1 %v5618_v32 }
 0x455   : > { %7888 = vmatmul.mubr.msk.bf16.gmra.mrb[188].mxu0 %vm920_vm2, %v12034_v42  ;;  %v3414_v6 = vadd.f32 %v3312_v0, %v2804_v19  ;;  %v3315_v36 = vadd.f32 %v7774_v15, %v7662_v4 }
 0x456   : > { %v7663_v48 = vpop.f32.mrb[84].mxu0  ;;  %v5586_v30 = vpop.permute.xlu0 %5585 }
 0x457   : > { %3446 = vst.msk [vmem:[#allocation4 + $0x40] sm:$0xff] %vm920_vm2, %v3414_v6  ;;  %v3415_v21 = vadd.f32 %v3315_v36, %v2805_v22  ;;  %v7775_v28 = vpop.f32.mrb[84].mxu1  ;;  %v7664_v7 = vpop.f32.mrb[85].mxu0  ;;  %7952 = vmatpush3.bf16.msra.mxu0 %v5586_v30 }
 0x458   : > { %v7665_v43 = vadd.f32 %v7664_v7, %v7663_v48  ;;  %v7776_v18 = vpop.f32.mrb[85].mxu1  ;;  %v7666_v52 = vpop.f32.mrb[86].mxu0  ;;  %7936 = vmatmul.mubr.msk.bf16.gmra.mrb[188].mxu1 %vm920_vm2, %v12034_v42 }
 0x459   : > { %3447 = vst.msk [vmem:[#allocation4 + $0x48] sm:$0xff] %vm920_vm2, %v3415_v21  ;;  %v7777_v35 = vadd.f32 %v7776_v18, %v7775_v28  ;;  %v7778_v44 = vpop.f32.mrb[86].mxu1  ;;  %v7667_v49 = vpop.f32.mrb[87].mxu0 }
 0x45a   : > { %v7668_v27 = vadd.f32 %v7667_v49, %v7666_v52  ;;  %v7779_v10 = vpop.f32.mrb[87].mxu1 }
 0x45b   : > { %v3320_v8 = vadd.f32 %v7777_v35, %v7665_v43  ;;  %v7780_v14 = vadd.f32 %v7779_v10, %v7778_v44 }
 0x45d   : > { %v3416_v57 = vadd.f32 %v3320_v8, %v2806_v37  ;;  %v3323_v34 = vadd.f32 %v7780_v14, %v7668_v27 }
 0x45e   : > { %v7669_v63 = vpop.f32.mrb[88].mxu0 }
 0x45f   : > { %3448 = vst.msk [vmem:[#allocation4 + $0x50] sm:$0xff] %vm920_vm2, %v3416_v57  ;;  %v3417_v42 = vadd.f32 %v3323_v34, %v2807_v12  ;;  %v7781_v3 = vpop.f32.mrb[88].mxu1  ;;  %v7670_v53 = vpop.f32.mrb[89].mxu0 }
 0x460   : > { %v7671_v50 = vadd.f32 %v7670_v53, %v7669_v63  ;;  %v7782_v31 = vpop.f32.mrb[89].mxu1  ;;  %v7672_v54 = vpop.f32.mrb[90].mxu0  ;;  %v2316_v63 = vld [vmem:[#allocation3 + $0x8] sm:$0xff] }
 0x461   : > { %3449 = vst.msk [vmem:[#allocation4 + $0x58] sm:$0xff] %vm920_vm2, %v3417_v42  ;;  %v7783_v41 = vadd.f32 %v7782_v31, %v7781_v3  ;;  %v7784_v23 = vpop.f32.mrb[90].mxu1  ;;  %v7673_v1 = vpop.f32.mrb[91].mxu0  ;;  %v2315_v31 = vld [vmem:[#allocation3] sm:$0xff] }
 0x462   : > { %v7674_v29 = vadd.f32 %v7673_v1, %v7672_v54  ;;  %v7785_v17 = vpop.f32.mrb[91].mxu1  ;;  %v15192_v54 = vld [vmem:[#allocation132_spill] sm:$0xff] }
 0x463   : > { %v3328_v60 = vadd.f32 %v7783_v41, %v7671_v50  ;;  %v7786_v9 = vadd.f32 %v7785_v17, %v7784_v23  ;;  %v15193_v41 = vld [vmem:[#allocation134_spill] sm:$0xff] }
 0x464   : > { %v15194_v23 = vsub.f32 %v15192_v54, %v15193_v41  ;;  %v15209_v54 = vld [vmem:[#allocation144_spill] sm:$0xff]  ;;  %v15210_v41 = vld [vmem:[#allocation146_spill] sm:$0xff] }
 0x465   : > { %v3418_v55 = vadd.f32 %v3328_v60, %v2808_v51  ;;  %v3331_v20 = vadd.f32 %v7786_v9, %v7674_v29  ;;  %v15195_v51 = vld [vmem:[#allocation169_spill] sm:$0xff] }
 0x466   : > { %v7675_v16 = vpop.f32.mrb[92].mxu0  ;;  %v1735_v1 = vmul.f32 1.442695, %v15194_v23  ;;  %v2348_v60 = vmul.f32 %v15195_v51, %v2316_v63  ;;  %v2318_v9 = vld [vmem:[#allocation3 + $0x18] sm:$0xff]  ;;  %v2319_v63 = vld [vmem:[#allocation3 + $0x20] sm:$0xff]  ;;  %v15211_v23 = vsub.f32 %v15209_v54, %v15210_v41  ;;  %v2333_v54 = vld [vmem:[#allocation3 + $0x90] sm:$0xff] }
 0x467   : > { %3450 = vst.msk [vmem:[#allocation4 + $0x60] sm:$0xff] %vm920_vm2, %v3418_v55  ;;  %v3419_v61 = vadd.f32 %v3331_v20, %v2809_v58  ;;  %v7787_v11 = vpop.f32.mrb[92].mxu1  ;;  %v7676_v56 = vpop.f32.mrb[93].mxu0 }
 0x468   : > { %v7677_v62 = vadd.f32 %v7676_v56, %v7675_v16  ;;  %v7788_v45 = vpop.f32.mrb[93].mxu1  ;;  %v7678_v40 = vpop.f32.mrb[94].mxu0  ;;  %v15197_v56 = vld [vmem:[#allocation168_spill] sm:$0xff]  ;;  %8696 = vpow2.f32 %v1735_v1  ;;  %v1747_v1 = vmul.f32 1.442695, %v15211_v23 }
 0x469   : > { %3451 = vst.msk [vmem:[#allocation4 + $0x68] sm:$0xff] %vm920_vm2, %v3419_v61  ;;  %v7789_v46 = vadd.f32 %v7788_v45, %v7787_v11  ;;  %v7790_v5 = vpop.f32.mrb[94].mxu1  ;;  %v7679_v2 = vpop.f32.mrb[95].mxu0 }
 0x46a   : > { %v7680_v38 = vadd.f32 %v7679_v2, %v7678_v40  ;;  %v7791_v33 = vpop.f32.mrb[95].mxu1  ;;  %v15198_v40 = vld [vmem:[#allocation171_spill] sm:$0xff]  ;;  %v15200_v2 = vld [vmem:[#allocation138_spill] sm:$0xff] }
 0x46b   : > { %v12232_v4 = vadd.f32 %v7789_v46, %v7677_v62  ;;  %v7792_v59 = vadd.f32 %v7791_v33, %v7790_v5  ;;  %v2347_v62 = vmul.f32 %v15197_v56, %v2315_v31  ;;  %v2350_v46 = vmul.f32 %v15198_v40, %v2318_v9  ;;  %v15199_v5 = vld [vmem:[#allocation136_spill] sm:$0xff]  ;;  %v15214_v9 = vld [vmem:[#allocation174_spill] sm:$0xff] }
 0x46c   : > { %v2329_v56 = vld [vmem:[#allocation3 + $0x70] sm:$0xff] }
 0x46d   : > { %15186 = vst [vmem:[#allocation52_spill] sm:$0xff] %v12232_v4  ;;  %v12234_v39 = vadd.f32 %v7792_v59, %v7680_v38  ;;  %v15201_v38 = vsub.f32 %v15199_v5, %v15200_v2  ;;  %v15216_v5 = vld [vmem:[#allocation148_spill] sm:$0xff]  ;;  %v15217_v2 = vld [vmem:[#allocation150_spill] sm:$0xff] }
 0x46e   : > { %v7681_v24 = vpop.f32.mrb[96].mxu0 }
 0x46f   : > { %15187 = vst [vmem:[#allocation54_spill] sm:$0xff] %v12234_v39  ;;  %v7793_v19 = vpop.f32.mrb[96].mxu1  ;;  %v7682_v0 = vpop.f32.mrb[97].mxu0  ;;  %v1739_v33 = vmul.f32 1.442695, %v15201_v38  ;;  %v15218_v38 = vsub.f32 %v15216_v5, %v15217_v2 }
 0x470   : > { %v7683_v15 = vadd.f32 %v7682_v0, %v7681_v24  ;;  %v7794_v32 = vpop.f32.mrb[97].mxu1  ;;  %v7684_v22 = vpop.f32.mrb[98].mxu0 }
 0x471   : > { %v7795_v6 = vadd.f32 %v7794_v32, %v7793_v19  ;;  %v7796_v36 = vpop.f32.mrb[98].mxu1  ;;  %v7685_v48 = vpop.f32.mrb[99].mxu0  ;;  %8698 = vpow2.f32 %v1739_v33  ;;  %v1751_v33 = vmul.f32 1.442695, %v15218_v38 }
 0x472   : > { %v7686_v30 = vadd.f32 %v7685_v48, %v7684_v22  ;;  %v7797_v21 = vpop.f32.mrb[99].mxu1 }
 0x473   : > { %v12236_v28 = vadd.f32 %v7795_v6, %v7683_v15  ;;  %v7798_v7 = vadd.f32 %v7797_v21, %v7796_v36  ;;  %v2317_v15 = vld [vmem:[#allocation3 + $0x10] sm:$0xff]  ;;  %v2320_v36 = vld [vmem:[#allocation3 + $0x28] sm:$0xff] }
 0x475   : > { %15188 = vst [vmem:[#allocation53_spill] sm:$0xff] %v12236_v28  ;;  %v12238_v26 = vadd.f32 %v7798_v7, %v7686_v30  ;;  %v15203_v7 = vld [vmem:[#allocation140_spill] sm:$0xff] }
 0x476   : > { %v7687_v43 = vpop.f32.mrb[100].mxu0 }
 0x477   : > { %15189 = vst [vmem:[#allocation55_spill] sm:$0xff] %v12238_v26  ;;  %v7799_v18 = vpop.f32.mrb[100].mxu1  ;;  %v7688_v52 = vpop.f32.mrb[101].mxu0 }
 0x478   : > { %v7689_v35 = vadd.f32 %v7688_v52, %v7687_v43  ;;  %v7800_v44 = vpop.f32.mrb[101].mxu1  ;;  %v7690_v49 = vpop.f32.mrb[102].mxu0  ;;  %v15204_v43 = vld [vmem:[#allocation142_spill] sm:$0xff] }
 0x479   : > { %v7801_v47 = vadd.f32 %v7800_v44, %v7799_v18  ;;  %v7802_v27 = vpop.f32.mrb[102].mxu1  ;;  %v7691_v10 = vpop.f32.mrb[103].mxu0  ;;  %v15205_v18 = vsub.f32 %v15203_v7, %v15204_v43 }
 0x47a   : > { %v7692_v37 = vadd.f32 %v7691_v10, %v7690_v49  ;;  %v7803_v8 = vpop.f32.mrb[103].mxu1 }
 0x47b   : > { %v12240_v14 = vadd.f32 %v7801_v47, %v7689_v35  ;;  %v7804_v12 = vadd.f32 %v7803_v8, %v7802_v27  ;;  %v1743_v52 = vmul.f32 1.442695, %v15205_v18  ;;  %v15206_v47 = vld [vmem:[#allocation170_spill] sm:$0xff] }
 0x47c   : > { %v2349_v27 = vmul.f32 %v15206_v47, %v2317_v15  ;;  %v2323_v47 = vld [vmem:[#allocation3 + $0x40] sm:$0xff] }
 0x47d   : > { %15190 = vst [vmem:[#allocation56_spill] sm:$0xff] %v12240_v14  ;;  %v12242_v57 = vadd.f32 %v7804_v12, %v7692_v37  ;;  %v15207_v12 = vld [vmem:[#allocation173_spill] sm:$0xff]  ;;  %8700 = vpow2.f32 %v1743_v52 }
 0x47e   : > { %v7693_v34 = vpop.f32.mrb[104].mxu0  ;;  %8702 = vpow2.f32 %v1747_v1 }
 0x47f   : > { %15191 = vst [vmem:[#allocation58_spill] sm:$0xff] %v12242_v57  ;;  %v7805_v42 = vpop.f32.mrb[104].mxu1  ;;  %v7694_v3 = vpop.f32.mrb[105].mxu0  ;;  %8704 = vpow2.f32 %v1751_v33  ;;  %v15232_v33 = vld [vmem:[#allocation177_spill] sm:$0xff] }
 0x480   : > { %v7695_v53 = vadd.f32 %v7694_v3, %v7693_v34  ;;  %v7806_v13 = vpop.f32.mrb[105].mxu1  ;;  %v7696_v50 = vpop.f32.mrb[106].mxu0  ;;  %v2352_v34 = vmul.f32 %v15207_v12, %v2320_v36  ;;  %v15219_v36 = vld [vmem:[#allocation175_spill] sm:$0xff] }
 0x481   : > { %v7807_v25 = vadd.f32 %v7806_v13, %v7805_v42  ;;  %v7808_v29 = vpop.f32.mrb[106].mxu1  ;;  %v7697_v17 = vpop.f32.mrb[107].mxu0 }
 0x482   : > { %v7698_v58 = vadd.f32 %v7697_v17, %v7696_v50  ;;  %v7809_v55 = vpop.f32.mrb[107].mxu1  ;;  %v2388_v20 = vpop.xlane.xlu0 %2387  ;;  %v2321_v50 = vld [vmem:[#allocation3 + $0x30] sm:$0xff] }
 0x483   : > { %v12248_v16 = vadd.f32 %v7807_v25, %v7695_v53  ;;  %v7810_v61 = vadd.f32 %v7809_v55, %v7808_v29  ;;  %v2540_v11 = vadd.f32 %v2388_v20, %v2348_v60  ;;  %v15213_v29 = vld [vmem:[#allocation172_spill] sm:$0xff]  ;;  %v12276_v55 = vpop.eup %8696 }
 0x484   : > { %v2351_v17 = vmul.f32 %v15213_v29, %v2319_v63  ;;  %15215 = vst [vmem:[#allocation61_spill] sm:$0xff] %v12276_v55  ;;  %v2324_v29 = vld [vmem:[#allocation3 + $0x48] sm:$0xff] }
 0x485   : > { %15196 = vst [vmem:[#allocation57_spill] sm:$0xff] %v12248_v16  ;;  %v2383_v45 = vpop.xlane.xlu1 %2382  ;;  %v12255_v59 = vadd.f32 %v7810_v61, %v7698_v58  ;;  %2573 = vst.msk [vmem:[#allocation3 + $0x8] sm:$0xff] %vm2571_vm3, %v2540_v11  ;;  %v2353_v58 = vmul.f32 %v15214_v9, %v2321_v50  ;;  %v15227_v50 = vld [vmem:[#allocation176_spill] sm:$0xff] }
 0x486   : > { %v2539_v24 = vadd.f32 %v2383_v45, %v2347_v62  ;;  %v7699_v19 = vpop.f32.mrb[108].mxu0  ;;  %v2398_v0 = vpop.xlane.xlu0 %2397  ;;  %v2322_v62 = vld [vmem:[#allocation3 + $0x38] sm:$0xff] }
 0x487   : > { %15202 = vst [vmem:[#allocation59_spill] sm:$0xff] %v12255_v59  ;;  %v7811_v32 = vpop.f32.mrb[108].mxu1  ;;  %v2542_v22 = vadd.f32 %v2398_v0, %v2350_v46  ;;  %v7700_v6 = vpop.f32.mrb[109].mxu0 }
 0x488   : > { %2572 = vst.msk [vmem:[#allocation3] sm:$0xff] %vm2571_vm3, %v2539_v24  ;;  %v7701_v48 = vadd.f32 %v7700_v6, %v7699_v19  ;;  %v7812_v30 = vpop.f32.mrb[109].mxu1  ;;  %v7702_v21 = vpop.f32.mrb[110].mxu0  ;;  %v2361_v6 = vmul.f32 %v12276_v55, %v2329_v56 }
 0x489   : > { %2575 = vst.msk [vmem:[#allocation3 + $0x18] sm:$0xff] %vm2571_vm3, %v2542_v22  ;;  %v7813_v35 = vadd.f32 %v7812_v30, %v7811_v32  ;;  %v7814_v44 = vpop.f32.mrb[110].mxu1  ;;  %v7703_v49 = vpop.f32.mrb[111].mxu0 }
 0x48a   : > { %v7704_v10 = vadd.f32 %v7703_v49, %v7702_v21  ;;  %v7815_v37 = vpop.f32.mrb[111].mxu1  ;;  %v2393_v8 = vpop.xlane.xlu1 %2392 }
 0x48b   : > { %v12265_v42 = vadd.f32 %v7813_v35, %v7701_v48  ;;  %v7816_v3 = vadd.f32 %v7815_v37, %v7814_v44  ;;  %v2541_v53 = vadd.f32 %v2393_v8, %v2349_v27  ;;  %v2408_v13 = vpop.xlane.xlu0 %2407  ;;  %v2354_v48 = vmul.f32 %v15219_v36, %v2322_v62  ;;  %v12285_v30 = vpop.eup %8698  ;;  %v2331_v35 = vld [vmem:[#allocation3 + $0x80] sm:$0xff]  ;;  %v15222_v27 = vld [vmem:[#allocation152_spill] sm:$0xff] }
 0x48c   : > { %v2544_v31 = vadd.f32 %v2408_v13, %v2352_v34  ;;  %15220 = vst [vmem:[#allocation63_spill] sm:$0xff] %v12285_v30  ;;  %v2363_v63 = vmul.f32 %v12285_v30, %v2331_v35  ;;  %v15234_v36 = vld [vmem:[#allocation160_spill] sm:$0xff]  ;;  %v15238_v35 = vld [vmem:[#allocation135_spill] sm:$0xff] }
 0x48d   : > { %15208 = vst [vmem:[#allocation60_spill] sm:$0xff] %v12265_v42  ;;  %v12270_v25 = vadd.f32 %v7816_v3, %v7704_v10  ;;  %2574 = vst.msk [vmem:[#allocation3 + $0x10] sm:$0xff] %vm2571_vm3, %v2541_v53  ;;  %v15223_v10 = vld [vmem:[#allocation154_spill] sm:$0xff]  ;;  %v12297_v3 = vpop.eup %8700 }
 0x48e   : > { %2577 = vst.msk [vmem:[#allocation3 + $0x28] sm:$0xff] %vm2571_vm3, %v2544_v31  ;;  %v7705_v51 = vpop.f32.mrb[112].mxu0  ;;  %v2403_v60 = vpop.xlane.xlu1 %2402  ;;  %v15224_v37 = vsub.f32 %v15222_v27, %v15223_v10  ;;  %15226 = vst [vmem:[#allocation65_spill] sm:$0xff] %v12297_v3  ;;  %v2355_v31 = vmul.f32 %v15227_v50, %v2323_v47 }
 0x48f   : > { %15212 = vst [vmem:[#allocation62_spill] sm:$0xff] %v12270_v25  ;;  %v7817_v20 = vpop.f32.mrb[112].mxu1  ;;  %v2543_v61 = vadd.f32 %v2403_v60, %v2351_v17  ;;  %v2413_v11 = vpop.xlane.xlu0 %2412  ;;  %v15228_v17 = vld [vmem:[#allocation156_spill] sm:$0xff] }
 0x490   : > { %v2545_v45 = vadd.f32 %v2413_v11, %v2353_v58  ;;  %v7706_v40 = vpop.f32.mrb[113].mxu0  ;;  %v7818_v46 = vpop.f32.mrb[113].mxu1  ;;  %v1755_v8 = vmul.f32 1.442695, %v15224_v37 }
 0x491   : > { %2576 = vst.msk [vmem:[#allocation3 + $0x20] sm:$0xff] %vm2571_vm3, %v2543_v61  ;;  %v7707_v24 = vadd.f32 %v7706_v40, %v7705_v51  ;;  %v7819_v19 = vadd.f32 %v7818_v46, %v7817_v20  ;;  %v7708_v0 = vpop.f32.mrb[114].mxu0  ;;  %v7820_v15 = vpop.f32.mrb[114].mxu1  ;;  %v15229_v51 = vld [vmem:[#allocation158_spill] sm:$0xff]  ;;  %v2365_v40 = vmul.f32 %v12297_v3, %v2333_v54 }
 0x492   : > { %2578 = vst.msk [vmem:[#allocation3 + $0x30] sm:$0xff] %vm2571_vm3, %v2545_v45  ;;  %v7709_v32 = vpop.f32.mrb[115].mxu0  ;;  %v7821_v22 = vpop.f32.mrb[115].mxu1  ;;  %8706 = vpow2.f32 %v1755_v8  ;;  %v15230_v60 = vsub.f32 %v15228_v17, %v15229_v51 }
 0x493   : > { %v12287_v21 = vadd.f32 %v7819_v19, %v7707_v24  ;;  %v7710_v7 = vadd.f32 %v7709_v32, %v7708_v0  ;;  %v7822_v43 = vadd.f32 %v7821_v22, %v7820_v15  ;;  %v2453_v18 = vpop.xlane.xlu1 %2452  ;;  %v2418_v52 = vpop.xlane.xlu0 %2417  ;;  %v2356_v24 = vmul.f32 %v15232_v33, %v2324_v29  ;;  %v2335_v19 = vld [vmem:[#allocation3 + $0xa0] sm:$0xff] }
 0x494   : > { %v2553_v44 = vadd.f32 %v2453_v18, %v2361_v6  ;;  %v2546_v49 = vadd.f32 %v2418_v52, %v2354_v48  ;;  %v1759_v9 = vmul.f32 1.442695, %v15230_v60  ;;  %v12305_v46 = vpop.eup %8702  ;;  %v2325_v6 = vld [vmem:[#allocation3 + $0x50] sm:$0xff]  ;;  %v15235_v48 = vld [vmem:[#allocation162_spill] sm:$0xff]  ;;  %v15237_v52 = vld [vmem:[#allocation133_spill] sm:$0xff] }
 0x495   : > { %15221 = vst [vmem:[#allocation64_spill] sm:$0xff] %v12287_v21  ;;  %v12292_v12 = vadd.f32 %v7822_v43, %v7710_v7  ;;  %15231 = vst [vmem:[#allocation67_spill] sm:$0xff] %v12305_v46  ;;  %v15236_v7 = vsub.f32 %v15234_v36, %v15235_v48  ;;  %v2367_v10 = vmul.f32 %v12305_v46, %v2335_v19  ;;  %v12321_v37 = vpop.eup %8704  ;;  %v15250_v19 = vld [vmem:[#allocation179_spill] sm:$0xff] }
 0x496   : > { %2586 = vst.msk [vmem:[#allocation3 + $0x70] sm:$0xff] %vm2571_vm3, %v2553_v44  ;;  %2579 = vst.msk [vmem:[#allocation3 + $0x38] sm:$0xff] %vm2571_vm3, %v2546_v49  ;;  %v7711_v34 = vpop.f32.mrb[116].mxu0  ;;  %8708 = vpow2.f32 %v1759_v9  ;;  %v15239_v44 = vsub.f32 %v15237_v52, %v15238_v35  ;;  %v15253_v52 = vld [vmem:[#allocation143_spill] sm:$0xff] }
 0x497   : > { %15225 = vst [vmem:[#allocation66_spill] sm:$0xff] %v12292_v12  ;;  %v7823_v53 = vpop.f32.mrb[116].mxu1  ;;  %v2463_v13 = vpop.xlane.xlu1 %2462  ;;  %v1763_v43 = vmul.f32 1.442695, %v15236_v7  ;;  %15241 = vst [vmem:[#allocation69_spill] sm:$0xff] %v12321_v37  ;;  %v2327_v7 = vld [vmem:[#allocation3 + $0x60] sm:$0xff] }
 0x498   : > { %v2555_v41 = vadd.f32 %v2463_v13, %v2363_v63  ;;  %v2423_v23 = vpop.xlane.xlu0 %2422  ;;  %v7712_v1 = vpop.f32.mrb[117].mxu0  ;;  %v1737_v49 = vmul.f32 1.442695, %v15239_v44  ;;  %v15242_v63 = vld [vmem:[#allocation178_spill] sm:$0xff]  ;;  %v2337_v13 = vld [vmem:[#allocation3 + $0xb0] sm:$0xff]  ;;  %v2346_v12 = vld [vmem:[#allocation3 + $0xf8] sm:$0xff] }
 0x499   : > { %v2547_v58 = vadd.f32 %v2423_v23, %v2355_v31  ;;  %v7713_v20 = vadd.f32 %v7712_v1, %v7711_v34  ;;  %v7824_v61 = vpop.f32.mrb[117].mxu1  ;;  %v7714_v11 = vpop.f32.mrb[118].mxu0  ;;  %8710 = vpow2.f32 %v1763_v43  ;;  %v15243_v23 = vld [vmem:[#allocation164_spill] sm:$0xff]  ;;  %v15244_v1 = vld [vmem:[#allocation166_spill] sm:$0xff] }
 0x49a   : > { %2588 = vst.msk [vmem:[#allocation3 + $0x80] sm:$0xff] %vm2571_vm3, %v2555_v41  ;;  %v7825_v56 = vadd.f32 %v7824_v61, %v7823_v53  ;;  %v7826_v62 = vpop.f32.mrb[118].mxu1  ;;  %v7715_v45 = vpop.f32.mrb[119].mxu0  ;;  %v2357_v53 = vmul.f32 %v15242_v63, %v2325_v6  ;;  %v2326_v41 = vld [vmem:[#allocation3 + $0x58] sm:$0xff]  ;;  %v15245_v29 = vsub.f32 %v15243_v23, %v15244_v1  ;;  %8712 = vpow2.f32 %v1737_v49  ;;  %v15247_v61 = vld [vmem:[#allocation139_spill] sm:$0xff] }
 0x49b   : > { %2580 = vst.msk [vmem:[#allocation3 + $0x40] sm:$0xff] %vm2571_vm3, %v2547_v58  ;;  %v7716_v5 = vadd.f32 %v7715_v45, %v7714_v11  ;;  %v7827_v2 = vpop.f32.mrb[119].mxu1  ;;  %v2473_v38 = vpop.xlane.xlu1 %2472  ;;  %v2328_v23 = vld [vmem:[#allocation3 + $0x68] sm:$0xff] }
 0x49c   : > { %v12309_v0 = vadd.f32 %v7825_v56, %v7713_v20  ;;  %v7828_v15 = vadd.f32 %v7827_v2, %v7826_v62  ;;  %v2557_v32 = vadd.f32 %v2473_v38, %v2365_v40  ;;  %v2428_v22 = vpop.xlane.xlu0 %2427  ;;  %v1767_v17 = vmul.f32 1.442695, %v15245_v29  ;;  %v15246_v20 = vld [vmem:[#allocation137_spill] sm:$0xff]  ;;  %v12333_v2 = vpop.eup %8706 }
 0x49d   : > { %v2548_v18 = vadd.f32 %v2428_v22, %v2356_v24  ;;  %v15248_v11 = vsub.f32 %v15246_v20, %v15247_v61  ;;  %15249 = vst [vmem:[#allocation71_spill] sm:$0xff] %v12333_v2 }
 0x49e   : > { %15233 = vst [vmem:[#allocation68_spill] sm:$0xff] %v12309_v0  ;;  %v12317_v47 = vadd.f32 %v7828_v15, %v7716_v5  ;;  %2590 = vst.msk [vmem:[#allocation3 + $0x90] sm:$0xff] %vm2571_vm3, %v2557_v32  ;;  %v7717_v27 = vpop.f32.mrb[120].mxu0  ;;  %v2369_v5 = vmul.f32 %v12321_v37, %v2337_v13  ;;  %v2358_v15 = vmul.f32 %v15250_v19, %v2326_v41  ;;  %v2339_v32 = vld [vmem:[#allocation3 + $0xc0] sm:$0xff]  ;;  %8714 = vpow2.f32 %v1767_v17 }
 0x49f   : > { %2581 = vst.msk [vmem:[#allocation3 + $0x48] sm:$0xff] %vm2571_vm3, %v2548_v18  ;;  %v7829_v8 = vpop.f32.mrb[120].mxu1  ;;  %v2483_v34 = vpop.xlane.xlu1 %2482  ;;  %v1741_v56 = vmul.f32 1.442695, %v15248_v11  ;;  %v15252_v18 = vld [vmem:[#allocation141_spill] sm:$0xff]  ;;  %v2343_v19 = vld [vmem:[#allocation3 + $0xe0] sm:$0xff] }
 0x4a0   : > { %15240 = vst [vmem:[#allocation70_spill] sm:$0xff] %v12317_v47  ;;  %v2559_v50 = vadd.f32 %v2483_v34, %v2367_v10  ;;  %v2433_v31 = vpop.xlane.xlu0 %2432  ;;  %v7718_v54 = vpop.f32.mrb[121].mxu0  ;;  %v15254_v35 = vsub.f32 %v15252_v18, %v15253_v52  ;;  %v2371_v10 = vmul.f32 %v12333_v2, %v2339_v32  ;;  %v15265_v18 = vld [vmem:[#allocation149_spill] sm:$0xff]  ;;  %v15266_v52 = vld [vmem:[#allocation151_spill] sm:$0xff] }
 0x4a1   : > { %v2549_v51 = vadd.f32 %v2433_v31, %v2357_v53  ;;  %v7719_v60 = vadd.f32 %v7718_v54, %v7717_v27  ;;  %v7830_v9 = vpop.f32.mrb[121].mxu1  ;;  %v7720_v58 = vpop.f32.mrb[122].mxu0  ;;  %8716 = vpow2.f32 %v1741_v56  ;;  %v15257_v53 = vld [vmem:[#allocation180_spill] sm:$0xff] }
 0x4a2   : > { %2592 = vst.msk [vmem:[#allocation3 + $0xa0] sm:$0xff] %vm2571_vm3, %v2559_v50  ;;  %v7831_v62 = vadd.f32 %v7830_v9, %v7829_v8  ;;  %v7832_v45 = vpop.f32.mrb[122].mxu1  ;;  %v7721_v40 = vpop.f32.mrb[123].mxu0  ;;  %v1745_v44 = vmul.f32 1.442695, %v15254_v35  ;;  %v2359_v13 = vmul.f32 %v15257_v53, %v2327_v7  ;;  %v2341_v50 = vld [vmem:[#allocation3 + $0xd0] sm:$0xff]  ;;  %v15267_v35 = vsub.f32 %v15265_v18, %v15266_v52 }
 0x4a3   : > { %2582 = vst.msk [vmem:[#allocation3 + $0x50] sm:$0xff] %vm2571_vm3, %v2549_v51  ;;  %v7722_v38 = vadd.f32 %v7721_v40, %v7720_v58  ;;  %v7833_v33 = vpop.f32.mrb[123].mxu1  ;;  %v2493_v24 = vpop.xlane.xlu1 %2492  ;;  %v15259_v9 = vld [vmem:[#allocation147_spill] sm:$0xff]  ;;  %v2330_v7 = vld [vmem:[#allocation3 + $0x78] sm:$0xff] }
 0x4a4   : > { %v12337_v22 = vadd.f32 %v7831_v62, %v7719_v60  ;;  %v7834_v6 = vadd.f32 %v7833_v33, %v7832_v45  ;;  %v2561_v36 = vadd.f32 %v2493_v24, %v2369_v5  ;;  %v2438_v48 = vpop.xlane.xlu0 %2437  ;;  %v12346_v8 = vpop.eup %8708  ;;  %8718 = vpow2.f32 %v1745_v44  ;;  %v15258_v60 = vld [vmem:[#allocation145_spill] sm:$0xff]  ;;  %v15276_v18 = vld [vmem:[#allocation159_spill] sm:$0xff] }
 0x4a5   : > { %v2550_v43 = vadd.f32 %v2438_v48, %v2358_v15  ;;  %15256 = vst [vmem:[#allocation73_spill] sm:$0xff] %v12346_v8  ;;  %v15260_v58 = vsub.f32 %v15258_v60, %v15259_v9  ;;  %v2373_v62 = vmul.f32 %v12346_v8, %v2341_v50  ;;  %v12355_v45 = vpop.eup %8710  ;;  %v15262_v33 = vld [vmem:[#allocation181_spill] sm:$0xff]  ;;  %v1753_v44 = vmul.f32 1.442695, %v15267_v35  ;;  %v15272_v9 = vld [vmem:[#allocation155_spill] sm:$0xff] }
 0x4a6   : > { %15251 = vst [vmem:[#allocation72_spill] sm:$0xff] %v12337_v22  ;;  %v12342_v49 = vadd.f32 %v7834_v6, %v7722_v38  ;;  %2594 = vst.msk [vmem:[#allocation3 + $0xb0] sm:$0xff] %vm2571_vm3, %v2561_v36  ;;  %v7723_v27 = vpop.f32.mrb[124].mxu0  ;;  %v2360_v24 = vmul.f32 %v15262_v33, %v2328_v23  ;;  %v12359_v15 = vpop.eup %8712  ;;  %v2332_v23 = vld [vmem:[#allocation3 + $0x88] sm:$0xff]  ;;  %v15271_v60 = vld [vmem:[#allocation153_spill] sm:$0xff] }
 0x4a7   : > { %2583 = vst.msk [vmem:[#allocation3 + $0x58] sm:$0xff] %vm2571_vm3, %v2550_v43  ;;  %v7835_v34 = vpop.f32.mrb[124].mxu1  ;;  %v2503_v63 = vpop.xlane.xlu1 %2502  ;;  %v1749_v20 = vmul.f32 1.442695, %v15260_v58  ;;  %15261 = vst [vmem:[#allocation75_spill] sm:$0xff] %v12355_v45  ;;  %v2362_v53 = vmul.f32 %v12359_v15, %v2330_v7  ;;  %v15273_v58 = vsub.f32 %v15271_v60, %v15272_v9 }
 0x4a8   : > { %15255 = vst [vmem:[#allocation74_spill] sm:$0xff] %v12342_v49  ;;  %v2563_v31 = vadd.f32 %v2503_v63, %v2371_v10  ;;  %v2443_v54 = vpop.xlane.xlu0 %2442  ;;  %v7724_v41 = vpop.f32.mrb[125].mxu0  ;;  %15263 = vst [vmem:[#allocation76_spill] sm:$0xff] %v12359_v15  ;;  %v2375_v10 = vmul.f32 %v12355_v45, %v2343_v19 }
 0x4a9   : > { %v2551_v1 = vadd.f32 %v2443_v54, %v2359_v13  ;;  %v7725_v29 = vadd.f32 %v7724_v41, %v7723_v27  ;;  %v7836_v17 = vpop.f32.mrb[125].mxu1  ;;  %v7726_v51 = vpop.f32.mrb[126].mxu0  ;;  %8720 = vpow2.f32 %v1749_v20  ;;  %v2345_v13 = vld [vmem:[#allocation3 + $0xf0] sm:$0xff]  ;;  %v1757_v20 = vmul.f32 1.442695, %v15273_v58 }
 0x4aa   : > { %2596 = vst.msk [vmem:[#allocation3 + $0xc0] sm:$0xff] %vm2571_vm3, %v2563_v31  ;;  %v7837_v61 = vadd.f32 %v7836_v17, %v7835_v34  ;;  %v7838_v11 = vpop.f32.mrb[126].mxu1  ;;  %v7727_v56 = vpop.f32.mrb[127].mxu0  ;;  %8722 = vpow2.f32 %v1753_v44 }
 0x4ab   : > { %2584 = vst.msk [vmem:[#allocation3 + $0x60] sm:$0xff] %vm2571_vm3, %v2551_v1  ;;  %v7728_v40 = vadd.f32 %v7727_v56, %v7726_v51  ;;  %v7839_v5 = vpop.f32.mrb[127].mxu1  ;;  %v2513_v38 = vpop.xlane.xlu1 %2512  ;;  %8724 = vpow2.f32 %v1757_v20  ;;  %v15279_v20 = vld [vmem:[#allocation161_spill] sm:$0xff] }
 0x4ac   : > { %v12361_v32 = vadd.f32 %v7837_v61, %v7725_v29  ;;  %v7840_v6 = vadd.f32 %v7839_v5, %v7838_v11  ;;  %v2565_v36 = vadd.f32 %v2513_v38, %v2373_v62  ;;  %v2448_v48 = vpop.xlane.xlu0 %2447  ;;  %v12370_v34 = vpop.eup %8714 }
 0x4ad   : > { %v2552_v43 = vadd.f32 %v2448_v48, %v2360_v24  ;;  %15269 = vst [vmem:[#allocation79_spill] sm:$0xff] %v12370_v34  ;;  %v12376_v31 = vpop.eup %8716  ;;  %v2377_v61 = vmul.f32 %v12370_v34, %v2345_v13 }
 0x4ae   : > { %15264 = vst [vmem:[#allocation78_spill] sm:$0xff] %v12361_v32  ;;  %v12366_v27 = vadd.f32 %v7840_v6, %v7728_v40  ;;  %2598 = vst.msk [vmem:[#allocation3 + $0xd0] sm:$0xff] %vm2571_vm3, %v2565_v36  ;;  %v2364_v62 = vmul.f32 %v12376_v31, %v2332_v23  ;;  %v12397_v38 = vpop.eup %8718  ;;  %v2334_v6 = vld [vmem:[#allocation3 + $0x98] sm:$0xff]  ;;  %v2336_v23 = vld [vmem:[#allocation3 + $0xa8] sm:$0xff] }
 0x4af   : > { %2585 = vst.msk [vmem:[#allocation3 + $0x68] sm:$0xff] %vm2571_vm3, %v2552_v43  ;;  %v2523_v63 = vpop.xlane.xlu1 %2522  ;;  %15270 = vst [vmem:[#allocation80_spill] sm:$0xff] %v12376_v31  ;;  %v15275_v43 = vld [vmem:[#allocation157_spill] sm:$0xff] }
 0x4b0   : > { %15268 = vst [vmem:[#allocation77_spill] sm:$0xff] %v12366_v27  ;;  %v12374_v50 = vpop.f32.mrb[128].mxu0  ;;  %v2567_v54 = vadd.f32 %v2523_v63, %v2375_v10  ;;  %v2458_v41 = vpop.xlane.xlu0 %2457  ;;  %15274 = vst [vmem:[#allocation82_spill] sm:$0xff] %v12397_v38  ;;  %v15277_v52 = vsub.f32 %v15275_v43, %v15276_v18  ;;  %v2338_v18 = vld [vmem:[#allocation3 + $0xb8] sm:$0xff] }
 0x4b1   : > { %v12378_v1 = vpop.f32.mrb[129].mxu0  ;;  %v2554_v29 = vadd.f32 %v2458_v41, %v2362_v53  ;;  %v2366_v53 = vmul.f32 %v12397_v38, %v2334_v6  ;;  %v2342_v32 = vld [vmem:[#allocation3 + $0xd8] sm:$0xff] }
 0x4b2   : > { %v4161_v17 = vmax.f32 %v12374_v50, %v12378_v1  ;;  %v12382_v51 = vpop.f32.mrb[130].mxu0  ;;  %2600 = vst.msk [vmem:[#allocation3 + $0xe0] sm:$0xff] %vm2571_vm3, %v2567_v54  ;;  %v1761_v35 = vmul.f32 1.442695, %v15277_v52 }
 0x4b3   : > { %v12389_v11 = vpop.f32.mrb[131].mxu0  ;;  %2587 = vst.msk [vmem:[#allocation3 + $0x78] sm:$0xff] %vm2571_vm3, %v2554_v29  ;;  %v2533_v56 = vpop.xlane.xlu1 %2532 }
 0x4b4   : > { %v12393_v40 = vpop.f32.mrb[128].mxu1  ;;  %v4166_v5 = vmax.f32 %v12382_v51, %v12389_v11  ;;  %v2569_v33 = vadd.f32 %v2533_v56, %v2377_v61  ;;  %v2468_v24 = vpop.xlane.xlu0 %2467  ;;  %8726 = vpow2.f32 %v1761_v35  ;;  %v15280_v61 = vld [vmem:[#allocation163_spill] sm:$0xff] }
 0x4b5   : > { %v4162_v19 = vmax.f32 %v4161_v17, %v12393_v40  ;;  %v12400_v36 = vpop.f32.mrb[129].mxu1  ;;  %v2556_v48 = vadd.f32 %v2468_v24, %v2364_v62  ;;  %v12416_v54 = vpop.eup %8720  ;;  %v15281_v56 = vsub.f32 %v15279_v20, %v15280_v61 }
 0x4b6   : > { %v12402_v7 = vpop.f32.mrb[130].mxu1  ;;  %2602 = vst.msk [vmem:[#allocation3 + $0xf0] sm:$0xff] %vm2571_vm3, %v2569_v33  ;;  %15278 = vst [vmem:[#allocation81_spill] sm:$0xff] %v12416_v54  ;;  %v2368_v33 = vmul.f32 %v12416_v54, %v2336_v23  ;;  %v12436_v6 = vpop.eup %8722 }
 0x4b7   : > { %v4163_v44 = vmax.f32 %v4162_v19, %v12400_v36  ;;  %v4167_v10 = vmax.f32 %v4166_v5, %v12402_v7  ;;  %v12410_v63 = vpop.f32.mrb[131].mxu1  ;;  %2589 = vst.msk [vmem:[#allocation3 + $0x88] sm:$0xff] %vm2571_vm3, %v2556_v48  ;;  %v1765_v62 = vmul.f32 1.442695, %v15281_v56  ;;  %15282 = vst [vmem:[#allocation83_spill] sm:$0xff] %v12436_v6  ;;  %v12454_v56 = vpop.eup %8724 }
 0x4b8   : > { %v12414_v13 = vpop.f32.mrb[132].mxu0  ;;  %v2478_v41 = vpop.xlane.xlu0 %2477  ;;  %15286 = vst [vmem:[#allocation84_spill] sm:$0xff] %v12454_v56 }
 0x4b9   : > { %4164 = vmax.xlane.f32.xlu1 %v4163_v44  ;;  %v12418_v29 = vpop.f32.mrb[133].mxu0  ;;  %v4168_v17 = vmax.f32 %v4167_v10, %v12410_v63  ;;  %v2558_v60 = vadd.f32 %v2478_v41, %v2366_v53  ;;  %8728 = vpow2.f32 %v1765_v62  ;;  %v15283_v10 = vld [vmem:[#allocation165_spill] sm:$0xff]  ;;  %v15284_v53 = vld [vmem:[#allocation167_spill] sm:$0xff] }
 0x4ba   : > { %v4171_v9 = vmax.f32 %v12414_v13, %v12418_v29  ;;  %v12423_v58 = vpop.f32.mrb[134].mxu0  ;;  %v15285_v41 = vsub.f32 %v15283_v10, %v15284_v53 }
 0x4bb   : > { %v12428_v5 = vpop.f32.mrb[135].mxu0  ;;  %4169 = vmax.xlane.f32.xlu0 %v4168_v17  ;;  %2591 = vst.msk [vmem:[#allocation3 + $0x98] sm:$0xff] %vm2571_vm3, %v2558_v60  ;;  %v12434_v19 = vpop.f32.mrb[132].mxu1 }
 0x4bc   : > { %v4176_v24 = vmax.f32 %v12423_v58, %v12428_v5  ;;  %v2488_v48 = vpop.xlane.xlu0 %2487  ;;  %v4172_v43 = vmax.f32 %v4171_v9, %v12434_v19  ;;  %v12439_v52 = vpop.f32.mrb[133].mxu1  ;;  %v1769_v23 = vmul.f32 1.442695, %v15285_v41  ;;  %v2370_v9 = vmul.f32 %v12436_v6, %v2338_v18 }
 0x4bd   : > { %v2560_v35 = vadd.f32 %v2488_v48, %v2368_v33  ;;  %v12441_v44 = vpop.f32.mrb[134].mxu1  ;;  %v2340_v48 = vld [vmem:[#allocation3 + $0xc8] sm:$0xff] }
 0x4be   : > { %v4173_v17 = vmax.f32 %v4172_v43, %v12439_v52  ;;  %v4177_v60 = vmax.f32 %v4176_v24, %v12441_v44  ;;  %v12448_v20 = vpop.f32.mrb[135].mxu1  ;;  %8730 = vpow2.f32 %v1769_v23 }
 0x4bf   : > { %2593 = vst.msk [vmem:[#allocation3 + $0xa8] sm:$0xff] %vm2571_vm3, %v2560_v35  ;;  %v2372_v35 = vmul.f32 %v12454_v56, %v2340_v48 }
 0x4c0   : > { %v12452_v61 = vpop.f32.mrb[136].mxu0  ;;  %v2498_v33 = vpop.xlane.xlu0 %2497  ;;  %v4178_v62 = vmax.f32 %v4177_v60, %v12448_v20  ;;  %4174 = vmax.xlane.f32.xlu0 %v4173_v17 }
 0x4c1   : > { %v12457_v10 = vpop.f32.mrb[137].mxu0  ;;  %v2562_v43 = vadd.f32 %v2498_v33, %v2370_v9  ;;  %v12471_v60 = vpop.eup %8726 }
 0x4c2   : > { %v4181_v24 = vmax.f32 %v12452_v61, %v12457_v10  ;;  %v12461_v53 = vpop.f32.mrb[138].mxu0  ;;  %4179 = vmax.xlane.f32.xlu1 %v4178_v62  ;;  %15287 = vst [vmem:[#allocation86_spill] sm:$0xff] %v12471_v60  ;;  %v2374_v27 = vmul.f32 %v12471_v60, %v2342_v32 }
 0x4c3   : > { %v12463_v18 = vpop.f32.mrb[139].mxu0  ;;  %2595 = vst.msk [vmem:[#allocation3 + $0xb8] sm:$0xff] %vm2571_vm3, %v2562_v43  ;;  %v12469_v17 = vpop.f32.mrb[136].mxu1 }
 0x4c4   : > { %v4186_v41 = vmax.f32 %v12461_v53, %v12463_v18  ;;  %v2508_v9 = vpop.xlane.xlu0 %2507  ;;  %v4182_v33 = vmax.f32 %v4181_v24, %v12469_v17  ;;  %v12474_v22 = vpop.f32.mrb[137].mxu1 }
 0x4c5   : > { %v2564_v23 = vadd.f32 %v2508_v9, %v2372_v35  ;;  %v12476_v62 = vpop.f32.mrb[138].mxu1  ;;  %v12486_v49 = vpop.eup %8728  ;;  %v2344_v35 = vld [vmem:[#allocation3 + $0xe8] sm:$0xff] }
 0x4c6   : > { %v4183_v43 = vmax.f32 %v4182_v33, %v12474_v22  ;;  %v4187_v48 = vmax.f32 %v4186_v41, %v12476_v62  ;;  %v12480_v0 = vpop.f32.mrb[139].mxu1  ;;  %15288 = vst [vmem:[#allocation85_spill] sm:$0xff] %v12486_v49  ;;  %v2376_v32 = vmul.f32 %v12486_v49, %v2344_v35 }
 0x4c7   : > { %2597 = vst.msk [vmem:[#allocation3 + $0xc8] sm:$0xff] %vm2571_vm3, %v2564_v23 }
 0x4c8   : > { %v12484_v21 = vpop.f32.mrb[140].mxu0  ;;  %v2518_v24 = vpop.xlane.xlu0 %2517  ;;  %v4188_v42 = vmax.f32 %v4187_v48, %v12480_v0  ;;  %4184 = vmax.xlane.f32.xlu0 %v4183_v43 }
 0x4c9   : > { %v12489_v9 = vpop.f32.mrb[141].mxu0  ;;  %v2566_v33 = vadd.f32 %v2518_v24, %v2374_v27  ;;  %v12503_v43 = vpop.eup %8730 }
 0x4ca   : > { %v4191_v41 = vmax.f32 %v12484_v21, %v12489_v9  ;;  %v12493_v47 = vpop.f32.mrb[142].mxu0  ;;  %4189 = vmax.xlane.f32.xlu1 %v4188_v42  ;;  %15289 = vst [vmem:[#allocation87_spill] sm:$0xff] %v12503_v43  ;;  %v2378_v59 = vmul.f32 %v12503_v43, %v2346_v12 }
 0x4cb   : > { %v12495_v23 = vpop.f32.mrb[143].mxu0  ;;  %2599 = vst.msk [vmem:[#allocation3 + $0xd8] sm:$0xff] %vm2571_vm3, %v2566_v33  ;;  %v12501_v16 = vpop.f32.mrb[140].mxu1 }
 0x4cc   : > { %v4196_v48 = vmax.f32 %v12493_v47, %v12495_v23  ;;  %v2528_v27 = vpop.xlane.xlu0 %2527  ;;  %v4192_v24 = vmax.f32 %v4191_v41, %v12501_v16  ;;  %v12506_v14 = vpop.f32.mrb[141].mxu1 }
 0x4cd   : > { %v2568_v42 = vadd.f32 %v2528_v27, %v2376_v32  ;;  %v12508_v25 = vpop.f32.mrb[142].mxu1 }
 0x4ce   : > { %v4193_v33 = vmax.f32 %v4192_v24, %v12506_v14  ;;  %v4197_v35 = vmax.f32 %v4196_v48, %v12508_v25  ;;  %v12512_v28 = vpop.f32.mrb[143].mxu1 }
 0x4cf   : > { %2601 = vst.msk [vmem:[#allocation3 + $0xe8] sm:$0xff] %vm2571_vm3, %v2568_v42 }
 0x4d0   : > { %v12516_v39 = vpop.f32.mrb[144].mxu0  ;;  %v2538_v57 = vpop.xlane.xlu0 %2537  ;;  %v4198_v41 = vmax.f32 %v4197_v35, %v12512_v28  ;;  %4194 = vmax.xlane.f32.xlu0 %v4193_v33 }
 0x4d1   : > { %v12519_v26 = vpop.f32.mrb[145].mxu0  ;;  %v2570_v32 = vadd.f32 %v2538_v57, %v2378_v59 }
 0x4d2   : > { %v4201_v27 = vmax.f32 %v12516_v39, %v12519_v26  ;;  %v12523_v24 = vpop.f32.mrb[146].mxu0  ;;  %4199 = vmax.xlane.f32.xlu1 %v4198_v41 }
 0x4d3   : > { %v12525_v48 = vpop.f32.mrb[147].mxu0  ;;  %2603 = vst.msk [vmem:[#allocation3 + $0xf8] sm:$0xff] %vm2571_vm3, %v2570_v32  ;;  %v12530_v42 = vpop.f32.mrb[144].mxu1 }
 0x4d4   : > { %v4206_v12 = vmax.f32 %v12523_v24, %v12525_v48  ;;  %v4202_v33 = vmax.f32 %v4201_v27, %v12530_v42  ;;  %v12533_v35 = vpop.f32.mrb[145].mxu1 }
 0x4d5   : > { %v12535_v57 = vpop.f32.mrb[146].mxu1 }
 0x4d6   : > { %v4203_v59 = vmax.f32 %v4202_v33, %v12533_v35  ;;  %v4207_v4 = vmax.f32 %v4206_v12, %v12535_v57  ;;  %v12539_v41 = vpop.f32.mrb[147].mxu1 }
 0x4d8   : > { %v12541_v34 = vpop.f32.mrb[148].mxu0  ;;  %v4208_v32 = vmax.f32 %v4207_v4, %v12539_v41  ;;  %4204 = vmax.xlane.f32.xlu0 %v4203_v59 }
 0x4d9   : > { %v12544_v45 = vpop.f32.mrb[149].mxu0 }
 0x4da   : > { %v4211_v27 = vmax.f32 %v12541_v34, %v12544_v45  ;;  %v12548_v8 = vpop.f32.mrb[150].mxu0  ;;  %4209 = vmax.xlane.f32.xlu1 %v4208_v32 }
 0x4db   : > { %15290 = vst [vmem:[#allocation88_spill] sm:$0xff] %v12548_v8  ;;  %v12550_v43 = vpop.f32.mrb[151].mxu0  ;;  %v12552_v33 = vpop.f32.mrb[148].mxu1 }
 0x4dc   : > { %15291 = vst [vmem:[#allocation90_spill] sm:$0xff] %v12550_v43  ;;  %v4216_v12 = vmax.f32 %v12548_v8, %v12550_v43  ;;  %v4212_v2 = vmax.f32 %v4211_v27, %v12552_v33  ;;  %v12557_v49 = vpop.f32.mrb[149].mxu1  ;;  %v13030_v8 = vld [vmem:[#allocation2 + $0x1b8] sm:$0xff] }
 0x4dd   : > { %v12559_v4 = vpop.f32.mrb[150].mxu1  ;;  %15415 = vst [vmem:[#allocation189_spill] sm:$0xff] %v13030_v8 }
 0x4de   : > { %15292 = vst [vmem:[#allocation89_spill] sm:$0xff] %v12559_v4  ;;  %v4213_v59 = vmax.f32 %v4212_v2, %v12557_v49  ;;  %v4217_v37 = vmax.f32 %v4216_v12, %v12559_v4  ;;  %v12563_v60 = vpop.f32.mrb[151].mxu1 }
 0x4df   : > { %15293 = vst [vmem:[#allocation91_spill] sm:$0xff] %v12563_v60 }
 0x4e0   : > { %v12565_v32 = vpop.f32.mrb[152].mxu0  ;;  %4214 = vmax.xlane.f32.xlu1 %v4213_v59  ;;  %v4218_v46 = vmax.f32 %v4217_v37, %v12563_v60  ;;  %v12973_v60 = vld [vmem:[#allocation2 + $0x188] sm:$0xff] }
 0x4e1   : > { %15294 = vst [vmem:[#allocation92_spill] sm:$0xff] %v12565_v32  ;;  %v12568_v56 = vpop.f32.mrb[153].mxu0  ;;  %15405 = vst [vmem:[#allocation167_spill] sm:$0xff] %v12973_v60 }
 0x4e2   : > { %15295 = vst [vmem:[#allocation94_spill] sm:$0xff] %v12568_v56  ;;  %v4221_v27 = vmax.f32 %v12565_v32, %v12568_v56  ;;  %v12572_v3 = vpop.f32.mrb[154].mxu0 }
 0x4e3   : > { %15296 = vst [vmem:[#allocation93_spill] sm:$0xff] %v12572_v3  ;;  %v12574_v6 = vpop.f32.mrb[155].mxu0  ;;  %v12576_v30 = vpop.f32.mrb[152].mxu1 }
 0x4e4   : > { %15297 = vst [vmem:[#allocation95_spill] sm:$0xff] %v12574_v6  ;;  %15298 = vst [vmem:[#allocation96_spill] sm:$0xff] %v12576_v30  ;;  %v4226_v2 = vmax.f32 %v12572_v3, %v12574_v6  ;;  %4219 = vmax.xlane.f32.xlu1 %v4218_v46  ;;  %v4222_v12 = vmax.f32 %v4221_v27, %v12576_v30  ;;  %v12581_v59 = vpop.f32.mrb[153].mxu1 }
 0x4e5   : > { %15299 = vst [vmem:[#allocation98_spill] sm:$0xff] %v12581_v59  ;;  %v12583_v37 = vpop.f32.mrb[154].mxu1 }
 0x4e6   : > { %15300 = vst [vmem:[#allocation97_spill] sm:$0xff] %v12583_v37  ;;  %v4223_v54 = vmax.f32 %v4222_v12, %v12581_v59  ;;  %v4227_v15 = vmax.f32 %v4226_v2, %v12583_v37  ;;  %v12587_v38 = vpop.f32.mrb[155].mxu1 }
 0x4e7   : > { %15301 = vst [vmem:[#allocation99_spill] sm:$0xff] %v12587_v38 }
 0x4e8   : > { %v12589_v31 = vpop.f32.mrb[156].mxu0  ;;  %4224 = vmax.xlane.f32.xlu1 %v4223_v54  ;;  %v4228_v6 = vmax.f32 %v4227_v15, %v12587_v38 }
 0x4e9   : > { %15302 = vst [vmem:[#allocation100_spill] sm:$0xff] %v12589_v31  ;;  %v12591_v56 = vpop.f32.mrb[157].mxu0 }
 0x4ea   : > { %15303 = vst [vmem:[#allocation102_spill] sm:$0xff] %v12591_v56  ;;  %v4231_v46 = vmax.f32 %v12589_v31, %v12591_v56  ;;  %v12596_v27 = vpop.f32.mrb[158].mxu0 }
 0x4eb   : > { %15304 = vst [vmem:[#allocation101_spill] sm:$0xff] %v12596_v27  ;;  %v12598_v3 = vpop.f32.mrb[159].mxu0  ;;  %v12602_v2 = vpop.f32.mrb[156].mxu1 }
 0x4ec   : > { %15305 = vst [vmem:[#allocation103_spill] sm:$0xff] %v12598_v3  ;;  %v4236_v12 = vmax.f32 %v12596_v27, %v12598_v3  ;;  %15306 = vst [vmem:[#allocation104_spill] sm:$0xff] %v12602_v2  ;;  %v4232_v37 = vmax.f32 %v4231_v46, %v12602_v2  ;;  %v12605_v59 = vpop.f32.mrb[157].mxu1  ;;  %4229 = vmax.xlane.f32.xlu1 %v4228_v6 }
 0x4ed   : > { %15307 = vst [vmem:[#allocation106_spill] sm:$0xff] %v12605_v59  ;;  %v12607_v54 = vpop.f32.mrb[158].mxu1 }
 0x4ee   : > { %15308 = vst [vmem:[#allocation105_spill] sm:$0xff] %v12607_v54  ;;  %v4233_v15 = vmax.f32 %v4232_v37, %v12605_v59  ;;  %v4237_v56 = vmax.f32 %v4236_v12, %v12607_v54  ;;  %v12611_v31 = vpop.f32.mrb[159].mxu1 }
 0x4ef   : > { %15309 = vst [vmem:[#allocation107_spill] sm:$0xff] %v12611_v31 }
 0x4f0   : > { %v12613_v38 = vpop.f32.mrb[160].mxu0  ;;  %v4238_v3 = vmax.f32 %v4237_v56, %v12611_v31  ;;  %4234 = vmax.xlane.f32.xlu1 %v4233_v15 }
 0x4f1   : > { %15310 = vst [vmem:[#allocation108_spill] sm:$0xff] %v12613_v38  ;;  %v12615_v30 = vpop.f32.mrb[161].mxu0 }
 0x4f2   : > { %15311 = vst [vmem:[#allocation110_spill] sm:$0xff] %v12615_v30  ;;  %v4241_v46 = vmax.f32 %v12613_v38, %v12615_v30  ;;  %v12620_v2 = vpop.f32.mrb[162].mxu0  ;;  %4239 = vmax.xlane.f32.xlu0 %v4238_v3 }
 0x4f3   : > { %15312 = vst [vmem:[#allocation109_spill] sm:$0xff] %v12620_v2  ;;  %v12622_v6 = vpop.f32.mrb[163].mxu0  ;;  %v12624_v37 = vpop.f32.mrb[160].mxu1 }
 0x4f4   : > { %15313 = vst [vmem:[#allocation111_spill] sm:$0xff] %v12622_v6  ;;  %15314 = vst [vmem:[#allocation112_spill] sm:$0xff] %v12624_v37  ;;  %v4246_v12 = vmax.f32 %v12620_v2, %v12622_v6  ;;  %v4242_v59 = vmax.f32 %v4241_v46, %v12624_v37  ;;  %v12629_v54 = vpop.f32.mrb[161].mxu1 }
 0x4f5   : > { %15315 = vst [vmem:[#allocation114_spill] sm:$0xff] %v12629_v54  ;;  %v12631_v27 = vpop.f32.mrb[162].mxu1 }
 0x4f6   : > { %15316 = vst [vmem:[#allocation113_spill] sm:$0xff] %v12631_v27  ;;  %v4243_v56 = vmax.f32 %v4242_v59, %v12629_v54  ;;  %v4247_v15 = vmax.f32 %v4246_v12, %v12631_v27  ;;  %v12635_v30 = vpop.f32.mrb[163].mxu1 }
 0x4f7   : > { %15317 = vst [vmem:[#allocation115_spill] sm:$0xff] %v12635_v30 }
 0x4f8   : > { %v12637_v38 = vpop.f32.mrb[164].mxu0  ;;  %v4248_v31 = vmax.f32 %v4247_v15, %v12635_v30  ;;  %4244 = vmax.xlane.f32.xlu1 %v4243_v56 }
 0x4f9   : > { %15318 = vst [vmem:[#allocation116_spill] sm:$0xff] %v12637_v38  ;;  %v12639_v3 = vpop.f32.mrb[165].mxu0 }
 0x4fa   : > { %15319 = vst [vmem:[#allocation118_spill] sm:$0xff] %v12639_v3  ;;  %v4251_v46 = vmax.f32 %v12637_v38, %v12639_v3  ;;  %v12644_v37 = vpop.f32.mrb[166].mxu0 }
 0x4fb   : > { %15320 = vst [vmem:[#allocation117_spill] sm:$0xff] %v12644_v37  ;;  %v12646_v6 = vpop.f32.mrb[167].mxu0  ;;  %v12650_v12 = vpop.f32.mrb[164].mxu1 }
 0x4fc   : > { %15321 = vst [vmem:[#allocation119_spill] sm:$0xff] %v12646_v6  ;;  %v4256_v59 = vmax.f32 %v12644_v37, %v12646_v6  ;;  %15322 = vst [vmem:[#allocation120_spill] sm:$0xff] %v12650_v12  ;;  %v4252_v54 = vmax.f32 %v4251_v46, %v12650_v12  ;;  %v12653_v27 = vpop.f32.mrb[165].mxu1  ;;  %4249 = vmax.xlane.f32.xlu1 %v4248_v31 }
 0x4fd   : > { %15323 = vst [vmem:[#allocation122_spill] sm:$0xff] %v12653_v27  ;;  %v12655_v2 = vpop.f32.mrb[166].mxu1 }
 0x4fe   : > { %15324 = vst [vmem:[#allocation121_spill] sm:$0xff] %v12655_v2  ;;  %v4253_v56 = vmax.f32 %v4252_v54, %v12653_v27  ;;  %v4257_v15 = vmax.f32 %v4256_v59, %v12655_v2  ;;  %v12659_v3 = vpop.f32.mrb[167].mxu1 }
 0x4ff   : > { %15325 = vst [vmem:[#allocation123_spill] sm:$0xff] %v12659_v3 }
 0x500   : > { %v12661_v38 = vpop.f32.mrb[168].mxu0  ;;  %v4258_v6 = vmax.f32 %v4257_v15, %v12659_v3  ;;  %4254 = vmax.xlane.f32.xlu1 %v4253_v56 }
 0x501   : > { %15326 = vst [vmem:[#allocation124_spill] sm:$0xff] %v12661_v38  ;;  %v12663_v30 = vpop.f32.mrb[169].mxu0 }
 0x502   : > { %15327 = vst [vmem:[#allocation126_spill] sm:$0xff] %v12663_v30  ;;  %v4261_v46 = vmax.f32 %v12661_v38, %v12663_v30  ;;  %v12668_v12 = vpop.f32.mrb[170].mxu0  ;;  %4259 = vmax.xlane.f32.xlu0 %v4258_v6 }
 0x503   : > { %15328 = vst [vmem:[#allocation125_spill] sm:$0xff] %v12668_v12  ;;  %v12670_v31 = vpop.f32.mrb[171].mxu0  ;;  %v12674_v59 = vpop.f32.mrb[168].mxu1 }
 0x504   : > { %15329 = vst [vmem:[#allocation127_spill] sm:$0xff] %v12670_v31  ;;  %v4266_v54 = vmax.f32 %v12668_v12, %v12670_v31  ;;  %15330 = vst [vmem:[#allocation128_spill] sm:$0xff] %v12674_v59  ;;  %v4262_v27 = vmax.f32 %v4261_v46, %v12674_v59  ;;  %v12677_v2 = vpop.f32.mrb[169].mxu1 }
 0x505   : > { %15331 = vst [vmem:[#allocation130_spill] sm:$0xff] %v12677_v2  ;;  %v12679_v37 = vpop.f32.mrb[170].mxu1 }
 0x506   : > { %15332 = vst [vmem:[#allocation129_spill] sm:$0xff] %v12679_v37  ;;  %v4263_v56 = vmax.f32 %v4262_v27, %v12677_v2  ;;  %v4267_v15 = vmax.f32 %v4266_v54, %v12679_v37  ;;  %v12683_v30 = vpop.f32.mrb[171].mxu1 }
 0x507   : > { %15333 = vst [vmem:[#allocation131_spill] sm:$0xff] %v12683_v30 }
 0x508   : > { %v12685_v38 = vpop.f32.mrb[172].mxu0  ;;  %v4268_v31 = vmax.f32 %v4267_v15, %v12683_v30  ;;  %4264 = vmax.xlane.f32.xlu1 %v4263_v56 }
 0x509   : > { %15334 = vst [vmem:[#allocation48_spill] sm:$0xff] %v12685_v38  ;;  %v12687_v6 = vpop.f32.mrb[173].mxu0 }
 0x50a   : > { %15335 = vst [vmem:[#allocation49_spill] sm:$0xff] %v12687_v6  ;;  %v4271_v46 = vmax.f32 %v12685_v38, %v12687_v6  ;;  %v12692_v59 = vpop.f32.mrb[174].mxu0  ;;  %4269 = vmax.xlane.f32.xlu0 %v4268_v31 }
 0x50b   : > { %15336 = vst [vmem:[#allocation31_spill] sm:$0xff] %v12692_v59  ;;  %v12694_v12 = vpop.f32.mrb[175].mxu0  ;;  %v12698_v54 = vpop.f32.mrb[172].mxu1 }
 0x50c   : > { %15337 = vst [vmem:[#allocation30_spill] sm:$0xff] %v12694_v12  ;;  %v4276_v27 = vmax.f32 %v12692_v59, %v12694_v12  ;;  %15338 = vst [vmem:[#allocation32_spill] sm:$0xff] %v12698_v54  ;;  %v4272_v2 = vmax.f32 %v4271_v46, %v12698_v54  ;;  %v12701_v37 = vpop.f32.mrb[173].mxu1 }
 0x50d   : > { %15339 = vst [vmem:[#allocation34_spill] sm:$0xff] %v12701_v37  ;;  %v12703_v3 = vpop.f32.mrb[174].mxu1 }
 0x50e   : > { %15340 = vst [vmem:[#allocation33_spill] sm:$0xff] %v12703_v3  ;;  %v4273_v56 = vmax.f32 %v4272_v2, %v12701_v37  ;;  %v4277_v15 = vmax.f32 %v4276_v27, %v12703_v3  ;;  %v12707_v6 = vpop.f32.mrb[175].mxu1 }
 0x50f   : > { %15341 = vst [vmem:[#allocation35_spill] sm:$0xff] %v12707_v6 }
 0x510   : > { %v12709_v38 = vpop.f32.mrb[176].mxu0  ;;  %v4278_v12 = vmax.f32 %v4277_v15, %v12707_v6  ;;  %4274 = vmax.xlane.f32.xlu1 %v4273_v56 }
 0x511   : > { %15342 = vst [vmem:[#allocation42_spill] sm:$0xff] %v12709_v38  ;;  %v12711_v31 = vpop.f32.mrb[177].mxu0 }
 0x512   : > { %15343 = vst [vmem:[#allocation44_spill] sm:$0xff] %v12711_v31  ;;  %v4281_v46 = vmax.f32 %v12709_v38, %v12711_v31  ;;  %v12716_v54 = vpop.f32.mrb[178].mxu0  ;;  %4279 = vmax.xlane.f32.xlu0 %v4278_v12 }
 0x513   : > { %15344 = vst [vmem:[#allocation43_spill] sm:$0xff] %v12716_v54  ;;  %v12718_v59 = vpop.f32.mrb[179].mxu0  ;;  %v12722_v27 = vpop.f32.mrb[176].mxu1 }
 0x514   : > { %15345 = vst [vmem:[#allocation46_spill] sm:$0xff] %v12718_v59  ;;  %v4286_v2 = vmax.f32 %v12716_v54, %v12718_v59  ;;  %15346 = vst [vmem:[#allocation45_spill] sm:$0xff] %v12722_v27  ;;  %v4282_v37 = vmax.f32 %v4281_v46, %v12722_v27  ;;  %v12725_v3 = vpop.f32.mrb[177].mxu1 }
 0x515   : > { %15347 = vst [vmem:[#allocation38_spill] sm:$0xff] %v12725_v3  ;;  %v12727_v30 = vpop.f32.mrb[178].mxu1 }
 0x516   : > { %15348 = vst [vmem:[#allocation37_spill] sm:$0xff] %v12727_v30  ;;  %v4283_v56 = vmax.f32 %v4282_v37, %v12725_v3  ;;  %v4287_v15 = vmax.f32 %v4286_v2, %v12727_v30  ;;  %v12731_v31 = vpop.f32.mrb[179].mxu1 }
 0x517   : > { %15349 = vst [vmem:[#allocation47_spill] sm:$0xff] %v12731_v31 }
 0x518   : > { %v12733_v38 = vpop.f32.mrb[180].mxu0  ;;  %v4288_v59 = vmax.f32 %v4287_v15, %v12731_v31  ;;  %4284 = vmax.xlane.f32.xlu1 %v4283_v56 }
 0x519   : > { %15350 = vst [vmem:[#allocation50_spill] sm:$0xff] %v12733_v38  ;;  %v12735_v12 = vpop.f32.mrb[181].mxu0 }
 0x51a   : > { %15351 = vst [vmem:[#allocation36_spill] sm:$0xff] %v12735_v12  ;;  %v4291_v46 = vmax.f32 %v12733_v38, %v12735_v12  ;;  %v12740_v27 = vpop.f32.mrb[182].mxu0  ;;  %4289 = vmax.xlane.f32.xlu0 %v4288_v59 }
 0x51b   : > { %15352 = vst [vmem:[#allocation39_spill] sm:$0xff] %v12740_v27  ;;  %v12742_v54 = vpop.f32.mrb[183].mxu0  ;;  %v12746_v2 = vpop.f32.mrb[180].mxu1 }
 0x51c   : > { %15353 = vst [vmem:[#allocation51_spill] sm:$0xff] %v12742_v54  ;;  %v4296_v37 = vmax.f32 %v12740_v27, %v12742_v54  ;;  %15354 = vst [vmem:[#allocation40_spill] sm:$0xff] %v12746_v2  ;;  %v4292_v3 = vmax.f32 %v4291_v46, %v12746_v2  ;;  %v12749_v30 = vpop.f32.mrb[181].mxu1 }
 0x51d   : > { %15355 = vst [vmem:[#allocation41_spill] sm:$0xff] %v12749_v30  ;;  %v12751_v6 = vpop.f32.mrb[182].mxu1 }
 0x51e   : > { %15356 = vst [vmem:[#allocation132_spill] sm:$0xff] %v12751_v6  ;;  %v4293_v56 = vmax.f32 %v4292_v3, %v12749_v30  ;;  %v4297_v15 = vmax.f32 %v4296_v37, %v12751_v6  ;;  %v12755_v12 = vpop.f32.mrb[183].mxu1 }
 0x51f   : > { %15357 = vst [vmem:[#allocation134_spill] sm:$0xff] %v12755_v12 }
 0x520   : > { %v12757_v38 = vpop.f32.mrb[184].mxu0  ;;  %v4298_v54 = vmax.f32 %v4297_v15, %v12755_v12  ;;  %4294 = vmax.xlane.f32.xlu1 %v4293_v56 }
 0x521   : > { %15358 = vst [vmem:[#allocation169_spill] sm:$0xff] %v12757_v38  ;;  %v12759_v59 = vpop.f32.mrb[185].mxu0 }
 0x522   : > { %15359 = vst [vmem:[#allocation168_spill] sm:$0xff] %v12759_v59  ;;  %v4301_v46 = vmax.f32 %v12757_v38, %v12759_v59  ;;  %v12764_v2 = vpop.f32.mrb[186].mxu0  ;;  %4299 = vmax.xlane.f32.xlu0 %v4298_v54 }
 0x523   : > { %15360 = vst [vmem:[#allocation171_spill] sm:$0xff] %v12764_v2  ;;  %v12766_v27 = vpop.f32.mrb[187].mxu0  ;;  %v12770_v37 = vpop.f32.mrb[184].mxu1 }
 0x524   : > { %15361 = vst [vmem:[#allocation136_spill] sm:$0xff] %v12766_v27  ;;  %v4306_v3 = vmax.f32 %v12764_v2, %v12766_v27  ;;  %15362 = vst [vmem:[#allocation138_spill] sm:$0xff] %v12770_v37  ;;  %v4302_v30 = vmax.f32 %v4301_v46, %v12770_v37  ;;  %v12773_v6 = vpop.f32.mrb[185].mxu1 }
 0x525   : > { %15363 = vst [vmem:[#allocation140_spill] sm:$0xff] %v12773_v6  ;;  %v12775_v31 = vpop.f32.mrb[186].mxu1 }
 0x526   : > { %15364 = vst [vmem:[#allocation142_spill] sm:$0xff] %v12775_v31  ;;  %v4303_v56 = vmax.f32 %v4302_v30, %v12773_v6  ;;  %v4307_v15 = vmax.f32 %v4306_v3, %v12775_v31  ;;  %v12779_v59 = vpop.f32.mrb[187].mxu1 }
 0x527   : > { %15365 = vst [vmem:[#allocation170_spill] sm:$0xff] %v12779_v59 }
 0x528   : > { %v12781_v38 = vpop.f32.mrb[188].mxu0  ;;  %v4308_v54 = vmax.f32 %v4307_v15, %v12779_v59  ;;  %4304 = vmax.xlane.f32.xlu1 %v4303_v56 }
 0x529   : > { %15366 = vst [vmem:[#allocation173_spill] sm:$0xff] %v12781_v38  ;;  %v12784_v27 = vpop.f32.mrb[189].mxu0 }
 0x52a   : > { %15367 = vst [vmem:[#allocation144_spill] sm:$0xff] %v12784_v27  ;;  %v4311_v46 = vmax.f32 %v12781_v38, %v12784_v27  ;;  %v12788_v37 = vpop.f32.mrb[190].mxu0  ;;  %4309 = vmax.xlane.f32.xlu0 %v4308_v54  ;;  %v12834_v27 = vld [vmem:[#allocation2 + $0x118] sm:$0xff] }
 0x52b   : > { %15368 = vst [vmem:[#allocation146_spill] sm:$0xff] %v12788_v37  ;;  %v12790_v2 = vpop.f32.mrb[191].mxu0  ;;  %v12794_v3 = vpop.f32.mrb[188].mxu1  ;;  %15379 = vst [vmem:[#allocation177_spill] sm:$0xff] %v12834_v27 }
 0x52c   : > { %15369 = vst [vmem:[#allocation172_spill] sm:$0xff] %v12790_v2  ;;  %v4316_v30 = vmax.f32 %v12788_v37, %v12790_v2  ;;  %15370 = vst [vmem:[#allocation174_spill] sm:$0xff] %v12794_v3  ;;  %v12797_v6 = vmax.f32 %v4311_v46, %v12794_v3  ;;  %v12799_v15 = vpop.f32.mrb[189].mxu1  ;;  %v12812_v37 = vld [vmem:[#allocation2 + $0x100] sm:$0xff]  ;;  %v12814_v46 = vld [vmem:[#allocation2 + $0x108] sm:$0xff] }
 0x52d   : > { %15371 = vst [vmem:[#allocation148_spill] sm:$0xff] %v12799_v15  ;;  %v12801_v56 = vpop.f32.mrb[190].mxu1  ;;  %15374 = vst [vmem:[#allocation152_spill] sm:$0xff] %v12812_v37 }
 0x52e   : > { %15372 = vst [vmem:[#allocation150_spill] sm:$0xff] %v12801_v56  ;;  %v12806_v38 = vmax.f32 %v4316_v30, %v12801_v56  ;;  %v12808_v54 = vpop.f32.mrb[191].mxu1  ;;  %15375 = vst [vmem:[#allocation154_spill] sm:$0xff] %v12814_v46 }
 0x52f   : > { %15373 = vst [vmem:[#allocation175_spill] sm:$0xff] %v12808_v54 }
 0x546   : > { %v4165_v59 = vpop.xlane.xlu1 %4164 }
 0x547   : > { %v12817_v3 = vmax.f32 %v12812_v37, %v4165_v59  ;;  %v12831_v59 = vld [vmem:[#allocation2 + $0x110] sm:$0xff] }
 0x548   : > { %v4170_v31 = vpop.xlane.xlu0 %4169  ;;  %15378 = vst [vmem:[#allocation158_spill] sm:$0xff] %v12831_v59 }
 0x549   : > { %15376 = vst [vmem:[#allocation176_spill] sm:$0xff] %v12817_v3  ;;  %6053 = vst.msk [vmem:[#allocation2 + $0x100] sm:$0xff] %vm2571_vm3, %v12817_v3  ;;  %4451 = vperm.xlu1 %8331, %v12817_v3   ;;  %v12825_v30 = vmax.f32 %v12814_v46, %v4170_v31  ;;  %v12854_v31 = vld [vmem:[#allocation2 + $0x128] sm:$0xff]  ;;  %v12952_v46 = vld [vmem:[#allocation2 + $0x178] sm:$0xff] }
 0x54a   : > { %15383 = vst [vmem:[#allocation135_spill] sm:$0xff] %v12854_v31  ;;  %15402 = vst [vmem:[#allocation161_spill] sm:$0xff] %v12952_v46 }
 0x54b   : > { %15377 = vst [vmem:[#allocation156_spill] sm:$0xff] %v12825_v30  ;;  %6054 = vst.msk [vmem:[#allocation2 + $0x108] sm:$0xff] %vm2571_vm3, %v12825_v30 }
 0x54d   : > { %4456 = vperm.xlu1 %8331, %v12825_v30   ;;  %v4175_v56 = vpop.xlane.xlu0 %4174 }
 0x54e   : > { %v12837_v12 = vmax.f32 %v12831_v59, %v4175_v56  ;;  %v12852_v56 = vld [vmem:[#allocation2 + $0x120] sm:$0xff] }
 0x54f   : > { %v4180_v32 = vpop.xlane.xlu1 %4179  ;;  %15382 = vst [vmem:[#allocation133_spill] sm:$0xff] %v12852_v56 }
 0x550   : > { %15380 = vst [vmem:[#allocation160_spill] sm:$0xff] %v12837_v12  ;;  %6055 = vst.msk [vmem:[#allocation2 + $0x110] sm:$0xff] %vm2571_vm3, %v12837_v12  ;;  %v12844_v2 = vmax.f32 %v12834_v27, %v4180_v32 }
 0x551   : > { %4461 = vperm.xlu1 %8331, %v12837_v12   ;;  %v12874_v12 = vld [vmem:[#allocation2 + $0x138] sm:$0xff] }
 0x552   : > { %15381 = vst [vmem:[#allocation162_spill] sm:$0xff] %v12844_v2  ;;  %6056 = vst.msk [vmem:[#allocation2 + $0x118] sm:$0xff] %vm2571_vm3, %v12844_v2  ;;  %4466 = vperm.xlu0 %8330, %v12844_v2  }
 0x553   : > { %15387 = vst [vmem:[#allocation137_spill] sm:$0xff] %v12874_v12 }
 0x555   : > { %v4185_v30 = vpop.xlane.xlu0 %4184 }
 0x556   : > { %v12857_v59 = vmax.f32 %v12852_v56, %v4185_v30  ;;  %v12872_v30 = vld [vmem:[#allocation2 + $0x130] sm:$0xff] }
 0x557   : > { %v4190_v32 = vpop.xlane.xlu1 %4189  ;;  %15386 = vst [vmem:[#allocation166_spill] sm:$0xff] %v12872_v30 }
 0x558   : > { %15384 = vst [vmem:[#allocation178_spill] sm:$0xff] %v12857_v59  ;;  %6057 = vst.msk [vmem:[#allocation2 + $0x120] sm:$0xff] %vm2571_vm3, %v12857_v59  ;;  %v12864_v55 = vmax.f32 %v12854_v31, %v4190_v32  ;;  %4471 = vperm.xlu1 %8331, %v12857_v59   ;;  %v12894_v59 = vld [vmem:[#allocation2 + $0x148] sm:$0xff] }
 0x559   : > { %15391 = vst [vmem:[#allocation143_spill] sm:$0xff] %v12894_v59 }
 0x55a   : > { %15385 = vst [vmem:[#allocation164_spill] sm:$0xff] %v12864_v55  ;;  %6058 = vst.msk [vmem:[#allocation2 + $0x128] sm:$0xff] %vm2571_vm3, %v12864_v55  ;;  %4476 = vperm.xlu0 %8330, %v12864_v55  }
 0x55d   : > { %v4195_v27 = vpop.xlane.xlu0 %4194 }
 0x55e   : > { %v12877_v56 = vmax.f32 %v12872_v30, %v4195_v27  ;;  %v12892_v27 = vld [vmem:[#allocation2 + $0x140] sm:$0xff] }
 0x55f   : > { %v4200_v32 = vpop.xlane.xlu1 %4199  ;;  %15390 = vst [vmem:[#allocation141_spill] sm:$0xff] %v12892_v27 }
 0x560   : > { %15388 = vst [vmem:[#allocation139_spill] sm:$0xff] %v12877_v56  ;;  %6059 = vst.msk [vmem:[#allocation2 + $0x130] sm:$0xff] %vm2571_vm3, %v12877_v56  ;;  %v12884_v2 = vmax.f32 %v12874_v12, %v4200_v32  ;;  %4481 = vperm.xlu1 %8331, %v12877_v56  }
 0x562   : > { %15389 = vst [vmem:[#allocation179_spill] sm:$0xff] %v12884_v2  ;;  %6060 = vst.msk [vmem:[#allocation2 + $0x138] sm:$0xff] %vm2571_vm3, %v12884_v2  ;;  %4486 = vperm.xlu0 %8330, %v12884_v2  }
 0x565   : > { %v4205_v31 = vpop.xlane.xlu0 %4204 }
 0x566   : > { %v12897_v30 = vmax.f32 %v12892_v27, %v4205_v31  ;;  %v12912_v31 = vld [vmem:[#allocation2 + $0x150] sm:$0xff]  ;;  %v12917_v27 = vld [vmem:[#allocation2 + $0x158] sm:$0xff] }
 0x567   : > { %v4210_v32 = vpop.xlane.xlu1 %4209  ;;  %15394 = vst [vmem:[#allocation147_spill] sm:$0xff] %v12912_v31  ;;  %15396 = vst [vmem:[#allocation149_spill] sm:$0xff] %v12917_v27 }
 0x568   : > { %15392 = vst [vmem:[#allocation180_spill] sm:$0xff] %v12897_v30  ;;  %6061 = vst.msk [vmem:[#allocation2 + $0x140] sm:$0xff] %vm2571_vm3, %v12897_v30  ;;  %v12904_v55 = vmax.f32 %v12894_v59, %v4210_v32  ;;  %4491 = vperm.xlu0 %8330, %v12897_v30   ;;  %v12937_v30 = vld [vmem:[#allocation2 + $0x168] sm:$0xff] }
 0x569   : > { %15399 = vst [vmem:[#allocation155_spill] sm:$0xff] %v12937_v30 }
 0x56a   : > { %15393 = vst [vmem:[#allocation145_spill] sm:$0xff] %v12904_v55  ;;  %6062 = vst.msk [vmem:[#allocation2 + $0x148] sm:$0xff] %vm2571_vm3, %v12904_v55  ;;  %4496 = vperm.xlu1 %8331, %v12904_v55   ;;  %v12927_v55 = vld [vmem:[#allocation2 + $0x160] sm:$0xff] }
 0x56b   : > { %15398 = vst [vmem:[#allocation153_spill] sm:$0xff] %v12927_v55 }
 0x56d   : > { %v4215_v12 = vpop.xlane.xlu1 %4214 }
 0x56e   : > { %v12915_v56 = vmax.f32 %v12912_v31, %v4215_v12 }
 0x570   : > { %15395 = vst [vmem:[#allocation181_spill] sm:$0xff] %v12915_v56  ;;  %6063 = vst.msk [vmem:[#allocation2 + $0x150] sm:$0xff] %vm2571_vm3, %v12915_v56  ;;  %4501 = vperm.xlu0 %8330, %v12915_v56  }
 0x571   : > { %v4220_v2 = vpop.xlane.xlu1 %4219 }
 0x572   : > { %v12925_v59 = vmax.f32 %v12917_v27, %v4220_v2  ;;  %v12946_v27 = vld [vmem:[#allocation2 + $0x170] sm:$0xff] }
 0x573   : > { %15401 = vst [vmem:[#allocation159_spill] sm:$0xff] %v12946_v27 }
 0x574   : > { %15397 = vst [vmem:[#allocation151_spill] sm:$0xff] %v12925_v59  ;;  %6064 = vst.msk [vmem:[#allocation2 + $0x158] sm:$0xff] %vm2571_vm3, %v12925_v59  ;;  %4506 = vperm.xlu1 %8331, %v12925_v59  }
 0x575   : > { %v4225_v32 = vpop.xlane.xlu1 %4224 }
 0x576   : > { %v12935_v31 = vmax.f32 %v12927_v55, %v4225_v32 }
 0x578   : > { %6065 = vst.msk [vmem:[#allocation2 + $0x160] sm:$0xff] %vm2571_vm3, %v12935_v31 }
 0x579   : > { %v4230_v56 = vpop.xlane.xlu1 %4229 }
 0x57a   : > { %v12944_v12 = vmax.f32 %v12937_v30, %v4230_v56  ;;  %v12968_v30 = vld [vmem:[#allocation2 + $0x180] sm:$0xff] }
 0x57b   : > { %15404 = vst [vmem:[#allocation165_spill] sm:$0xff] %v12968_v30 }
 0x57c   : > { %15400 = vst [vmem:[#allocation157_spill] sm:$0xff] %v12944_v12  ;;  %6066 = vst.msk [vmem:[#allocation2 + $0x168] sm:$0xff] %vm2571_vm3, %v12944_v12 }
 0x57d   : > { %v4235_v32 = vpop.xlane.xlu1 %4234 }
 0x57e   : > { %v12955_v2 = vmax.f32 %v12946_v27, %v4235_v32  ;;  %v15413_v27 = vmax.f32 %v12797_v6, %v12799_v15 }
 0x57f   : > { %v4240_v55 = vpop.xlane.xlu0 %4239 }
 0x580   : > { %6067 = vst.msk [vmem:[#allocation2 + $0x170] sm:$0xff] %vm2571_vm3, %v12955_v2  ;;  %v12962_v56 = vmax.f32 %v12952_v46, %v4240_v55  ;;  %v12982_v46 = vld [vmem:[#allocation2 + $0x190] sm:$0xff] }
 0x581   : > { %15407 = vst [vmem:[#allocation183_spill] sm:$0xff] %v12982_v46 }
 0x582   : > { %15403 = vst [vmem:[#allocation163_spill] sm:$0xff] %v12962_v56  ;;  %6068 = vst.msk [vmem:[#allocation2 + $0x178] sm:$0xff] %vm2571_vm3, %v12962_v56 }
 0x585   : > { %v4245_v32 = vpop.xlane.xlu1 %4244 }
 0x586   : > { %v12971_v37 = vmax.f32 %v12968_v30, %v4245_v32  ;;  %v12988_v32 = vld [vmem:[#allocation2 + $0x198] sm:$0xff]  ;;  %v15409_v30 = vmax.f32 %v12806_v38, %v12808_v54  ;;  %v13009_v38 = vld [vmem:[#allocation2 + $0x1a8] sm:$0xff] }
 0x587   : > { %15408 = vst [vmem:[#allocation184_spill] sm:$0xff] %v12988_v32  ;;  %15412 = vst [vmem:[#allocation187_spill] sm:$0xff] %v13009_v38 }
 0x588   : > { %6069 = vst.msk [vmem:[#allocation2 + $0x180] sm:$0xff] %vm2571_vm3, %v12971_v37 }
 0x589   : > { %v4250_v55 = vpop.xlane.xlu1 %4249 }
 0x58a   : > { %v12980_v59 = vmax.f32 %v12973_v60, %v4250_v55 }
 0x58c   : > { %15406 = vst [vmem:[#allocation182_spill] sm:$0xff] %v12980_v59  ;;  %6070 = vst.msk [vmem:[#allocation2 + $0x188] sm:$0xff] %vm2571_vm3, %v12980_v59 }
 0x58d   : > { %v4255_v4 = vpop.xlane.xlu1 %4254 }
 0x58e   : > { %v12991_v3 = vmax.f32 %v12982_v46, %v4255_v4  ;;  %v13007_v4 = vld [vmem:[#allocation2 + $0x1a0] sm:$0xff] }
 0x58f   : > { %4319 = vmax.xlane.f32.xlu0 %v15409_v30  ;;  %v4260_v55 = vpop.xlane.xlu0 %4259  ;;  %15411 = vst [vmem:[#allocation186_spill] sm:$0xff] %v13007_v4 }
 0x590   : > { %v12997_v43 = vmax.f32 %v12988_v32, %v4260_v55  ;;  %6071 = vst.msk [vmem:[#allocation2 + $0x190] sm:$0xff] %vm2571_vm3, %v12991_v3 }
 0x592   : > { %15410 = vst [vmem:[#allocation185_spill] sm:$0xff] %v12997_v43  ;;  %6072 = vst.msk [vmem:[#allocation2 + $0x198] sm:$0xff] %vm2571_vm3, %v12997_v43 }
 0x595   : > { %v4265_v30 = vpop.xlane.xlu1 %4264 }
 0x596   : > { %v13012_v55 = vmax.f32 %v13007_v4, %v4265_v30  ;;  %v13028_v30 = vld [vmem:[#allocation2 + $0x1b0] sm:$0xff] }
 0x597   : > { %v4270_v54 = vpop.xlane.xlu0 %4269  ;;  %15414 = vst [vmem:[#allocation188_spill] sm:$0xff] %v13028_v30 }
 0x598   : > { %4314 = vmax.xlane.f32.xlu1 %v15413_v27  ;;  %v13018_v46 = vmax.f32 %v13009_v38, %v4270_v54  ;;  %6073 = vst.msk [vmem:[#allocation2 + $0x1a0] sm:$0xff] %vm2571_vm3, %v13012_v55  ;;  %v13046_v38 = vld [vmem:[#allocation2 + $0x1c0] sm:$0xff] }
 0x599   : > { %15417 = vst [vmem:[#allocation191_spill] sm:$0xff] %v13046_v38 }
 0x59a   : > { %6074 = vst.msk [vmem:[#allocation2 + $0x1a8] sm:$0xff] %vm2571_vm3, %v13018_v46 }
 0x59d   : > { %v4275_v6 = vpop.xlane.xlu1 %4274 }
 0x59e   : > { %v13033_v54 = vmax.f32 %v13028_v30, %v4275_v6  ;;  %v13049_v6 = vld [vmem:[#allocation2 + $0x1c8] sm:$0xff] }
 0x59f   : > { %v4280_v27 = vpop.xlane.xlu0 %4279  ;;  %15418 = vst [vmem:[#allocation192_spill] sm:$0xff] %v13049_v6 }
 0x5a0   : > { %15416 = vst [vmem:[#allocation190_spill] sm:$0xff] %v13033_v54  ;;  %v13036_v60 = vmax.f32 %v13030_v8, %v4280_v27  ;;  %6075 = vst.msk [vmem:[#allocation2 + $0x1b0] sm:$0xff] %vm2571_vm3, %v13033_v54 }
 0x5a2   : > { %6076 = vst.msk [vmem:[#allocation2 + $0x1b8] sm:$0xff] %vm2571_vm3, %v13036_v60 }
 0x5a5   : > { %4511 = vperm.xlu0 %8330, %v12935_v31   ;;  %v4285_v27 = vpop.xlane.xlu1 %4284 }
 0x5a6   : > { %v13052_v4 = vmax.f32 %v13046_v38, %v4285_v27  ;;  %v13067_v27 = vld [vmem:[#allocation2 + $0x1d0] sm:$0xff] }
 0x5a7   : > { %v4290_v15 = vpop.xlane.xlu0 %4289  ;;  %15421 = vst [vmem:[#allocation195_spill] sm:$0xff] %v13067_v27 }
 0x5a8   : > { %15419 = vst [vmem:[#allocation193_spill] sm:$0xff] %v13052_v4  ;;  %v13055_v30 = vmax.f32 %v13049_v6, %v4290_v15  ;;  %6077 = vst.msk [vmem:[#allocation2 + $0x1c0] sm:$0xff] %vm2571_vm3, %v13052_v4  ;;  %v13071_v15 = vld [vmem:[#allocation2 + $0x1d8] sm:$0xff] }
 0x5a9   : > { %4526 = vperm.xlu0 %8330, %v12962_v56   ;;  %4516 = vperm.xlu1 %8331, %v12944_v12   ;;  %15422 = vst [vmem:[#allocation196_spill] sm:$0xff] %v13071_v15 }
 0x5aa   : > { %15420 = vst [vmem:[#allocation194_spill] sm:$0xff] %v13055_v30  ;;  %6078 = vst.msk [vmem:[#allocation2 + $0x1c8] sm:$0xff] %vm2571_vm3, %v13055_v30 }
 0x5ad   : > { %4521 = vperm.xlu1 %8331, %v12955_v2   ;;  %4536 = vperm.xlu0 %8330, %v12980_v59   ;;  %v4295_v32 = vpop.xlane.xlu1 %4294 }
 0x5ae   : > { %v13074_v38 = vmax.f32 %v13067_v27, %v4295_v32  ;;  %v13089_v32 = vld [vmem:[#allocation2 + $0x1e0] sm:$0xff] }
 0x5af   : > { %v4300_v56 = vpop.xlane.xlu0 %4299  ;;  %15425 = vst [vmem:[#allocation199_spill] sm:$0xff] %v13089_v32 }
 0x5b0   : > { %15423 = vst [vmem:[#allocation197_spill] sm:$0xff] %v13074_v38  ;;  %v13077_v12 = vmax.f32 %v13071_v15, %v4300_v56  ;;  %6079 = vst.msk [vmem:[#allocation2 + $0x1d0] sm:$0xff] %vm2571_vm3, %v13074_v38  ;;  %v13093_v56 = vld [vmem:[#allocation2 + $0x1e8] sm:$0xff] }
 0x5b1   : > { %4531 = vperm.xlu1 %8331, %v12971_v37   ;;  %4546 = vperm.xlu0 %8330, %v12997_v43   ;;  %15426 = vst [vmem:[#allocation200_spill] sm:$0xff] %v13093_v56 }
 0x5b2   : > { %15424 = vst [vmem:[#allocation198_spill] sm:$0xff] %v13077_v12  ;;  %6080 = vst.msk [vmem:[#allocation2 + $0x1d8] sm:$0xff] %vm2571_vm3, %v13077_v12 }
 0x5b5   : > { %4556 = vperm.xlu0 %8330, %v13018_v46   ;;  %4541 = vperm.xlu1 %8331, %v12991_v3   ;;  %v4305_v8 = vpop.xlane.xlu1 %4304 }
 0x5b6   : > { %v13096_v27 = vmax.f32 %v13089_v32, %v4305_v8 }
 0x5b7   : > { %v4310_v59 = vpop.xlane.xlu0 %4309 }
 0x5b8   : > { %15427 = vst [vmem:[#allocation201_spill] sm:$0xff] %v13096_v27  ;;  %v13099_v43 = vmax.f32 %v13093_v56, %v4310_v59  ;;  %6081 = vst.msk [vmem:[#allocation2 + $0x1e0] sm:$0xff] %vm2571_vm3, %v13096_v27 }
 0x5b9   : > { %4566 = vperm.xlu0 %8330, %v13036_v60   ;;  %4551 = vperm.xlu1 %8331, %v13012_v55  }
 0x5ba   : > { %15428 = vst [vmem:[#allocation202_spill] sm:$0xff] %v13099_v43  ;;  %6082 = vst.msk [vmem:[#allocation2 + $0x1e8] sm:$0xff] %vm2571_vm3, %v13099_v43 }
 0x5bd   : > { %4576 = vperm.xlu0 %8330, %v13055_v30   ;;  %4561 = vperm.xlu1 %8331, %v13033_v54  }
 0x5c1   : > { %4586 = vperm.xlu0 %8330, %v13077_v12   ;;  %4571 = vperm.xlu1 %8331, %v13052_v4  }
 0x5c5   : > { %4596 = vperm.xlu0 %8330, %v13099_v43   ;;  %4581 = vperm.xlu1 %8331, %v13074_v38  }
 0x5c8   : > { %v4452_v8 = vpop.permute.xlu1 %4451 }
 0x5c9   : > { %v4609_v59 = vsub.f32 %v12374_v50, %v4452_v8  ;;  %v4610_v6 = vsub.f32 %v12378_v1, %v4452_v8  ;;  %v4611_v15 = vsub.f32 %v12393_v40, %v4452_v8  ;;  %v4612_v32 = vsub.f32 %v12400_v36, %v4452_v8  ;;  %4591 = vperm.xlu1 %8331, %v13096_v27  }
 0x5cb   : > { %v4737_v56 = vmul.f32 1.442695, %v4609_v59  ;;  %v4739_v54 = vmul.f32 1.442695, %v4610_v6  ;;  %v4741_v12 = vmul.f32 1.442695, %v4611_v15 }
 0x5cc   : > { %v4743_v30 = vmul.f32 1.442695, %v4612_v32  ;;  %v4457_v4 = vpop.permute.xlu1 %4456 }
 0x5cd   : > { %8732 = vpow2.f32 %v4737_v56  ;;  %v4613_v43 = vsub.f32 %v12382_v51, %v4457_v4  ;;  %v4614_v38 = vsub.f32 %v12389_v11, %v4457_v4  ;;  %v4615_v50 = vsub.f32 %v12402_v7, %v4457_v4 }
 0x5ce   : > { %8734 = vpow2.f32 %v4739_v54  ;;  %v4616_v1 = vsub.f32 %v12410_v63, %v4457_v4 }
 0x5cf   : > { %8736 = vpow2.f32 %v4741_v12  ;;  %v4745_v40 = vmul.f32 1.442695, %v4613_v43  ;;  %v4747_v36 = vmul.f32 1.442695, %v4614_v38  ;;  %v4749_v8 = vmul.f32 1.442695, %v4615_v50 }
 0x5d0   : > { %8738 = vpow2.f32 %v4743_v30  ;;  %v4751_v59 = vmul.f32 1.442695, %v4616_v1  ;;  %v4462_v6 = vpop.permute.xlu1 %4461 }
 0x5d1   : > { %8740 = vpow2.f32 %v4745_v40  ;;  %v4617_v15 = vsub.f32 %v12414_v13, %v4462_v6  ;;  %v4618_v32 = vsub.f32 %v12418_v29, %v4462_v6  ;;  %v4619_v51 = vsub.f32 %v12434_v19, %v4462_v6  ;;  %v4467_v7 = vpop.permute.xlu0 %4466 }
 0x5d2   : > { %8742 = vpow2.f32 %v4747_v36  ;;  %v4620_v11 = vsub.f32 %v12439_v52, %v4462_v6  ;;  %v4621_v38 = vsub.f32 %v12423_v58, %v4467_v7  ;;  %v4622_v30 = vsub.f32 %v12428_v5, %v4467_v7 }
 0x5d3   : > { %8744 = vpow2.f32 %v4749_v8  ;;  %v4753_v63 = vmul.f32 1.442695, %v4617_v15  ;;  %v4755_v12 = vmul.f32 1.442695, %v4618_v32  ;;  %v4757_v43 = vmul.f32 1.442695, %v4619_v51 }
 0x5d4   : > { %8746 = vpow2.f32 %v4751_v59  ;;  %v4759_v4 = vmul.f32 1.442695, %v4620_v11  ;;  %v4623_v13 = vsub.f32 %v12441_v44, %v4467_v7  ;;  %v4624_v29 = vsub.f32 %v12448_v20, %v4467_v7 }
 0x5d5   : > { %8748 = vpow2.f32 %v4753_v63  ;;  %v4761_v19 = vmul.f32 1.442695, %v4621_v38  ;;  %v4763_v54 = vmul.f32 1.442695, %v4622_v30 }
 0x5d6   : > { %8750 = vpow2.f32 %v4755_v12  ;;  %v4765_v56 = vmul.f32 1.442695, %v4623_v13  ;;  %v4767_v1 = vmul.f32 1.442695, %v4624_v29 }
 0x5d7   : > { %v8733_v52 = vpop.eup %8732  ;;  %8752 = vpow2.f32 %v4757_v43  ;;  %v4472_v40 = vpop.permute.xlu1 %4471 }
 0x5d8   : > { %v8735_v50 = vpop.eup %8734  ;;  %8754 = vpow2.f32 %v4759_v4  ;;  %v4625_v58 = vsub.f32 %v12452_v61, %v4472_v40  ;;  %v4626_v5 = vsub.f32 %v12457_v10, %v4472_v40  ;;  %v4627_v44 = vsub.f32 %v12469_v17, %v4472_v40 }
 0x5d9   : > { %v8737_v36 = vpop.eup %8736  ;;  %8756 = vpow2.f32 %v4761_v19  ;;  %v4628_v20 = vsub.f32 %v12474_v22, %v4472_v40  ;;  %v4477_v59 = vpop.permute.xlu0 %4476  ;;  %v5058_v6 = vadd.f32 %v8735_v50, %v8733_v52 }
 0x5da   : > { %v13137_v8 = vpop.eup %8738  ;;  %8758 = vpow2.f32 %v4763_v54  ;;  %v4769_v32 = vmul.f32 1.442695, %v4625_v58  ;;  %v4771_v51 = vmul.f32 1.442695, %v4626_v5  ;;  %v4773_v11 = vmul.f32 1.442695, %v4627_v44 }
 0x5db   : > { %v8741_v15 = vpop.eup %8740  ;;  %8760 = vpow2.f32 %v4765_v56  ;;  %v4775_v63 = vmul.f32 1.442695, %v4628_v20  ;;  %v4629_v61 = vsub.f32 %v12461_v53, %v4477_v59  ;;  %v4630_v10 = vsub.f32 %v12463_v18, %v4477_v59 }
 0x5dc   : > { %v8743_v7 = vpop.eup %8742  ;;  %8762 = vpow2.f32 %v4767_v1  ;;  %v4631_v12 = vsub.f32 %v12476_v62, %v4477_v59  ;;  %v4632_v22 = vsub.f32 %v12480_v0, %v4477_v59  ;;  %v5507_v13 = vpack.c.bf16 %v8741_v15, %v8733_v52 }
 0x5dd   : > { %v8745_v17 = vpop.eup %8744  ;;  %8764 = vpow2.f32 %v4769_v32  ;;  %v5508_v43 = vpack.c.bf16 %v8743_v7, %v8735_v50  ;;  %v4777_v38 = vmul.f32 1.442695, %v4629_v61  ;;  %v4779_v30 = vmul.f32 1.442695, %v4630_v10 }
 0x5de   : > { %v8747_v4 = vpop.eup %8746  ;;  %8766 = vpow2.f32 %v4771_v51  ;;  %v4781_v19 = vmul.f32 1.442695, %v4631_v12  ;;  %v4783_v54 = vmul.f32 1.442695, %v4632_v22  ;;  %v5509_v56 = vpack.c.bf16 %v8745_v17, %v8737_v36 }
 0x5df   : > { %v8749_v29 = vpop.eup %8748  ;;  %8768 = vpow2.f32 %v4773_v11  ;;  %5699 = vmatprep.mubr.bf16.mxu0 %v5508_v43  ;;  %v5510_v53 = vpack.c.bf16 %v8747_v4, %v13137_v8  ;;  %v4482_v62 = vpop.permute.xlu1 %4481  ;;  %v5063_v1 = vadd.f32 %v8743_v7, %v8741_v15  ;;  %v13145_v0 = vadd.f32 %v8737_v36, %v5058_v6 }
 0x5e0   : > { %v8751_v18 = vpop.eup %8750  ;;  %8770 = vpow2.f32 %v4775_v63  ;;  %5700 = vmatmul.mubr.bf16.vlgmr.msra.gmra.mrb[192].mxu0 %v5507_v13  ;;  %v4633_v52 = vsub.f32 %v12484_v21, %v4482_v62  ;;  %v4634_v40 = vsub.f32 %v12489_v9, %v4482_v62  ;;  %v4635_v58 = vsub.f32 %v12501_v16, %v4482_v62 }
 0x5e1   : > { %v8753_v50 = vpop.eup %8752  ;;  %8772 = vpow2.f32 %v4777_v38  ;;  %5860 = vmatprep.mubr.bf16.mxu1 %v5510_v53  ;;  %v4636_v44 = vsub.f32 %v12506_v14, %v4482_v62  ;;  %v4487_v20 = vpop.permute.xlu0 %4486  ;;  %v5064_v59 = vadd.f32 %v8745_v17, %v5063_v1  ;;  %v5068_v32 = vadd.f32 %v8751_v18, %v8749_v29 }
 0x5e2   : > { %v8755_v5 = vpop.eup %8754  ;;  %8774 = vpow2.f32 %v4779_v30  ;;  %5861 = vmatmul.mubr.bf16.vlgmr.msra.gmra.mrb[192].mxu1 %v5509_v56  ;;  %v4785_v36 = vmul.f32 1.442695, %v4633_v52  ;;  %v4787_v6 = vmul.f32 1.442695, %v4634_v40  ;;  %v4789_v51 = vmul.f32 1.442695, %v4635_v58 }
 0x5e3   : > { %v13151_v15 = vpop.eup %8756  ;;  %8776 = vpow2.f32 %v4781_v19  ;;  %v4791_v21 = vmul.f32 1.442695, %v4636_v44  ;;  %v4637_v16 = vsub.f32 %v12493_v47, %v4487_v20  ;;  %v4638_v9 = vsub.f32 %v12495_v23, %v4487_v20 }
 0x5e4   : > { %v13153_v11 = vpop.eup %8758  ;;  %8778 = vpow2.f32 %v4783_v54  ;;  %v4639_v14 = vsub.f32 %v12508_v25, %v4487_v20  ;;  %v4640_v63 = vsub.f32 %v12512_v28, %v4487_v20  ;;  %v5511_v22 = vpack.c.bf16 %v13151_v15, %v8749_v29 }
 0x5e5   : > { %v13157_v7 = vpop.eup %8760  ;;  %8780 = vpow2.f32 %v4785_v36  ;;  %v5512_v61 = vpack.c.bf16 %v13153_v11, %v8751_v18  ;;  %v4793_v17 = vmul.f32 1.442695, %v4637_v16  ;;  %v4795_v12 = vmul.f32 1.442695, %v4638_v9 }
 0x5e6   : > { %v13162_v10 = vpop.eup %8762  ;;  %8782 = vpow2.f32 %v4787_v6  ;;  %v4797_v47 = vmul.f32 1.442695, %v4639_v14  ;;  %v4799_v23 = vmul.f32 1.442695, %v4640_v63  ;;  %v5513_v28 = vpack.c.bf16 %v13157_v7, %v8753_v50 }
 0x5e7   : > { %v8765_v43 = vpop.eup %8764  ;;  %8784 = vpow2.f32 %v4789_v51  ;;  %5707 = vmatprep.mubr.bf16.mxu0 %v5512_v61  ;;  %v5514_v38 = vpack.c.bf16 %v13162_v10, %v8755_v5  ;;  %v4492_v25 = vpop.permute.xlu0 %4491  ;;  %v13167_v13 = vadd.f32 %v8747_v4, %v5064_v59  ;;  %v5069_v19 = vadd.f32 %v8753_v50, %v5068_v32 }
 0x5e8   : > { %v8767_v30 = vpop.eup %8766  ;;  %8786 = vpow2.f32 %v4791_v21  ;;  %5708 = vmatmul.mubr.bf16.gmra.mrb[196].mxu0 %v5511_v22  ;;  %v4641_v29 = vsub.f32 %v12516_v39, %v4492_v25  ;;  %v4642_v53 = vsub.f32 %v12519_v26, %v4492_v25  ;;  %v4643_v18 = vsub.f32 %v12530_v42, %v4492_v25 }
 0x5e9   : > { %15429 = vst [vmem:[#allocation203_spill] sm:$0xff] %v13167_v13  ;;  %v8769_v54 = vpop.eup %8768  ;;  %8788 = vpow2.f32 %v4793_v17  ;;  %5868 = vmatprep.mubr.bf16.mxu1 %v5514_v38  ;;  %v4644_v62 = vsub.f32 %v12533_v35, %v4492_v25  ;;  %v4497_v1 = vpop.permute.xlu1 %4496  ;;  %v13173_v52 = vadd.f32 %v8755_v5, %v5069_v19  ;;  %v5078_v4 = vadd.f32 %v8767_v30, %v8765_v43 }
 0x5ea   : > { %v8771_v56 = vpop.eup %8770  ;;  %8790 = vpow2.f32 %v4795_v12  ;;  %5869 = vmatmul.mubr.bf16.gmra.mrb[196].mxu1 %v5513_v28  ;;  %v4801_v50 = vmul.f32 1.442695, %v4641_v29  ;;  %v4803_v58 = vmul.f32 1.442695, %v4642_v53  ;;  %v4805_v44 = vmul.f32 1.442695, %v4643_v18 }
 0x5eb   : > { %15430 = vst [vmem:[#allocation204_spill] sm:$0xff] %v13173_v52  ;;  %v13175_v40 = vpop.eup %8772  ;;  %8792 = vpow2.f32 %v4797_v47  ;;  %v4807_v26 = vmul.f32 1.442695, %v4644_v62  ;;  %v4645_v42 = vsub.f32 %v12523_v24, %v4497_v1  ;;  %v4646_v20 = vsub.f32 %v12525_v48, %v4497_v1  ;;  %v15433_v18 = vld [vmem:[#allocation88_spill] sm:$0xff] }
 0x5ec   : > { %v13177_v39 = vpop.eup %8774  ;;  %8794 = vpow2.f32 %v4799_v23  ;;  %v4647_v35 = vsub.f32 %v12535_v57, %v4497_v1  ;;  %v4648_v5 = vsub.f32 %v12539_v41, %v4497_v1  ;;  %v5515_v21 = vpack.c.bf16 %v13175_v40, %v8765_v43 }
 0x5ed   : > { %v13181_v59 = vpop.eup %8776  ;;  %8796 = vpow2.f32 %v4801_v50  ;;  %v5516_v32 = vpack.c.bf16 %v13177_v39, %v8767_v30  ;;  %v4809_v6 = vmul.f32 1.442695, %v4645_v42  ;;  %v4811_v51 = vmul.f32 1.442695, %v4646_v20 }
 0x5ee   : > { %v13186_v36 = vpop.eup %8778  ;;  %8798 = vpow2.f32 %v4803_v58  ;;  %v4813_v24 = vmul.f32 1.442695, %v4647_v35  ;;  %v4815_v48 = vmul.f32 1.442695, %v4648_v5  ;;  %v5517_v57 = vpack.c.bf16 %v13181_v59, %v8769_v54  ;;  %v15436_v58 = vld [vmem:[#allocation91_spill] sm:$0xff] }
 0x5ef   : > { %v8781_v16 = vpop.eup %8780  ;;  %8800 = vpow2.f32 %v4805_v44  ;;  %5715 = vmatprep.mubr.bf16.mxu0 %v5516_v32  ;;  %v5518_v9 = vpack.c.bf16 %v13186_v36, %v8771_v56  ;;  %v4502_v41 = vpop.permute.xlu0 %4501  ;;  %v5079_v63 = vadd.f32 %v8769_v54, %v5078_v4  ;;  %v13193_v61 = vadd.f32 %v13137_v8, %v13145_v0  ;;  %v15435_v4 = vld [vmem:[#allocation89_spill] sm:$0xff] }
 0x5f0   : > { %v8783_v14 = vpop.eup %8782  ;;  %8802 = vpow2.f32 %v4807_v26  ;;  %5716 = vmatmul.mubr.bf16.gmra.mrb[200].mxu0 %v5515_v21  ;;  %v4649_v12 = vsub.f32 %v12541_v34, %v4502_v41  ;;  %v4650_v22 = vsub.f32 %v12544_v45, %v4502_v41  ;;  %v4651_v43 = vsub.f32 %v12552_v33, %v4502_v41 }
 0x5f1   : > { %15431 = vst [vmem:[#allocation205_spill] sm:$0xff] %v13193_v61  ;;  %v8785_v17 = vpop.eup %8784  ;;  %8804 = vpow2.f32 %v4809_v6  ;;  %5876 = vmatprep.mubr.bf16.mxu1 %v5518_v9  ;;  %v4652_v23 = vsub.f32 %v12557_v49, %v4502_v41  ;;  %v13199_v38 = vadd.f32 %v8771_v56, %v5079_v63  ;;  %v5088_v30 = vadd.f32 %v8783_v14, %v8781_v16  ;;  %v15434_v49 = vld [vmem:[#allocation90_spill] sm:$0xff] }
 0x5f2   : > { %v8787_v47 = vpop.eup %8786  ;;  %8806 = vpow2.f32 %v4811_v51  ;;  %5877 = vmatmul.mubr.bf16.gmra.mrb[200].mxu1 %v5517_v57  ;;  %v4817_v8 = vmul.f32 1.442695, %v4649_v12  ;;  %v4819_v0 = vmul.f32 1.442695, %v4650_v22  ;;  %v4821_v25 = vmul.f32 1.442695, %v4651_v43 }
 0x5f3   : > { %15432 = vst [vmem:[#allocation206_spill] sm:$0xff] %v13199_v38  ;;  %v8789_v28 = vpop.eup %8788  ;;  %8808 = vpow2.f32 %v4813_v24  ;;  %v4823_v34 = vmul.f32 1.442695, %v4652_v23  ;;  %v4507_v54 = vpop.permute.xlu1 %4506  ;;  %v5089_v29 = vadd.f32 %v8785_v17, %v5088_v30  ;;  %v5083_v9 = vadd.f32 %v13177_v39, %v13175_v40 }
 0x5f4   : > { %v8791_v19 = vpop.eup %8790  ;;  %8810 = vpow2.f32 %v4815_v48  ;;  %v5519_v45 = vpack.c.bf16 %v8789_v28, %v8781_v16  ;;  %v4653_v62 = vsub.f32 %v15433_v18, %v4507_v54  ;;  %v4654_v56 = vsub.f32 %v15434_v49, %v4507_v54 }
 0x5f5   : > { %v8793_v33 = vpop.eup %8792  ;;  %8812 = vpow2.f32 %v4817_v8  ;;  %v5520_v53 = vpack.c.bf16 %v8791_v19, %v8783_v14  ;;  %v4655_v50 = vsub.f32 %v15435_v4, %v4507_v54  ;;  %v4656_v44 = vsub.f32 %v15436_v58, %v4507_v54 }
 0x5f6   : > { %v8795_v1 = vpop.eup %8794  ;;  %8814 = vpow2.f32 %v4819_v0  ;;  %v5521_v26 = vpack.c.bf16 %v8793_v33, %v8785_v17  ;;  %v4825_v35 = vmul.f32 1.442695, %v4653_v62  ;;  %v4827_v5 = vmul.f32 1.442695, %v4654_v56 }
 0x5f7   : > { %v8797_v42 = vpop.eup %8796  ;;  %8816 = vpow2.f32 %v4821_v25  ;;  %5723 = vmatprep.mubr.bf16.mxu0 %v5520_v53  ;;  %v5522_v20 = vpack.c.bf16 %v8795_v1, %v8787_v47  ;;  %v4829_v6 = vmul.f32 1.442695, %v4655_v50  ;;  %v4831_v51 = vmul.f32 1.442695, %v4656_v44 }
 0x5f8   : > { %v8799_v32 = vpop.eup %8798  ;;  %8818 = vpow2.f32 %v4823_v34  ;;  %5724 = vmatmul.mubr.bf16.gmra.mrb[204].mxu0 %v5519_v45  ;;  %v13205_v21 = vadd.f32 %v8787_v47, %v5089_v29  ;;  %v5073_v48 = vadd.f32 %v13153_v11, %v13151_v15  ;;  %v5093_v57 = vadd.f32 %v8791_v19, %v8789_v28 }
 0x5f9   : > { %v8801_v16 = vpop.eup %8800  ;;  %5884 = vmatprep.mubr.bf16.mxu1 %v5522_v20  ;;  %8820 = vpow2.f32 %v4825_v35  ;;  %v5098_v24 = vadd.f32 %v8799_v32, %v8797_v42  ;;  %v5084_v12 = vadd.f32 %v13181_v59, %v5083_v9 }
 0x5fa   : > { %15437 = vst [vmem:[#allocation88_spill] sm:$0xff] %v13205_v21  ;;  %v8803_v14 = vpop.eup %8802  ;;  %8822 = vpow2.f32 %v4827_v5  ;;  %5885 = vmatmul.mubr.bf16.gmra.mrb[204].mxu1 %v5521_v26  ;;  %v5074_v17 = vadd.f32 %v13157_v7, %v5073_v48  ;;  %v5094_v47 = vadd.f32 %v8793_v33, %v5093_v57  ;;  %v15445_v26 = vld [vmem:[#allocation152_spill] sm:$0xff]  ;;  %v15448_v5 = vld [vmem:[#allocation154_spill] sm:$0xff] }
 0x5fb   : > { %v8805_v41 = vpop.eup %8804  ;;  %8824 = vpow2.f32 %v4829_v6  ;;  %v5099_v63 = vadd.f32 %v8801_v16, %v5098_v24  ;;  %v13219_v39 = vadd.f32 %v13186_v36, %v5084_v12  ;;  %v15452_v24 = vld [vmem:[#allocation160_spill] sm:$0xff]  ;;  %v15455_v57 = vld [vmem:[#allocation162_spill] sm:$0xff] }
 0x5fc   : > { %v8807_v22 = vpop.eup %8806  ;;  %8826 = vpow2.f32 %v4831_v51  ;;  %v5523_v43 = vpack.c.bf16 %v8805_v41, %v8797_v42  ;;  %v13216_v40 = vadd.f32 %v13162_v10, %v5074_v17  ;;  %v13221_v8 = vadd.f32 %v8795_v1, %v5094_v47  ;;  %v15446_v42 = vld [vmem:[#allocation176_spill] sm:$0xff]  ;;  %v15457_v17 = vld [vmem:[#allocation133_spill] sm:$0xff]  ;;  %v15458_v12 = vld [vmem:[#allocation178_spill] sm:$0xff] }
 0x5fd   : > { %v8809_v23 = vpop.eup %8808  ;;  %v5524_v15 = vpack.c.bf16 %v8807_v22, %v8799_v32  ;;  %v13213_v11 = vadd.f32 %v8803_v14, %v5099_v63  ;;  %15440 = vst [vmem:[#allocation91_spill] sm:$0xff] %v13219_v39  ;;  %v5103_v7 = vadd.f32 %v8807_v22, %v8805_v41  ;;  %v15447_v20 = vsub.f32 %v15445_v26, %v15446_v42  ;;  %v15449_v32 = vld [vmem:[#allocation156_spill] sm:$0xff]  ;;  %v15460_v47 = vld [vmem:[#allocation135_spill] sm:$0xff]  ;;  %v15478_v26 = vld [vmem:[#allocation149_spill] sm:$0xff] }
 0x5fe   : > { %15439 = vst [vmem:[#allocation89_spill] sm:$0xff] %v13216_v40  ;;  %v8811_v30 = vpop.eup %8810  ;;  %v5525_v28 = vpack.c.bf16 %v8809_v23, %v8801_v16  ;;  %15441 = vst [vmem:[#allocation207_spill] sm:$0xff] %v13221_v8  ;;  %v15450_v6 = vsub.f32 %v15448_v5, %v15449_v32  ;;  %v15451_v16 = vld [vmem:[#allocation158_spill] sm:$0xff]  ;;  %v15459_v22 = vsub.f32 %v15457_v17, %v15458_v12  ;;  %v15479_v42 = vld [vmem:[#allocation151_spill] sm:$0xff] }
 0x5ff   : > { %15438 = vst [vmem:[#allocation90_spill] sm:$0xff] %v13213_v11  ;;  %v8813_v59 = vpop.eup %8812  ;;  %5731 = vmatprep.mubr.bf16.mxu0 %v5524_v15  ;;  %v5526_v0 = vpack.c.bf16 %v8811_v30, %v8803_v14  ;;  %v5104_v19 = vadd.f32 %v8809_v23, %v5103_v7  ;;  %v4385_v35 = vmul.f32 1.442695, %v15447_v20  ;;  %v15453_v48 = vsub.f32 %v15451_v16, %v15452_v24  ;;  %v15454_v14 = vld [vmem:[#allocation177_spill] sm:$0xff]  ;;  %v15461_v23 = vld [vmem:[#allocation164_spill] sm:$0xff]  ;;  %v15464_v7 = vld [vmem:[#allocation139_spill] sm:$0xff] }
 0x600   : > { %v8815_v25 = vpop.eup %8814  ;;  %5732 = vmatmul.mubr.bf16.gmra.mrb[208].mxu0 %v5523_v43  ;;  %v4387_v51 = vmul.f32 1.442695, %v15450_v6  ;;  %v15456_v41 = vsub.f32 %v15454_v14, %v15455_v57  ;;  %v4393_v43 = vmul.f32 1.442695, %v15459_v22  ;;  %v15462_v15 = vsub.f32 %v15460_v47, %v15461_v23  ;;  %v15481_v5 = vld [vmem:[#allocation153_spill] sm:$0xff]  ;;  %v15487_v14 = vld [vmem:[#allocation159_spill] sm:$0xff] }
 0x601   : > { %v8817_v34 = vpop.eup %8816  ;;  %5892 = vmatprep.mubr.bf16.mxu1 %v5526_v0  ;;  %v5108_v54 = vadd.f32 %v8815_v25, %v8813_v59  ;;  %v13223_v10 = vadd.f32 %v8811_v30, %v5104_v19  ;;  %v4389_v9 = vmul.f32 1.442695, %v15453_v48  ;;  %8828 = vpow2.f32 %v4385_v35  ;;  %v15467_v19 = vld [vmem:[#allocation179_spill] sm:$0xff]  ;;  %v15484_v16 = vld [vmem:[#allocation157_spill] sm:$0xff]  ;;  %v15573_v8 = vld [vmem:[#allocation108_spill] sm:$0xff] }
 0x602   : > { %v8819_v45 = vpop.eup %8818  ;;  %5893 = vmatmul.mubr.bf16.gmra.mrb[208].mxu1 %v5525_v28  ;;  %v4391_v63 = vmul.f32 1.442695, %v15456_v41  ;;  %8830 = vpow2.f32 %v4387_v51  ;;  %v4395_v30 = vmul.f32 1.442695, %v15462_v15  ;;  %v15463_v28 = vld [vmem:[#allocation166_spill] sm:$0xff]  ;;  %v15480_v20 = vsub.f32 %v15478_v26, %v15479_v42  ;;  %v15483_v51 = vld [vmem:[#allocation155_spill] sm:$0xff] }
 0x603   : > { %15442 = vst [vmem:[#allocation208_spill] sm:$0xff] %v13223_v10  ;;  %v8821_v36 = vpop.eup %8820  ;;  %v5109_v29 = vadd.f32 %v8817_v34, %v5108_v54  ;;  %8832 = vpow2.f32 %v4389_v9  ;;  %v15482_v32 = vsub.f32 %v15481_v5, %v12935_v31  ;;  %v15485_v24 = vsub.f32 %v15483_v51, %v15484_v16  ;;  %v15490_v17 = vld [vmem:[#allocation161_spill] sm:$0xff]  ;;  %v15491_v12 = vld [vmem:[#allocation163_spill] sm:$0xff]  ;;  %v15519_v51 = vld [vmem:[#allocation192_spill] sm:$0xff] }
 0x604   : > { %v8823_v33 = vpop.eup %8822  ;;  %v5527_v53 = vpack.c.bf16 %v8821_v36, %v8813_v59  ;;  %v15465_v59 = vsub.f32 %v15463_v28, %v15464_v7  ;;  %8834 = vpow2.f32 %v4391_v63  ;;  %v4407_v35 = vmul.f32 1.442695, %v15480_v20  ;;  %v15495_v23 = vld [vmem:[#allocation165_spill] sm:$0xff]  ;;  %v15499_v7 = vld [vmem:[#allocation182_spill] sm:$0xff] }
 0x605   : > { %v8825_v18 = vpop.eup %8824  ;;  %v5528_v62 = vpack.c.bf16 %v8823_v33, %v8815_v25  ;;  %v13225_v49 = vadd.f32 %v8819_v45, %v5109_v29  ;;  %v5113_v56 = vadd.f32 %v8823_v33, %v8821_v36  ;;  %v15466_v25 = vld [vmem:[#allocation137_spill] sm:$0xff]  ;;  %8836 = vpow2.f32 %v4393_v43  ;;  %v15470_v36 = vld [vmem:[#allocation180_spill] sm:$0xff]  ;;  %v15520_v16 = vld [vmem:[#allocation194_spill] sm:$0xff] }
 0x606   : > { %v8827_v1 = vpop.eup %8826  ;;  %v5529_v4 = vpack.c.bf16 %v8825_v18, %v8817_v34  ;;  %v4397_v0 = vmul.f32 1.442695, %v15465_v59  ;;  %v15468_v34 = vsub.f32 %v15466_v25, %v15467_v19  ;;  %8838 = vpow2.f32 %v4395_v30  ;;  %v13281_v43 = vld [vmem:[#allocation2 + $0x1f8] sm:$0xff] }
 0x607   : > { %15443 = vst [vmem:[#allocation209_spill] sm:$0xff] %v13225_v49  ;;  %5739 = vmatprep.mubr.bf16.mxu0 %v5528_v62  ;;  %v5530_v50 = vpack.c.bf16 %v8827_v1, %v8819_v45  ;;  %v5114_v58 = vadd.f32 %v8825_v18, %v5113_v56  ;;  %v15469_v45 = vld [vmem:[#allocation141_spill] sm:$0xff]  ;;  %v4409_v6 = vmul.f32 1.442695, %v15482_v32  ;;  %v4411_v48 = vmul.f32 1.442695, %v15485_v24 }
 0x608   : > { %5740 = vmatmul.mubr.bf16.gmra.mrb[212].mxu0 %v5527_v53  ;;  %v4399_v54 = vmul.f32 1.442695, %v15468_v34  ;;  %v15471_v29 = vsub.f32 %v15469_v45, %v15470_v36  ;;  %v15472_v53 = vld [vmem:[#allocation143_spill] sm:$0xff]  ;;  %v15473_v18 = vld [vmem:[#allocation145_spill] sm:$0xff]  ;;  %8840 = vpow2.f32 %v4397_v0  ;;  %v15488_v57 = vsub.f32 %v15487_v14, %v12955_v2  ;;  %15493 = vst [vmem:[#allocation154_spill] sm:$0xff] %v13281_v43 }
 0x609   : > { %5900 = vmatprep.mubr.bf16.mxu1 %v5530_v50  ;;  %v13227_v44 = vadd.f32 %v8827_v1, %v5114_v58  ;;  %v15474_v62 = vsub.f32 %v15472_v53, %v15473_v18  ;;  %v15475_v1 = vld [vmem:[#allocation147_spill] sm:$0xff]  ;;  %v15492_v22 = vsub.f32 %v15490_v17, %v15491_v12  ;;  %v15496_v15 = vsub.f32 %v15495_v23, %v12971_v37  ;;  %v15522_v14 = vld [vmem:[#allocation61_spill] sm:$0xff]  ;;  %v15526_v17 = vld [vmem:[#allocation198_spill] sm:$0xff] }
 0x60a   : > { %5901 = vmatmul.mubr.bf16.gmra.mrb[212].mxu1 %v5529_v4  ;;  %v4401_v33 = vmul.f32 1.442695, %v15471_v29  ;;  %v15476_v4 = vld [vmem:[#allocation181_spill] sm:$0xff]  ;;  %8842 = vpow2.f32 %v4399_v54  ;;  %v4413_v41 = vmul.f32 1.442695, %v15488_v57  ;;  %v15498_v2 = vld [vmem:[#allocation167_spill] sm:$0xff]  ;;  %v15521_v24 = vsub.f32 %v15519_v51, %v15520_v16 }
 0x60b   : > { %15444 = vst [vmem:[#allocation210_spill] sm:$0xff] %v13227_v44  ;;  %v4403_v56 = vmul.f32 1.442695, %v15474_v62  ;;  %v15477_v50 = vsub.f32 %v15475_v1, %v15476_v4  ;;  %v13271_v9 = vpop.eup %8828  ;;  %v4415_v31 = vmul.f32 1.442695, %v15492_v22  ;;  %v15500_v59 = vsub.f32 %v15498_v2, %v15499_v7  ;;  %v15502_v34 = vld [vmem:[#allocation183_spill] sm:$0xff] }
 0x60c   : > { %8844 = vpow2.f32 %v4401_v33  ;;  %15486 = vst [vmem:[#allocation152_spill] sm:$0xff] %v13271_v9  ;;  %v13276_v63 = vpop.eup %8830  ;;  %v4417_v30 = vmul.f32 1.442695, %v15496_v15  ;;  %v15503_v54 = vsub.f32 %v15502_v34, %v12991_v3  ;;  %v15506_v29 = vld [vmem:[#allocation184_spill] sm:$0xff]  ;;  %v15507_v33 = vld [vmem:[#allocation185_spill] sm:$0xff]  ;;  %v15560_v3 = vld [vmem:[#allocation63_spill] sm:$0xff] }
 0x60d   : > { %v4405_v58 = vmul.f32 1.442695, %v15477_v50  ;;  %8846 = vpow2.f32 %v4403_v56  ;;  %15489 = vst [vmem:[#allocation176_spill] sm:$0xff] %v13276_v63  ;;  %v13283_v47 = vpop.eup %8832  ;;  %v4419_v0 = vmul.f32 1.442695, %v15500_v59  ;;  %v15508_v53 = vsub.f32 %v15506_v29, %v15507_v33  ;;  %v15509_v56 = vld [vmem:[#allocation186_spill] sm:$0xff] }
 0x60e   : > { %15494 = vst [vmem:[#allocation156_spill] sm:$0xff] %v13283_v47  ;;  %v13288_v28 = vpop.eup %8834  ;;  %v4421_v45 = vmul.f32 1.442695, %v15503_v54  ;;  %v15510_v1 = vsub.f32 %v15509_v56, %v13012_v55  ;;  %v15529_v23 = vld [vmem:[#allocation92_spill] sm:$0xff]  ;;  %v15541_v16 = vld [vmem:[#allocation105_spill] sm:$0xff] }
 0x60f   : > { %8848 = vpow2.f32 %v4405_v58  ;;  %15497 = vst [vmem:[#allocation158_spill] sm:$0xff] %v13288_v28  ;;  %v13293_v19 = vpop.eup %8836  ;;  %v4423_v18 = vmul.f32 1.442695, %v15508_v53  ;;  %v15512_v58 = vld [vmem:[#allocation187_spill] sm:$0xff]  ;;  %v15531_v7 = vld [vmem:[#allocation96_spill] sm:$0xff]  ;;  %v15570_v10 = vld [vmem:[#allocation121_spill] sm:$0xff] }
 0x610   : > { %8850 = vpow2.f32 %v4407_v35  ;;  %15501 = vst [vmem:[#allocation160_spill] sm:$0xff] %v13293_v19  ;;  %v13301_v37 = vpop.eup %8838  ;;  %v4425_v4 = vmul.f32 1.442695, %v15510_v1  ;;  %v15513_v26 = vsub.f32 %v15512_v58, %v13018_v46  ;;  %v15516_v35 = vld [vmem:[#allocation189_spill] sm:$0xff]  ;;  %v13334_v46 = vld [vmem:[#allocation2 + $0x1f0] sm:$0xff] }
 0x611   : > { %8852 = vpow2.f32 %v4409_v6  ;;  %15505 = vst [vmem:[#allocation162_spill] sm:$0xff] %v13301_v37  ;;  %v15517_v5 = vsub.f32 %v15516_v35, %v13036_v60  ;;  %15523 = vst [vmem:[#allocation166_spill] sm:$0xff] %v13334_v46  ;;  %v15539_v35 = vld [vmem:[#allocation101_spill] sm:$0xff] }
 0x612   : > { %8854 = vpow2.f32 %v4411_v48  ;;  %v13306_v62 = vpop.eup %8840  ;;  %v4427_v42 = vmul.f32 1.442695, %v15513_v26  ;;  %v4435_v48 = vmul.f32 1.442695, %v15521_v24 }
 0x613   : > { %8856 = vpow2.f32 %v4413_v41  ;;  %v4431_v32 = vmul.f32 1.442695, %v15517_v5  ;;  %v15525_v41 = vld [vmem:[#allocation196_spill] sm:$0xff] }
 0x614   : > { %8858 = vpow2.f32 %v4415_v31  ;;  %v13316_v50 = vpop.eup %8842  ;;  %v15527_v12 = vsub.f32 %v15525_v41, %v15526_v17  ;;  %v15543_v41 = vld [vmem:[#allocation107_spill] sm:$0xff] }
 0x615   : > { %8860 = vpow2.f32 %v4417_v30  ;;  %15511 = vst [vmem:[#allocation133_spill] sm:$0xff] %v13316_v50  ;;  %v15530_v30 = vld [vmem:[#allocation94_spill] sm:$0xff] }
 0x616   : > { %8862 = vpow2.f32 %v4419_v0  ;;  %v13321_v20 = vpop.eup %8844  ;;  %v4439_v22 = vmul.f32 1.442695, %v15527_v12  ;;  %v15532_v0 = vld [vmem:[#allocation98_spill] sm:$0xff]  ;;  %v15544_v12 = vld [vmem:[#allocation93_spill] sm:$0xff] }
 0x617   : > { %15514 = vst [vmem:[#allocation178_spill] sm:$0xff] %v13321_v20  ;;  %8864 = vpow2.f32 %v4421_v45  ;;  %v13323_v55 = vpop.eup %8846 }
 0x618   : > { %15515 = vst [vmem:[#allocation135_spill] sm:$0xff] %v13323_v55  ;;  %8866 = vpow2.f32 %v4423_v18  ;;  %v15536_v18 = vld [vmem:[#allocation80_spill] sm:$0xff] }
 0x619   : > { %v13328_v6 = vpop.eup %8848  ;;  %8868 = vpow2.f32 %v4425_v4 }
 0x61a   : > { %15518 = vst [vmem:[#allocation164_spill] sm:$0xff] %v13328_v6  ;;  %v13336_v57 = vpop.eup %8850  ;;  %8870 = vpow2.f32 %v4427_v42 }
 0x61b   : > { %15524 = vst [vmem:[#allocation139_spill] sm:$0xff] %v13336_v57  ;;  %v13341_v31 = vpop.eup %8852  ;;  %8872 = vpow2.f32 %v4431_v32  ;;  %v15540_v32 = vld [vmem:[#allocation103_spill] sm:$0xff] }
 0x61c   : > { %v4320_v25 = vpop.xlane.xlu0 %4319  ;;  %15528 = vst [vmem:[#allocation137_spill] sm:$0xff] %v13341_v31  ;;  %v13347_v54 = vpop.eup %8854  ;;  %8874 = vpow2.f32 %v4435_v48 }
 0x61d   : > { %v13299_v36 = vmax.f32 %v13281_v43, %v4320_v25  ;;  %15533 = vst [vmem:[#allocation179_spill] sm:$0xff] %v13347_v54  ;;  %v13352_v29 = vpop.eup %8856  ;;  %8876 = vpow2.f32 %v4439_v22  ;;  %v15568_v43 = vld [vmem:[#allocation119_spill] sm:$0xff] }
 0x61e   : > { %15535 = vst [vmem:[#allocation180_spill] sm:$0xff] %v13352_v29  ;;  %v13355_v56 = vpop.eup %8858  ;;  %v15608_v29 = vld [vmem:[#allocation73_spill] sm:$0xff] }
 0x61f   : > { %15504 = vst [vmem:[#allocation177_spill] sm:$0xff] %v13299_v36  ;;  %6084 = vst.msk [vmem:[#allocation2 + $0x1f8] sm:$0xff] %vm2571_vm3, %v13299_v36  ;;  %4606 = vperm.xlu0 %8330, %v13299_v36   ;;  %v13362_v26 = vpop.eup %8860 }
 0x620   : > { %15537 = vst [vmem:[#allocation143_spill] sm:$0xff] %v13355_v56  ;;  %15538 = vst [vmem:[#allocation145_spill] sm:$0xff] %v13362_v26 }
 0x623   : > { %2708 = vperm.xlu0 %8330, %v15522_v14   ;;  %v13367_v14 = vpop.eup %8862 }
 0x624   : > { %v4512_v60 = vpop.permute.xlu0 %4511  ;;  %15542 = vst [vmem:[#allocation147_spill] sm:$0xff] %v13367_v14  ;;  %v15613_v14 = vld [vmem:[#allocation48_spill] sm:$0xff] }
 0x625   : > { %v4657_v15 = vsub.f32 %v15529_v23, %v4512_v60  ;;  %v4658_v2 = vsub.f32 %v15530_v30, %v4512_v60  ;;  %v4659_v59 = vsub.f32 %v15531_v7, %v4512_v60  ;;  %v4660_v25 = vsub.f32 %v15532_v0, %v4512_v60  ;;  %v4315_v34 = vpop.xlane.xlu1 %4314  ;;  %v13371_v60 = vpop.eup %8864  ;;  %v15546_v30 = vld [vmem:[#allocation82_spill] sm:$0xff] }
 0x626   : > { %v13350_v45 = vmax.f32 %v13334_v46, %v4315_v34  ;;  %15545 = vst [vmem:[#allocation181_spill] sm:$0xff] %v13371_v60 }
 0x627   : > { %v4833_v33 = vmul.f32 1.442695, %v4657_v15  ;;  %v4835_v53 = vmul.f32 1.442695, %v4658_v2  ;;  %2723 = vperm.xlu0 %8330, %v15536_v18   ;;  %v4837_v1 = vmul.f32 1.442695, %v4659_v59  ;;  %v13374_v2 = vpop.eup %8866 }
 0x628   : > { %15534 = vst [vmem:[#allocation141_spill] sm:$0xff] %v13350_v45  ;;  %6083 = vst.msk [vmem:[#allocation2 + $0x1f0] sm:$0xff] %vm2571_vm3, %v13350_v45  ;;  %v4527_v58 = vpop.permute.xlu0 %4526  ;;  %4601 = vperm.xlu1 %8331, %v13350_v45   ;;  %v4839_v42 = vmul.f32 1.442695, %v4660_v25  ;;  %v15548_v59 = vld [vmem:[#allocation95_spill] sm:$0xff]  ;;  %v15549_v25 = vld [vmem:[#allocation97_spill] sm:$0xff] }
 0x629   : > { %v4669_v5 = vsub.f32 %v15539_v35, %v4527_v58  ;;  %v4670_v51 = vsub.f32 %v15540_v32, %v4527_v58  ;;  %v4671_v24 = vsub.f32 %v15541_v16, %v4527_v58  ;;  %v4517_v48 = vpop.permute.xlu1 %4516  ;;  %8878 = vpow2.f32 %v4833_v33  ;;  %15547 = vst [vmem:[#allocation149_spill] sm:$0xff] %v13374_v2  ;;  %v15550_v18 = vld [vmem:[#allocation76_spill] sm:$0xff] }
 0x62a   : > { %v4672_v17 = vsub.f32 %v15543_v41, %v4527_v58  ;;  %v4661_v22 = vsub.f32 %v15544_v12, %v4517_v48  ;;  %8880 = vpow2.f32 %v4835_v53  ;;  %v4662_v0 = vsub.f32 %v15548_v59, %v4517_v48  ;;  %v13379_v58 = vpop.eup %8868  ;;  %v15552_v53 = vld [vmem:[#allocation99_spill] sm:$0xff]  ;;  %v15556_v59 = vld [vmem:[#allocation81_spill] sm:$0xff] }
 0x62b   : > { %v4857_v23 = vmul.f32 1.442695, %v4669_v5  ;;  %v4859_v15 = vmul.f32 1.442695, %v4670_v51  ;;  %2733 = vperm.xlu0 %8330, %v15546_v30   ;;  %8882 = vpow2.f32 %v4837_v1  ;;  %v4861_v7 = vmul.f32 1.442695, %v4671_v24  ;;  %v13382_v51 = vpop.eup %8870 }
 0x62c   : > { %v4663_v34 = vsub.f32 %v15549_v25, %v4517_v48  ;;  %v4537_v33 = vpop.permute.xlu0 %4536  ;;  %2713 = vperm.xlu1 %8331, %v15550_v18   ;;  %15551 = vst [vmem:[#allocation151_spill] sm:$0xff] %v13379_v58  ;;  %8884 = vpow2.f32 %v4839_v42  ;;  %v4863_v35 = vmul.f32 1.442695, %v4672_v17  ;;  %v4664_v5 = vsub.f32 %v15552_v53, %v4517_v48  ;;  %15553 = vst [vmem:[#allocation153_spill] sm:$0xff] %v13382_v51  ;;  %v15554_v1 = vld [vmem:[#allocation109_spill] sm:$0xff]  ;;  %v15555_v41 = vld [vmem:[#allocation111_spill] sm:$0xff]  ;;  %v13387_v25 = vpop.eup %8872 }
 0x62d   : > { %v4522_v32 = vpop.permute.xlu1 %4521  ;;  %8886 = vpow2.f32 %v4857_v23  ;;  %v4841_v16 = vmul.f32 1.442695, %v4661_v22  ;;  %v4677_v24 = vsub.f32 %v15554_v1, %v4537_v33  ;;  %v4678_v12 = vsub.f32 %v15555_v41, %v4537_v33  ;;  %15557 = vst [vmem:[#allocation155_spill] sm:$0xff] %v13387_v25  ;;  %v15558_v17 = vld [vmem:[#allocation113_spill] sm:$0xff]  ;;  %v15559_v48 = vld [vmem:[#allocation115_spill] sm:$0xff]  ;;  %v13392_v22 = vpop.eup %8874  ;;  %v15562_v1 = vld [vmem:[#allocation100_spill] sm:$0xff] }
 0x62e   : > { %8888 = vpow2.f32 %v4859_v15  ;;  %v4843_v30 = vmul.f32 1.442695, %v4662_v0  ;;  %v4845_v42 = vmul.f32 1.442695, %v4663_v34  ;;  %v4679_v18 = vsub.f32 %v15558_v17, %v4537_v33  ;;  %15561 = vst [vmem:[#allocation157_spill] sm:$0xff] %v13392_v22  ;;  %v15563_v0 = vld [vmem:[#allocation102_spill] sm:$0xff]  ;;  %v13396_v45 = vpop.eup %8876 }
 0x62f   : > { %2743 = vperm.xlu0 %8330, %v15556_v59   ;;  %8890 = vpow2.f32 %v4861_v7  ;;  %v4680_v53 = vsub.f32 %v15559_v48, %v4537_v33  ;;  %v4847_v23 = vmul.f32 1.442695, %v4664_v5  ;;  %v4665_v15 = vsub.f32 %v15562_v1, %v4522_v32  ;;  %15564 = vst [vmem:[#allocation159_spill] sm:$0xff] %v13396_v45  ;;  %v15565_v17 = vld [vmem:[#allocation104_spill] sm:$0xff]  ;;  %v15566_v33 = vld [vmem:[#allocation106_spill] sm:$0xff]  ;;  %v15569_v5 = vld [vmem:[#allocation83_spill] sm:$0xff] }
 0x630   : > { %v4547_v4 = vpop.permute.xlu0 %4546  ;;  %2718 = vperm.xlu1 %8331, %v15560_v3   ;;  %8892 = vpow2.f32 %v4863_v35  ;;  %v4666_v41 = vsub.f32 %v15563_v0, %v4522_v32  ;;  %v4873_v7 = vmul.f32 1.442695, %v4677_v24  ;;  %v4875_v34 = vmul.f32 1.442695, %v4678_v12  ;;  %v15567_v3 = vld [vmem:[#allocation117_spill] sm:$0xff]  ;;  %v15607_v51 = vld [vmem:[#allocation43_spill] sm:$0xff] }
 0x631   : > { %v4532_v59 = vpop.permute.xlu1 %4531  ;;  %8894 = vpow2.f32 %v4841_v16  ;;  %v4667_v46 = vsub.f32 %v15565_v17, %v4522_v32  ;;  %v4668_v48 = vsub.f32 %v15566_v33, %v4522_v32  ;;  %v4685_v36 = vsub.f32 %v15567_v3, %v4547_v4  ;;  %v15571_v24 = vld [vmem:[#allocation65_spill] sm:$0xff]  ;;  %v15572_v17 = vld [vmem:[#allocation123_spill] sm:$0xff] }
 0x632   : > { %8896 = vpow2.f32 %v4843_v30  ;;  %v4686_v35 = vsub.f32 %v15568_v43, %v4547_v4  ;;  %v4877_v0 = vmul.f32 1.442695, %v4679_v18  ;;  %v4879_v44 = vmul.f32 1.442695, %v4680_v53  ;;  %v15574_v18 = vld [vmem:[#allocation110_spill] sm:$0xff]  ;;  %v15591_v45 = vld [vmem:[#allocation69_spill] sm:$0xff] }
 0x633   : > { %2753 = vperm.xlu0 %8330, %v15569_v5   ;;  %v13403_v1 = vpop.eup %8878  ;;  %8898 = vpow2.f32 %v4845_v42  ;;  %v4687_v16 = vsub.f32 %v15570_v10, %v4547_v4  ;;  %v4849_v30 = vmul.f32 1.442695, %v4665_v15  ;;  %v4851_v32 = vmul.f32 1.442695, %v4666_v41  ;;  %v15576_v15 = vld [vmem:[#allocation84_spill] sm:$0xff] }
 0x634   : > { %2728 = vperm.xlu1 %8331, %v15571_v24   ;;  %v13407_v12 = vpop.eup %8880  ;;  %8900 = vpow2.f32 %v4847_v23  ;;  %v4688_v33 = vsub.f32 %v15572_v17, %v4547_v4  ;;  %v4557_v3 = vpop.permute.xlu0 %4556  ;;  %v4853_v5 = vmul.f32 1.442695, %v4667_v46  ;;  %v4673_v42 = vsub.f32 %v15573_v8, %v4532_v59  ;;  %v15577_v17 = vld [vmem:[#allocation112_spill] sm:$0xff]  ;;  %v15578_v46 = vld [vmem:[#allocation114_spill] sm:$0xff]  ;;  %v15579_v8 = vld [vmem:[#allocation67_spill] sm:$0xff] }
 0x635   : > { %v13410_v43 = vpop.eup %8882  ;;  %8902 = vpow2.f32 %v4873_v7  ;;  %v4674_v53 = vsub.f32 %v15574_v18, %v4532_v59  ;;  %v4542_v39 = vpop.permute.xlu1 %4541  ;;  %v4855_v24 = vmul.f32 1.442695, %v4668_v48  ;;  %v4889_v49 = vmul.f32 1.442695, %v4685_v36  ;;  %v15582_v36 = vld [vmem:[#allocation127_spill] sm:$0xff] }
 0x636   : > { %v13414_v10 = vpop.eup %8884  ;;  %8904 = vpow2.f32 %v4875_v34  ;;  %v4891_v23 = vmul.f32 1.442695, %v4686_v35  ;;  %v4893_v4 = vmul.f32 1.442695, %v4687_v16  ;;  %v4675_v7 = vsub.f32 %v15577_v17, %v4532_v59  ;;  %v15581_v34 = vld [vmem:[#allocation125_spill] sm:$0xff] }
 0x637   : > { %15575 = vst [vmem:[#allocation161_spill] sm:$0xff] %v13414_v10  ;;  %2763 = vperm.xlu0 %8330, %v15576_v15   ;;  %v13417_v41 = vpop.eup %8886  ;;  %8906 = vpow2.f32 %v4877_v0  ;;  %v4676_v40 = vsub.f32 %v15578_v46, %v4532_v59  ;;  %v4895_v11 = vmul.f32 1.442695, %v4688_v33  ;;  %v4693_v48 = vsub.f32 %v15581_v34, %v4557_v3  ;;  %v15584_v16 = vld [vmem:[#allocation129_spill] sm:$0xff]  ;;  %v15586_v59 = vld [vmem:[#allocation131_spill] sm:$0xff]  ;;  %v15589_v34 = vld [vmem:[#allocation86_spill] sm:$0xff] }
 0x638   : > { %2738 = vperm.xlu1 %8331, %v15579_v8   ;;  %v13422_v18 = vpop.eup %8888  ;;  %8908 = vpow2.f32 %v4879_v44  ;;  %v4694_v35 = vsub.f32 %v15582_v36, %v4557_v3  ;;  %v4865_v15 = vmul.f32 1.442695, %v4673_v42  ;;  %v4867_v0 = vmul.f32 1.442695, %v4674_v53  ;;  %v15587_v8 = vld [vmem:[#allocation116_spill] sm:$0xff]  ;;  %v15588_v44 = vld [vmem:[#allocation118_spill] sm:$0xff]  ;;  %v4567_v52 = vpop.permute.xlu0 %4566 }
 0x639   : > { %15580 = vst [vmem:[#allocation163_spill] sm:$0xff] %v13422_v18  ;;  %v13426_v61 = vpop.eup %8890  ;;  %8910 = vpow2.f32 %v4849_v30  ;;  %v4695_v21 = vsub.f32 %v15584_v16, %v4557_v3  ;;  %v4696_v46 = vsub.f32 %v15586_v59, %v4557_v3  ;;  %v4681_v38 = vsub.f32 %v15587_v8, %v4542_v39  ;;  %v15590_v53 = vld [vmem:[#allocation120_spill] sm:$0xff]  ;;  %v13438_v16 = vpop.permute.xlu1 %4551  ;;  %v15592_v8 = vld [vmem:[#allocation122_spill] sm:$0xff] }
 0x63a   : > { %15583 = vst [vmem:[#allocation165_spill] sm:$0xff] %v13426_v61  ;;  %v13429_v17 = vpop.eup %8892  ;;  %8912 = vpow2.f32 %v4851_v32  ;;  %v4682_v33 = vsub.f32 %v15588_v44, %v4542_v39  ;;  %v4869_v30 = vmul.f32 1.442695, %v4675_v7  ;;  %v4871_v42 = vmul.f32 1.442695, %v4676_v40  ;;  %v15595_v40 = vld [vmem:[#allocation30_spill] sm:$0xff] }
 0x63b   : > { %15585 = vst [vmem:[#allocation167_spill] sm:$0xff] %v13429_v17  ;;  %2773 = vperm.xlu0 %8330, %v15589_v34   ;;  %v13435_v36 = vpop.eup %8894  ;;  %8914 = vpow2.f32 %v4853_v5  ;;  %v4683_v13 = vsub.f32 %v15590_v53, %v4542_v39  ;;  %v4905_v3 = vmul.f32 1.442695, %v4693_v48  ;;  %v4907_v59 = vmul.f32 1.442695, %v4694_v35  ;;  %v15594_v5 = vld [vmem:[#allocation31_spill] sm:$0xff] }
 0x63c   : > { %2748 = vperm.xlu1 %8331, %v15591_v45   ;;  %v13441_v32 = vpop.eup %8896  ;;  %8916 = vpow2.f32 %v4855_v24  ;;  %v4684_v44 = vsub.f32 %v15592_v8, %v4542_v39  ;;  %v4909_v34 = vmul.f32 1.442695, %v4695_v21  ;;  %v4701_v7 = vsub.f32 %v15594_v5, %v4567_v52  ;;  %v15597_v24 = vld [vmem:[#allocation85_spill] sm:$0xff]  ;;  %v15599_v35 = vld [vmem:[#allocation35_spill] sm:$0xff] }
 0x63d   : > { %v13444_v27 = vpop.eup %8898  ;;  %8918 = vpow2.f32 %v4889_v49  ;;  %v4702_v58 = vsub.f32 %v15595_v40, %v4567_v52  ;;  %v4911_v22 = vmul.f32 1.442695, %v4696_v46  ;;  %v13450_v45 = vmul.f32 1.442695, %v4681_v38  ;;  %v15598_v21 = vld [vmem:[#allocation33_spill] sm:$0xff]  ;;  %v15600_v5 = vld [vmem:[#allocation71_spill] sm:$0xff] }
 0x63e   : > { %15593 = vst [vmem:[#allocation182_spill] sm:$0xff] %v13444_v27  ;;  %v13448_v53 = vpop.eup %8900  ;;  %8920 = vpow2.f32 %v4891_v23  ;;  %v13452_v60 = vmul.f32 1.442695, %v4682_v33  ;;  %v13457_v39 = vmul.f32 1.442695, %v4683_v13  ;;  %v4703_v49 = vsub.f32 %v15598_v21, %v4567_v52  ;;  %v15601_v23 = vld [vmem:[#allocation124_spill] sm:$0xff] }
 0x63f   : > { %15596 = vst [vmem:[#allocation183_spill] sm:$0xff] %v13448_v53  ;;  %2783 = vperm.xlu0 %8330, %v15597_v24   ;;  %v13455_v48 = vpop.eup %8902  ;;  %8922 = vpow2.f32 %v4893_v4  ;;  %v4704_v8 = vsub.f32 %v15599_v35, %v4567_v52  ;;  %v13464_v38 = vmul.f32 1.442695, %v4684_v44  ;;  %v4689_v46 = vsub.f32 %v15601_v23, %v13438_v16  ;;  %v15602_v33 = vld [vmem:[#allocation126_spill] sm:$0xff]  ;;  %v4577_v4 = vpop.permute.xlu0 %4576  ;;  %v15603_v35 = vld [vmem:[#allocation128_spill] sm:$0xff] }
 0x640   : > { %2758 = vperm.xlu1 %8331, %v15600_v5   ;;  %v13462_v40 = vpop.eup %8904  ;;  %8924 = vpow2.f32 %v4895_v11  ;;  %v4690_v24 = vsub.f32 %v15602_v33, %v13438_v16  ;;  %v13472_v21 = vmul.f32 1.442695, %v4701_v7  ;;  %v13474_v52 = vmul.f32 1.442695, %v4702_v58  ;;  %v13478_v11 = vpop.permute.xlu1 %4561  ;;  %v15605_v23 = vld [vmem:[#allocation130_spill] sm:$0xff]  ;;  %v15606_v7 = vld [vmem:[#allocation87_spill] sm:$0xff] }
 0x641   : > { %v13470_v13 = vpop.eup %8906  ;;  %8926 = vpow2.f32 %v4865_v15  ;;  %v4691_v5 = vsub.f32 %v15603_v35, %v13438_v16  ;;  %v4692_v25 = vsub.f32 %v15605_v23, %v13438_v16  ;;  %v5532_v33 = vpack.c.bf16 %v13441_v32, %v13407_v12 }
 0x642   : > { %v13480_v44 = vpop.eup %8908  ;;  %8928 = vpow2.f32 %v4867_v0  ;;  %v5534_v15 = vpack.c.bf16 %v13448_v53, %v13414_v10  ;;  %v13491_v35 = vmul.f32 1.442695, %v4703_v49  ;;  %v13493_v26 = vmul.f32 1.442695, %v4704_v8  ;;  %v15610_v49 = vld [vmem:[#allocation37_spill] sm:$0xff] }
 0x643   : > { %15604 = vst [vmem:[#allocation184_spill] sm:$0xff] %v13480_v44  ;;  %2793 = vperm.xlu0 %8330, %v15606_v7   ;;  %v13489_v58 = vpop.eup %8910  ;;  %8930 = vpow2.f32 %v4869_v30  ;;  %v4709_v0 = vsub.f32 %v15607_v51, %v4577_v4  ;;  %v13499_v23 = vmul.f32 1.442695, %v4689_v46  ;;  %v13501_v2 = vmul.f32 1.442695, %v4690_v24  ;;  %5747 = vmatprep.mubr.bf16.mxu0 %v5532_v33  ;;  %v15609_v7 = vld [vmem:[#allocation46_spill] sm:$0xff] }
 0x644   : > { %2768 = vperm.xlu1 %8331, %v15608_v29   ;;  %v13497_v16 = vpop.eup %8912  ;;  %8932 = vpow2.f32 %v4871_v42  ;;  %5908 = vmatprep.mubr.bf16.mxu1 %v5534_v15  ;;  %v4710_v31 = vsub.f32 %v15609_v7, %v4577_v4  ;;  %v4711_v8 = vsub.f32 %v15610_v49, %v4577_v4  ;;  %v5531_v51 = vpack.c.bf16 %v13435_v36, %v13403_v1  ;;  %v15612_v33 = vld [vmem:[#allocation47_spill] sm:$0xff]  ;;  %v4572_v6 = vpop.permute.xlu1 %4571 }
 0x645   : > { %v13504_v30 = vpop.eup %8914  ;;  %8934 = vpow2.f32 %v4905_v3  ;;  %v5533_v29 = vpack.c.bf16 %v13444_v27, %v13410_v43  ;;  %v13513_v46 = vmul.f32 1.442695, %v4691_v5  ;;  %v13515_v24 = vmul.f32 1.442695, %v4692_v25  ;;  %v4587_v5 = vpop.permute.xlu0 %4586  ;;  %v15621_v27 = vld [vmem:[#allocation134_spill] sm:$0xff] }
 0x646   : > { %v13511_v42 = vpop.eup %8916  ;;  %8936 = vpow2.f32 %v4907_v59  ;;  %v4712_v15 = vsub.f32 %v15612_v33, %v4577_v4  ;;  %v13521_v7 = vmul.f32 1.442695, %v4709_v0  ;;  %v13523_v49 = vmul.f32 1.442695, %v4710_v31  ;;  %5748 = vmatmul.mubr.bf16.gmra.mrb[216].mxu0 %v5531_v51  ;;  %v15614_v4 = vld [vmem:[#allocation49_spill] sm:$0xff]  ;;  %v15615_v0 = vld [vmem:[#allocation75_spill] sm:$0xff] }
 0x647   : > { %15611 = vst [vmem:[#allocation185_spill] sm:$0xff] %v13511_v42  ;;  %5322 = vperm.xlu0 %8330, %v13276_v63   ;;  %v13519_v3 = vpop.eup %8918  ;;  %8938 = vpow2.f32 %v4909_v34  ;;  %5909 = vmatmul.mubr.bf16.gmra.mrb[216].mxu1 %v5533_v29  ;;  %v4697_v59 = vsub.f32 %v15613_v14, %v13478_v11  ;;  %v4698_v33 = vsub.f32 %v15614_v4, %v13478_v11  ;;  %v13539_v14 = vmul.f32 1.442695, %v4711_v8  ;;  %v15616_v29 = vld [vmem:[#allocation32_spill] sm:$0xff]  ;;  %v15617_v63 = vld [vmem:[#allocation34_spill] sm:$0xff] }
 0x648   : > { %v13527_v25 = vpop.eup %8920  ;;  %8940 = vpow2.f32 %v4911_v22  ;;  %v5536_v34 = vpack.c.bf16 %v13422_v18, %v13497_v16  ;;  %v5538_v31 = vpack.c.bf16 %v13429_v17, %v13511_v42  ;;  %2778 = vperm.xlu1 %8331, %v15615_v0   ;;  %v4699_v22 = vsub.f32 %v15616_v29, %v13478_v11  ;;  %v15618_v0 = vld [vmem:[#allocation39_spill] sm:$0xff]  ;;  %v15620_v29 = vld [vmem:[#allocation132_spill] sm:$0xff] }
 0x649   : > { %v13536_v51 = vpop.eup %8922  ;;  %8942 = vpow2.f32 %v13450_v45  ;;  %v4700_v4 = vsub.f32 %v15617_v63, %v13478_v11  ;;  %v13548_v53 = vmul.f32 1.442695, %v4712_v15  ;;  %v4717_v17 = vsub.f32 %v15618_v0, %v4587_v5  ;;  %v15619_v18 = vld [vmem:[#allocation51_spill] sm:$0xff]  ;;  %v15622_v11 = vld [vmem:[#allocation42_spill] sm:$0xff] }
 0x64a   : > { %v13545_v56 = vpop.eup %8924  ;;  %8944 = vpow2.f32 %v13452_v60  ;;  %5755 = vmatprep.mubr.bf16.mxu0 %v5536_v34  ;;  %5916 = vmatprep.mubr.bf16.mxu1 %v5538_v31  ;;  %v4718_v45 = vsub.f32 %v15619_v18, %v4587_v5  ;;  %v4719_v20 = vsub.f32 %v15620_v29, %v4587_v5  ;;  %v4720_v63 = vsub.f32 %v15621_v27, %v4587_v5  ;;  %v15623_v18 = vld [vmem:[#allocation44_spill] sm:$0xff]  ;;  %v15624_v0 = vld [vmem:[#allocation79_spill] sm:$0xff]  ;;  %v15625_v29 = vld [vmem:[#allocation45_spill] sm:$0xff] }
 0x64b   : > { %v13552_v8 = vpop.eup %8926  ;;  %8946 = vpow2.f32 %v13457_v39  ;;  %v4705_v42 = vsub.f32 %v15622_v11, %v4572_v6  ;;  %5332 = vperm.xlu0 %8330, %v13288_v28   ;;  %v13562_v15 = vmul.f32 1.442695, %v4697_v59  ;;  %v13564_v34 = vmul.f32 1.442695, %v4698_v33  ;;  %v4597_v28 = vpop.permute.xlu0 %4596 }
 0x64c   : > { %v13559_v60 = vpop.eup %8928  ;;  %8948 = vpow2.f32 %v13464_v38  ;;  %v4706_v31 = vsub.f32 %v15623_v18, %v4572_v6  ;;  %2788 = vperm.xlu1 %8331, %v15624_v0   ;;  %v13571_v27 = vmul.f32 1.442695, %v4699_v22  ;;  %v13573_v5 = vmul.f32 1.442695, %v4700_v4  ;;  %v13576_v38 = vpop.permute.xlu1 %4581  ;;  %v15626_v0 = vld [vmem:[#allocation38_spill] sm:$0xff] }
 0x64d   : > { %v13568_v39 = vpop.eup %8930  ;;  %8950 = vpow2.f32 %v13472_v21  ;;  %v4707_v11 = vsub.f32 %v15625_v29, %v4572_v6  ;;  %v13581_v33 = vmul.f32 1.442695, %v4717_v17  ;;  %v13583_v18 = vmul.f32 1.442695, %v4718_v45 }
 0x64e   : > { %v13578_v59 = vpop.eup %8932  ;;  %8952 = vpow2.f32 %v13474_v52  ;;  %v4708_v10 = vsub.f32 %v15626_v0, %v4572_v6  ;;  %v13589_v22 = vmul.f32 1.442695, %v4719_v20  ;;  %v13591_v4 = vmul.f32 1.442695, %v4720_v63  ;;  %v15629_v6 = vld [vmem:[#allocation171_spill] sm:$0xff]  ;;  %v15631_v63 = vld [vmem:[#allocation142_spill] sm:$0xff] }
 0x64f   : > { %v13586_v21 = vpop.eup %8934  ;;  %8954 = vpow2.f32 %v13491_v35  ;;  %v13593_v29 = vmul.f32 1.442695, %v4705_v42  ;;  %5342 = vperm.xlu0 %8330, %v13301_v37   ;;  %v13599_v17 = vmul.f32 1.442695, %v4706_v31  ;;  %v13601_v52 = vmul.f32 1.442695, %v4707_v11 }
 0x650   : > { %v13596_v54 = vpop.eup %8936  ;;  %8956 = vpow2.f32 %v13493_v26  ;;  %v4725_v45 = vsub.f32 %v15629_v6, %v4597_v28  ;;  %5317 = vperm.xlu1 %8331, %v13271_v9   ;;  %v15630_v35 = vld [vmem:[#allocation136_spill] sm:$0xff]  ;;  %v4727_v0 = vsub.f32 %v15631_v63, %v4597_v28  ;;  %v5535_v37 = vpack.c.bf16 %v13417_v41, %v13489_v58  ;;  %v15633_v11 = vld [vmem:[#allocation170_spill] sm:$0xff]  ;;  %v13629_v63 = vpop.permute.xlu1 %4591 }
 0x651   : > { %15627 = vst [vmem:[#allocation186_spill] sm:$0xff] %v13599_v17  ;;  %15628 = vst [vmem:[#allocation187_spill] sm:$0xff] %v13601_v52  ;;  %v13605_v20 = vpop.eup %8938  ;;  %8958 = vpow2.f32 %v13499_v23  ;;  %v4726_v42 = vsub.f32 %v15630_v35, %v4597_v28  ;;  %v13615_v31 = vmul.f32 1.442695, %v4708_v10  ;;  %v4728_v6 = vsub.f32 %v15633_v11, %v4597_v28  ;;  %v15636_v11 = vld [vmem:[#allocation40_spill] sm:$0xff] }
 0x652   : > { %v13612_v26 = vpop.eup %8940  ;;  %8960 = vpow2.f32 %v13501_v2  ;;  %v5537_v9 = vpack.c.bf16 %v13426_v61, %v13504_v30  ;;  %5756 = vmatmul.mubr.bf16.gmra.mrb[220].mxu0 %v5535_v37  ;;  %v5540_v23 = vpack.c.bf16 %v13462_v40, %v13559_v60  ;;  %v5542_v35 = vpack.c.bf16 %v13480_v44, %v13578_v59  ;;  %v15634_v2 = vld [vmem:[#allocation50_spill] sm:$0xff]  ;;  %v15637_v61 = vld [vmem:[#allocation41_spill] sm:$0xff] }
 0x653   : > { %15632 = vst [vmem:[#allocation189_spill] sm:$0xff] %v13615_v31  ;;  %v13620_v52 = vpop.eup %8942  ;;  %8962 = vpow2.f32 %v13513_v46  ;;  %v4713_v10 = vsub.f32 %v15634_v2, %v13576_v38  ;;  %5352 = vperm.xlu0 %8330, %v13316_v50   ;;  %v15635_v46 = vld [vmem:[#allocation36_spill] sm:$0xff]  ;;  %v4715_v31 = vsub.f32 %v15636_v11, %v13576_v38  ;;  %v4716_v44 = vsub.f32 %v15637_v61, %v13576_v38 }
 0x654   : > { %v8945_v28 = vpop.eup %8944  ;;  %8964 = vpow2.f32 %v13515_v24  ;;  %5917 = vmatmul.mubr.bf16.gmra.mrb[220].mxu1 %v5537_v9  ;;  %v4714_v37 = vsub.f32 %v15635_v46, %v13576_v38  ;;  %5327 = vperm.xlu1 %8331, %v13283_v47   ;;  %v13643_v50 = vmul.f32 1.442695, %v4725_v45  ;;  %v13645_v17 = vmul.f32 1.442695, %v4726_v42  ;;  %v15638_v38 = vld [vmem:[#allocation169_spill] sm:$0xff]  ;;  %v15639_v42 = vld [vmem:[#allocation168_spill] sm:$0xff] }
 0x655   : > { %v13640_v2 = vpop.eup %8946  ;;  %8966 = vpow2.f32 %v13521_v7  ;;  %v13647_v9 = vmul.f32 1.442695, %v4727_v0  ;;  %5763 = vmatprep.mubr.bf16.mxu0 %v5540_v23  ;;  %5924 = vmatprep.mubr.bf16.mxu1 %v5542_v35  ;;  %v13650_v46 = vmul.f32 1.442695, %v4728_v6  ;;  %v13652_v61 = vmul.f32 1.442695, %v4713_v10 }
 0x656   : > { %v8949_v24 = vpop.eup %8948  ;;  %8968 = vpow2.f32 %v13523_v49  ;;  %v13659_v7 = vmul.f32 1.442695, %v4714_v37  ;;  %v13661_v45 = vmul.f32 1.442695, %v4715_v31  ;;  %v13669_v6 = vmul.f32 1.442695, %v4716_v44 }
 0x657   : > { %v13656_v47 = vpop.eup %8950  ;;  %8970 = vpow2.f32 %v13539_v14  ;;  %5362 = vperm.xlu0 %8330, %v13323_v55   ;;  %v5539_v23 = vpack.c.bf16 %v13455_v48, %v13552_v8  ;;  %v5541_v14 = vpack.c.bf16 %v13470_v13, %v13568_v39  ;;  %v15641_v35 = vld [vmem:[#allocation138_spill] sm:$0xff]  ;;  %v15642_v37 = vld [vmem:[#allocation140_spill] sm:$0xff]  ;;  %v5544_v44 = vpack.c.bf16 %v13527_v25, %v8945_v28 }
 0x658   : > { %v13666_v49 = vpop.eup %8952  ;;  %8972 = vpow2.f32 %v13548_v53  ;;  %15640 = vst [vmem:[#allocation192_spill] sm:$0xff] %v13669_v6  ;;  %5337 = vperm.xlu1 %8331, %v13293_v19   ;;  %v5546_v11 = vpack.c.bf16 %v13545_v56, %v8949_v24  ;;  %v5543_v55 = vpack.c.bf16 %v13519_v3, %v13620_v52  ;;  %v5118_v53 = vadd.f32 %v13407_v12, %v13403_v1 }
 0x659   : > { %v13676_v31 = vpop.eup %8954  ;;  %8974 = vpow2.f32 %v13562_v15  ;;  %v5545_v15 = vpack.c.bf16 %v13536_v51, %v13640_v2  ;;  %v5138_v10 = vadd.f32 %v13559_v60, %v13552_v8 }
 0x65a   : > { %v13684_v0 = vpop.eup %8956  ;;  %8976 = vpow2.f32 %v13564_v34  ;;  %5764 = vmatmul.mubr.bf16.gmra.mrb[224].mxu0 %v5539_v23  ;;  %v5128_v34 = vadd.f32 %v13497_v16, %v13489_v58  ;;  %v5148_v23 = vadd.f32 %v8945_v28, %v13620_v52  ;;  %v5119_v58 = vadd.f32 %v13410_v43, %v5118_v53  ;;  %v15643_v52 = vld [vmem:[#allocation179_spill] sm:$0xff]  ;;  %v15644_v43 = vld [vmem:[#allocation161_spill] sm:$0xff]  ;;  %v15647_v53 = vld [vmem:[#allocation178_spill] sm:$0xff] }
 0x65b   : > { %v13692_v19 = vpop.eup %8958  ;;  %8978 = vpow2.f32 %v13571_v27  ;;  %5372 = vperm.xlu0 %8330, %v13336_v57   ;;  %5771 = vmatprep.mubr.bf16.mxu0 %v5544_v44  ;;  %v5123_v57 = vadd.f32 %v13441_v32, %v13435_v36  ;;  %v5139_v36 = vadd.f32 %v13568_v39, %v5138_v10  ;;  %v15645_v28 = vld [vmem:[#allocation185_spill] sm:$0xff] }
 0x65c   : > { %v8961_v6 = vpop.eup %8960  ;;  %8980 = vpow2.f32 %v13573_v5  ;;  %5925 = vmatmul.mubr.bf16.gmra.mrb[224].mxu1 %v5541_v14  ;;  %v5547_v27 = vpack.c.bf16 %v13586_v21, %v13692_v19  ;;  %5347 = vperm.xlu1 %8331, %v13306_v62   ;;  %v5129_v16 = vadd.f32 %v13504_v30, %v5128_v34  ;;  %v5149_v32 = vadd.f32 %v13640_v2, %v5148_v23  ;;  %v15648_v34 = vld [vmem:[#allocation163_spill] sm:$0xff] }
 0x65d   : > { %v13708_v1 = vpop.eup %8962  ;;  %8982 = vpow2.f32 %v13581_v33  ;;  %5932 = vmatprep.mubr.bf16.mxu1 %v5546_v11  ;;  %v5548_v12 = vpack.c.bf16 %v13596_v54, %v8961_v6  ;;  %v13726_v30 = vadd.f32 %v15644_v43, %v5119_v58  ;;  %v13735_v39 = vadd.f32 %v13578_v59, %v5139_v36  ;;  %v15650_v58 = vld [vmem:[#allocation183_spill] sm:$0xff] }
 0x65e   : > { %v8965_v8 = vpop.eup %8964  ;;  %8984 = vpow2.f32 %v13583_v18  ;;  %v5549_v60 = vpack.c.bf16 %v13605_v20, %v13708_v1  ;;  %v13729_v18 = vadd.f32 %v15645_v28, %v5129_v16  ;;  %v13737_v2 = vadd.f32 %v8949_v24, %v5149_v32  ;;  %v15649_v24 = vld [vmem:[#allocation186_spill] sm:$0xff]  ;;  %v15651_v36 = vld [vmem:[#allocation187_spill] sm:$0xff] }
 0x65f   : > { %v13720_v5 = vpop.eup %8966  ;;  %8986 = vpow2.f32 %v13589_v22  ;;  %v5550_v33 = vpack.c.bf16 %v13612_v26, %v8965_v8  ;;  %5382 = vperm.xlu0 %8330, %v15643_v52   ;;  %v15646_v22 = vld [vmem:[#allocation182_spill] sm:$0xff]  ;;  %v5158_v44 = vadd.f32 %v8961_v6, %v13692_v19  ;;  %v5133_v23 = vadd.f32 %v15648_v34, %v13417_v41  ;;  %v15652_v41 = vld [vmem:[#allocation143_spill] sm:$0xff] }
 0x660   : > { %v13731_v11 = vpop.eup %8968  ;;  %8988 = vpow2.f32 %v13591_v4  ;;  %v5124_v14 = vadd.f32 %v15646_v22, %v5123_v57  ;;  %5357 = vperm.xlu1 %8331, %v15647_v53   ;;  %v5143_v4 = vadd.f32 %v13462_v40, %v13455_v48  ;;  %v5163_v16 = vadd.f32 %v13596_v54, %v13586_v21  ;;  %v15653_v40 = vld [vmem:[#allocation165_spill] sm:$0xff] }
 0x661   : > { %v13740_v10 = vpop.eup %8970  ;;  %8990 = vpow2.f32 %v13593_v29  ;;  %v5153_v29 = vadd.f32 %v13527_v25, %v13519_v3  ;;  %v5159_v48 = vadd.f32 %v13708_v1, %v5158_v44  ;;  %v5134_v32 = vadd.f32 %v15653_v40, %v5133_v23  ;;  %v15654_v22 = vld [vmem:[#allocation189_spill] sm:$0xff] }
 0x662   : > { %v13749_v59 = vpop.eup %8972  ;;  %8992 = vpow2.f32 %v15649_v24  ;;  %v13753_v57 = vadd.f32 %v15650_v58, %v5124_v14  ;;  %5772 = vmatmul.mubr.bf16.gmra.mrb[228].mxu0 %v5543_v55  ;;  %v5144_v43 = vadd.f32 %v13470_v13, %v5143_v4  ;;  %v5164_v55 = vadd.f32 %v13605_v20, %v5163_v16  ;;  %v15655_v13 = vld [vmem:[#allocation164_spill] sm:$0xff]  ;;  %v15658_v24 = vld [vmem:[#allocation147_spill] sm:$0xff] }
 0x663   : > { %v13759_v6 = vpop.eup %8974  ;;  %8994 = vpow2.f32 %v15651_v36  ;;  %5392 = vperm.xlu0 %8330, %v15652_v41   ;;  %5779 = vmatprep.mubr.bf16.mxu0 %v5548_v12  ;;  %v5154_v3 = vadd.f32 %v13536_v51, %v5153_v29  ;;  %v13776_v44 = vadd.f32 %v8965_v8, %v5159_v48  ;;  %v15657_v4 = vld [vmem:[#allocation184_spill] sm:$0xff]  ;;  %v5173_v36 = vadd.f32 %v13666_v49, %v13656_v47 }
 0x664   : > { %v8977_v28 = vpop.eup %8976  ;;  %8996 = vpow2.f32 %v15654_v22  ;;  %5933 = vmatmul.mubr.bf16.gmra.mrb[228].mxu1 %v5545_v15  ;;  %v5551_v54 = vpack.c.bf16 %v13656_v47, %v13759_v6  ;;  %5367 = vperm.xlu1 %8331, %v15655_v13   ;;  %v15656_v15 = vld [vmem:[#allocation167_spill] sm:$0xff]  ;;  %v15660_v40 = vsub.f32 %v15639_v42, %v13629_v63  ;;  %v15662_v42 = vsub.f32 %v15641_v35, %v13629_v63 }
 0x665   : > { %v13771_v25 = vpop.eup %8978  ;;  %8998 = vpow2.f32 %v13643_v50  ;;  %5940 = vmatprep.mubr.bf16.mxu1 %v5550_v33  ;;  %v5552_v14 = vpack.c.bf16 %v13666_v49, %v8977_v28  ;;  %v13779_v12 = vadd.f32 %v15656_v15, %v5134_v32  ;;  %v5168_v23 = vadd.f32 %v8977_v28, %v13759_v6  ;;  %v15661_v32 = vld [vmem:[#allocation137_spill] sm:$0xff] }
 0x666   : > { %v8981_v34 = vpop.eup %8980  ;;  %9000 = vpow2.f32 %v13645_v17  ;;  %v5553_v51 = vpack.c.bf16 %v13676_v31, %v13771_v25  ;;  %v13786_v50 = vadd.f32 %v15657_v4, %v5144_v43  ;;  %v13794_v58 = vadd.f32 %v13545_v56, %v5154_v3  ;;  %v15665_v4 = vld [vmem:[#allocation192_spill] sm:$0xff] }
 0x667   : > { %v13788_v33 = vpop.eup %8982  ;;  %9002 = vpow2.f32 %v13647_v9  ;;  %v5554_v8 = vpack.c.bf16 %v13684_v0, %v8981_v34  ;;  %5402 = vperm.xlu0 %8330, %v15658_v24   ;;  %v13797_v17 = vadd.f32 %v13612_v26, %v5164_v55  ;;  %v5169_v16 = vadd.f32 %v13771_v25, %v5168_v23 }
 0x668   : > { %v13799_v29 = vpop.eup %8984  ;;  %9004 = vpow2.f32 %v13650_v46  ;;  %v5183_v9 = vadd.f32 %v13731_v11, %v13720_v5  ;;  %v15659_v56 = vsub.f32 %v15638_v38, %v13629_v63  ;;  %v4963_v46 = vmul.f32 1.442695, %v15660_v40  ;;  %5377 = vperm.xlu1 %8331, %v15661_v32   ;;  %v15671_v40 = vld [vmem:[#allocation200_spill] sm:$0xff] }
 0x669   : > { %v13807_v48 = vpop.eup %8986  ;;  %9006 = vpow2.f32 %v13652_v61  ;;  %v5193_v49 = vadd.f32 %v13799_v29, %v13788_v33  ;;  %v13822_v28 = vadd.f32 %v8981_v34, %v5169_v16  ;;  %v5174_v61 = vadd.f32 %v13676_v31, %v5173_v36 }
 0x66a   : > { %v4961_v26 = vmul.f32 1.442695, %v15659_v56  ;;  %v13819_v43 = vpop.eup %8988  ;;  %9008 = vpow2.f32 %v13659_v7  ;;  %v5184_v38 = vadd.f32 %v13740_v10, %v5183_v9  ;;  %v4965_v3 = vmul.f32 1.442695, %v15662_v42  ;;  %5780 = vmatmul.mubr.bf16.gmra.mrb[232].mxu0 %v5547_v27  ;;  %v15664_v7 = vld [vmem:[#allocation149_spill] sm:$0xff] }
 0x66b   : > { %v13826_v22 = vpop.eup %8990  ;;  %9010 = vpow2.f32 %v13661_v45  ;;  %v15663_v55 = vsub.f32 %v15642_v37, %v13629_v63  ;;  %5412 = vperm.xlu0 %8330, %v15664_v7   ;;  %v5194_v34 = vadd.f32 %v13807_v48, %v5193_v49  ;;  %5787 = vmatprep.mubr.bf16.mxu0 %v5552_v14  ;;  %v13847_v45 = vadd.f32 %v13684_v0, %v5174_v61  ;;  %v15666_v37 = vld [vmem:[#allocation180_spill] sm:$0xff]  ;;  %v15668_v0 = vld [vmem:[#allocation190_spill] sm:$0xff] }
 0x66c   : > { %v8993_v23 = vpop.eup %8992  ;;  %9012 = vpow2.f32 %v15665_v4  ;;  %5941 = vmatmul.mubr.bf16.gmra.mrb[232].mxu1 %v5549_v60  ;;  %v5555_v63 = vpack.c.bf16 %v13720_v5, %v13826_v22  ;;  %v13850_v19 = vadd.f32 %v13749_v59, %v5184_v38  ;;  %5387 = vperm.xlu1 %8331, %v15666_v37   ;;  %v15667_v60 = vld [vmem:[#allocation188_spill] sm:$0xff]  ;;  %v15672_v49 = vld [vmem:[#allocation202_spill] sm:$0xff] }
 0x66d   : > { %v4967_v15 = vmul.f32 1.442695, %v15663_v55  ;;  %v13852_v21 = vpop.eup %8994  ;;  %9014 = vpow2.f32 %v4961_v26  ;;  %5948 = vmatprep.mubr.bf16.mxu1 %v5554_v8  ;;  %v5556_v35 = vpack.c.bf16 %v13731_v11, %v8993_v23  ;;  %v5178_v20 = vadd.f32 %v8993_v23, %v13826_v22  ;;  %v15670_v8 = vld [vmem:[#allocation153_spill] sm:$0xff] }
 0x66e   : > { %v13858_v27 = vadd.f32 %v13819_v43, %v5194_v34  ;;  %v8997_v1 = vpop.eup %8996  ;;  %v15669_v14 = vsub.f32 %v15667_v60, %v15668_v0  ;;  %9016 = vpow2.f32 %v4963_v46  ;;  %v5557_v36 = vpack.c.bf16 %v13740_v10, %v13852_v21  ;;  %v15674_v46 = vld [vmem:[#allocation145_spill] sm:$0xff] }
 0x66f   : > { %v13865_v9 = vpop.eup %8998  ;;  %9018 = vpow2.f32 %v4965_v3  ;;  %v5558_v11 = vpack.c.bf16 %v13749_v59, %v8997_v1  ;;  %5422 = vperm.xlu0 %8330, %v15670_v8   ;;  %v5179_v56 = vadd.f32 %v13852_v21, %v5178_v20  ;;  %v15673_v61 = vsub.f32 %v15671_v40, %v15672_v49  ;;  %v15675_v59 = vld [vmem:[#allocation191_spill] sm:$0xff]  ;;  %v15676_v34 = vld [vmem:[#allocation193_spill] sm:$0xff] }
 0x670   : > { %v4429_v16 = vmul.f32 1.442695, %v15669_v14  ;;  %v9001_v26 = vpop.eup %9000  ;;  %9020 = vpow2.f32 %v4967_v15  ;;  %5397 = vperm.xlu1 %8331, %v15674_v46   ;;  %v15677_v23 = vsub.f32 %v15675_v59, %v15676_v34  ;;  %v15678_v15 = vld [vmem:[#allocation155_spill] sm:$0xff]  ;;  %v15681_v40 = vld [vmem:[#allocation197_spill] sm:$0xff] }
 0x671   : > { %v4443_v38 = vmul.f32 1.442695, %v15673_v61  ;;  %v13873_v42 = vpop.eup %9002  ;;  %v13876_v10 = vadd.f32 %v8997_v1, %v5179_v56  ;;  %v5203_v3 = vadd.f32 %v9001_v26, %v13865_v9  ;;  %v15680_v56 = vld [vmem:[#allocation195_spill] sm:$0xff] }
 0x672   : > { %v9005_v55 = vpop.eup %9004  ;;  %9022 = vpow2.f32 %v4429_v16  ;;  %v4433_v4 = vmul.f32 1.442695, %v15677_v23  ;;  %5788 = vmatmul.mubr.bf16.gmra.mrb[236].mxu0 %v5551_v54  ;;  %v15679_v16 = vld [vmem:[#allocation181_spill] sm:$0xff]  ;;  %v15682_v49 = vsub.f32 %v15680_v56, %v15681_v40  ;;  %v15684_v59 = vld [vmem:[#allocation151_spill] sm:$0xff] }
 0x673   : > { %v9007_v21 = vpop.eup %9006  ;;  %5432 = vperm.xlu0 %8330, %v15678_v15   ;;  %v5204_v20 = vadd.f32 %v13873_v42, %v5203_v3  ;;  %9024 = vpow2.f32 %v4443_v38  ;;  %5795 = vmatprep.mubr.bf16.mxu0 %v5556_v35 }
 0x674   : > { %v9009_v60 = vpop.eup %9008  ;;  %5949 = vmatmul.mubr.bf16.gmra.mrb[236].mxu1 %v5553_v51  ;;  %v5559_v1 = vpack.c.bf16 %v13788_v33, %v9007_v21  ;;  %5407 = vperm.xlu1 %8331, %v15679_v16   ;;  %9026 = vpow2.f32 %v4433_v4  ;;  %v4437_v61 = vmul.f32 1.442695, %v15682_v49  ;;  %v15683_v33 = vld [vmem:[#allocation157_spill] sm:$0xff]  ;;  %v15693_v49 = vld [vmem:[#allocation150_spill] sm:$0xff] }
 0x675   : > { %v9011_v0 = vpop.eup %9010  ;;  %5956 = vmatprep.mubr.bf16.mxu1 %v5558_v11  ;;  %v5560_v14 = vpack.c.bf16 %v13799_v29, %v9009_v60  ;;  %v5188_v47 = vadd.f32 %v9009_v60, %v9007_v21  ;;  %v13893_v6 = vadd.f32 %v9005_v55, %v5204_v20  ;;  %v15685_v21 = vld [vmem:[#allocation199_spill] sm:$0xff] }
 0x676   : > { %v9013_v54 = vpop.eup %9012  ;;  %v5561_v31 = vpack.c.bf16 %v13807_v48, %v9011_v0  ;;  %9028 = vpow2.f32 %v4437_v61  ;;  %v15686_v48 = vld [vmem:[#allocation201_spill] sm:$0xff]  ;;  %v15694_v61 = vld [vmem:[#allocation175_spill] sm:$0xff] }
 0x677   : > { %v9015_v25 = vpop.eup %9014  ;;  %v5562_v51 = vpack.c.bf16 %v13819_v43, %v9013_v54  ;;  %5442 = vperm.xlu0 %8330, %v15683_v33   ;;  %v5189_v35 = vadd.f32 %v9011_v0, %v5188_v47  ;;  %v15687_v20 = vsub.f32 %v15685_v21, %v15686_v48  ;;  %v15688_v0 = vld [vmem:[#allocation159_spill] sm:$0xff]  ;;  %v15697_v48 = vld [vmem:[#allocation52_spill] sm:$0xff] }
 0x678   : > { %v9017_v29 = vpop.eup %9016  ;;  %v5563_v11 = vpack.c.bf16 %v13865_v9, %v9015_v25  ;;  %5417 = vperm.xlu1 %8331, %v15684_v59   ;;  %v2621_v21 = vld [vmem:[#allocation4 + $0x88] sm:$0xff] }
 0x679   : > { %v9019_v38 = vpop.eup %9018  ;;  %v5564_v3 = vpack.c.bf16 %v9001_v26, %v9017_v29  ;;  %v13903_v34 = vadd.f32 %v9013_v54, %v5189_v35  ;;  %v5198_v23 = vadd.f32 %v9017_v29, %v9015_v25  ;;  %v4441_v60 = vmul.f32 1.442695, %v15687_v20 }
 0x67a   : > { %v9021_v4 = vpop.eup %9020  ;;  %v5565_v43 = vpack.c.bf16 %v13873_v42, %v9019_v38  ;;  %5796 = vmatmul.mubr.bf16.gmra.mrb[240].mxu0 %v5555_v63  ;;  %v15691_v42 = vld [vmem:[#allocation146_spill] sm:$0xff] }
 0x67b   : > { %v5566_v9 = vpack.c.bf16 %v9005_v55, %v9021_v4  ;;  %5452 = vperm.xlu0 %8330, %v15688_v0   ;;  %v5199_v26 = vadd.f32 %v9019_v38, %v5198_v23  ;;  %5803 = vmatprep.mubr.bf16.mxu0 %v5560_v14  ;;  %9030 = vpow2.f32 %v4441_v60  ;;  %v15692_v14 = vld [vmem:[#allocation172_spill] sm:$0xff] }
 0x67c   : > { %v13913_v47 = vpop.eup %9022  ;;  %5957 = vmatmul.mubr.bf16.gmra.mrb[240].mxu1 %v5557_v36 }
 0x67d   : > { %5964 = vmatprep.mubr.bf16.mxu1 %v5562_v51  ;;  %5427 = vperm.xlu1 %8331, %v13913_v47   ;;  %v13916_v54 = vadd.f32 %v9021_v4, %v5199_v26  ;;  %v13918_v56 = vpop.eup %9024  ;;  %v2618_v51 = vld [vmem:[#allocation4 + $0x70] sm:$0xff] }
 0x67e   : > { %15689 = vst [vmem:[#allocation194_spill] sm:$0xff] %v13918_v56  ;;  %v13921_v5 = vpop.eup %9026  ;;  %v15696_v4 = vld [vmem:[#allocation204_spill] sm:$0xff] }
 0x67f   : > { %5462 = vperm.xlu0 %8330, %v13918_v56  }
 0x680   : > { %v13924_v22 = vpop.eup %9028 }
 0x681   : > { %5437 = vperm.xlu1 %8331, %v13921_v5  }
 0x682   : > { %5804 = vmatmul.mubr.bf16.gmra.mrb[244].mxu0 %v5559_v1 }
 0x683   : > { %5811 = vmatprep.mubr.bf16.mxu0 %v5564_v3 }
 0x684   : > { %5965 = vmatmul.mubr.bf16.gmra.mrb[244].mxu1 %v5561_v31  ;;  %v15695_v31 = vld [vmem:[#allocation203_spill] sm:$0xff] }
 0x685   : > { %5972 = vmatprep.mubr.bf16.mxu1 %v5566_v9  ;;  %5447 = vperm.xlu1 %8331, %v13924_v22   ;;  %v13927_v63 = vpop.eup %9030  ;;  %v15698_v9 = vld [vmem:[#allocation206_spill] sm:$0xff] }
 0x686   : > { %15690 = vst [vmem:[#allocation61_spill] sm:$0xff] %v13927_v63 }
 0x689   : > { %5457 = vperm.xlu1 %8331, %v13927_v63  }
 0x68a   : > { %5812 = vmatmul.mubr.bf16.gmra.mrb[248].mxu0 %v5563_v11 }
 0x68c   : > { %5973 = vmatmul.mubr.bf16.gmra.mrb[248].mxu1 %v5565_v43 }
 0x69e   : > { %v4607_v36 = vpop.permute.xlu0 %4606  ;;  %5066 = vadd.xlane.f32.xlu0 %v15695_v31  ;;  %v15703_v31 = vld [vmem:[#allocation55_spill] sm:$0xff] }
 0x69f   : > { %v4733_v55 = vsub.f32 %v15691_v42, %v4607_v36  ;;  %v4734_v40 = vsub.f32 %v15692_v14, %v4607_v36  ;;  %v4735_v1 = vsub.f32 %v15693_v49, %v4607_v36  ;;  %v4736_v25 = vsub.f32 %v15694_v61, %v4607_v36  ;;  %v15699_v36 = vld [vmem:[#allocation173_spill] sm:$0xff] }
 0x6a1   : > { %v4985_v35 = vmul.f32 1.442695, %v4733_v55  ;;  %v4987_v29 = vmul.f32 1.442695, %v4734_v40  ;;  %v4989_v38 = vmul.f32 1.442695, %v4735_v1 }
 0x6a2   : > { %v2709_v3 = vpop.permute.xlu0 %2708  ;;  %v4991_v23 = vmul.f32 1.442695, %v4736_v25  ;;  %5071 = vadd.xlane.f32.xlu0 %v15696_v4  ;;  %v15700_v55 = vld [vmem:[#allocation144_spill] sm:$0xff]  ;;  %v15701_v40 = vld [vmem:[#allocation174_spill] sm:$0xff]  ;;  %v2623_v25 = vld [vmem:[#allocation4 + $0x98] sm:$0xff] }
 0x6a3   : > { %9032 = vpow2.f32 %v4985_v35  ;;  %v2810_v11 = vmul.f32 %v2709_v3, %v2618_v51  ;;  %v15702_v1 = vld [vmem:[#allocation148_spill] sm:$0xff]  ;;  %v2619_v35 = vld [vmem:[#allocation4 + $0x78] sm:$0xff] }
 0x6a4   : > { %9034 = vpow2.f32 %v4987_v29 }
 0x6a5   : > { %v3420_v20 = vadd.f32 %v15697_v48, %v2810_v11  ;;  %9036 = vpow2.f32 %v4989_v38 }
 0x6a6   : > { %v2724_v60 = vpop.permute.xlu0 %2723  ;;  %9038 = vpow2.f32 %v4991_v23  ;;  %5081 = vadd.xlane.f32.xlu0 %v15698_v9 }
 0x6a7   : > { %3452 = vst.msk [vmem:[#allocation4 + $0x70] sm:$0xff] %vm920_vm2, %v3420_v20  ;;  %v2813_v43 = vmul.f32 %v2724_v60, %v2621_v21  ;;  %v4602_v26 = vpop.permute.xlu1 %4601  ;;  %v15704_v21 = vld [vmem:[#allocation88_spill] sm:$0xff]  ;;  %v2625_v60 = vld [vmem:[#allocation4 + $0xa8] sm:$0xff] }
 0x6a8   : > { %v4729_v42 = vsub.f32 %v15699_v36, %v4602_v26  ;;  %v4730_v14 = vsub.f32 %v15700_v55, %v4602_v26  ;;  %v4731_v49 = vsub.f32 %v15701_v40, %v4602_v26  ;;  %v4732_v61 = vsub.f32 %v15702_v1, %v4602_v26  ;;  %v15705_v26 = vld [vmem:[#allocation58_spill] sm:$0xff]  ;;  %v15707_v40 = vld [vmem:[#allocation205_spill] sm:$0xff] }
 0x6a9   : > { %v3423_v51 = vadd.f32 %v15703_v31, %v2813_v43  ;;  %v2620_v36 = vld [vmem:[#allocation4 + $0x80] sm:$0xff] }
 0x6aa   : > { %v4977_v29 = vmul.f32 1.442695, %v4729_v42  ;;  %v4979_v38 = vmul.f32 1.442695, %v4730_v14  ;;  %v4981_v3 = vmul.f32 1.442695, %v4731_v49  ;;  %v2734_v23 = vpop.permute.xlu0 %2733  ;;  %5091 = vadd.xlane.f32.xlu0 %v15704_v21 }
 0x6ab   : > { %3455 = vst.msk [vmem:[#allocation4 + $0x88] sm:$0xff] %vm920_vm2, %v3423_v51  ;;  %v4983_v11 = vmul.f32 1.442695, %v4732_v61  ;;  %v2815_v4 = vmul.f32 %v2734_v23, %v2623_v25  ;;  %v2714_v48 = vpop.permute.xlu1 %2713  ;;  %v15706_v55 = vld [vmem:[#allocation54_spill] sm:$0xff]  ;;  %v15710_v21 = vld [vmem:[#allocation53_spill] sm:$0xff] }
 0x6ac   : > { %9040 = vpow2.f32 %v4977_v29  ;;  %v2811_v20 = vmul.f32 %v2714_v48, %v2619_v35  ;;  %v15708_v61 = vld [vmem:[#allocation90_spill] sm:$0xff]  ;;  %v2627_v29 = vld [vmem:[#allocation4 + $0xb8] sm:$0xff] }
 0x6ad   : > { %v13946_v9 = vpop.eup %9032  ;;  %9042 = vpow2.f32 %v4979_v38  ;;  %v3425_v43 = vadd.f32 %v15705_v26, %v2815_v4  ;;  %5061 = vadd.xlane.f32.xlu1 %v15707_v40 }
 0x6ae   : > { %v13949_v42 = vpop.eup %9034  ;;  %9044 = vpow2.f32 %v4981_v3  ;;  %v3421_v14 = vadd.f32 %v15706_v55, %v2811_v20  ;;  %v2744_v49 = vpop.permute.xlu0 %2743  ;;  %5101 = vadd.xlane.f32.xlu0 %v15708_v61  ;;  %v15709_v3 = vld [vmem:[#allocation59_spill] sm:$0xff]  ;;  %v15711_v20 = vld [vmem:[#allocation89_spill] sm:$0xff] }
 0x6af   : > { %9046 = vpow2.f32 %v4983_v11  ;;  %3457 = vst.msk [vmem:[#allocation4 + $0x98] sm:$0xff] %vm920_vm2, %v3425_v43  ;;  %v2817_v1 = vmul.f32 %v2744_v49, %v2625_v60  ;;  %v2719_v25 = vpop.permute.xlu1 %2718  ;;  %v5213_v31 = vadd.f32 %v13949_v42, %v13946_v9  ;;  %v13957_v51 = vpop.eup %9036  ;;  %v2622_v11 = vld [vmem:[#allocation4 + $0x90] sm:$0xff] }
 0x6b0   : > { %3453 = vst.msk [vmem:[#allocation4 + $0x78] sm:$0xff] %vm920_vm2, %v3421_v14  ;;  %v2812_v35 = vmul.f32 %v2719_v25, %v2620_v36  ;;  %v13960_v38 = vpop.eup %9038  ;;  %v15712_v14 = vld [vmem:[#allocation209_spill] sm:$0xff] }
 0x6b1   : > { %v3427_v23 = vadd.f32 %v15709_v3, %v2817_v1  ;;  %v5214_v4 = vadd.f32 %v13957_v51, %v5213_v31  ;;  %5076 = vadd.xlane.f32.xlu1 %v15711_v20  ;;  %v2629_v31 = vld [vmem:[#allocation4 + $0xc8] sm:$0xff] }
 0x6b2   : > { %v3422_v48 = vadd.f32 %v15710_v21, %v2812_v35  ;;  %v2754_v26 = vpop.permute.xlu0 %2753  ;;  %5111 = vadd.xlane.f32.xlu0 %v15712_v14  ;;  %v15713_v35 = vld [vmem:[#allocation62_spill] sm:$0xff]  ;;  %v15714_v14 = vld [vmem:[#allocation56_spill] sm:$0xff] }
 0x6b3   : > { %v7953_v60 = vpop.f32.mrb[192].mxu0  ;;  %3459 = vst.msk [vmem:[#allocation4 + $0xa8] sm:$0xff] %vm920_vm2, %v3427_v23  ;;  %v2819_v43 = vmul.f32 %v2754_v26, %v2627_v29  ;;  %v2729_v36 = vpop.permute.xlu1 %2728  ;;  %v13969_v40 = vadd.f32 %v13960_v38, %v5214_v4  ;;  %v2624_v23 = vld [vmem:[#allocation4 + $0xa0] sm:$0xff]  ;;  %v15715_v4 = vld [vmem:[#allocation91_spill] sm:$0xff] }
 0x6b4   : > { %v7954_v55 = vpop.f32.mrb[193].mxu0  ;;  %3454 = vst.msk [vmem:[#allocation4 + $0x80] sm:$0xff] %vm920_vm2, %v3422_v48  ;;  %v2814_v25 = vmul.f32 %v2729_v36, %v2622_v11 }
 0x6b5   : > { %v8065_v49 = vpop.f32.mrb[192].mxu1  ;;  %v7955_v1 = vadd.f32 %v7954_v55, %v7953_v60  ;;  %v7956_v61 = vpop.f32.mrb[194].mxu0  ;;  %v3429_v3 = vadd.f32 %v15713_v35, %v2819_v43  ;;  %5086 = vadd.xlane.f32.xlu1 %v15715_v4 }
 0x6b6   : > { %v8066_v21 = vpop.f32.mrb[193].mxu1  ;;  %v7957_v20 = vpop.f32.mrb[195].mxu0  ;;  %v3424_v0 = vadd.f32 %v15714_v14, %v2814_v25  ;;  %5121 = vadd.xlane.f32.xlu0 %v13726_v30  ;;  %v15716_v14 = vld [vmem:[#allocation66_spill] sm:$0xff] }
 0x6b7   : > { %v9041_v29 = vpop.eup %9040  ;;  %v8067_v26 = vadd.f32 %v8066_v21, %v8065_v49  ;;  %v8068_v56 = vpop.f32.mrb[194].mxu1  ;;  %v7958_v33 = vadd.f32 %v7957_v20, %v7956_v61  ;;  %3461 = vst.msk [vmem:[#allocation4 + $0xb8] sm:$0xff] %vm920_vm2, %v3429_v3  ;;  %v2631_v21 = vld [vmem:[#allocation4 + $0xd8] sm:$0xff] }
 0x6b8   : > { %v2764_v15 = vpop.permute.xlu0 %2763  ;;  %v9043_v48 = vpop.eup %9042  ;;  %v5567_v55 = vpack.c.bf16 %v13946_v9, %v9041_v29  ;;  %3456 = vst.msk [vmem:[#allocation4 + $0x90] sm:$0xff] %vm920_vm2, %v3424_v0  ;;  %v15717_v9 = vld [vmem:[#allocation57_spill] sm:$0xff] }
 0x6b9   : > { %v8069_v60 = vpop.f32.mrb[195].mxu1  ;;  %v2821_v11 = vmul.f32 %v2764_v15, %v2629_v31  ;;  %v2739_v43 = vpop.permute.xlu1 %2738  ;;  %v13978_v35 = vadd.f32 %v8067_v26, %v7955_v1  ;;  %v5568_v25 = vpack.c.bf16 %v13949_v42, %v9043_v48  ;;  %v2626_v31 = vld [vmem:[#allocation4 + $0xb0] sm:$0xff]  ;;  %v5208_v30 = vadd.f32 %v9043_v48, %v9041_v29  ;;  %v15718_v1 = vld [vmem:[#allocation207_spill] sm:$0xff] }
 0x6ba   : > { %v9045_v36 = vpop.eup %9044  ;;  %v8070_v49 = vadd.f32 %v8069_v60, %v8068_v56  ;;  %v2816_v61 = vmul.f32 %v2739_v43, %v2624_v23  ;;  %5096 = vadd.xlane.f32.xlu1 %v15718_v1  ;;  %5131 = vadd.xlane.f32.xlu0 %v13729_v18  ;;  %v2633_v43 = vld [vmem:[#allocation4 + $0xe8] sm:$0xff] }
 0x6bb   : > { %v9047_v20 = vpop.eup %9046  ;;  %v3431_v3 = vadd.f32 %v15716_v14, %v2821_v11  ;;  %v5569_v15 = vpack.c.bf16 %v13957_v51, %v9045_v36  ;;  %v7959_v26 = vpop.f32.mrb[196].mxu0  ;;  %5819 = vmatprep.mubr.bf16.mxu0 %v5568_v25  ;;  %v5209_v29 = vadd.f32 %v9045_v36, %v5208_v30 }
 0x6bc   : > { %v13984_v4 = vadd.f32 %v8070_v49, %v7958_v33  ;;  %v3426_v63 = vadd.f32 %v15717_v9, %v2816_v61  ;;  %v5570_v0 = vpack.c.bf16 %v13960_v38, %v9047_v20  ;;  %v2774_v56 = vpop.permute.xlu0 %2773  ;;  %v7960_v23 = vpop.f32.mrb[197].mxu0  ;;  %5820 = vmatmul.mubr.bf16.gmra.mrb[252].mxu0 %v5567_v55  ;;  %v15719_v49 = vld [vmem:[#allocation70_spill] sm:$0xff] }
 0x6bd   : > { %3463 = vst.msk [vmem:[#allocation4 + $0xc8] sm:$0xff] %vm920_vm2, %v3431_v3  ;;  %v2823_v42 = vmul.f32 %v2774_v56, %v2631_v21  ;;  %v2749_v51 = vpop.permute.xlu1 %2748  ;;  %v8071_v33 = vpop.f32.mrb[196].mxu1  ;;  %v7961_v48 = vadd.f32 %v7960_v23, %v7959_v26  ;;  %v2628_v21 = vld [vmem:[#allocation4 + $0xc0] sm:$0xff]  ;;  %v13993_v14 = vadd.f32 %v9047_v20, %v5209_v29  ;;  %v15720_v3 = vld [vmem:[#allocation60_spill] sm:$0xff]  ;;  %v2635_v56 = vld [vmem:[#allocation4 + $0xf8] sm:$0xff] }
 0x6be   : > { %3458 = vst.msk [vmem:[#allocation4 + $0xa0] sm:$0xff] %vm920_vm2, %v3426_v63  ;;  %5980 = vmatprep.mubr.bf16.mxu1 %v5570_v0  ;;  %v7962_v60 = vpop.f32.mrb[198].mxu0  ;;  %v2818_v11 = vmul.f32 %v2749_v51, %v2626_v31  ;;  %v8072_v61 = vpop.f32.mrb[197].mxu1  ;;  %v15721_v63 = vld [vmem:[#allocation208_spill] sm:$0xff]  ;;  %5141 = vadd.xlane.f32.xlu0 %v13735_v39 }
 0x6bf   : > { %v3433_v38 = vadd.f32 %v15719_v49, %v2823_v42  ;;  %5981 = vmatmul.mubr.bf16.gmra.mrb[252].mxu1 %v5569_v15  ;;  %v7963_v25 = vpop.f32.mrb[199].mxu0  ;;  %v8073_v18 = vadd.f32 %v8072_v61, %v8071_v33  ;;  %v8074_v55 = vpop.f32.mrb[198].mxu1  ;;  %5106 = vadd.xlane.f32.xlu1 %v15721_v63  ;;  %v15722_v42 = vld [vmem:[#allocation74_spill] sm:$0xff]  ;;  %v2630_v51 = vld [vmem:[#allocation4 + $0xd0] sm:$0xff] }
 0x6c0   : > { %v3428_v36 = vadd.f32 %v15720_v3, %v2818_v11  ;;  %v7964_v30 = vadd.f32 %v7963_v25, %v7962_v60  ;;  %v2784_v9 = vpop.permute.xlu0 %2783  ;;  %v8075_v31 = vpop.f32.mrb[199].mxu1  ;;  %v15723_v33 = vld [vmem:[#allocation64_spill] sm:$0xff]  ;;  %v15724_v11 = vld [vmem:[#allocation210_spill] sm:$0xff]  ;;  %v15725_v3 = vld [vmem:[#allocation77_spill] sm:$0xff] }
 0x6c1   : > { %3465 = vst.msk [vmem:[#allocation4 + $0xd8] sm:$0xff] %vm920_vm2, %v3433_v38  ;;  %v2825_v1 = vmul.f32 %v2784_v9, %v2633_v43  ;;  %v2759_v26 = vpop.permute.xlu1 %2758  ;;  %v13999_v15 = vadd.f32 %v8073_v18, %v7961_v48  ;;  %v8076_v20 = vadd.f32 %v8075_v31, %v8074_v55  ;;  %v5284_v55 = vld [vmem:[#allocation4 + $0x108] sm:$0xff] }
 0x6c2   : > { %3460 = vst.msk [vmem:[#allocation4 + $0xb0] sm:$0xff] %vm920_vm2, %v3428_v36  ;;  %v2820_v0 = vmul.f32 %v2759_v26, %v2628_v21  ;;  %5151 = vadd.xlane.f32.xlu0 %v13737_v2 }
 0x6c3   : > { %v3435_v23 = vadd.f32 %v15722_v42, %v2825_v1  ;;  %v5874_v29 = vadd.f32 %v8076_v20, %v7964_v30  ;;  %5116 = vadd.xlane.f32.xlu1 %v15724_v11  ;;  %v7965_v49 = vpop.f32.mrb[200].mxu0  ;;  %v15726_v1 = vld [vmem:[#allocation68_spill] sm:$0xff] }
 0x6c4   : > { %v3430_v60 = vadd.f32 %v15723_v33, %v2820_v0  ;;  %v2794_v43 = vpop.permute.xlu0 %2793  ;;  %v7966_v48 = vpop.f32.mrb[201].mxu0  ;;  %v2632_v0 = vld [vmem:[#allocation4 + $0xe0] sm:$0xff] }
 0x6c5   : > { %3467 = vst.msk [vmem:[#allocation4 + $0xe8] sm:$0xff] %vm920_vm2, %v3435_v23  ;;  %v2827_v39 = vmul.f32 %v2794_v43, %v2635_v56  ;;  %v2769_v38 = vpop.permute.xlu1 %2768  ;;  %v8077_v61 = vpop.f32.mrb[200].mxu1  ;;  %v7967_v25 = vadd.f32 %v7966_v48, %v7965_v49  ;;  %v5286_v49 = vld [vmem:[#allocation4 + $0x118] sm:$0xff] }
 0x6c6   : > { %3462 = vst.msk [vmem:[#allocation4 + $0xc0] sm:$0xff] %vm920_vm2, %v3430_v60  ;;  %v7968_v21 = vpop.f32.mrb[202].mxu0  ;;  %v2822_v18 = vmul.f32 %v2769_v38, %v2630_v51  ;;  %v8078_v30 = vpop.f32.mrb[201].mxu1  ;;  %5161 = vadd.xlane.f32.xlu0 %v13776_v44 }
 0x6c7   : > { %v3437_v36 = vadd.f32 %v15725_v3, %v2827_v39  ;;  %v7969_v63 = vpop.f32.mrb[203].mxu0  ;;  %v8079_v9 = vadd.f32 %v8078_v30, %v8077_v61  ;;  %v8080_v31 = vpop.f32.mrb[202].mxu1  ;;  %5126 = vadd.xlane.f32.xlu1 %v13753_v57  ;;  %v15727_v39 = vld [vmem:[#allocation72_spill] sm:$0xff] }
 0x6c8   : > { %v3432_v26 = vadd.f32 %v15726_v1, %v2822_v18  ;;  %v7970_v20 = vadd.f32 %v7969_v63, %v7968_v21  ;;  %v5323_v2 = vpop.permute.xlu0 %5322  ;;  %v8081_v56 = vpop.f32.mrb[203].mxu1  ;;  %v2634_v61 = vld [vmem:[#allocation4 + $0xf0] sm:$0xff] }
 0x6c9   : > { %3469 = vst.msk [vmem:[#allocation4 + $0xf8] sm:$0xff] %vm920_vm2, %v3437_v36  ;;  %v5476_v42 = vmul.f32 %v5323_v2, %v5284_v55  ;;  %v14013_v23 = vadd.f32 %v8079_v9, %v7967_v25  ;;  %v8082_v51 = vadd.f32 %v8081_v56, %v8080_v31  ;;  %v2779_v33 = vpop.permute.xlu1 %2778  ;;  %v5288_v36 = vld [vmem:[#allocation4 + $0x128] sm:$0xff] }
 0x6ca   : > { %3464 = vst.msk [vmem:[#allocation4 + $0xd0] sm:$0xff] %vm920_vm2, %v3432_v26  ;;  %v2824_v11 = vmul.f32 %v2779_v33, %v2632_v0  ;;  %5171 = vadd.xlane.f32.xlu0 %v13822_v28  ;;  %v15728_v0 = vld [vmem:[#allocation78_spill] sm:$0xff]  ;;  %v5290_v33 = vld [vmem:[#allocation4 + $0x138] sm:$0xff] }
 0x6cb   : > { %v5990_v60 = vadd.f32 %v13984_v4, %v5476_v42  ;;  %v5882_v43 = vadd.f32 %v8082_v51, %v7970_v20  ;;  %5136 = vadd.xlane.f32.xlu1 %v13779_v12  ;;  %v7971_v57 = vpop.f32.mrb[204].mxu0  ;;  %v5283_v20 = vld [vmem:[#allocation4 + $0x100] sm:$0xff] }
 0x6cc   : > { %v3434_v48 = vadd.f32 %v15727_v39, %v2824_v11  ;;  %v5333_v38 = vpop.permute.xlu0 %5332  ;;  %v7972_v44 = vpop.f32.mrb[205].mxu0  ;;  %v5285_v39 = vld [vmem:[#allocation4 + $0x110] sm:$0xff] }
 0x6cd   : > { %6022 = vst.msk [vmem:[#allocation4 + $0x108] sm:$0xff] %vm920_vm2, %v5990_v60  ;;  %v8083_v25 = vpop.f32.mrb[204].mxu1  ;;  %v5478_v21 = vmul.f32 %v5333_v38, %v5286_v49  ;;  %v7973_v18 = vadd.f32 %v7972_v44, %v7971_v57  ;;  %v7974_v55 = vpop.f32.mrb[206].mxu0 }
 0x6ce   : > { %3466 = vst.msk [vmem:[#allocation4 + $0xe0] sm:$0xff] %vm920_vm2, %v3434_v48  ;;  %v8084_v4 = vpop.f32.mrb[205].mxu1  ;;  %v2789_v3 = vpop.permute.xlu1 %2788  ;;  %5181 = vadd.xlane.f32.xlu0 %v13876_v10 }
 0x6cf   : > { %v5992_v12 = vadd.f32 %v5874_v29, %v5478_v21  ;;  %v8085_v30 = vadd.f32 %v8084_v4, %v8083_v25  ;;  %v8086_v63 = vpop.f32.mrb[206].mxu1  ;;  %v2826_v9 = vmul.f32 %v2789_v3, %v2634_v61  ;;  %v7975_v31 = vpop.f32.mrb[207].mxu0  ;;  %5146 = vadd.xlane.f32.xlu1 %v13786_v50 }
 0x6d0   : > { %v7976_v1 = vadd.f32 %v7975_v31, %v7974_v55  ;;  %v8087_v26 = vpop.f32.mrb[207].mxu1  ;;  %v5343_v28 = vpop.permute.xlu0 %5342 }
 0x6d1   : > { %6024 = vst.msk [vmem:[#allocation4 + $0x118] sm:$0xff] %vm920_vm2, %v5992_v12  ;;  %v14025_v2 = vadd.f32 %v8085_v30, %v7973_v18  ;;  %v3436_v56 = vadd.f32 %v15728_v0, %v2826_v9  ;;  %v8088_v42 = vadd.f32 %v8087_v26, %v8086_v63  ;;  %v5480_v29 = vmul.f32 %v5343_v28, %v5288_v36 }
 0x6d2   : > { %v5318_v51 = vpop.permute.xlu1 %5317  ;;  %5191 = vadd.xlane.f32.xlu0 %v13903_v34 }
 0x6d3   : > { %3468 = vst.msk [vmem:[#allocation4 + $0xf0] sm:$0xff] %vm920_vm2, %v3436_v56  ;;  %v5890_v60 = vadd.f32 %v8088_v42, %v7976_v1  ;;  %v5994_v50 = vadd.f32 %v5882_v43, %v5480_v29  ;;  %v5475_v11 = vmul.f32 %v5318_v51, %v5283_v20  ;;  %5156 = vadd.xlane.f32.xlu1 %v13794_v58  ;;  %v7977_v49 = vpop.f32.mrb[208].mxu0  ;;  %v5292_v43 = vld [vmem:[#allocation4 + $0x148] sm:$0xff] }
 0x6d4   : > { %v5353_v10 = vpop.permute.xlu0 %5352  ;;  %v7978_v57 = vpop.f32.mrb[209].mxu0 }
 0x6d5   : > { %6026 = vst.msk [vmem:[#allocation4 + $0x128] sm:$0xff] %vm920_vm2, %v5994_v50  ;;  %v5989_v48 = vadd.f32 %v13978_v35, %v5475_v11  ;;  %v8089_v38 = vpop.f32.mrb[208].mxu1  ;;  %v5482_v44 = vmul.f32 %v5353_v10, %v5290_v33  ;;  %v7979_v61 = vadd.f32 %v7978_v57, %v7977_v49  ;;  %v7980_v25 = vpop.f32.mrb[210].mxu0  ;;  %v5287_v35 = vld [vmem:[#allocation4 + $0x120] sm:$0xff] }
 0x6d6   : > { %v8090_v21 = vpop.f32.mrb[209].mxu1  ;;  %v5328_v18 = vpop.permute.xlu1 %5327  ;;  %5201 = vadd.xlane.f32.xlu0 %v13916_v54  ;;  %v5289_v54 = vld [vmem:[#allocation4 + $0x130] sm:$0xff] }
 0x6d7   : > { %6021 = vst.msk [vmem:[#allocation4 + $0x100] sm:$0xff] %vm920_vm2, %v5989_v48  ;;  %v5996_v58 = vadd.f32 %v5890_v60, %v5482_v44  ;;  %v8091_v55 = vadd.f32 %v8090_v21, %v8089_v38  ;;  %v8092_v4 = vpop.f32.mrb[210].mxu1  ;;  %v5477_v3 = vmul.f32 %v5328_v18, %v5285_v39  ;;  %v7981_v36 = vpop.f32.mrb[211].mxu0  ;;  %5166 = vadd.xlane.f32.xlu1 %v13797_v17  ;;  %v15730_v21 = vld [vmem:[#allocation177_spill] sm:$0xff] }
 0x6d8   : > { %v7982_v34 = vadd.f32 %v7981_v36, %v7980_v25  ;;  %v8093_v12 = vpop.f32.mrb[211].mxu1  ;;  %v5363_v30 = vpop.permute.xlu0 %5362  ;;  %v15729_v25 = vld [vmem:[#allocation154_spill] sm:$0xff] }
 0x6d9   : > { %6028 = vst.msk [vmem:[#allocation4 + $0x138] sm:$0xff] %vm920_vm2, %v5996_v58  ;;  %v5895_v63 = vadd.f32 %v8091_v55, %v7979_v61  ;;  %v5991_v9 = vadd.f32 %v13999_v15, %v5477_v3  ;;  %v8094_v31 = vadd.f32 %v8093_v12, %v8092_v4  ;;  %v5484_v1 = vmul.f32 %v5363_v30, %v5292_v43  ;;  %v15732_v30 = vld [vmem:[#allocation166_spill] sm:$0xff] }
 0x6da   : > { %v5338_v26 = vpop.permute.xlu1 %5337  ;;  %5211 = vadd.xlane.f32.xlu0 %v13993_v14  ;;  %v5294_v14 = vld [vmem:[#allocation4 + $0x158] sm:$0xff]  ;;  %v15731_v18 = vsub.f32 %v15729_v25, %v15730_v21 }
 0x6db   : > { %6023 = vst.msk [vmem:[#allocation4 + $0x110] sm:$0xff] %vm920_vm2, %v5991_v9  ;;  %v5898_v28 = vadd.f32 %v8094_v31, %v7982_v34  ;;  %v5479_v20 = vmul.f32 %v5338_v26, %v5287_v35  ;;  %5176 = vadd.xlane.f32.xlu1 %v13847_v45  ;;  %v7983_v17 = vpop.f32.mrb[212].mxu0  ;;  %v15733_v35 = vld [vmem:[#allocation141_spill] sm:$0xff] }
 0x6dc   : > { %v7984_v0 = vpop.f32.mrb[213].mxu0  ;;  %v5373_v10 = vpop.permute.xlu0 %5372  ;;  %v4447_v43 = vmul.f32 1.442695, %v15731_v18 }
 0x6dd   : > { %v5998_v56 = vadd.f32 %v5898_v28, %v5484_v1  ;;  %v5993_v42 = vadd.f32 %v14013_v23, %v5479_v20  ;;  %v8095_v29 = vpop.f32.mrb[212].mxu1  ;;  %v7985_v51 = vadd.f32 %v7984_v0, %v7983_v17  ;;  %v7986_v15 = vpop.f32.mrb[214].mxu0  ;;  %v5291_v23 = vld [vmem:[#allocation4 + $0x140] sm:$0xff]  ;;  %v5486_v58 = vmul.f32 %v5373_v10, %v5294_v14  ;;  %v5296_v10 = vld [vmem:[#allocation4 + $0x168] sm:$0xff] }
 0x6de   : > { %v8096_v33 = vpop.f32.mrb[213].mxu1  ;;  %v5348_v60 = vpop.permute.xlu1 %5347  ;;  %9048 = vpow2.f32 %v4447_v43 }
 0x6df   : > { %6030 = vst.msk [vmem:[#allocation4 + $0x148] sm:$0xff] %vm920_vm2, %v5998_v56  ;;  %6025 = vst.msk [vmem:[#allocation4 + $0x120] sm:$0xff] %vm920_vm2, %v5993_v42  ;;  %v8097_v50 = vadd.f32 %v8096_v33, %v8095_v29  ;;  %v8098_v11 = vpop.f32.mrb[214].mxu1  ;;  %v5481_v45 = vmul.f32 %v5348_v60, %v5289_v54  ;;  %v7987_v49 = vpop.f32.mrb[215].mxu0  ;;  %5186 = vadd.xlane.f32.xlu1 %v13850_v19  ;;  %v5293_v19 = vld [vmem:[#allocation4 + $0x150] sm:$0xff]  ;;  %v5295_v33 = vld [vmem:[#allocation4 + $0x160] sm:$0xff] }
 0x6e0   : > { %v7988_v57 = vadd.f32 %v7987_v49, %v7986_v15  ;;  %v8099_v39 = vpop.f32.mrb[215].mxu1 }
 0x6e1   : > { %v5903_v48 = vadd.f32 %v8097_v50, %v7985_v51  ;;  %v5995_v38 = vadd.f32 %v14025_v2, %v5481_v45  ;;  %v8100_v44 = vadd.f32 %v8099_v39, %v8098_v11 }
 0x6e2   : > { %v5358_v61 = vpop.permute.xlu1 %5357 }
 0x6e3   : > { %6027 = vst.msk [vmem:[#allocation4 + $0x130] sm:$0xff] %vm920_vm2, %v5995_v38  ;;  %v5906_v55 = vadd.f32 %v8100_v44, %v7988_v57  ;;  %v5483_v4 = vmul.f32 %v5358_v61, %v5291_v23  ;;  %5196 = vadd.xlane.f32.xlu1 %v13858_v27  ;;  %v15734_v27 = vsub.f32 %v15732_v30, %v15733_v35 }
 0x6e5   : > { %v6000_v3 = vadd.f32 %v5906_v55, %v5486_v58  ;;  %v5997_v36 = vadd.f32 %v5895_v63, %v5483_v4  ;;  %v4445_v9 = vmul.f32 1.442695, %v15734_v27  ;;  %v5383_v63 = vpop.permute.xlu0 %5382 }
 0x6e6   : > { %v5368_v34 = vpop.permute.xlu1 %5367  ;;  %v5488_v25 = vmul.f32 %v5383_v63, %v5296_v10 }
 0x6e7   : > { %6032 = vst.msk [vmem:[#allocation4 + $0x158] sm:$0xff] %vm920_vm2, %v6000_v3  ;;  %6029 = vst.msk [vmem:[#allocation4 + $0x140] sm:$0xff] %vm920_vm2, %v5997_v36  ;;  %v5485_v2 = vmul.f32 %v5368_v34, %v5293_v19  ;;  %5206 = vadd.xlane.f32.xlu1 %v13893_v6  ;;  %9050 = vpow2.f32 %v4445_v9  ;;  %v4995_v34 = vld [vmem:[#allocation3 + $0x108] sm:$0xff] }
 0x6e8   : > { %v14059_v31 = vpop.eup %9048 }
 0x6e9   : > { %v5999_v12 = vadd.f32 %v5903_v48, %v5485_v2  ;;  %v5393_v6 = vpop.permute.xlu0 %5392  ;;  %v5297_v2 = vld [vmem:[#allocation4 + $0x170] sm:$0xff] }
 0x6ea   : > { %v5378_v28 = vpop.permute.xlu1 %5377 }
 0x6eb   : > { %6031 = vst.msk [vmem:[#allocation4 + $0x150] sm:$0xff] %vm920_vm2, %v5999_v12  ;;  %5216 = vadd.xlane.f32.xlu1 %v13969_v40  ;;  %v5487_v23 = vmul.f32 %v5378_v28, %v5295_v33  ;;  %v5298_v28 = vld [vmem:[#allocation4 + $0x178] sm:$0xff]  ;;  %v15735_v33 = vld [vmem:[#allocation176_spill] sm:$0xff] }
 0x6ec   : > { %v5490_v10 = vmul.f32 %v5393_v6, %v5298_v28 }
 0x6ed   : > { %v14065_v26 = vpop.permute.xlu0 %5402 }
 0x6ee   : > { %v5388_v40 = vpop.permute.xlu1 %5387 }
 0x6f0   : > { %5472 = vperm.xlu0 %8330, %v14059_v31  }
 0x6f1   : > { %v14062_v1 = vpop.eup %9050  ;;  %v14067_v20 = vpop.permute.xlu0 %5412 }
 0x6f2   : > { %v14071_v0 = vpop.permute.xlu1 %5397 }
 0x6f5   : > { %v14069_v17 = vpop.permute.xlu0 %5422 }
 0x6f6   : > { %v14075_v56 = vpop.permute.xlu1 %5407 }
 0x6f9   : > { %v14073_v54 = vpop.permute.xlu0 %5432 }
 0x6fa   : > { %v14079_v29 = vpop.permute.xlu1 %5417 }
 0x6fc   : > { %5467 = vperm.xlu1 %8331, %v14062_v1  }
 0x6fd   : > { %v14077_v42 = vpop.permute.xlu0 %5442 }
 0x6fe   : > { %v14083_v21 = vpop.permute.xlu1 %5427 }
 0x701   : > { %v14081_v61 = vpop.permute.xlu0 %5452 }
 0x702   : > { %v14089_v4 = vpop.permute.xlu1 %5437 }
 0x705   : > { %v14087_v55 = vpop.permute.xlu0 %5462 }
 0x719   : > { %v7989_v51 = vpop.f32.mrb[216].mxu0 }
 0x71a   : > { %v8101_v15 = vpop.f32.mrb[216].mxu1  ;;  %v7990_v60 = vpop.f32.mrb[217].mxu0 }
 0x71b   : > { %v8102_v50 = vpop.f32.mrb[217].mxu1  ;;  %v7991_v11 = vadd.f32 %v7990_v60, %v7989_v51  ;;  %v7992_v49 = vpop.f32.mrb[218].mxu0  ;;  %v5027_v60 = vmul.f32 %v15735_v33, %v4995_v34  ;;  %v15736_v34 = vld [vmem:[#allocation156_spill] sm:$0xff] }
 0x71c   : > { %v8103_v45 = vadd.f32 %v8102_v50, %v8101_v15  ;;  %v8104_v14 = vpop.f32.mrb[218].mxu1  ;;  %v7993_v57 = vpop.f32.mrb[219].mxu0  ;;  %v5489_v50 = vmul.f32 %v5388_v40, %v5297_v2 }
 0x71d   : > { %v8105_v39 = vpop.f32.mrb[219].mxu1  ;;  %v7994_v38 = vadd.f32 %v7993_v57, %v7992_v49 }
 0x71e   : > { %v5911_v48 = vadd.f32 %v8103_v45, %v7991_v11  ;;  %v8106_v44 = vadd.f32 %v8105_v39, %v8104_v14 }
 0x720   : > { %v6001_v18 = vadd.f32 %v5911_v48, %v5487_v23  ;;  %v5914_v43 = vadd.f32 %v8106_v44, %v7994_v38  ;;  %v14092_v23 = vpop.permute.xlu1 %5447  ;;  %v4996_v38 = vld [vmem:[#allocation3 + $0x110] sm:$0xff] }
 0x721   : > { %v5028_v2 = vmul.f32 %v15736_v34, %v4996_v38 }
 0x722   : > { %6033 = vst.msk [vmem:[#allocation4 + $0x160] sm:$0xff] %vm920_vm2, %v6001_v18  ;;  %v6002_v58 = vadd.f32 %v5914_v43, %v5488_v25  ;;  %v5299_v43 = vld [vmem:[#allocation4 + $0x180] sm:$0xff] }
 0x724   : > { %6034 = vst.msk [vmem:[#allocation4 + $0x168] sm:$0xff] %vm920_vm2, %v6002_v58 }
 0x725   : > { %v7995_v19 = vpop.f32.mrb[220].mxu0 }
 0x726   : > { %v7996_v36 = vpop.f32.mrb[221].mxu0 }
 0x727   : > { %v8107_v3 = vpop.f32.mrb[220].mxu1  ;;  %v7997_v12 = vadd.f32 %v7996_v36, %v7995_v19  ;;  %v7998_v35 = vpop.f32.mrb[222].mxu0 }
 0x728   : > { %v8108_v30 = vpop.f32.mrb[221].mxu1  ;;  %v7999_v63 = vpop.f32.mrb[223].mxu0 }
 0x729   : > { %v8109_v27 = vadd.f32 %v8108_v30, %v8107_v3  ;;  %v8110_v9 = vpop.f32.mrb[222].mxu1  ;;  %v8000_v51 = vadd.f32 %v7999_v63, %v7998_v35  ;;  %v5491_v63 = vmul.f32 %v14071_v0, %v5299_v43 }
 0x72a   : > { %v8111_v15 = vpop.f32.mrb[223].mxu1 }
 0x72b   : > { %v5919_v11 = vadd.f32 %v8109_v27, %v7997_v12  ;;  %v8112_v45 = vadd.f32 %v8111_v15, %v8110_v9  ;;  %v5067_v49 = vpop.xlane.xlu0 %5066  ;;  %v5300_v12 = vld [vmem:[#allocation4 + $0x188] sm:$0xff]  ;;  %v4998_v9 = vld [vmem:[#allocation3 + $0x120] sm:$0xff] }
 0x72c   : > { %v5219_v14 = vadd.f32 %v5067_v49, %v5027_v60  ;;  %v5492_v33 = vmul.f32 %v14065_v26, %v5300_v12  ;;  %v14100_v60 = vpop.permute.xlu1 %5457  ;;  %v15738_v12 = vld [vmem:[#allocation152_spill] sm:$0xff] }
 0x72d   : > { %v6003_v57 = vadd.f32 %v5919_v11, %v5489_v50  ;;  %v5922_v39 = vadd.f32 %v8112_v45, %v8000_v51  ;;  %v8001_v48 = vpop.f32.mrb[224].mxu0  ;;  %v15737_v45 = vld [vmem:[#allocation160_spill] sm:$0xff] }
 0x72e   : > { %5251 = vst.msk [vmem:[#allocation3 + $0x108] sm:$0xff] %vm2571_vm3, %v5219_v14  ;;  %v8002_v18 = vpop.f32.mrb[225].mxu0  ;;  %v5030_v49 = vmul.f32 %v15737_v45, %v4998_v9 }
 0x72f   : > { %6035 = vst.msk [vmem:[#allocation4 + $0x170] sm:$0xff] %vm920_vm2, %v6003_v57  ;;  %v6004_v44 = vadd.f32 %v5922_v39, %v5490_v10  ;;  %v8113_v25 = vpop.f32.mrb[224].mxu1  ;;  %v8003_v40 = vadd.f32 %v8002_v18, %v8001_v48  ;;  %v8004_v19 = vpop.f32.mrb[226].mxu0  ;;  %v5000_v57 = vld [vmem:[#allocation3 + $0x130] sm:$0xff] }
 0x730   : > { %v8114_v58 = vpop.f32.mrb[225].mxu1  ;;  %v8005_v36 = vpop.f32.mrb[227].mxu0 }
 0x731   : > { %6036 = vst.msk [vmem:[#allocation4 + $0x178] sm:$0xff] %vm920_vm2, %v6004_v44  ;;  %v8115_v6 = vadd.f32 %v8114_v58, %v8113_v25  ;;  %v8116_v3 = vpop.f32.mrb[226].mxu1  ;;  %v8006_v30 = vadd.f32 %v8005_v36, %v8004_v19  ;;  %v5072_v27 = vpop.xlane.xlu0 %5071  ;;  %v4994_v44 = vld [vmem:[#allocation3 + $0x100] sm:$0xff]  ;;  %v5301_v25 = vld [vmem:[#allocation4 + $0x190] sm:$0xff] }
 0x732   : > { %v8117_v35 = vpop.f32.mrb[227].mxu1  ;;  %v5220_v15 = vadd.f32 %v5072_v27, %v5028_v2  ;;  %v5493_v27 = vmul.f32 %v14075_v56, %v5301_v25 }
 0x733   : > { %v5927_v28 = vadd.f32 %v8115_v6, %v8003_v40  ;;  %v8118_v51 = vadd.f32 %v8117_v35, %v8116_v3  ;;  %v5032_v6 = vmul.f32 %v13306_v62, %v5000_v57  ;;  %v5302_v3 = vld [vmem:[#allocation4 + $0x198] sm:$0xff]  ;;  %v5002_v35 = vld [vmem:[#allocation3 + $0x140] sm:$0xff] }
 0x734   : > { %5252 = vst.msk [vmem:[#allocation3 + $0x110] sm:$0xff] %vm2571_vm3, %v5220_v15  ;;  %v5034_v62 = vmul.f32 %v15647_v53, %v5002_v35 }
 0x735   : > { %v6005_v50 = vadd.f32 %v5927_v28, %v5491_v63  ;;  %v5930_v11 = vadd.f32 %v8118_v51, %v8006_v30  ;;  %v8007_v14 = vpop.f32.mrb[228].mxu0  ;;  %v5082_v10 = vpop.xlane.xlu0 %5081  ;;  %v5026_v30 = vmul.f32 %v15738_v12, %v4994_v44 }
 0x736   : > { %v8008_v48 = vpop.f32.mrb[229].mxu0  ;;  %v5222_v38 = vadd.f32 %v5082_v10, %v5030_v49 }
 0x737   : > { %6037 = vst.msk [vmem:[#allocation4 + $0x180] sm:$0xff] %vm920_vm2, %v6005_v50  ;;  %v6006_v39 = vadd.f32 %v5930_v11, %v5492_v33  ;;  %v8119_v0 = vpop.f32.mrb[228].mxu1  ;;  %v8009_v26 = vadd.f32 %v8008_v48, %v8007_v14  ;;  %v8010_v43 = vpop.f32.mrb[230].mxu0  ;;  %v5494_v33 = vmul.f32 %v14067_v20, %v5302_v3  ;;  %v4997_v14 = vld [vmem:[#allocation3 + $0x118] sm:$0xff]  ;;  %v5303_v48 = vld [vmem:[#allocation4 + $0x1a0] sm:$0xff] }
 0x738   : > { %v8120_v18 = vpop.f32.mrb[229].mxu1  ;;  %v8011_v19 = vpop.f32.mrb[231].mxu0  ;;  %5254 = vst.msk [vmem:[#allocation3 + $0x120] sm:$0xff] %vm2571_vm3, %v5222_v38 }
 0x739   : > { %6038 = vst.msk [vmem:[#allocation4 + $0x188] sm:$0xff] %vm920_vm2, %v6006_v39  ;;  %v8121_v40 = vadd.f32 %v8120_v18, %v8119_v0  ;;  %v8122_v58 = vpop.f32.mrb[230].mxu1  ;;  %v8012_v36 = vadd.f32 %v8011_v19, %v8010_v43  ;;  %v5092_v2 = vpop.xlane.xlu0 %5091  ;;  %v5004_v0 = vld [vmem:[#allocation3 + $0x150] sm:$0xff]  ;;  %v15739_v18 = vld [vmem:[#allocation158_spill] sm:$0xff] }
 0x73a   : > { %v8123_v34 = vpop.f32.mrb[231].mxu1  ;;  %v5224_v28 = vadd.f32 %v5092_v2, %v5032_v6  ;;  %v5062_v51 = vpop.xlane.xlu1 %5061  ;;  %v5029_v43 = vmul.f32 %v15739_v18, %v4997_v14  ;;  %v5036_v3 = vmul.f32 %v15655_v13, %v5004_v0  ;;  %v5305_v14 = vld [vmem:[#allocation4 + $0x1b0] sm:$0xff] }
 0x73b   : > { %v5935_v9 = vadd.f32 %v8121_v40, %v8009_v26  ;;  %v8124_v63 = vadd.f32 %v8123_v34, %v8122_v58  ;;  %v5218_v15 = vadd.f32 %v5062_v51, %v5026_v30  ;;  %v5304_v40 = vld [vmem:[#allocation4 + $0x1a8] sm:$0xff]  ;;  %v5495_v34 = vmul.f32 %v14079_v29, %v5303_v48  ;;  %v15740_v51 = vld [vmem:[#allocation162_spill] sm:$0xff]  ;;  %v5008_v18 = vld [vmem:[#allocation3 + $0x170] sm:$0xff] }
 0x73c   : > { %5256 = vst.msk [vmem:[#allocation3 + $0x130] sm:$0xff] %vm2571_vm3, %v5224_v28 }
 0x73d   : > { %v6007_v50 = vadd.f32 %v5935_v9, %v5493_v27  ;;  %v5938_v11 = vadd.f32 %v8124_v63, %v8012_v36  ;;  %v8013_v45 = vpop.f32.mrb[232].mxu0  ;;  %5250 = vst.msk [vmem:[#allocation3 + $0x100] sm:$0xff] %vm2571_vm3, %v5218_v15  ;;  %v5102_v49 = vpop.xlane.xlu0 %5101  ;;  %v4999_v36 = vld [vmem:[#allocation3 + $0x128] sm:$0xff]  ;;  %v5496_v9 = vmul.f32 %v14069_v17, %v5304_v40 }
 0x73e   : > { %v8014_v57 = vpop.f32.mrb[233].mxu0  ;;  %v5226_v39 = vadd.f32 %v5102_v49, %v5034_v62  ;;  %v5077_v6 = vpop.xlane.xlu1 %5076  ;;  %v5031_v15 = vmul.f32 %v15740_v51, %v4999_v36  ;;  %v5001_v49 = vld [vmem:[#allocation3 + $0x138] sm:$0xff]  ;;  %v5307_v51 = vld [vmem:[#allocation4 + $0x1c0] sm:$0xff] }
 0x73f   : > { %6039 = vst.msk [vmem:[#allocation4 + $0x190] sm:$0xff] %vm920_vm2, %v6007_v50  ;;  %v6008_v56 = vadd.f32 %v5938_v11, %v5494_v33  ;;  %v8125_v10 = vpop.f32.mrb[232].mxu1  ;;  %v8015_v20 = vadd.f32 %v8014_v57, %v8013_v45  ;;  %v8016_v44 = vpop.f32.mrb[234].mxu0  ;;  %v5221_v30 = vadd.f32 %v5077_v6, %v5029_v43  ;;  %v5006_v50 = vld [vmem:[#allocation3 + $0x160] sm:$0xff]  ;;  %v5497_v43 = vmul.f32 %v14083_v21, %v5305_v14 }
 0x740   : > { %v8126_v38 = vpop.f32.mrb[233].mxu1  ;;  %v8017_v26 = vpop.f32.mrb[235].mxu0  ;;  %5258 = vst.msk [vmem:[#allocation3 + $0x140] sm:$0xff] %vm2571_vm3, %v5226_v39  ;;  %v5038_v48 = vmul.f32 %v15661_v32, %v5006_v50  ;;  %v5040_v32 = vmul.f32 %v15666_v37, %v5008_v18 }
 0x741   : > { %6040 = vst.msk [vmem:[#allocation4 + $0x198] sm:$0xff] %vm920_vm2, %v6008_v56  ;;  %v8127_v25 = vadd.f32 %v8126_v38, %v8125_v10  ;;  %v8128_v53 = vpop.f32.mrb[234].mxu1  ;;  %v8018_v58 = vadd.f32 %v8017_v26, %v8016_v44  ;;  %v5112_v35 = vpop.xlane.xlu0 %5111 }
 0x742   : > { %v8129_v19 = vpop.f32.mrb[235].mxu1  ;;  %v5228_v27 = vadd.f32 %v5112_v35, %v5036_v3  ;;  %5253 = vst.msk [vmem:[#allocation3 + $0x118] sm:$0xff] %vm2571_vm3, %v5221_v30  ;;  %v5087_v13 = vpop.xlane.xlu1 %5086  ;;  %v5003_v35 = vld [vmem:[#allocation3 + $0x148] sm:$0xff] }
 0x743   : > { %v5943_v2 = vadd.f32 %v8127_v25, %v8015_v20  ;;  %v8130_v12 = vadd.f32 %v8129_v19, %v8128_v53  ;;  %v5223_v45 = vadd.f32 %v5087_v13, %v5031_v15  ;;  %v5306_v20 = vld [vmem:[#allocation4 + $0x1b8] sm:$0xff] }
 0x744   : > { %5260 = vst.msk [vmem:[#allocation3 + $0x150] sm:$0xff] %vm2571_vm3, %v5228_v27  ;;  %v15741_v53 = vld [vmem:[#allocation133_spill] sm:$0xff]  ;;  %v5498_v36 = vmul.f32 %v14073_v54, %v5306_v20 }
 0x745   : > { %v6009_v63 = vadd.f32 %v5943_v2, %v5495_v34  ;;  %v5946_v28 = vadd.f32 %v8130_v12, %v8018_v58  ;;  %v8019_v33 = vpop.f32.mrb[236].mxu0  ;;  %5255 = vst.msk [vmem:[#allocation3 + $0x128] sm:$0xff] %vm2571_vm3, %v5223_v45  ;;  %v5122_v25 = vpop.xlane.xlu0 %5121  ;;  %v5033_v26 = vmul.f32 %v15741_v53, %v5001_v49  ;;  %v15743_v53 = vld [vmem:[#allocation139_spill] sm:$0xff] }
 0x746   : > { %v8020_v62 = vpop.f32.mrb[237].mxu0  ;;  %v5230_v19 = vadd.f32 %v5122_v25, %v5038_v48 }
 0x747   : > { %6041 = vst.msk [vmem:[#allocation4 + $0x1a0] sm:$0xff] %vm920_vm2, %v6009_v63  ;;  %v6010_v29 = vadd.f32 %v5946_v28, %v5496_v9  ;;  %v8131_v11 = vpop.f32.mrb[236].mxu1  ;;  %v8021_v17 = vadd.f32 %v8020_v62, %v8019_v33  ;;  %v8022_v10 = vpop.f32.mrb[238].mxu0  ;;  %v5010_v28 = vld [vmem:[#allocation3 + $0x180] sm:$0xff]  ;;  %v5308_v62 = vld [vmem:[#allocation4 + $0x1c8] sm:$0xff] }
 0x748   : > { %v8132_v56 = vpop.f32.mrb[237].mxu1  ;;  %v8023_v0 = vpop.f32.mrb[239].mxu0  ;;  %5262 = vst.msk [vmem:[#allocation3 + $0x160] sm:$0xff] %vm2571_vm3, %v5230_v19 }
 0x749   : > { %6042 = vst.msk [vmem:[#allocation4 + $0x1a8] sm:$0xff] %vm920_vm2, %v6010_v29  ;;  %v8133_v57 = vadd.f32 %v8132_v56, %v8131_v11  ;;  %v8134_v39 = vpop.f32.mrb[238].mxu1  ;;  %v8024_v38 = vadd.f32 %v8023_v0, %v8022_v10  ;;  %v5097_v6 = vpop.xlane.xlu1 %5096  ;;  %v15742_v29 = vld [vmem:[#allocation135_spill] sm:$0xff]  ;;  %v5005_v56 = vld [vmem:[#allocation3 + $0x158] sm:$0xff]  ;;  %v5499_v10 = vmul.f32 %v14089_v4, %v5307_v51 }
 0x74a   : > { %v8135_v44 = vpop.f32.mrb[239].mxu1  ;;  %v5225_v3 = vadd.f32 %v5097_v6, %v5033_v26  ;;  %v5132_v30 = vpop.xlane.xlu0 %5131  ;;  %v5035_v11 = vmul.f32 %v15742_v29, %v5003_v35  ;;  %v5037_v26 = vmul.f32 %v15743_v53, %v5005_v56  ;;  %v5007_v6 = vld [vmem:[#allocation3 + $0x168] sm:$0xff]  ;;  %v5310_v35 = vld [vmem:[#allocation4 + $0x1d8] sm:$0xff]  ;;  %v5016_v56 = vld [vmem:[#allocation3 + $0x1b0] sm:$0xff] }
 0x74b   : > { %v5951_v40 = vadd.f32 %v8133_v57, %v8021_v17  ;;  %v8136_v58 = vadd.f32 %v8135_v44, %v8134_v39  ;;  %v5232_v63 = vadd.f32 %v5132_v30, %v5040_v32  ;;  %v5042_v17 = vmul.f32 %v15674_v46, %v5010_v28  ;;  %v5014_v28 = vld [vmem:[#allocation3 + $0x1a0] sm:$0xff] }
 0x74c   : > { %5257 = vst.msk [vmem:[#allocation3 + $0x138] sm:$0xff] %vm2571_vm3, %v5225_v3  ;;  %v5309_v3 = vld [vmem:[#allocation4 + $0x1d0] sm:$0xff] }
 0x74d   : > { %v6011_v34 = vadd.f32 %v5951_v40, %v5497_v43  ;;  %v5954_v2 = vadd.f32 %v8136_v58, %v8024_v38  ;;  %v8025_v12 = vpop.f32.mrb[240].mxu0  ;;  %5264 = vst.msk [vmem:[#allocation3 + $0x170] sm:$0xff] %vm2571_vm3, %v5232_v63  ;;  %v5107_v14 = vpop.xlane.xlu1 %5106  ;;  %v5500_v38 = vmul.f32 %v14077_v42, %v5308_v62  ;;  %v5012_v43 = vld [vmem:[#allocation3 + $0x190] sm:$0xff]  ;;  %v5039_v63 = vmul.f32 %v15643_v52, %v5007_v6 }
 0x74e   : > { %v8026_v9 = vpop.f32.mrb[241].mxu0  ;;  %v5227_v0 = vadd.f32 %v5107_v14, %v5035_v11  ;;  %v5142_v48 = vpop.xlane.xlu0 %5141  ;;  %v5044_v30 = vmul.f32 %v15679_v16, %v5012_v43  ;;  %v5501_v51 = vmul.f32 %v14092_v23, %v5309_v3  ;;  %v5046_v16 = vmul.f32 %v15684_v59, %v5014_v28 }
 0x74f   : > { %6043 = vst.msk [vmem:[#allocation4 + $0x1b0] sm:$0xff] %vm920_vm2, %v6011_v34  ;;  %v6012_v21 = vadd.f32 %v5954_v2, %v5498_v36  ;;  %v8137_v27 = vpop.f32.mrb[240].mxu1  ;;  %v8027_v54 = vadd.f32 %v8026_v9, %v8025_v12  ;;  %v8028_v33 = vpop.f32.mrb[242].mxu0  ;;  %v5234_v20 = vadd.f32 %v5142_v48, %v5042_v17 }
 0x750   : > { %v8138_v15 = vpop.f32.mrb[241].mxu1  ;;  %v8029_v50 = vpop.f32.mrb[243].mxu0  ;;  %5259 = vst.msk [vmem:[#allocation3 + $0x148] sm:$0xff] %vm2571_vm3, %v5227_v0 }
 0x751   : > { %6044 = vst.msk [vmem:[#allocation4 + $0x1b8] sm:$0xff] %vm920_vm2, %v6012_v21  ;;  %v8139_v13 = vadd.f32 %v8138_v15, %v8137_v27  ;;  %v8140_v37 = vpop.f32.mrb[242].mxu1  ;;  %v8030_v45 = vadd.f32 %v8029_v50, %v8028_v33  ;;  %v5117_v46 = vpop.xlane.xlu1 %5116  ;;  %v5502_v50 = vmul.f32 %v14081_v61, %v5310_v35 }
 0x752   : > { %v8141_v49 = vpop.f32.mrb[243].mxu1  ;;  %5266 = vst.msk [vmem:[#allocation3 + $0x180] sm:$0xff] %vm2571_vm3, %v5234_v20  ;;  %v5229_v19 = vadd.f32 %v5117_v46, %v5037_v26  ;;  %v5152_v9 = vpop.xlane.xlu0 %5151  ;;  %v5048_v26 = vmul.f32 %v13913_v47, %v5016_v56  ;;  %v5021_v56 = vld [vmem:[#allocation3 + $0x1d8] sm:$0xff] }
 0x753   : > { %v5959_v57 = vadd.f32 %v8139_v13, %v8027_v54  ;;  %v8142_v39 = vadd.f32 %v8141_v49, %v8140_v37  ;;  %v5236_v33 = vadd.f32 %v5152_v9, %v5044_v30  ;;  %v5020_v30 = vld [vmem:[#allocation3 + $0x1d0] sm:$0xff] }
 0x754   : > { %5261 = vst.msk [vmem:[#allocation3 + $0x158] sm:$0xff] %vm2571_vm3, %v5229_v19  ;;  %v5018_v19 = vld [vmem:[#allocation3 + $0x1c0] sm:$0xff] }
 0x755   : > { %v6013_v44 = vadd.f32 %v5959_v57, %v5499_v10  ;;  %v5962_v25 = vadd.f32 %v8142_v39, %v8030_v45  ;;  %v8031_v18 = vpop.f32.mrb[244].mxu0  ;;  %v5127_v13 = vpop.xlane.xlu1 %5126  ;;  %5268 = vst.msk [vmem:[#allocation3 + $0x190] sm:$0xff] %vm2571_vm3, %v5236_v33  ;;  %v5009_v45 = vld [vmem:[#allocation3 + $0x178] sm:$0xff]  ;;  %v5311_v10 = vld [vmem:[#allocation4 + $0x1e0] sm:$0xff] }
 0x756   : > { %v8032_v58 = vpop.f32.mrb[245].mxu0  ;;  %v5231_v37 = vadd.f32 %v5127_v13, %v5039_v63  ;;  %v5162_v52 = vpop.xlane.xlu0 %5161  ;;  %v5041_v20 = vmul.f32 %v15652_v41, %v5009_v45  ;;  %v5503_v46 = vmul.f32 %v14100_v60, %v5311_v10  ;;  %v5013_v60 = vld [vmem:[#allocation3 + $0x198] sm:$0xff]  ;;  %v5022_v63 = vld [vmem:[#allocation3 + $0x1e0] sm:$0xff] }
 0x757   : > { %6045 = vst.msk [vmem:[#allocation4 + $0x1c0] sm:$0xff] %vm920_vm2, %v6013_v44  ;;  %v6014_v4 = vadd.f32 %v5962_v25, %v5500_v38  ;;  %v8143_v40 = vpop.f32.mrb[244].mxu1  ;;  %v8033_v42 = vadd.f32 %v8032_v58, %v8031_v18  ;;  %v8034_v34 = vpop.f32.mrb[246].mxu0  ;;  %v5238_v17 = vadd.f32 %v5162_v52, %v5046_v16  ;;  %v5312_v38 = vld [vmem:[#allocation4 + $0x1e8] sm:$0xff] }
 0x758   : > { %v8144_v36 = vpop.f32.mrb[245].mxu1  ;;  %v8035_v12 = vpop.f32.mrb[247].mxu0  ;;  %5263 = vst.msk [vmem:[#allocation3 + $0x168] sm:$0xff] %vm2571_vm3, %v5231_v37  ;;  %v5011_v18 = vld [vmem:[#allocation3 + $0x188] sm:$0xff]  ;;  %v5504_v3 = vmul.f32 %v14087_v55, %v5312_v38  ;;  %v5045_v55 = vmul.f32 %v15664_v7, %v5013_v60  ;;  %v5017_v7 = vld [vmem:[#allocation3 + $0x1b8] sm:$0xff] }
 0x759   : > { %6046 = vst.msk [vmem:[#allocation4 + $0x1c8] sm:$0xff] %vm920_vm2, %v6014_v4  ;;  %v8145_v2 = vadd.f32 %v8144_v36, %v8143_v40  ;;  %v8146_v32 = vpop.f32.mrb[246].mxu1  ;;  %v8036_v21 = vadd.f32 %v8035_v12, %v8034_v34  ;;  %v5137_v53 = vpop.xlane.xlu1 %5136  ;;  %v5043_v41 = vmul.f32 %v15658_v24, %v5011_v18  ;;  %v5050_v34 = vmul.f32 %v13921_v5, %v5018_v19  ;;  %v5015_v5 = vld [vmem:[#allocation3 + $0x1a8] sm:$0xff]  ;;  %v5025_v38 = vld [vmem:[#allocation3 + $0x1f8] sm:$0xff]  ;;  %v5313_v19 = vld [vmem:[#allocation4 + $0x1f0] sm:$0xff] }
 0x75a   : > { %v8147_v27 = vpop.f32.mrb[247].mxu1  ;;  %5270 = vst.msk [vmem:[#allocation3 + $0x1a0] sm:$0xff] %vm2571_vm3, %v5238_v17  ;;  %v5233_v40 = vadd.f32 %v5137_v53, %v5041_v20  ;;  %v5172_v58 = vpop.xlane.xlu0 %5171 }
 0x75b   : > { %v5967_v54 = vadd.f32 %v8145_v2, %v8033_v42  ;;  %v8148_v15 = vadd.f32 %v8147_v27, %v8146_v32  ;;  %v5240_v6 = vadd.f32 %v5172_v58, %v5048_v26 }
 0x75c   : > { %5265 = vst.msk [vmem:[#allocation3 + $0x178] sm:$0xff] %vm2571_vm3, %v5233_v40 }
 0x75d   : > { %v6015_v29 = vadd.f32 %v5967_v54, %v5501_v51  ;;  %v5970_v11 = vadd.f32 %v8148_v15, %v8036_v21  ;;  %v8037_v62 = vpop.f32.mrb[248].mxu0  ;;  %5272 = vst.msk [vmem:[#allocation3 + $0x1b0] sm:$0xff] %vm2571_vm3, %v5240_v6  ;;  %v5147_v47 = vpop.xlane.xlu1 %5146  ;;  %v5052_v21 = vmul.f32 %v13924_v22, %v5020_v30  ;;  %v5047_v51 = vmul.f32 %v15670_v8, %v5015_v5  ;;  %v15744_v15 = vld [vmem:[#allocation61_spill] sm:$0xff]  ;;  %v15745_v22 = vld [vmem:[#allocation155_spill] sm:$0xff] }
 0x75e   : > { %v8038_v14 = vpop.f32.mrb[249].mxu0  ;;  %v5235_v32 = vadd.f32 %v5147_v47, %v5043_v41  ;;  %v5182_v12 = vpop.xlane.xlu0 %5181  ;;  %v5054_v33 = vmul.f32 %v15744_v15, %v5022_v63  ;;  %v5019_v8 = vld [vmem:[#allocation3 + $0x1c8] sm:$0xff]  ;;  %v5314_v47 = vld [vmem:[#allocation4 + $0x1f8] sm:$0xff] }
 0x75f   : > { %6047 = vst.msk [vmem:[#allocation4 + $0x1d0] sm:$0xff] %vm920_vm2, %v6015_v29  ;;  %v6016_v23 = vadd.f32 %v5970_v11, %v5502_v50  ;;  %v8149_v49 = vpop.f32.mrb[248].mxu1  ;;  %v8039_v61 = vadd.f32 %v8038_v14, %v8037_v62  ;;  %v8040_v39 = vpop.f32.mrb[250].mxu0  ;;  %v5242_v35 = vadd.f32 %v5182_v12, %v5050_v34  ;;  %v5024_v50 = vld [vmem:[#allocation3 + $0x1f0] sm:$0xff]  ;;  %v5049_v11 = vmul.f32 %v15745_v22, %v5017_v7  ;;  %v6092_v5 = vld [vmem:[#allocation3 + $0x18] sm:$0xff] (!%p7386_p12)  ;;  %v6094_v63 = vld [vmem:[#allocation3 + $0x28] sm:$0xff] (!%p7386_p12) }
 0x760   : > { %v8150_v57 = vpop.f32.mrb[249].mxu1  ;;  %v8041_v48 = vpop.f32.mrb[251].mxu0  ;;  %5267 = vst.msk [vmem:[#allocation3 + $0x188] sm:$0xff] %vm2571_vm3, %v5235_v32  ;;  %v5056_v62 = vmul.f32 %v14062_v1, %v5024_v50  ;;  %v6098_v7 = vld [vmem:[#allocation3 + $0x48] sm:$0xff] (!%p7386_p12) }
 0x761   : > { %6048 = vst.msk [vmem:[#allocation4 + $0x1d8] sm:$0xff] %vm920_vm2, %v6016_v23  ;;  %v8151_v0 = vadd.f32 %v8150_v57, %v8149_v49  ;;  %v8152_v59 = vpop.f32.mrb[250].mxu1  ;;  %v8042_v44 = vadd.f32 %v8041_v48, %v8040_v39  ;;  %v5157_v24 = vpop.xlane.xlu1 %5156  ;;  %v15746_v49 = vld [vmem:[#allocation157_spill] sm:$0xff] }
 0x762   : > { %v8153_v25 = vpop.f32.mrb[251].mxu1  ;;  %5274 = vst.msk [vmem:[#allocation3 + $0x1c0] sm:$0xff] %vm2571_vm3, %v5242_v35  ;;  %v5237_v27 = vadd.f32 %v5157_v24, %v5045_v55  ;;  %v5192_v9 = vpop.xlane.xlu0 %5191  ;;  %v5051_v14 = vmul.f32 %v15746_v49, %v5019_v8  ;;  %v6091_v24 = vld [vmem:[#allocation3 + $0x10] sm:$0xff] (!%p7386_p12) }
 0x763   : > { %v5975_v43 = vadd.f32 %v8151_v0, %v8039_v61  ;;  %v8154_v4 = vadd.f32 %v8153_v25, %v8152_v59  ;;  %v5244_v28 = vadd.f32 %v5192_v9, %v5052_v21  ;;  %v15747_v61 = vld [vmem:[#allocation159_spill] sm:$0xff]  ;;  %v15748_v59 = vld [vmem:[#allocation194_spill] sm:$0xff]  ;;  %v5057_v25 = vmul.f32 %v14059_v31, %v5025_v38 }
 0x764   : > { %5269 = vst.msk [vmem:[#allocation3 + $0x198] sm:$0xff] %vm2571_vm3, %v5237_v27  ;;  %v5053_v57 = vmul.f32 %v15747_v61, %v5021_v56  ;;  %v5023_v0 = vld [vmem:[#allocation3 + $0x1e8] sm:$0xff]  ;;  %v6089_v21 = vld [vmem:[#allocation3] sm:$0xff] (!%p7386_p12)  ;;  %v9505_v27 = vmov (!%p7386_p12), 0   ;;  %9134 = vrcp.f32 (!%p7386_p12), %v6091_v24 }
 0x765   : > { %v6017_v42 = vadd.f32 %v5975_v43, %v5503_v46  ;;  %v5978_v36 = vadd.f32 %v8154_v4, %v8042_v44  ;;  %5276 = vst.msk [vmem:[#allocation3 + $0x1d0] sm:$0xff] %vm2571_vm3, %v5244_v28  ;;  %v5167_v54 = vpop.xlane.xlu1 %5166  ;;  %v5055_v48 = vmul.f32 %v15748_v59, %v5023_v0  ;;  %9133 = vset.pattern.permute.xlu1 (!%p7386_p12), %v9505_v27  ;;  %v6090_v9 = vld [vmem:[#allocation3 + $0x8] sm:$0xff] (!%p7386_p12)  ;;  %9136 = vrcp.f32 (!%p7386_p12), %v6089_v21  ;;  %v6093_v28 = vld [vmem:[#allocation3 + $0x20] sm:$0xff] (!%p7386_p12)  ;;  %v6540_v21 = vld [vmem:[#allocation3 + $0x110] sm:$0xff] (!%p7386_p12) }
 0x766   : > { %v5239_v13 = vadd.f32 %v5167_v54, %v5047_v51  ;;  %v5202_v37 = vpop.xlane.xlu0 %5201  ;;  %9132 = vset.pattern.permute.xlu0 (!%p7386_p12), %v9505_v27  ;;  %9138 = vrcp.f32 (!%p7386_p12), %v6092_v5  ;;  %v6096_v51 = vld [vmem:[#allocation3 + $0x38] sm:$0xff] (!%p7386_p12)  ;;  %v6095_v54 = vld [vmem:[#allocation3 + $0x30] sm:$0xff] (!%p7386_p12)  ;;  %v6106_v56 = vld [vmem:[#allocation3 + $0x88] sm:$0xff] (!%p7386_p12) }
 0x767   : > { %6049 = vst.msk [vmem:[#allocation4 + $0x1e0] sm:$0xff] %vm920_vm2, %v6017_v42  ;;  %v6018_v2 = vadd.f32 %v5978_v36, %v5504_v3  ;;  %v5246_v29 = vadd.f32 %v5202_v37, %v5054_v33  ;;  %9140 = vrcp.f32 (!%p7386_p12), %v6090_v9  ;;  %v6097_v37 = vld [vmem:[#allocation3 + $0x40] sm:$0xff] (!%p7386_p12)  ;;  %v6543_v27 = vld [vmem:[#allocation3 + $0x128] sm:$0xff] (!%p7386_p12) }
 0x768   : > { %5271 = vst.msk [vmem:[#allocation3 + $0x1a8] sm:$0xff] %vm2571_vm3, %v5239_v13  ;;  %9142 = vrcp.f32 (!%p7386_p12), %v6094_v63  ;;  %v6105_v61 = vld [vmem:[#allocation3 + $0x80] sm:$0xff] (!%p7386_p12) }
 0x769   : > { %6050 = vst.msk [vmem:[#allocation4 + $0x1e8] sm:$0xff] %vm920_vm2, %v6018_v2  ;;  %v5177_v16 = vpop.xlane.xlu1 %5176  ;;  %9144 = vrcp.f32 (!%p7386_p12), %v6093_v28  ;;  %v6109_v38 = vld [vmem:[#allocation3 + $0xa0] sm:$0xff] (!%p7386_p12) }
 0x76a   : > { %5278 = vst.msk [vmem:[#allocation3 + $0x1e0] sm:$0xff] %vm2571_vm3, %v5246_v29  ;;  %v5241_v52 = vadd.f32 %v5177_v16, %v5049_v11  ;;  %v5212_v45 = vpop.xlane.xlu0 %5211  ;;  %9146 = vrcp.f32 (!%p7386_p12), %v6096_v51  ;;  %v6100_v29 = vld [vmem:[#allocation3 + $0x58] sm:$0xff] (!%p7386_p12)  ;;  %v6099_v11 = vld [vmem:[#allocation3 + $0x50] sm:$0xff] (!%p7386_p12)  ;;  %v6542_v63 = vld [vmem:[#allocation3 + $0x120] sm:$0xff] (!%p7386_p12) }
 0x76b   : > { %v5248_v23 = vadd.f32 %v5212_v45, %v5056_v62  ;;  %9148 = vrcp.f32 (!%p7386_p12), %v6095_v54  ;;  %v6102_v62 = vld [vmem:[#allocation3 + $0x68] sm:$0xff] (!%p7386_p12)  ;;  %v6545_v51 = vld [vmem:[#allocation3 + $0x138] sm:$0xff] (!%p7386_p12) }
 0x76c   : > { %5273 = vst.msk [vmem:[#allocation3 + $0x1b8] sm:$0xff] %vm2571_vm3, %v5241_v52  ;;  %9150 = vrcp.f32 (!%p7386_p12), %v6098_v7  ;;  %v6101_v52 = vld [vmem:[#allocation3 + $0x60] sm:$0xff] (!%p7386_p12)  ;;  %v6547_v7 = vld [vmem:[#allocation3 + $0x148] sm:$0xff] (!%p7386_p12) }
 0x76d   : > { %5280 = vst.msk [vmem:[#allocation3 + $0x1f0] sm:$0xff] %vm2571_vm3, %v5248_v23  ;;  %v5187_v17 = vpop.xlane.xlu1 %5186  ;;  %9152 = vrcp.f32 (!%p7386_p12), %v6097_v37  ;;  %v6104_v23 = vld [vmem:[#allocation3 + $0x78] sm:$0xff] (!%p7386_p12)  ;;  %v6546_v37 = vld [vmem:[#allocation3 + $0x140] sm:$0xff] (!%p7386_p12) }
 0x76e   : > { %v5243_v10 = vadd.f32 %v5187_v17, %v5051_v14  ;;  %v9135_v15 = vpop.eup (!%p7386_p12), %9134  ;;  %9154 = vrcp.f32 (!%p7386_p12), %v6100_v29  ;;  %v6103_v14 = vld [vmem:[#allocation3 + $0x70] sm:$0xff] (!%p7386_p12)  ;;  %v6549_v29 = vld [vmem:[#allocation3 + $0x158] sm:$0xff] (!%p7386_p12) }
 0x76f   : > { %v5473_v34 = vpop.permute.xlu0 %5472  ;;  %v9137_v33 = vpop.eup (!%p7386_p12), %9136  ;;  %6197 = vperm.xlu1 (!%p7386_p12), %9133, %v9135_v15   ;;  %9156 = vrcp.f32 (!%p7386_p12), %v6099_v11  ;;  %v6544_v15 = vld [vmem:[#allocation3 + $0x130] sm:$0xff] (!%p7386_p12) }
 0x770   : > { %5275 = vst.msk [vmem:[#allocation3 + $0x1c8] sm:$0xff] %vm2571_vm3, %v5243_v10  ;;  %v5506_v12 = vmul.f32 %v5473_v34, %v5314_v47  ;;  %v9139_v13 = vpop.eup (!%p7386_p12), %9138  ;;  %6187 = vperm.xlu0 (!%p7386_p12), %9132, %v9137_v33   ;;  %9158 = vrcp.f32 (!%p7386_p12), %v6102_v62  ;;  %v6120_v34 = vld [vmem:[#allocation3 + $0xf8] sm:$0xff] (!%p7386_p12)  ;;  %v6548_v11 = vld [vmem:[#allocation3 + $0x150] sm:$0xff] (!%p7386_p12)  ;;  %v6551_v62 = vld [vmem:[#allocation3 + $0x168] sm:$0xff] (!%p7386_p12) }
 0x771   : > { %v5197_v39 = vpop.xlane.xlu1 %5196  ;;  %v9141_v50 = vpop.eup (!%p7386_p12), %9140  ;;  %9160 = vrcp.f32 (!%p7386_p12), %v6101_v52  ;;  %v6550_v52 = vld [vmem:[#allocation3 + $0x160] sm:$0xff] (!%p7386_p12) }
 0x772   : > { %v5245_v1 = vadd.f32 %v5197_v39, %v5053_v57  ;;  %v9143_v22 = vpop.eup (!%p7386_p12), %9142  ;;  %9162 = vrcp.f32 (!%p7386_p12), %v6104_v23  ;;  %v6108_v39 = vld [vmem:[#allocation3 + $0x98] sm:$0xff] (!%p7386_p12) }
 0x773   : > { %6202 = vperm.xlu1 (!%p7386_p12), %9133, %v9139_v13   ;;  %v9145_v16 = vpop.eup (!%p7386_p12), %9144  ;;  %9164 = vrcp.f32 (!%p7386_p12), %v6103_v14  ;;  %v6553_v23 = vld [vmem:[#allocation3 + $0x178] sm:$0xff] (!%p7386_p12)  ;;  %v6552_v14 = vld [vmem:[#allocation3 + $0x170] sm:$0xff] (!%p7386_p12) }
 0x774   : > { %5277 = vst.msk [vmem:[#allocation3 + $0x1d8] sm:$0xff] %vm2571_vm3, %v5245_v1  ;;  %6192 = vperm.xlu0 (!%p7386_p12), %9132, %v9141_v50   ;;  %v9147_v8 = vpop.eup (!%p7386_p12), %9146  ;;  %9166 = vrcp.f32 (!%p7386_p12), %v6106_v56  ;;  %v6107_v1 = vld [vmem:[#allocation3 + $0x90] sm:$0xff] (!%p7386_p12)  ;;  %v6555_v56 = vld [vmem:[#allocation3 + $0x188] sm:$0xff] (!%p7386_p12) }
 0x775   : > { %v5207_v20 = vpop.xlane.xlu1 %5206  ;;  %v9149_v45 = vpop.eup (!%p7386_p12), %9148  ;;  %9168 = vrcp.f32 (!%p7386_p12), %v6105_v61  ;;  %v6554_v61 = vld [vmem:[#allocation3 + $0x180] sm:$0xff] (!%p7386_p12) }
 0x776   : > { %v5247_v44 = vadd.f32 %v5207_v20, %v5055_v48  ;;  %v9151_v49 = vpop.eup (!%p7386_p12), %9150  ;;  %9170 = vrcp.f32 (!%p7386_p12), %v6108_v39  ;;  %v6110_v48 = vld [vmem:[#allocation3 + $0xa8] sm:$0xff] (!%p7386_p12)  ;;  %v6557_v39 = vld [vmem:[#allocation3 + $0x198] sm:$0xff] (!%p7386_p12) }
 0x777   : > { %6212 = vperm.xlu1 (!%p7386_p12), %9133, %v9143_v22   ;;  %v9153_v17 = vpop.eup (!%p7386_p12), %9152  ;;  %9172 = vrcp.f32 (!%p7386_p12), %v6107_v1  ;;  %v6556_v1 = vld [vmem:[#allocation3 + $0x190] sm:$0xff] (!%p7386_p12) }
 0x778   : > { %5279 = vst.msk [vmem:[#allocation3 + $0x1e8] sm:$0xff] %vm2571_vm3, %v5247_v44  ;;  %6207 = vperm.xlu0 (!%p7386_p12), %9132, %v9145_v16   ;;  %v9155_v10 = vpop.eup (!%p7386_p12), %9154  ;;  %9174 = vrcp.f32 (!%p7386_p12), %v6110_v48  ;;  %v6559_v48 = vld [vmem:[#allocation3 + $0x1a8] sm:$0xff] (!%p7386_p12) }
 0x779   : > { %v5217_v53 = vpop.xlane.xlu1 %5216  ;;  %v9157_v57 = vpop.eup (!%p7386_p12), %9156  ;;  %9176 = vrcp.f32 (!%p7386_p12), %v6109_v38  ;;  %v6558_v38 = vld [vmem:[#allocation3 + $0x1a0] sm:$0xff] (!%p7386_p12) }
 0x77a   : > { %v5249_v26 = vadd.f32 %v5217_v53, %v5057_v25  ;;  %v9159_v0 = vpop.eup (!%p7386_p12), %9158  ;;  %v6112_v25 = vld [vmem:[#allocation3 + $0xb8] sm:$0xff] (!%p7386_p12) }
 0x77b   : > { %6222 = vperm.xlu1 (!%p7386_p12), %9133, %v9147_v8   ;;  %v9161_v59 = vpop.eup (!%p7386_p12), %9160  ;;  %9178 = vrcp.f32 (!%p7386_p12), %v6112_v25  ;;  %v6561_v25 = vld [vmem:[#allocation3 + $0x1b8] sm:$0xff] (!%p7386_p12) }
 0x77c   : > { %5281 = vst.msk [vmem:[#allocation3 + $0x1f8] sm:$0xff] %vm2571_vm3, %v5249_v26  ;;  %6217 = vperm.xlu0 (!%p7386_p12), %9132, %v9149_v45   ;;  %v9163_v20 = vpop.eup (!%p7386_p12), %9162  ;;  %v6111_v26 = vld [vmem:[#allocation3 + $0xb0] sm:$0xff] (!%p7386_p12) }
 0x77d   : > { %v5468_v46 = vpop.permute.xlu1 %5467  ;;  %v9165_v44 = vpop.eup (!%p7386_p12), %9164  ;;  %9180 = vrcp.f32 (!%p7386_p12), %v6111_v26  ;;  %v6560_v26 = vld [vmem:[#allocation3 + $0x1b0] sm:$0xff] (!%p7386_p12) }
 0x77e   : > { %v5505_v31 = vmul.f32 %v5468_v46, %v5313_v19  ;;  %v9167_v53 = vpop.eup (!%p7386_p12), %9166  ;;  %v6114_v46 = vld [vmem:[#allocation3 + $0xc8] sm:$0xff] (!%p7386_p12) }
 0x77f   : > { %6232 = vperm.xlu1 (!%p7386_p12), %9133, %v9151_v49   ;;  %9182 = vrcp.f32 (!%p7386_p12), %v6114_v46  ;;  %v6563_v46 = vld [vmem:[#allocation3 + $0x1c8] sm:$0xff] (!%p7386_p12) }
 0x780   : > { %6227 = vperm.xlu0 (!%p7386_p12), %9132, %v9153_v17  }
 0x783   : > { %6242 = vperm.xlu1 (!%p7386_p12), %9133, %v9155_v10  }
 0x784   : > { %6237 = vperm.xlu0 (!%p7386_p12), %9132, %v9157_v57  }
 0x787   : > { %6252 = vperm.xlu1 (!%p7386_p12), %9133, %v9159_v0  }
 0x788   : > { %6247 = vperm.xlu0 (!%p7386_p12), %9132, %v9161_v59  }
 0x78b   : > { %6262 = vperm.xlu1 (!%p7386_p12), %9133, %v9163_v20  }
 0x78c   : > { %6257 = vperm.xlu0 (!%p7386_p12), %9132, %v9165_v44  }
 0x78f   : > { %v8043_v18 = vpop.f32.mrb[252].mxu0  ;;  %6272 = vperm.xlu1 (!%p7386_p12), %9133, %v9167_v53  }
 0x790   : > { %v8044_v43 = vpop.f32.mrb[253].mxu0 }
 0x791   : > { %v8045_v40 = vadd.f32 %v8044_v43, %v8043_v18  ;;  %v8046_v58 = vpop.f32.mrb[254].mxu0  ;;  %v9169_v18 = vpop.eup (!%p7386_p12), %9168 }
 0x792   : > { %v8155_v4 = vpop.f32.mrb[252].mxu1  ;;  %v8047_v3 = vpop.f32.mrb[255].mxu0  ;;  %6267 = vperm.xlu0 (!%p7386_p12), %9132, %v9169_v18  }
 0x793   : > { %v8156_v6 = vpop.f32.mrb[253].mxu1  ;;  %v8048_v41 = vadd.f32 %v8047_v3, %v8046_v58  ;;  %v9171_v43 = vpop.eup (!%p7386_p12), %9170  ;;  %v6116_v58 = vld [vmem:[#allocation3 + $0xd8] sm:$0xff] (!%p7386_p12) }
 0x794   : > { %v8157_v42 = vadd.f32 %v8156_v6, %v8155_v4  ;;  %v8158_v36 = vpop.f32.mrb[254].mxu1  ;;  %v6113_v4 = vld [vmem:[#allocation3 + $0xc0] sm:$0xff] (!%p7386_p12)  ;;  %6282 = vperm.xlu1 (!%p7386_p12), %9133, %v9171_v43   ;;  %v6115_v6 = vld [vmem:[#allocation3 + $0xd0] sm:$0xff] (!%p7386_p12) }
 0x795   : > { %v8159_v60 = vpop.f32.mrb[255].mxu1  ;;  %9184 = vrcp.f32 (!%p7386_p12), %v6113_v4  ;;  %v6562_v4 = vld [vmem:[#allocation3 + $0x1c0] sm:$0xff] (!%p7386_p12) }
 0x796   : > { %v5983_v2 = vadd.f32 %v8157_v42, %v8045_v40  ;;  %v8160_v32 = vadd.f32 %v8159_v60, %v8158_v36  ;;  %6088 = sbr.rel (%p7386_p12) target bundleno = 2279 (0x8e7), region = 52  ;;  %v9173_v40 = vpop.eup (!%p7386_p12), %9172  ;;  %9186 = vrcp.f32 (!%p7386_p12), %v6116_v58  ;;  %v6118_v42 = vld [vmem:[#allocation3 + $0xe8] sm:$0xff] (!%p7386_p12)  ;;  %v6565_v58 = vld [vmem:[#allocation3 + $0x1d8] sm:$0xff] (!%p7386_p12) }
 0x797   : > { %v9175_v19 = vpop.eup (!%p7386_p12), %9174  ;;  %6277 = vperm.xlu0 (!%p7386_p12), %9132, %v9173_v40   ;;  %9188 = vrcp.f32 (!%p7386_p12), %v6115_v6  ;;  %v6564_v6 = vld [vmem:[#allocation3 + $0x1d0] sm:$0xff] (!%p7386_p12) }
 0x798   : > { %v6019_v30 = vadd.f32 %v5983_v2, %v5505_v31  ;;  %v5986_v35 = vadd.f32 %v8160_v32, %v8048_v41  ;;  %v9177_v3 = vpop.eup (!%p7386_p12), %9176  ;;  %6292 = vperm.xlu1 (!%p7386_p12), %9133, %v9175_v19   ;;  %v6117_v41 = vld [vmem:[#allocation3 + $0xe0] sm:$0xff] (!%p7386_p12)  ;;  %9190 = vrcp.f32 (!%p7386_p12), %v6118_v42  ;;  %v6119_v31 = vld [vmem:[#allocation3 + $0xf0] sm:$0xff] (!%p7386_p12)  ;;  %v6539_v32 = vld [vmem:[#allocation3 + $0x108] sm:$0xff] (!%p7386_p12) }
 0x799   : > { %v9179_v36 = vpop.eup (!%p7386_p12), %9178  ;;  %9192 = vrcp.f32 (!%p7386_p12), %v6117_v41  ;;  %v6567_v42 = vld [vmem:[#allocation3 + $0x1e8] sm:$0xff] (!%p7386_p12)  ;;  %v6566_v41 = vld [vmem:[#allocation3 + $0x1e0] sm:$0xff] (!%p7386_p12) }
 0x79a   : > { %6051 = vst.msk [vmem:[#allocation4 + $0x1f0] sm:$0xff] %vm920_vm2, %v6019_v30  ;;  %v6020_v55 = vadd.f32 %v5986_v35, %v5506_v12  ;;  %v9181_v47 = vpop.eup (!%p7386_p12), %9180  ;;  %9194 = vrcp.f32 (!%p7386_p12), %v6120_v34  ;;  %v6538_v30 = vld [vmem:[#allocation3 + $0x100] sm:$0xff] (!%p7386_p12)  ;;  %v6569_v34 = vld [vmem:[#allocation3 + $0x1f8] sm:$0xff] (!%p7386_p12) }
 0x79b   : > { %6287 = vperm.xlu0 (!%p7386_p12), %9132, %v9177_v3   ;;  %v9183_v60 = vpop.eup (!%p7386_p12), %9182  ;;  %9196 = vrcp.f32 (!%p7386_p12), %v6119_v31  ;;  %v6568_v31 = vld [vmem:[#allocation3 + $0x1f0] sm:$0xff] (!%p7386_p12) }
 0x79c   : > { %6052 = vst.msk [vmem:[#allocation4 + $0x1f8] sm:$0xff] %vm920_vm2, %v6020_v55  ;;  %6302 = vperm.xlu1 (!%p7386_p12), %9133, %v9179_v36   ;;  %9198 = vrcp.f32 (!%p7386_p12), %v6539_v32  ;;  %v6541_v55 = vld [vmem:[#allocation3 + $0x118] sm:$0xff] (!%p7386_p12) }
 0x79d   : > { %9200 = vrcp.f32 %v6538_v30 }
 0x79e   : > { %9202 = vrcp.f32 %v6541_v55 }
 0x79f   : > { %6297 = vperm.xlu0 %9132, %v9181_v47   ;;  %v9185_v2 = vpop.eup %9184  ;;  %9204 = vrcp.f32 %v6540_v21  ;;  %v6155_v21 = vld [vmem:[#allocation4 + $0x10] sm:$0xff] }
 0x7a0   : > { %6312 = vperm.xlu1 %9133, %v9183_v60   ;;  %v9187_v12 = vpop.eup %9186  ;;  %9206 = vrcp.f32 %v6543_v27 }
 0x7a1   : > { %v9189_v35 = vpop.eup %9188  ;;  %9208 = vrcp.f32 %v6542_v63 }
 0x7a2   : > { %v9191_v24 = vpop.eup %9190  ;;  %9210 = vrcp.f32 %v6545_v51  ;;  %v6156_v51 = vld [vmem:[#allocation4 + $0x18] sm:$0xff] }
 0x7a3   : > { %6307 = vperm.xlu0 %9132, %v9185_v2   ;;  %v9193_v5 = vpop.eup %9192  ;;  %9212 = vrcp.f32 %v6544_v15  ;;  %v6154_v15 = vld [vmem:[#allocation4 + $0x8] sm:$0xff] }
 0x7a4   : > { %6322 = vperm.xlu1 %9133, %v9187_v12   ;;  %v9195_v9 = vpop.eup %9194  ;;  %9214 = vrcp.f32 %v6547_v7 }
 0x7a5   : > { %v9197_v28 = vpop.eup %9196  ;;  %9216 = vrcp.f32 %v6546_v37 }
 0x7a6   : > { %v9199_v54 = vpop.eup %9198  ;;  %9218 = vrcp.f32 %v6549_v29  ;;  %v6158_v29 = vld [vmem:[#allocation4 + $0x28] sm:$0xff] }
 0x7a7   : > { %6317 = vperm.xlu0 %9132, %v9189_v35   ;;  %v9201_v33 = vpop.eup %9200  ;;  %9220 = vrcp.f32 %v6548_v11  ;;  %v6157_v11 = vld [vmem:[#allocation4 + $0x20] sm:$0xff] }
 0x7a8   : > { %6332 = vperm.xlu1 %9133, %v9191_v24   ;;  %v9203_v13 = vpop.eup %9202  ;;  %9222 = vrcp.f32 %v6551_v62 }
 0x7a9   : > { %v9205_v50 = vpop.eup %9204  ;;  %9224 = vrcp.f32 %v6550_v52 }
 0x7aa   : > { %v9207_v22 = vpop.eup %9206  ;;  %9226 = vrcp.f32 %v6553_v23  ;;  %v6160_v23 = vld [vmem:[#allocation4 + $0x38] sm:$0xff] }
 0x7ab   : > { %6327 = vperm.xlu0 %9132, %v9193_v5   ;;  %v9209_v16 = vpop.eup %9208  ;;  %9228 = vrcp.f32 %v6552_v14  ;;  %v6153_v5 = vld [vmem:[#allocation4] sm:$0xff]  ;;  %v6159_v14 = vld [vmem:[#allocation4 + $0x30] sm:$0xff] }
 0x7ac   : > { %6342 = vperm.xlu1 %9133, %v9195_v9   ;;  %v9211_v8 = vpop.eup %9210  ;;  %9230 = vrcp.f32 %v6555_v56 }
 0x7ad   : > { %v9213_v45 = vpop.eup %9212  ;;  %9232 = vrcp.f32 %v6554_v61 }
 0x7ae   : > { %v9215_v49 = vpop.eup %9214  ;;  %9234 = vrcp.f32 %v6557_v39  ;;  %v6162_v39 = vld [vmem:[#allocation4 + $0x48] sm:$0xff] }
 0x7af   : > { %6337 = vperm.xlu0 %9132, %v9197_v28   ;;  %v9217_v17 = vpop.eup %9216  ;;  %9236 = vrcp.f32 %v6556_v1  ;;  %v6161_v1 = vld [vmem:[#allocation4 + $0x40] sm:$0xff] }
 0x7b0   : > { %6641 = vperm.xlu1 %9133, %v9199_v54   ;;  %v9219_v10 = vpop.eup %9218  ;;  %9238 = vrcp.f32 %v6559_v48 }
 0x7b1   : > { %v9221_v57 = vpop.eup %9220  ;;  %9240 = vrcp.f32 %v6558_v38 }
 0x7b2   : > { %v9223_v0 = vpop.eup %9222  ;;  %9242 = vrcp.f32 %v6561_v25  ;;  %v6164_v25 = vld [vmem:[#allocation4 + $0x58] sm:$0xff] }
 0x7b3   : > { %6636 = vperm.xlu0 %9132, %v9201_v33   ;;  %v9225_v59 = vpop.eup %9224  ;;  %9244 = vrcp.f32 %v6560_v26  ;;  %v6163_v26 = vld [vmem:[#allocation4 + $0x50] sm:$0xff] }
 0x7b4   : > { %6651 = vperm.xlu1 %9133, %v9203_v13   ;;  %v9227_v20 = vpop.eup %9226  ;;  %9246 = vrcp.f32 %v6563_v46 }
 0x7b5   : > { %v9229_v44 = vpop.eup %9228  ;;  %9248 = vrcp.f32 %v6562_v4 }
 0x7b6   : > { %v9231_v53 = vpop.eup %9230  ;;  %9250 = vrcp.f32 %v6565_v58  ;;  %v6166_v58 = vld [vmem:[#allocation4 + $0x68] sm:$0xff] }
 0x7b7   : > { %6646 = vperm.xlu0 %9132, %v9205_v50   ;;  %v9233_v18 = vpop.eup %9232  ;;  %9252 = vrcp.f32 %v6564_v6  ;;  %v6165_v6 = vld [vmem:[#allocation4 + $0x60] sm:$0xff] }
 0x7b8   : > { %6661 = vperm.xlu1 %9133, %v9207_v22   ;;  %v9235_v43 = vpop.eup %9234  ;;  %9254 = vrcp.f32 %v6567_v42 }
 0x7b9   : > { %v9237_v40 = vpop.eup %9236  ;;  %9256 = vrcp.f32 %v6566_v41 }
 0x7ba   : > { %v9239_v19 = vpop.eup %9238  ;;  %9258 = vrcp.f32 %v6569_v34  ;;  %v6168_v34 = vld [vmem:[#allocation4 + $0x78] sm:$0xff] }
 0x7bb   : > { %6656 = vperm.xlu0 %9132, %v9209_v16   ;;  %v9241_v3 = vpop.eup %9240  ;;  %9260 = vrcp.f32 %v6568_v31  ;;  %v6167_v31 = vld [vmem:[#allocation4 + $0x70] sm:$0xff] }
 0x7bc   : > { %6671 = vperm.xlu1 %9133, %v9211_v8   ;;  %v9243_v36 = vpop.eup %9242 }
 0x7bd   : > { %v9245_v47 = vpop.eup %9244 }
 0x7be   : > { %v9247_v60 = vpop.eup %9246 }
 0x7bf   : > { %6666 = vperm.xlu0 %9132, %v9213_v45   ;;  %v9249_v2 = vpop.eup %9248 }
 0x7c0   : > { %6681 = vperm.xlu1 %9133, %v9215_v49   ;;  %v9251_v32 = vpop.eup %9250 }
 0x7c1   : > { %v9253_v12 = vpop.eup %9252 }
 0x7c2   : > { %v9255_v30 = vpop.eup %9254 }
 0x7c3   : > { %6676 = vperm.xlu0 %9132, %v9217_v17   ;;  %v9257_v35 = vpop.eup %9256 }
 0x7c4   : > { %6691 = vperm.xlu1 %9133, %v9219_v10   ;;  %v9259_v55 = vpop.eup %9258 }
 0x7c5   : > { %v9261_v24 = vpop.eup %9260 }
 0x7c7   : > { %6686 = vperm.xlu0 %9132, %v9221_v57  }
 0x7c8   : > { %6701 = vperm.xlu1 %9133, %v9223_v0  }
 0x7cb   : > { %6696 = vperm.xlu0 %9132, %v9225_v59  }
 0x7cc   : > { %6711 = vperm.xlu1 %9133, %v9227_v20  }
 0x7cf   : > { %6706 = vperm.xlu0 %9132, %v9229_v44  }
 0x7d0   : > { %6721 = vperm.xlu1 %9133, %v9231_v53  }
 0x7d3   : > { %6716 = vperm.xlu0 %9132, %v9233_v18  }
 0x7d4   : > { %6731 = vperm.xlu1 %9133, %v9235_v43  }
 0x7d7   : > { %6726 = vperm.xlu0 %9132, %v9237_v40  }
 0x7d8   : > { %6741 = vperm.xlu1 %9133, %v9239_v19  }
 0x7db   : > { %6736 = vperm.xlu0 %9132, %v9241_v3  }
 0x7dc   : > { %6751 = vperm.xlu1 %9133, %v9243_v36  }
 0x7df   : > { %6746 = vperm.xlu0 %9132, %v9245_v47  }
 0x7e0   : > { %6761 = vperm.xlu1 %9133, %v9247_v60  }
 0x7e3   : > { %6756 = vperm.xlu0 %9132, %v9249_v2  }
 0x7e4   : > { %6771 = vperm.xlu1 %9133, %v9251_v32  }
 0x7e7   : > { %6766 = vperm.xlu0 %9132, %v9253_v12  }
 0x7e8   : > { %6781 = vperm.xlu1 %9133, %v9255_v30  }
 0x7eb   : > { %6776 = vperm.xlu0 %9132, %v9257_v35  }
 0x7ec   : > { %6791 = vperm.xlu1 %9133, %v9259_v55   ;;  %v6170_v55 = vld [vmem:[#allocation4 + $0x88] sm:$0xff] }
 0x7ee   : > { %v6198_v27 = vpop.permute.xlu1 %6197 }
 0x7ef   : > { %6786 = vperm.xlu0 %9132, %v9261_v24   ;;  %v6347_v9 = vmul.f32 %v6198_v27, %v6155_v21  ;;  %v6188_v63 = vpop.permute.xlu0 %6187  ;;  %v6169_v21 = vld [vmem:[#allocation4 + $0x80] sm:$0xff] }
 0x7f0   : > { %v6345_v28 = vmul.f32 %v6188_v63, %v6153_v5 }
 0x7f1   : > { %v7459_v54 = vpack.c.bf16 %v6347_v9, %v6347_v9 }
 0x7f2   : > { %v7457_v33 = vpack.c.bf16 %v6345_v28, %v6345_v28  ;;  %v6203_v7 = vpop.permute.xlu1 %6202 }
 0x7f3   : > { %6508 = vst.msk [vmem:[%s9857_s22 + $0x8] sm:$0xf] %vm6505_vm4, %v7459_v54  ;;  %v6348_v13 = vmul.f32 %v6203_v7, %v6156_v51  ;;  %v6193_v37 = vpop.permute.xlu0 %6192  ;;  %v6172_v51 = vld [vmem:[#allocation4 + $0x98] sm:$0xff] }
 0x7f4   : > { %6506 = vst.msk [vmem:[%s9857_s22] sm:$0xf] %vm6505_vm4, %v7457_v33  ;;  %v6346_v50 = vmul.f32 %v6193_v37, %v6154_v15  ;;  %v6171_v15 = vld [vmem:[#allocation4 + $0x90] sm:$0xff] }
 0x7f5   : > { %v7460_v22 = vpack.c.bf16 %v6348_v13, %v6348_v13 }
 0x7f6   : > { %v7458_v16 = vpack.c.bf16 %v6346_v50, %v6346_v50  ;;  %v6213_v62 = vpop.permute.xlu1 %6212 }
 0x7f7   : > { %6509 = vst.msk [vmem:[%s9857_s22 + $0xc] sm:$0xf] %vm6505_vm4, %v7460_v22  ;;  %v6350_v8 = vmul.f32 %v6213_v62, %v6158_v29  ;;  %v6208_v52 = vpop.permute.xlu0 %6207  ;;  %v6174_v29 = vld [vmem:[#allocation4 + $0xa8] sm:$0xff] }
 0x7f8   : > { %6507 = vst.msk [vmem:[%s9857_s22 + $0x4] sm:$0xf] %vm6505_vm4, %v7458_v16  ;;  %v6349_v45 = vmul.f32 %v6208_v52, %v6157_v11  ;;  %v6173_v11 = vld [vmem:[#allocation4 + $0xa0] sm:$0xff] }
 0x7f9   : > { %v7462_v49 = vpack.c.bf16 %v6350_v8, %v6350_v8 }
 0x7fa   : > { %v7461_v17 = vpack.c.bf16 %v6349_v45, %v6349_v45  ;;  %v6223_v56 = vpop.permute.xlu1 %6222 }
 0x7fb   : > { %6511 = vst.msk [vmem:[%s9857_s22 + $0x14] sm:$0xf] %vm6505_vm4, %v7462_v49  ;;  %v6352_v10 = vmul.f32 %v6223_v56, %v6160_v23  ;;  %v6218_v61 = vpop.permute.xlu0 %6217  ;;  %v6176_v23 = vld [vmem:[#allocation4 + $0xb8] sm:$0xff] }
 0x7fc   : > { %6510 = vst.msk [vmem:[%s9857_s22 + $0x10] sm:$0xf] %vm6505_vm4, %v7461_v17  ;;  %v6351_v57 = vmul.f32 %v6218_v61, %v6159_v14  ;;  %v6175_v14 = vld [vmem:[#allocation4 + $0xb0] sm:$0xff] }
 0x7fd   : > { %v7464_v0 = vpack.c.bf16 %v6352_v10, %v6352_v10 }
 0x7fe   : > { %v7463_v59 = vpack.c.bf16 %v6351_v57, %v6351_v57  ;;  %v6233_v48 = vpop.permute.xlu1 %6232 }
 0x7ff   : > { %6513 = vst.msk [vmem:[%s9857_s22 + $0x1c] sm:$0xf] %vm6505_vm4, %v7464_v0  ;;  %v6354_v20 = vmul.f32 %v6233_v48, %v6162_v39  ;;  %v6228_v38 = vpop.permute.xlu0 %6227  ;;  %v6178_v39 = vld [vmem:[#allocation4 + $0xc8] sm:$0xff] }
 0x800   : > { %6512 = vst.msk [vmem:[%s9857_s22 + $0x18] sm:$0xf] %vm6505_vm4, %v7463_v59  ;;  %v6353_v44 = vmul.f32 %v6228_v38, %v6161_v1  ;;  %v6177_v1 = vld [vmem:[#allocation4 + $0xc0] sm:$0xff] }
 0x801   : > { %v7466_v53 = vpack.c.bf16 %v6354_v20, %v6354_v20 }
 0x802   : > { %v7465_v18 = vpack.c.bf16 %v6353_v44, %v6353_v44  ;;  %v6243_v46 = vpop.permute.xlu1 %6242 }
 0x803   : > { %6515 = vst.msk [vmem:[%s9857_s22 + $0x24] sm:$0xf] %vm6505_vm4, %v7466_v53  ;;  %v6356_v43 = vmul.f32 %v6243_v46, %v6164_v25  ;;  %v6238_v4 = vpop.permute.xlu0 %6237  ;;  %v6180_v25 = vld [vmem:[#allocation4 + $0xd8] sm:$0xff] }
 0x804   : > { %6514 = vst.msk [vmem:[%s9857_s22 + $0x20] sm:$0xf] %vm6505_vm4, %v7465_v18  ;;  %v6355_v40 = vmul.f32 %v6238_v4, %v6163_v26  ;;  %v6179_v26 = vld [vmem:[#allocation4 + $0xd0] sm:$0xff] }
 0x805   : > { %v7468_v19 = vpack.c.bf16 %v6356_v43, %v6356_v43 }
 0x806   : > { %v7467_v3 = vpack.c.bf16 %v6355_v40, %v6355_v40  ;;  %v6253_v42 = vpop.permute.xlu1 %6252 }
 0x807   : > { %6517 = vst.msk [vmem:[%s9857_s22 + $0x2c] sm:$0xf] %vm6505_vm4, %v7468_v19  ;;  %v6358_v36 = vmul.f32 %v6253_v42, %v6166_v58  ;;  %v6248_v41 = vpop.permute.xlu0 %6247  ;;  %v6182_v58 = vld [vmem:[#allocation4 + $0xe8] sm:$0xff] }
 0x808   : > { %6516 = vst.msk [vmem:[%s9857_s22 + $0x28] sm:$0xf] %vm6505_vm4, %v7467_v3  ;;  %v6357_v47 = vmul.f32 %v6248_v41, %v6165_v6  ;;  %v6181_v6 = vld [vmem:[#allocation4 + $0xe0] sm:$0xff] }
 0x809   : > { %v7470_v60 = vpack.c.bf16 %v6358_v36, %v6358_v36 }
 0x80a   : > { %v7469_v2 = vpack.c.bf16 %v6357_v47, %v6357_v47  ;;  %v6263_v32 = vpop.permute.xlu1 %6262 }
 0x80b   : > { %6519 = vst.msk [vmem:[%s9857_s22 + $0x34] sm:$0xf] %vm6505_vm4, %v7470_v60  ;;  %v6360_v12 = vmul.f32 %v6263_v32, %v6168_v34  ;;  %v6258_v30 = vpop.permute.xlu0 %6257  ;;  %v6184_v34 = vld [vmem:[#allocation4 + $0xf8] sm:$0xff] }
 0x80c   : > { %6518 = vst.msk [vmem:[%s9857_s22 + $0x30] sm:$0xf] %vm6505_vm4, %v7469_v2  ;;  %v6359_v35 = vmul.f32 %v6258_v30, %v6167_v31  ;;  %v6183_v31 = vld [vmem:[#allocation4 + $0xf0] sm:$0xff] }
 0x80d   : > { %v7472_v24 = vpack.c.bf16 %v6360_v12, %v6360_v12 }
 0x80e   : > { %v7471_v5 = vpack.c.bf16 %v6359_v35, %v6359_v35  ;;  %v6273_v27 = vpop.permute.xlu1 %6272 }
 0x80f   : > { %6521 = vst.msk [vmem:[%s9857_s22 + $0x3c] sm:$0xf] %vm6505_vm4, %v7472_v24  ;;  %v6362_v9 = vmul.f32 %v6273_v27, %v6170_v55  ;;  %v6603_v55 = vld [vmem:[#allocation4 + $0x108] sm:$0xff] }
 0x810   : > { %6520 = vst.msk [vmem:[%s9857_s22 + $0x38] sm:$0xf] %vm6505_vm4, %v7471_v5 }
 0x811   : > { %v6268_v63 = vpop.permute.xlu0 %6267  ;;  %v7474_v54 = vpack.c.bf16 %v6362_v9, %v6362_v9 }
 0x812   : > { %v6361_v28 = vmul.f32 %v6268_v63, %v6169_v21  ;;  %v6602_v21 = vld [vmem:[#allocation4 + $0x100] sm:$0xff] }
 0x813   : > { %v6283_v7 = vpop.permute.xlu1 %6282  ;;  %6523 = vst.msk [vmem:[%s9857_s22 + $0x44] sm:$0xf] %vm6505_vm4, %v7474_v54 }
 0x814   : > { %v7473_v33 = vpack.c.bf16 %v6361_v28, %v6361_v28  ;;  %v6364_v13 = vmul.f32 %v6283_v7, %v6172_v51  ;;  %v6605_v51 = vld [vmem:[#allocation4 + $0x118] sm:$0xff] }
 0x816   : > { %v6278_v37 = vpop.permute.xlu0 %6277  ;;  %6522 = vst.msk [vmem:[%s9857_s22 + $0x40] sm:$0xf] %vm6505_vm4, %v7473_v33  ;;  %v7476_v22 = vpack.c.bf16 %v6364_v13, %v6364_v13 }
 0x817   : > { %v6363_v50 = vmul.f32 %v6278_v37, %v6171_v15  ;;  %v6293_v62 = vpop.permute.xlu1 %6292  ;;  %v6604_v15 = vld [vmem:[#allocation4 + $0x110] sm:$0xff] }
 0x818   : > { %6525 = vst.msk [vmem:[%s9857_s22 + $0x4c] sm:$0xf] %vm6505_vm4, %v7476_v22  ;;  %v6366_v8 = vmul.f32 %v6293_v62, %v6174_v29  ;;  %v6607_v29 = vld [vmem:[#allocation4 + $0x128] sm:$0xff] }
 0x819   : > { %v7475_v16 = vpack.c.bf16 %v6363_v50, %v6363_v50 }
 0x81a   : > { %v6288_v52 = vpop.permute.xlu0 %6287  ;;  %v7478_v49 = vpack.c.bf16 %v6366_v8, %v6366_v8 }
 0x81b   : > { %6524 = vst.msk [vmem:[%s9857_s22 + $0x48] sm:$0xf] %vm6505_vm4, %v7475_v16  ;;  %v6365_v45 = vmul.f32 %v6288_v52, %v6173_v11  ;;  %v6303_v56 = vpop.permute.xlu1 %6302  ;;  %v6606_v11 = vld [vmem:[#allocation4 + $0x120] sm:$0xff] }
 0x81c   : > { %6527 = vst.msk [vmem:[%s9857_s22 + $0x54] sm:$0xf] %vm6505_vm4, %v7478_v49  ;;  %v6368_v10 = vmul.f32 %v6303_v56, %v6176_v23  ;;  %v6609_v23 = vld [vmem:[#allocation4 + $0x138] sm:$0xff] }
 0x81d   : > { %v7477_v17 = vpack.c.bf16 %v6365_v45, %v6365_v45 }
 0x81e   : > { %v6298_v61 = vpop.permute.xlu0 %6297  ;;  %v7480_v0 = vpack.c.bf16 %v6368_v10, %v6368_v10 }
 0x81f   : > { %6526 = vst.msk [vmem:[%s9857_s22 + $0x50] sm:$0xf] %vm6505_vm4, %v7477_v17  ;;  %v6367_v57 = vmul.f32 %v6298_v61, %v6175_v14  ;;  %v6313_v48 = vpop.permute.xlu1 %6312  ;;  %v6608_v14 = vld [vmem:[#allocation4 + $0x130] sm:$0xff] }
 0x820   : > { %6529 = vst.msk [vmem:[%s9857_s22 + $0x5c] sm:$0xf] %vm6505_vm4, %v7480_v0  ;;  %v6370_v20 = vmul.f32 %v6313_v48, %v6178_v39  ;;  %v6611_v39 = vld [vmem:[#allocation4 + $0x148] sm:$0xff] }
 0x821   : > { %v7479_v59 = vpack.c.bf16 %v6367_v57, %v6367_v57 }
 0x822   : > { %v6308_v38 = vpop.permute.xlu0 %6307  ;;  %v7482_v53 = vpack.c.bf16 %v6370_v20, %v6370_v20 }
 0x823   : > { %6528 = vst.msk [vmem:[%s9857_s22 + $0x58] sm:$0xf] %vm6505_vm4, %v7479_v59  ;;  %v6369_v44 = vmul.f32 %v6308_v38, %v6177_v1  ;;  %v6323_v46 = vpop.permute.xlu1 %6322  ;;  %v6610_v1 = vld [vmem:[#allocation4 + $0x140] sm:$0xff] }
 0x824   : > { %6531 = vst.msk [vmem:[%s9857_s22 + $0x64] sm:$0xf] %vm6505_vm4, %v7482_v53  ;;  %v6372_v43 = vmul.f32 %v6323_v46, %v6180_v25  ;;  %v6613_v25 = vld [vmem:[#allocation4 + $0x158] sm:$0xff] }
 0x825   : > { %v7481_v18 = vpack.c.bf16 %v6369_v44, %v6369_v44 }
 0x826   : > { %v6318_v4 = vpop.permute.xlu0 %6317  ;;  %v7484_v19 = vpack.c.bf16 %v6372_v43, %v6372_v43 }
 0x827   : > { %6530 = vst.msk [vmem:[%s9857_s22 + $0x60] sm:$0xf] %vm6505_vm4, %v7481_v18  ;;  %v6371_v40 = vmul.f32 %v6318_v4, %v6179_v26  ;;  %v6333_v42 = vpop.permute.xlu1 %6332  ;;  %v6612_v26 = vld [vmem:[#allocation4 + $0x150] sm:$0xff] }
 0x828   : > { %6533 = vst.msk [vmem:[%s9857_s22 + $0x6c] sm:$0xf] %vm6505_vm4, %v7484_v19  ;;  %v6374_v36 = vmul.f32 %v6333_v42, %v6182_v58  ;;  %v6615_v58 = vld [vmem:[#allocation4 + $0x168] sm:$0xff] }
 0x829   : > { %v7483_v3 = vpack.c.bf16 %v6371_v40, %v6371_v40 }
 0x82a   : > { %v6328_v41 = vpop.permute.xlu0 %6327  ;;  %v7486_v60 = vpack.c.bf16 %v6374_v36, %v6374_v36 }
 0x82b   : > { %6532 = vst.msk [vmem:[%s9857_s22 + $0x68] sm:$0xf] %vm6505_vm4, %v7483_v3  ;;  %v6373_v47 = vmul.f32 %v6328_v41, %v6181_v6  ;;  %v6343_v32 = vpop.permute.xlu1 %6342  ;;  %v6614_v6 = vld [vmem:[#allocation4 + $0x160] sm:$0xff] }
 0x82c   : > { %6535 = vst.msk [vmem:[%s9857_s22 + $0x74] sm:$0xf] %vm6505_vm4, %v7486_v60  ;;  %v6376_v12 = vmul.f32 %v6343_v32, %v6184_v34  ;;  %v6617_v34 = vld [vmem:[#allocation4 + $0x178] sm:$0xff] }
 0x82d   : > { %v7485_v2 = vpack.c.bf16 %v6373_v47, %v6373_v47 }
 0x82e   : > { %v6338_v30 = vpop.permute.xlu0 %6337  ;;  %v7488_v24 = vpack.c.bf16 %v6376_v12, %v6376_v12 }
 0x82f   : > { %6534 = vst.msk [vmem:[%s9857_s22 + $0x70] sm:$0xf] %vm6505_vm4, %v7485_v2  ;;  %v6375_v35 = vmul.f32 %v6338_v30, %v6183_v31  ;;  %v6642_v27 = vpop.permute.xlu1 %6641  ;;  %v6616_v31 = vld [vmem:[#allocation4 + $0x170] sm:$0xff] }
 0x830   : > { %6537 = vst.msk [vmem:[%s9857_s22 + $0x7c] sm:$0xf] %vm6505_vm4, %v7488_v24  ;;  %v6795_v9 = vmul.f32 %v6642_v27, %v6603_v55  ;;  %v6619_v55 = vld [vmem:[#allocation4 + $0x188] sm:$0xff] }
 0x831   : > { %v7487_v5 = vpack.c.bf16 %v6375_v35, %v6375_v35 }
 0x832   : > { %v6637_v63 = vpop.permute.xlu0 %6636  ;;  %v7490_v54 = vpack.c.bf16 %v6795_v9, %v6795_v9 }
 0x833   : > { %6536 = vst.msk [vmem:[%s9857_s22 + $0x78] sm:$0xf] %vm6505_vm4, %v7487_v5  ;;  %v6794_v28 = vmul.f32 %v6637_v63, %v6602_v21  ;;  %v6652_v7 = vpop.permute.xlu1 %6651  ;;  %v6618_v21 = vld [vmem:[#allocation4 + $0x180] sm:$0xff] }
 0x834   : > { %v6797_v13 = vmul.f32 %v6652_v7, %v6605_v51  ;;  %6924 = vrot.lane.b32.xlu1 %v7490_v54, %s9506_s28  ;;  %v6621_v51 = vld [vmem:[#allocation4 + $0x198] sm:$0xff] }
 0x835   : > { %v7489_v33 = vpack.c.bf16 %v6794_v28, %v6794_v28 }
 0x836   : > { %v6647_v37 = vpop.permute.xlu0 %6646  ;;  %v7492_v22 = vpack.c.bf16 %v6797_v13, %v6797_v13 }
 0x837   : > { %v6796_v50 = vmul.f32 %v6647_v37, %v6604_v15  ;;  %6922 = vrot.lane.b32.xlu0 %v7489_v33, %s9506_s28  ;;  %v6662_v62 = vpop.permute.xlu1 %6661  ;;  %v6620_v15 = vld [vmem:[#allocation4 + $0x190] sm:$0xff] }
 0x838   : > { %v6799_v8 = vmul.f32 %v6662_v62, %v6607_v29  ;;  %6928 = vrot.lane.b32.xlu1 %v7492_v22, %s9506_s28  ;;  %v6623_v29 = vld [vmem:[#allocation4 + $0x1a8] sm:$0xff] }
 0x839   : > { %v7491_v16 = vpack.c.bf16 %v6796_v50, %v6796_v50 }
 0x83a   : > { %v6657_v52 = vpop.permute.xlu0 %6656  ;;  %v7494_v49 = vpack.c.bf16 %v6799_v8, %v6799_v8 }
 0x83b   : > { %v6798_v45 = vmul.f32 %v6657_v52, %v6606_v11  ;;  %6926 = vrot.lane.b32.xlu0 %v7491_v16, %s9506_s28  ;;  %v6672_v56 = vpop.permute.xlu1 %6671  ;;  %v6622_v11 = vld [vmem:[#allocation4 + $0x1a0] sm:$0xff] }
 0x83c   : > { %v6801_v10 = vmul.f32 %v6672_v56, %v6609_v23  ;;  %6932 = vrot.lane.b32.xlu1 %v7494_v49, %s9506_s28  ;;  %v6625_v23 = vld [vmem:[#allocation4 + $0x1b8] sm:$0xff] }
 0x83d   : > { %v7493_v17 = vpack.c.bf16 %v6798_v45, %v6798_v45 }
 0x83e   : > { %v6667_v61 = vpop.permute.xlu0 %6666  ;;  %v7496_v0 = vpack.c.bf16 %v6801_v10, %v6801_v10 }
 0x83f   : > { %v6800_v57 = vmul.f32 %v6667_v61, %v6608_v14  ;;  %6930 = vrot.lane.b32.xlu0 %v7493_v17, %s9506_s28  ;;  %v6682_v48 = vpop.permute.xlu1 %6681  ;;  %v6624_v14 = vld [vmem:[#allocation4 + $0x1b0] sm:$0xff] }
 0x840   : > { %v6803_v20 = vmul.f32 %v6682_v48, %v6611_v39  ;;  %6936 = vrot.lane.b32.xlu1 %v7496_v0, %s9506_s28  ;;  %v6627_v39 = vld [vmem:[#allocation4 + $0x1c8] sm:$0xff] }
 0x841   : > { %v7495_v59 = vpack.c.bf16 %v6800_v57, %v6800_v57 }
 0x842   : > { %v6677_v38 = vpop.permute.xlu0 %6676  ;;  %v7498_v53 = vpack.c.bf16 %v6803_v20, %v6803_v20 }
 0x843   : > { %v6802_v44 = vmul.f32 %v6677_v38, %v6610_v1  ;;  %6934 = vrot.lane.b32.xlu0 %v7495_v59, %s9506_s28  ;;  %v6692_v46 = vpop.permute.xlu1 %6691  ;;  %v6626_v1 = vld [vmem:[#allocation4 + $0x1c0] sm:$0xff] }
 0x844   : > { %v6805_v43 = vmul.f32 %v6692_v46, %v6613_v25  ;;  %6940 = vrot.lane.b32.xlu1 %v7498_v53, %s9506_s28  ;;  %v6629_v25 = vld [vmem:[#allocation4 + $0x1d8] sm:$0xff] }
 0x845   : > { %v7497_v18 = vpack.c.bf16 %v6802_v44, %v6802_v44 }
 0x846   : > { %v6687_v4 = vpop.permute.xlu0 %6686  ;;  %v7500_v19 = vpack.c.bf16 %v6805_v43, %v6805_v43 }
 0x847   : > { %v6804_v40 = vmul.f32 %v6687_v4, %v6612_v26  ;;  %6938 = vrot.lane.b32.xlu0 %v7497_v18, %s9506_s28  ;;  %v6702_v42 = vpop.permute.xlu1 %6701  ;;  %v6628_v26 = vld [vmem:[#allocation4 + $0x1d0] sm:$0xff] }
 0x848   : > { %v6807_v36 = vmul.f32 %v6702_v42, %v6615_v58  ;;  %6944 = vrot.lane.b32.xlu1 %v7500_v19, %s9506_s28  ;;  %v6631_v58 = vld [vmem:[#allocation4 + $0x1e8] sm:$0xff] }
 0x849   : > { %v7499_v3 = vpack.c.bf16 %v6804_v40, %v6804_v40 }
 0x84a   : > { %v6697_v41 = vpop.permute.xlu0 %6696  ;;  %v7502_v60 = vpack.c.bf16 %v6807_v36, %v6807_v36 }
 0x84b   : > { %v6806_v47 = vmul.f32 %v6697_v41, %v6614_v6  ;;  %6942 = vrot.lane.b32.xlu0 %v7499_v3, %s9506_s28  ;;  %v6712_v32 = vpop.permute.xlu1 %6711  ;;  %v6630_v6 = vld [vmem:[#allocation4 + $0x1e0] sm:$0xff] }
 0x84c   : > { %v6809_v12 = vmul.f32 %v6712_v32, %v6617_v34  ;;  %6948 = vrot.lane.b32.xlu1 %v7502_v60, %s9506_s28  ;;  %v6633_v34 = vld [vmem:[#allocation4 + $0x1f8] sm:$0xff] }
 0x84d   : > { %v7501_v2 = vpack.c.bf16 %v6806_v47, %v6806_v47 }
 0x84e   : > { %v6707_v30 = vpop.permute.xlu0 %6706  ;;  %v7504_v24 = vpack.c.bf16 %v6809_v12, %v6809_v12 }
 0x84f   : > { %v6808_v35 = vmul.f32 %v6707_v30, %v6616_v31  ;;  %6946 = vrot.lane.b32.xlu0 %v7501_v2, %s9506_s28  ;;  %v6722_v27 = vpop.permute.xlu1 %6721  ;;  %v6632_v31 = vld [vmem:[#allocation4 + $0x1f0] sm:$0xff] }
 0x850   : > { %v6811_v9 = vmul.f32 %v6722_v27, %v6619_v55  ;;  %6952 = vrot.lane.b32.xlu1 %v7504_v24, %s9506_s28 }
 0x851   : > { %v7503_v5 = vpack.c.bf16 %v6808_v35, %v6808_v35 }
 0x852   : > { %v6717_v63 = vpop.permute.xlu0 %6716  ;;  %v7506_v54 = vpack.c.bf16 %v6811_v9, %v6811_v9 }
 0x853   : > { %v6810_v28 = vmul.f32 %v6717_v63, %v6618_v21  ;;  %6950 = vrot.lane.b32.xlu0 %v7503_v5, %s9506_s28  ;;  %v6732_v7 = vpop.permute.xlu1 %6731 }
 0x854   : > { %v6813_v13 = vmul.f32 %v6732_v7, %v6621_v51  ;;  %6956 = vrot.lane.b32.xlu1 %v7506_v54, %s9506_s28 }
 0x855   : > { %v7505_v33 = vpack.c.bf16 %v6810_v28, %v6810_v28 }
 0x856   : > { %v6727_v37 = vpop.permute.xlu0 %6726  ;;  %v7508_v22 = vpack.c.bf16 %v6813_v13, %v6813_v13 }
 0x857   : > { %v6812_v50 = vmul.f32 %v6727_v37, %v6620_v15  ;;  %6954 = vrot.lane.b32.xlu0 %v7505_v33, %s9506_s28  ;;  %v6742_v62 = vpop.permute.xlu1 %6741 }
 0x858   : > { %v6815_v8 = vmul.f32 %v6742_v62, %v6623_v29  ;;  %6960 = vrot.lane.b32.xlu1 %v7508_v22, %s9506_s28 }
 0x859   : > { %v7507_v16 = vpack.c.bf16 %v6812_v50, %v6812_v50 }
 0x85a   : > { %v6737_v52 = vpop.permute.xlu0 %6736  ;;  %v7510_v49 = vpack.c.bf16 %v6815_v8, %v6815_v8 }
 0x85b   : > { %v6814_v45 = vmul.f32 %v6737_v52, %v6622_v11  ;;  %6958 = vrot.lane.b32.xlu0 %v7507_v16, %s9506_s28  ;;  %v6752_v56 = vpop.permute.xlu1 %6751 }
 0x85c   : > { %v6817_v10 = vmul.f32 %v6752_v56, %v6625_v23  ;;  %6964 = vrot.lane.b32.xlu1 %v7510_v49, %s9506_s28 }
 0x85d   : > { %v7509_v17 = vpack.c.bf16 %v6814_v45, %v6814_v45 }
 0x85e   : > { %v6747_v61 = vpop.permute.xlu0 %6746  ;;  %v7512_v0 = vpack.c.bf16 %v6817_v10, %v6817_v10 }
 0x85f   : > { %v6816_v57 = vmul.f32 %v6747_v61, %v6624_v14  ;;  %6962 = vrot.lane.b32.xlu0 %v7509_v17, %s9506_s28  ;;  %v6762_v48 = vpop.permute.xlu1 %6761 }
 0x860   : > { %v6819_v20 = vmul.f32 %v6762_v48, %v6627_v39  ;;  %6968 = vrot.lane.b32.xlu1 %v7512_v0, %s9506_s28 }
 0x861   : > { %v7511_v59 = vpack.c.bf16 %v6816_v57, %v6816_v57 }
 0x862   : > { %v6757_v38 = vpop.permute.xlu0 %6756  ;;  %v7514_v53 = vpack.c.bf16 %v6819_v20, %v6819_v20 }
 0x863   : > { %v6818_v44 = vmul.f32 %v6757_v38, %v6626_v1  ;;  %6966 = vrot.lane.b32.xlu0 %v7511_v59, %s9506_s28  ;;  %v6772_v46 = vpop.permute.xlu1 %6771 }
 0x864   : > { %v6821_v43 = vmul.f32 %v6772_v46, %v6629_v25  ;;  %6972 = vrot.lane.b32.xlu1 %v7514_v53, %s9506_s28 }
 0x865   : > { %v7513_v18 = vpack.c.bf16 %v6818_v44, %v6818_v44 }
 0x866   : > { %v6767_v4 = vpop.permute.xlu0 %6766  ;;  %v7516_v19 = vpack.c.bf16 %v6821_v43, %v6821_v43 }
 0x867   : > { %v6820_v40 = vmul.f32 %v6767_v4, %v6628_v26  ;;  %6970 = vrot.lane.b32.xlu0 %v7513_v18, %s9506_s28  ;;  %v6782_v42 = vpop.permute.xlu1 %6781 }
 0x868   : > { %v6823_v36 = vmul.f32 %v6782_v42, %v6631_v58  ;;  %6976 = vrot.lane.b32.xlu1 %v7516_v19, %s9506_s28 }
 0x869   : > { %v7515_v3 = vpack.c.bf16 %v6820_v40, %v6820_v40 }
 0x86a   : > { %v6777_v41 = vpop.permute.xlu0 %6776  ;;  %v7518_v60 = vpack.c.bf16 %v6823_v36, %v6823_v36 }
 0x86b   : > { %v6822_v47 = vmul.f32 %v6777_v41, %v6630_v6  ;;  %6974 = vrot.lane.b32.xlu0 %v7515_v3, %s9506_s28  ;;  %v6792_v32 = vpop.permute.xlu1 %6791 }
 0x86c   : > { %v6825_v12 = vmul.f32 %v6792_v32, %v6633_v34  ;;  %6980 = vrot.lane.b32.xlu1 %v7518_v60, %s9506_s28 }
 0x86d   : > { %v7517_v2 = vpack.c.bf16 %v6822_v47, %v6822_v47 }
 0x86e   : > { %v6787_v30 = vpop.permute.xlu0 %6786  ;;  %v7520_v55 = vpack.c.bf16 %v6825_v12, %v6825_v12 }
 0x86f   : > { %v6824_v35 = vmul.f32 %v6787_v30, %v6632_v31  ;;  %6978 = vrot.lane.b32.xlu0 %v7517_v2, %s9506_s28 }
 0x870   : > { %6984 = vrot.lane.b32.xlu1 %v7520_v55, %s9506_s28 }
 0x871   : > { %v7519_v24 = vpack.c.bf16 %v6824_v35, %v6824_v35 }
 0x873   : > { %6982 = vrot.lane.b32.xlu0 %v7519_v24, %s9506_s28 }
 0x8a6   : > { %v6925_v21 = vpop.permute.xlu1 %6924 }
 0x8a7   : > { %7020 = vst.msk [vmem:[%s9857_s22 + $0x4] sm:$0xf] %vm7018_vm5, %v6925_v21 }
 0x8a9   : > { %v6923_v5 = vpop.permute.xlu0 %6922 }
 0x8aa   : > { %7019 = vst.msk [vmem:[%s9857_s22] sm:$0xf] %vm7018_vm5, %v6923_v5  ;;  %v6929_v27 = vpop.permute.xlu1 %6928 }
 0x8ab   : > { %7022 = vst.msk [vmem:[%s9857_s22 + $0xc] sm:$0xf] %vm7018_vm5, %v6929_v27 }
 0x8ad   : > { %v6927_v9 = vpop.permute.xlu0 %6926 }
 0x8ae   : > { %7021 = vst.msk [vmem:[%s9857_s22 + $0x8] sm:$0xf] %vm7018_vm5, %v6927_v9  ;;  %v6933_v63 = vpop.permute.xlu1 %6932 }
 0x8af   : > { %7024 = vst.msk [vmem:[%s9857_s22 + $0x14] sm:$0xf] %vm7018_vm5, %v6933_v63 }
 0x8b1   : > { %v6931_v28 = vpop.permute.xlu0 %6930 }
 0x8b2   : > { %7023 = vst.msk [vmem:[%s9857_s22 + $0x10] sm:$0xf] %vm7018_vm5, %v6931_v28  ;;  %v6937_v51 = vpop.permute.xlu1 %6936 }
 0x8b3   : > { %7026 = vst.msk [vmem:[%s9857_s22 + $0x1c] sm:$0xf] %vm7018_vm5, %v6937_v51 }
 0x8b5   : > { %v6935_v54 = vpop.permute.xlu0 %6934 }
 0x8b6   : > { %7025 = vst.msk [vmem:[%s9857_s22 + $0x18] sm:$0xf] %vm7018_vm5, %v6935_v54  ;;  %v6941_v15 = vpop.permute.xlu1 %6940 }
 0x8b7   : > { %7028 = vst.msk [vmem:[%s9857_s22 + $0x24] sm:$0xf] %vm7018_vm5, %v6941_v15 }
 0x8b9   : > { %v6939_v33 = vpop.permute.xlu0 %6938 }
 0x8ba   : > { %7027 = vst.msk [vmem:[%s9857_s22 + $0x20] sm:$0xf] %vm7018_vm5, %v6939_v33  ;;  %v6945_v7 = vpop.permute.xlu1 %6944 }
 0x8bb   : > { %7030 = vst.msk [vmem:[%s9857_s22 + $0x2c] sm:$0xf] %vm7018_vm5, %v6945_v7 }
 0x8bd   : > { %v6943_v13 = vpop.permute.xlu0 %6942 }
 0x8be   : > { %7029 = vst.msk [vmem:[%s9857_s22 + $0x28] sm:$0xf] %vm7018_vm5, %v6943_v13  ;;  %v6949_v37 = vpop.permute.xlu1 %6948 }
 0x8bf   : > { %7032 = vst.msk [vmem:[%s9857_s22 + $0x34] sm:$0xf] %vm7018_vm5, %v6949_v37 }
 0x8c1   : > { %v6947_v50 = vpop.permute.xlu0 %6946 }
 0x8c2   : > { %7031 = vst.msk [vmem:[%s9857_s22 + $0x30] sm:$0xf] %vm7018_vm5, %v6947_v50  ;;  %v6953_v29 = vpop.permute.xlu1 %6952 }
 0x8c3   : > { %7034 = vst.msk [vmem:[%s9857_s22 + $0x3c] sm:$0xf] %vm7018_vm5, %v6953_v29 }
 0x8c5   : > { %v6951_v22 = vpop.permute.xlu0 %6950 }
 0x8c6   : > { %7033 = vst.msk [vmem:[%s9857_s22 + $0x38] sm:$0xf] %vm7018_vm5, %v6951_v22  ;;  %v6957_v11 = vpop.permute.xlu1 %6956 }
 0x8c7   : > { %7036 = vst.msk [vmem:[%s9857_s22 + $0x44] sm:$0xf] %vm7018_vm5, %v6957_v11 }
 0x8c9   : > { %v6955_v16 = vpop.permute.xlu0 %6954 }
 0x8ca   : > { %7035 = vst.msk [vmem:[%s9857_s22 + $0x40] sm:$0xf] %vm7018_vm5, %v6955_v16  ;;  %v6961_v62 = vpop.permute.xlu1 %6960 }
 0x8cb   : > { %7038 = vst.msk [vmem:[%s9857_s22 + $0x4c] sm:$0xf] %vm7018_vm5, %v6961_v62 }
 0x8cd   : > { %v6959_v8 = vpop.permute.xlu0 %6958 }
 0x8ce   : > { %7037 = vst.msk [vmem:[%s9857_s22 + $0x48] sm:$0xf] %vm7018_vm5, %v6959_v8  ;;  %v6965_v52 = vpop.permute.xlu1 %6964 }
 0x8cf   : > { %7040 = vst.msk [vmem:[%s9857_s22 + $0x54] sm:$0xf] %vm7018_vm5, %v6965_v52 }
 0x8d1   : > { %v6963_v45 = vpop.permute.xlu0 %6962 }
 0x8d2   : > { %7039 = vst.msk [vmem:[%s9857_s22 + $0x50] sm:$0xf] %vm7018_vm5, %v6963_v45  ;;  %v6969_v23 = vpop.permute.xlu1 %6968 }
 0x8d3   : > { %7042 = vst.msk [vmem:[%s9857_s22 + $0x5c] sm:$0xf] %vm7018_vm5, %v6969_v23 }
 0x8d5   : > { %v6967_v49 = vpop.permute.xlu0 %6966 }
 0x8d6   : > { %7041 = vst.msk [vmem:[%s9857_s22 + $0x58] sm:$0xf] %vm7018_vm5, %v6967_v49  ;;  %v6973_v14 = vpop.permute.xlu1 %6972 }
 0x8d7   : > { %7044 = vst.msk [vmem:[%s9857_s22 + $0x64] sm:$0xf] %vm7018_vm5, %v6973_v14 }
 0x8d9   : > { %v6971_v17 = vpop.permute.xlu0 %6970 }
 0x8da   : > { %7043 = vst.msk [vmem:[%s9857_s22 + $0x60] sm:$0xf] %vm7018_vm5, %v6971_v17  ;;  %v6977_v56 = vpop.permute.xlu1 %6976 }
 0x8db   : > { %7046 = vst.msk [vmem:[%s9857_s22 + $0x6c] sm:$0xf] %vm7018_vm5, %v6977_v56 }
 0x8dd   : > { %v6975_v10 = vpop.permute.xlu0 %6974 }
 0x8de   : > { %7045 = vst.msk [vmem:[%s9857_s22 + $0x68] sm:$0xf] %vm7018_vm5, %v6975_v10  ;;  %v6981_v61 = vpop.permute.xlu1 %6980 }
 0x8df   : > { %7048 = vst.msk [vmem:[%s9857_s22 + $0x74] sm:$0xf] %vm7018_vm5, %v6981_v61 }
 0x8e1   : > { %v6979_v57 = vpop.permute.xlu0 %6978 }
 0x8e2   : > { %7047 = vst.msk [vmem:[%s9857_s22 + $0x70] sm:$0xf] %vm7018_vm5, %v6979_v57  ;;  %v6985_v39 = vpop.permute.xlu1 %6984 }
 0x8e3   : > { %7050 = vst.msk [vmem:[%s9857_s22 + $0x7c] sm:$0xf] %vm7018_vm5, %v6985_v39 }
 0x8e5   : > { %v6983_v0 = vpop.permute.xlu0 %6982 }
 0x8e6   : > { %7049 = vst.msk [vmem:[%s9857_s22 + $0x78] sm:$0xf] %vm7018_vm5, %v6983_v0 }
 0x8e7 PF: > { %s15750_s10 = sld [smem:[#allocation19_spill]]  ;;  %s15751_s20 = sld [smem:[#allocation20_spill]] }
 0x8e8   : > { %s15752_s27 = sld [smem:[#allocation27_spill]]  ;;  %s7068_s7 = sshll.u32 %s9857_s22, 4  ;;  %s14355_s7 = int_to_ptr.vmem [resolvable:$true] %s7068_s7 }
 0x8e9   : > { %s15753_s8 = sld [smem:[#allocation212_spill]]  ;;  %s7052_s1 = scalar_lea.sflag [#allocation7], %s9837_s11 }
 0x8ea   : > { %s9352_s13 = scalar_lea.vmem %s14355_s7, 2048  ;;  %s9507_s12 = smov [#allocation11]  }
 0x8eb   : > { %p9353_p0 = scmp.ne.s32.totalorder %s14355_s7, %s9352_s13  ;;  %s9356_s22 = sshll.u32 %s9507_s12, 4  ;;  %s9357_s22 = int_to_ptr.vmem [resolvable:$false] %s9356_s22 }
 0x8ec   : > { %s9358_s19 = scalar_lea.vmem %s9357_s22, 4096  ;;  %p9359_p5 = scmp.lt.s32.totalorder %s14355_s7, %s9357_s22 }
 0x8ed   : > { %s7452_s9 = sshll.u32 %s15750_s10, 5  ;;  %s7453_s4 = sshll.u32 %s15751_s20, 7 }
 0x8ee   : > { %s7065_s15 = sadd.s32 %s7453_s4, %s7452_s9  ;;  %p15754_p1 = scmp.ne.s32.totalorder %s15752_s27, 0 }
 0x8ef   : > { %s7454_s16 = sshll.u32 %s7065_s15, 6  ;;  %p9360_p10 = scmp.lt.s32.totalorder %s9358_s19, %s9352_s13 }
 0x8f0   : > { %s14360_s30 = scalar_lea.hbm %s15753_s8, %s7454_s16  ;;  %p9354_p7 = pnand %p9353_p0, %p15754_p1 }
 0x8f1   : > { %p9361_p13 = por %p9360_p10, %p9359_p5 }
 0x8f2   : > { %p9355_p9 = pneg %p9354_p7 }
 0x8f4   : > { %p9362_p2 = pnand %p9361_p13, %p9355_p9 }
 0x8f6   : > { %9365 = shalt.err (!%p9362_p2)
}
 0x8f7   : > { %s9366_s3 = scalar_lea.hbm %s14360_s30, 2048  ;;  %s9370_s20 = scalar_lea.hbm %s15753_s8, 16384 }
 0x8f8   : > { %p9367_p8 = scmp.ne.s32.totalorder %s14360_s30, %s9366_s3  ;;  %p9371_p11 = scmp.lt.u32.totalorder %s14360_s30, %s15753_s8 }
 0x8f9   : > { %p9372_p3 = scmp.lt.u32.totalorder %s9370_s20, %s9366_s3  ;;  %p9374_p0 = scmp.lt.u32.totalorder %s9366_s3, %s14360_s30 }
 0x8fa   : > { %p9368_p6 = pnand %p9367_p8, %p15754_p1 }
 0x8fb   : > { %p9373_p12 = por %p9372_p3, %p9371_p11 }
 0x8fc   : > { %p9369_p4 = pneg %p9368_p6 }
 0x8fd   : > { %p9375_p7 = por %p9374_p0, %p9373_p12 }
 0x8ff   : > { %p9376_p9 = pnand %p9375_p7, %p9369_p4 }
 0x901   : > { %9379 = shalt.err (!%p9376_p9)
}
 0x902   : > { %s9508_s15 = smov 4  }
 0x903   : > { %8199 = dma.vmem_to_hbm [thread:$0]  (%p15754_p1), %s14355_s7, 2048, %s14360_s30, %s7052_s1, %s9504_s5, %s9504_s5, %s9508_s15  }
 0x904 PF: > { %s15755_s16 = sld [smem:[#allocation16_spill]]  ;;  %s15756_s18 = sld [smem:[#allocation29_spill]] }
 0x905   : > { %p8216_p5 = scmp.ge.s32.totalorder %s9494_s24, 2 }
 0x90a   : > { %s7083_s6 = sand.u32 1, %s15755_s16   ;;  %p15757_p10 = scmp.ne.s32.totalorder %s15756_s18, 0 }
 0x90b   : > { %s7084_s13 = scalar_lea.sflag [#allocation7], %s7083_s6 }
 0x90c   : > { %p8212_p13 = pnand %p8216_p5, %p15757_p10 }
 0x90e   : > { %9441 = dma.done.wait (!%p8212_p13), %s7084_s13, 2048  }
 0x90f   : > { %9443 = vsyncadd (!%p8212_p13), %s7084_s13, 4294965248  ;;  %s22_s24 = sadd.s32 1, %s9494_s24   ;;  %s15759_s12 = sld [smem:[#allocation15_spill]] }
 0x910   : > { %p14393_p2 = scmp.ge.s32.totalorder %s22_s24, 18   ;;  %s15760_s15 = sld [smem:[#allocation17_spill]] }
 0x911   : > { %s15761_s19 = sld [smem:[#allocation21_spill]]  ;;  %s15762_s22 = sld [smem:[#allocation26_spill]] }
 0x912   : > { %s15763_s11 = sld [smem:[#allocation28_spill]]  ;;  %s15764_s13 = smov %s9454_s14 }
 0x913   : > { %s15765_s14 = smov %s9757_s29  ;;  %s15766_s16 = smov %s9466_s17 }
 0x914   : > { %s15767_s17 = smov %s9752_s25  ;;  %s15768_s18 = smov %s9482_s21 }
 0x915   : > { %s15769_s20 = smov %s9490_s23  ;;  %s15770_s21 = smov %s15773_s26 }
 0x916   :  { %21 = sbr.rel (!%p14393_p2) target bundleno = 15 (0xf), region = 112 }
 0x918   : > { %s15771_s23 = smov %s15763_s11 }
 0x91d   :  { %7089 = vsyncpa [#allocation6], 1 }
 0x91e   :  { %7091 = vsyncpa [#allocation6 + $0x1], 1 }
 0x91f   :  { %7092 = vsyncpa [#allocation9], 1 }
 0x920   :  { %7094 = vsyncpa [#allocation9 + $0x1], 1 }
 0x921   :  { %7095 = vsyncpa [#allocation7], 1 }
 0x922   :  { %7097 = vsyncpa [#allocation7 + $0x1], 1 }

</bundles_post_ra>
